<compile_context>
chip_gen: v7x
topology: tpu7x:2x2x1
jax: 0.10.0
libtpu: 0.0.40
codegen_flags: <defaults>
</compile_context>

<pallas_src>
import functools

import jax
import jax.numpy as jnp
from jax import lax
from jax.experimental import pallas as pl
from jax.experimental.pallas import tpu as pltpu

# Small stand-ins for the module's image_height = image_width = 200.
IMAGE_H = 16
IMAGE_W = 16
BATCH = 2
BN_EPS = 1e-5

# Fits every generation: v5e/v6e have 128 MiB VMEM, v7x has 64 MiB physical.
VMEM_LIMIT = 64 * 1024 * 1024


# ----------------------------------------------------------------------------
# Fused conv trunk kernel: 3x (3x3 conv + bias + ReLU + BN shift) with
# in-kernel reflection re-padding between layers.
# ----------------------------------------------------------------------------
def _conv_trunk_kernel(x_ref,
                       w1_ref, b1_ref, s1_ref,
                       w2_ref, b2_ref, s2_ref,
                       w3_ref, b3_ref, s3_ref,
                       o_ref, buf2, buf3, *, H, W):
    Wp, Hp = W + 2, H + 2
    NV = Hp * Wp          # flat length of a reflection-padded image
    NO = H * Wp           # flat length of a padded-width conv output

    def conv3x3(src_ref, w_ref, b_ref, s_ref):
        # src_ref: (FL, Cin) flat reflection-padded image (FL >= NV + 2).
        # Output: (NO, Cout) padded-width activation; columns >= W are junk
        # (window wraps across the row boundary) and are handled downstream.
        cout = w_ref.shape[-1]
        acc = jnp.zeros((NO, cout), jnp.float32)
        for dy in range(3):
            for dx in range(3):
                win = src_ref[pl.ds(dy * Wp + dx, NO), :]        # (NO, Cin)
                acc = acc + jnp.dot(win.astype(jnp.bfloat16),    # bf16 MXU,
                                    w_ref[dy * 3 + dx],          # f32 acc
                                    preferred_element_type=jnp.float32)
        # BN scale folded into w/b; ReLU, then BN shift.
        return jnp.maximum(acc + b_ref[...], 0.0) + s_ref[...]

    def repad(act, dst_ref):
        # Build the next layer's reflection-padded flat image from a
        # padded-width activation.  The junk columns of `act` only land on
        # border positions that the reflection fixups overwrite below.
        cout = act.shape[-1]
        tail = dst_ref.shape[0] - NV
        # Tail rows stay zero so tap windows reading up to NV+1 are defined.
        dst_ref[pl.ds(NV, tail), :] = jnp.zeros((tail, cout), jnp.float32)
        # Interior: padded[(h+1), (w+1)] = act[h, w].
        dst_ref[pl.ds(Wp + 1, NO), :] = act
        # Reflected top / bottom rows (row 0 <- row 2, row Hp-1 <- row Hp-3).
        dst_ref[pl.ds(0, Wp), :] = dst_ref[pl.ds(2 * Wp, Wp), :]
        dst_ref[pl.ds((Hp - 1) * Wp, Wp), :] = dst_ref[pl.ds((Hp - 3) * Wp, Wp), :]
        # Reflected left / right columns via a masked select over the flat
        # image (col 0 <- col 2, col Wp-1 <- col Wp-3).
        v = dst_ref[pl.ds(0, NV), :]
        c = lax.broadcasted_iota(jnp.int32, (NV, cout), 0) % Wp
        left = dst_ref[pl.ds(2, NV), :]          # left[j]  = dst[j + 2]
        right = jnp.roll(v, 2, axis=0)           # right[j] = dst[j - 2]
        v = jnp.where(c == 0, left, jnp.where(c == Wp - 1, right, v))
        dst_ref[pl.ds(0, NV), :] = v

    act1 = conv3x3(x_ref, w1_ref, b1_ref, s1_ref)       # (NO, 4)
    repad(act1, buf2)
    act2 = conv3x3(buf2, w2_ref, b2_ref, s2_ref)        # (NO, 8)
    repad(act2, buf3)
    act3 = conv3x3(buf3, w3_ref, b3_ref, s3_ref)        # (NO, 8)

    # Zero the padded-width junk columns so the flat feature vector can feed
    # FC1 directly (their FC1 rows contribute exactly zero).
    c = lax.broadcasted_iota(jnp.int32, act3.shape, 0) % Wp
    o_ref[...] = jnp.where(c < W, act3, 0.0).astype(o_ref.dtype)


def conv_trunk(x_nhwc, conv_params):
    n, h, w, cin = x_nhwc.shape
    hp, wp = h + 2, w + 2
    nv, no = hp * wp, h * wp
    fl = nv + 8                     # slack so every tap window stays in bounds
    c1, c2, c3 = conv_params
    ch1 = c1["w"].shape[-1]         # buf2 channels (layer-1 output)
    ch2 = c2["w"].shape[-1]         # buf3 channels (layer-2 output)
    ch3 = c3["w"].shape[-1]         # trunk output channels

    # Layer-1 reflection pad + flatten + zero tail done host-side (tiny).
    xp = jnp.pad(x_nhwc, ((0, 0), (1, 1), (1, 1), (0, 0)), mode="reflect")
    xp = xp.reshape(n, nv, cin)
    xp = jnp.pad(xp, ((0, 0), (0, fl - nv), (0, 0)))

    kernel = functools.partial(_conv_trunk_kernel, H=h, W=w)
    const3 = lambda i: (0, 0, 0)
    const2 = lambda i: (0, 0)
    return pl.pallas_call(
        kernel,
        out_shape=jax.ShapeDtypeStruct((n, no, ch3), jnp.bfloat16),
        grid=(n,),
        in_specs=[
            pl.BlockSpec((None, fl, cin), lambda i: (i, 0, 0)),
            pl.BlockSpec(c1["w"].shape, const3),
            pl.BlockSpec(c1["b"].shape, const2),
            pl.BlockSpec(c1["shift"].shape, const2),
            pl.BlockSpec(c2["w"].shape, const3),
            pl.BlockSpec(c2["b"].shape, const2),
            pl.BlockSpec(c2["shift"].shape, const2),
            pl.BlockSpec(c3["w"].shape, const3),
            pl.BlockSpec(c3["b"].shape, const2),
            pl.BlockSpec(c3["shift"].shape, const2),
        ],
        out_specs=pl.BlockSpec((None, no, ch3), lambda i: (i, 0, 0)),
        scratch_shapes=[pltpu.VMEM((fl, ch1), jnp.float32),
                        pltpu.VMEM((fl, ch2), jnp.float32)],
        compiler_params=pltpu.CompilerParams(
            dimension_semantics=("parallel",),   # batch across cores (v7x)
            vmem_limit_bytes=VMEM_LIMIT,
        ),
    )(xp, c1["w"], c1["b"], c1["shift"],
      c2["w"], c2["b"], c2["shift"],
      c3["w"], c3["b"], c3["shift"])


# ----------------------------------------------------------------------------
# Fused FC stack kernel: FC1 (K-tiled, f32 acc) -> ReLU -> FC2 -> ReLU -> FC3
# ----------------------------------------------------------------------------
def _fc_stack_kernel(x_ref, w1_ref, b1_ref, w2_ref, b2_ref, w3_ref, b3_ref,
                     o_ref, acc_ref):
    k = pl.program_id(1)

    @pl.when(k == 0)
    def _():
        acc_ref[...] = jnp.zeros_like(acc_ref)

    acc_ref[...] += jnp.dot(x_ref[...].astype(jnp.bfloat16), w1_ref[...],
                            preferred_element_type=jnp.float32)

    @pl.when(k == pl.num_programs(1) - 1)
    def _():
        h1 = jnp.maximum(acc_ref[...] + b1_ref[...], 0.0)
        h2 = jnp.dot(h1.astype(jnp.bfloat16), w2_ref[...],
                     preferred_element_type=jnp.float32) + b2_ref[...]
        h2 = jnp.maximum(h2, 0.0)
        y = jnp.dot(h2.astype(jnp.bfloat16), w3_ref[...],
                    preferred_element_type=jnp.float32) + b3_ref[...]
        o_ref[...] = y.astype(o_ref.dtype)


def _pick_k_tile(k_dim, n1):
    # Single K step if the whole bf16 FC1 weight fits a modest VMEM budget
    # (demo case -> one grid step); otherwise the largest clean divisor tile.
    if k_dim * n1 * 2 <= 8 * 1024 * 1024:
        return k_dim
    for cand in (2048, 1536, 1024, 768, 512, 384, 256, 128):
        if k_dim % cand == 0:
            return cand
    return k_dim


def fc_stack(x, fc):
    m, k_dim = x.shape
    n1 = fc[0]["w"].shape[1]
    n2 = fc[1]["w"].shape[1]
    n3 = fc[2]["w"].shape[1]
    tk = _pick_k_tile(k_dim, n1)
    n_k = k_dim // tk

    flops = 2 * m * (k_dim * n1 + n1 * n2 + n2 * n3)
    bytes_accessed = (x.dtype.itemsize * m * k_dim
                      + 2 * (k_dim * n1 + n1 * n2 + n2 * n3)   # bf16 weights
                      + 4 * (n1 + n2 + n3 + m * n3))           # biases / out

    return pl.pallas_call(
        _fc_stack_kernel,
        out_shape=jax.ShapeDtypeStruct((m, n3), jnp.float32),
        grid=(1, n_k),
        in_specs=[
            pl.BlockSpec((m, tk), lambda i, j: (0, j)),
            pl.BlockSpec((tk, n1), lambda i, j: (j, 0)),
            pl.BlockSpec((1, n1), lambda i, j: (0, 0)),
            pl.BlockSpec((n1, n2), lambda i, j: (0, 0)),
            pl.BlockSpec((1, n2), lambda i, j: (0, 0)),
            pl.BlockSpec((n2, n3), lambda i, j: (0, 0)),
            pl.BlockSpec((1, n3), lambda i, j: (0, 0)),
        ],
        out_specs=pl.BlockSpec((m, n3), lambda i, j: (0, 0)),
        scratch_shapes=[pltpu.VMEM((m, n1), jnp.float32)],
        compiler_params=pltpu.CompilerParams(
            dimension_semantics=("parallel", "arbitrary"),
            vmem_limit_bytes=VMEM_LIMIT,
        ),
        cost_estimate=pl.CostEstimate(
            flops=flops, transcendentals=0, bytes_accessed=bytes_accessed),
    )(x, fc[0]["w"], fc[0]["b"], fc[1]["w"], fc[1]["b"], fc[2]["w"], fc[2]["b"])


# ----------------------------------------------------------------------------
# Parameter init (deterministic, synthetic) in kernel-friendly layouts
# ----------------------------------------------------------------------------
def init_params(key):
    def conv_params(k, cin, cout):
        kw, kb = jax.random.split(k)
        w = jax.random.normal(kw, (3, 3, cin, cout), jnp.float32) * 0.1
        b = jax.random.normal(kb, (cout,), jnp.float32) * 0.1
        gamma = jnp.ones((cout,), jnp.float32)     # BN weight
        beta = jnp.zeros((cout,), jnp.float32)     # BN bias
        run_mean = jnp.zeros((cout,), jnp.float32)
        run_var = jnp.ones((cout,), jnp.float32)
        scale = gamma / jnp.sqrt(run_var + BN_EPS)
        # relu(z) * scale == relu(z * scale) requires scale > 0 (gamma = 1).
        shift = beta - run_mean * scale
        return {
            "w": (w * scale).reshape(9, cin, cout).astype(jnp.bfloat16),
            "b": (b * scale).reshape(1, cout).astype(jnp.float32),
            "shift": shift.reshape(1, cout).astype(jnp.float32),
        }

    def fc_params(k, fin, fout):
        kw, kb = jax.random.split(k)
        w = jax.random.normal(kw, (fin, fout), jnp.float32) * 0.02
        b = jax.random.normal(kb, (fout,), jnp.float32) * 0.02
        return {"w": w.astype(jnp.bfloat16),
                "b": b.reshape(1, fout).astype(jnp.float32)}

    keys = jax.random.split(key, 6)
    # FC1 rows are in padded-width NHWC-flat order (H, W+2, 8); the pad-column
    # rows multiply zeroed features, so they contribute nothing.
    feat_dim = IMAGE_H * (IMAGE_W + 2) * 8
    return {
        "conv": [
            conv_params(keys[0], 3, 4),
            conv_params(keys[1], 4, 8),
            conv_params(keys[2], 8, 8),
        ],
        "fc": [
            fc_params(keys[3], feat_dim, 512),
            fc_params(keys[4], 512, 512),
            fc_params(keys[5], 512, 5),
        ],
    }


# ----------------------------------------------------------------------------
# Forward
# ----------------------------------------------------------------------------
def forward_fused(x_nchw, params):
    """Runs the shared-weight trunk on an already-fused (2N) batch."""
    x = jnp.transpose(x_nchw, (0, 2, 3, 1))       # NCHW -> NHWC once
    feats = conv_trunk(x, params["conv"])         # (2N, H*(W+2), 8) bf16
    feats = feats.reshape(feats.shape[0], -1)     # free flatten
    return fc_stack(feats, params["fc"])


@jax.jit
def siamese_forward(input1, input2, params):
    n = input1.shape[0]
    # Fuse the two branches so every layer's weights are streamed once.
    out = forward_fused(jnp.concatenate([input1, input2], axis=0), params)
    return out[:n], out[n:]


if __name__ == "__main__":
    key = jax.random.PRNGKey(0)
    k_params, k_in1, k_in2 = jax.random.split(key, 3)
    params = init_params(k_params)

    input1 = jax.random.normal(k_in1, (BATCH, 3, IMAGE_H, IMAGE_W), jnp.float32)
    input2 = jax.random.normal(k_in2, (BATCH, 3, IMAGE_H, IMAGE_W), jnp.float32)

    out1, out2 = siamese_forward(input1, input2, params)
    jax.block_until_ready((out1, out2))

    assert out1.shape == (BATCH, 5) and out2.shape == (BATCH, 5)
    assert bool(jnp.all(jnp.isfinite(out1))) and bool(jnp.all(jnp.isfinite(out2)))
    print("KERNEL_OK")
</pallas_src>

<mosaic_0001>
module attributes {stable_mosaic.version = 11 : i64} {
  func.func @_fc_stack_kernel(%arg0: i32, %arg1: i32, %arg2: memref<4x2304xbf16, #tpu.memory_space<vmem>>, %arg3: memref<2304x512xbf16, #tpu.memory_space<vmem>>, %arg4: memref<1x512xf32, #tpu.memory_space<vmem>>, %arg5: memref<512x512xbf16, #tpu.memory_space<vmem>>, %arg6: memref<1x512xf32, #tpu.memory_space<vmem>>, %arg7: memref<512x5xbf16, #tpu.memory_space<vmem>>, %arg8: memref<1x5xf32, #tpu.memory_space<vmem>>, %arg9: memref<4x5xf32, #tpu.memory_space<vmem>>, %arg10: memref<4x512xf32, #tpu.memory_space<vmem>>) attributes {dimension_semantics = [#tpu.dimension_semantics<parallel>, #tpu.dimension_semantics<arbitrary>], iteration_bounds = array<i64: 1, 1>, scalar_prefetch = 0 : i64, scratch_operands = 1 : i64, tpu.core_type = #tpu.core_type<tc>, window_params = [{transform_indices = @transform_0, window_bounds = array<i64: 4, 2304>}, {transform_indices = @transform_1, window_bounds = array<i64: 2304, 512>}, {pipeline_mode = #tpu.pipeline_mode<synchronous>, transform_indices = @transform_2, window_bounds = array<i64: 1, 512>}, {pipeline_mode = #tpu.pipeline_mode<synchronous>, transform_indices = @transform_3, window_bounds = array<i64: 512, 512>}, {pipeline_mode = #tpu.pipeline_mode<synchronous>, transform_indices = @transform_4, window_bounds = array<i64: 1, 512>}, {pipeline_mode = #tpu.pipeline_mode<synchronous>, transform_indices = @transform_5, window_bounds = array<i64: 512, 5>}, {pipeline_mode = #tpu.pipeline_mode<synchronous>, transform_indices = @transform_6, window_bounds = array<i64: 1, 5>}, {pipeline_mode = #tpu.pipeline_mode<synchronous>, transform_indices = @transform_7, window_bounds = array<i64: 4, 5>}]} {
    %c0_i32 = arith.constant 0 : i32
    %0 = arith.cmpi eq, %arg1, %c0_i32 : i32
    %1 = arith.extui %0 : i1 to i32
    %c0_i32_0 = arith.constant 0 : i32
    %2 = arith.cmpi ne, %1, %c0_i32_0 : i32
    scf.if %2 {
      %cst_10 = arith.constant 0.000000e+00 : f32
      %12 = vector.broadcast %cst_10 : f32 to vector<4x512xf32>
      %c0_11 = arith.constant 0 : index
      %c0_12 = arith.constant 0 : index
      %13 = vector.load %arg10[%c0_11, %c0_12] : memref<4x512xf32, #tpu.memory_space<vmem>>, vector<4x512xf32>
      tpu.vector_store %arg10[%c0_11, %c0_12], %12 {strides = array<i32>} : memref<4x512xf32, #tpu.memory_space<vmem>>, vector<4x512xf32>,
    } else {
    }
    %c0 = arith.constant 0 : index
    %c0_1 = arith.constant 0 : index
    %3 = vector.load %arg10[%c0, %c0_1] : memref<4x512xf32, #tpu.memory_space<vmem>>, vector<4x512xf32>
    %c0_2 = arith.constant 0 : index
    %c0_3 = arith.constant 0 : index
    %4 = vector.load %arg2[%c0_2, %c0_3] : memref<4x2304xbf16, #tpu.memory_space<vmem>>, vector<4x2304xbf16>
    %c0_4 = arith.constant 0 : index
    %c0_5 = arith.constant 0 : index
    %5 = vector.load %arg3[%c0_4, %c0_5] : memref<2304x512xbf16, #tpu.memory_space<vmem>>, vector<2304x512xbf16>
    %cst = arith.constant dense<0.000000e+00> : vector<4x512xf32>
    %6 = tpu.matmul %4, %5, %cst {dimension_numbers = #tpu.dot_dimension_numbers<[1], [0], [0], [1], [0, 0, 1, 1], [], []>} : vector<4x2304xbf16>, vector<2304x512xbf16>, vector<4x512xf32> -> vector<4x512xf32>
    %7 = arith.addf %3, %6 : vector<4x512xf32>
    %c0_6 = arith.constant 0 : index
    %c0_7 = arith.constant 0 : index
    %8 = vector.load %arg10[%c0_6, %c0_7] : memref<4x512xf32, #tpu.memory_space<vmem>>, vector<4x512xf32>
    tpu.vector_store %arg10[%c0_6, %c0_7], %7 {strides = array<i32>} : memref<4x512xf32, #tpu.memory_space<vmem>>, vector<4x512xf32>,
    %c0_i32_8 = arith.constant 0 : i32
    %9 = arith.cmpi eq, %arg1, %c0_i32_8 : i32
    %10 = arith.extui %9 : i1 to i32
    %c0_i32_9 = arith.constant 0 : i32
    %11 = arith.cmpi ne, %10, %c0_i32_9 : i32
    scf.if %11 {
      %c0_10 = arith.constant 0 : index
      %c0_11 = arith.constant 0 : index
      %12 = vector.load %arg10[%c0_10, %c0_11] : memref<4x512xf32, #tpu.memory_space<vmem>>, vector<4x512xf32>
      %c0_12 = arith.constant 0 : index
      %c0_13 = arith.constant 0 : index
      %13 = vector.load %arg4[%c0_12, %c0_13] : memref<1x512xf32, #tpu.memory_space<vmem>>, vector<1x512xf32>
      %14 = vector.broadcast %13 : vector<1x512xf32> to vector<4x512xf32>
      %15 = arith.addf %12, %14 : vector<4x512xf32>
      %cst_14 = arith.constant 0.000000e+00 : f32
      %16 = vector.broadcast %cst_14 : f32 to vector<4x512xf32>
      %17 = arith.maximumf %15, %16 : vector<4x512xf32>
      %18 = arith.truncf %17 : vector<4x512xf32> to vector<4x512xbf16>
      %c0_15 = arith.constant 0 : index
      %c0_16 = arith.constant 0 : index
      %19 = vector.load %arg5[%c0_15, %c0_16] : memref<512x512xbf16, #tpu.memory_space<vmem>>, vector<512x512xbf16>
      %cst_17 = arith.constant dense<0.000000e+00> : vector<4x512xf32>
      %20 = tpu.matmul %18, %19, %cst_17 {dimension_numbers = #tpu.dot_dimension_numbers<[1], [0], [0], [1], [0, 0, 1, 1], [], []>} : vector<4x512xbf16>, vector<512x512xbf16>, vector<4x512xf32> -> vector<4x512xf32>
      %c0_18 = arith.constant 0 : index
      %c0_19 = arith.constant 0 : index
      %21 = vector.load %arg6[%c0_18, %c0_19] : memref<1x512xf32, #tpu.memory_space<vmem>>, vector<1x512xf32>
      %22 = vector.broadcast %21 : vector<1x512xf32> to vector<4x512xf32>
      %23 = arith.addf %20, %22 : vector<4x512xf32>
      %cst_20 = arith.constant 0.000000e+00 : f32
      %24 = vector.broadcast %cst_20 : f32 to vector<4x512xf32>
      %25 = arith.maximumf %23, %24 : vector<4x512xf32>
      %26 = arith.truncf %25 : vector<4x512xf32> to vector<4x512xbf16>
      %c0_21 = arith.constant 0 : index
      %c0_22 = arith.constant 0 : index
      %27 = vector.load %arg7[%c0_21, %c0_22] : memref<512x5xbf16, #tpu.memory_space<vmem>>, vector<512x5xbf16>
      %cst_23 = arith.constant dense<0.000000e+00> : vector<4x5xf32>
      %28 = tpu.matmul %26, %27, %cst_23 {dimension_numbers = #tpu.dot_dimension_numbers<[1], [0], [0], [1], [0, 0, 1, 1], [], []>} : vector<4x512xbf16>, vector<512x5xbf16>, vector<4x5xf32> -> vector<4x5xf32>
      %c0_24 = arith.constant 0 : index
      %c0_25 = arith.constant 0 : index
      %29 = vector.load %arg8[%c0_24, %c0_25] : memref<1x5xf32, #tpu.memory_space<vmem>>, vector<1x5xf32>
      %30 = vector.broadcast %29 : vector<1x5xf32> to vector<4x5xf32>
      %31 = arith.addf %28, %30 : vector<4x5xf32>
      %c0_26 = arith.constant 0 : index
      %c0_27 = arith.constant 0 : index
      %32 = vector.load %arg9[%c0_26, %c0_27] : memref<4x5xf32, #tpu.memory_space<vmem>>, vector<4x5xf32>
      tpu.vector_store %arg9[%c0_26, %c0_27], %31 {strides = array<i32>} : memref<4x5xf32, #tpu.memory_space<vmem>>, vector<4x5xf32>,
    } else {
    }
    return
  }
  func.func @transform_0(%arg0: i32, %arg1: i32) -> (i32, i32) {
    %c0_i32 = arith.constant 0 : i32
    %c0_i32_0 = arith.constant 0 : i32
    return %c0_i32, %arg1 : i32, i32
  }
  func.func @transform_1(%arg0: i32, %arg1: i32) -> (i32, i32) {
    %c0_i32 = arith.constant 0 : i32
    %c0_i32_0 = arith.constant 0 : i32
    return %arg1, %c0_i32 : i32, i32
  }
  func.func @transform_2(%arg0: i32, %arg1: i32) -> (i32, i32) {
    %c0_i32 = arith.constant 0 : i32
    %c0_i32_0 = arith.constant 0 : i32
    %c0_i32_1 = arith.constant 0 : i32
    return %c0_i32, %c0_i32_0 : i32, i32
  }
  func.func @transform_3(%arg0: i32, %arg1: i32) -> (i32, i32) {
    %c0_i32 = arith.constant 0 : i32
    %c0_i32_0 = arith.constant 0 : i32
    %c0_i32_1 = arith.constant 0 : i32
    return %c0_i32, %c0_i32_0 : i32, i32
  }
  func.func @transform_4(%arg0: i32, %arg1: i32) -> (i32, i32) {
    %c0_i32 = arith.constant 0 : i32
    %c0_i32_0 = arith.constant 0 : i32
    %c0_i32_1 = arith.constant 0 : i32
    return %c0_i32, %c0_i32_0 : i32, i32
  }
  func.func @transform_5(%arg0: i32, %arg1: i32) -> (i32, i32) {
    %c0_i32 = arith.constant 0 : i32
    %c0_i32_0 = arith.constant 0 : i32
    %c0_i32_1 = arith.constant 0 : i32
    return %c0_i32, %c0_i32_0 : i32, i32
  }
  func.func @transform_6(%arg0: i32, %arg1: i32) -> (i32, i32) {
    %c0_i32 = arith.constant 0 : i32
    %c0_i32_0 = arith.constant 0 : i32
    %c0_i32_1 = arith.constant 0 : i32
    return %c0_i32, %c0_i32_0 : i32, i32
  }
  func.func @transform_7(%arg0: i32, %arg1: i32) -> (i32, i32) {
    %c0_i32 = arith.constant 0 : i32
    %c0_i32_0 = arith.constant 0 : i32
    %c0_i32_1 = arith.constant 0 : i32
    return %c0_i32, %c0_i32_0 : i32, i32
  }
}

module attributes {stable_mosaic.version = 11 : i64} {
  func.func @_conv_trunk_kernel(%arg0: i32, %arg1: memref<1x332x3xf32, #tpu.memory_space<vmem>>, %arg2: memref<9x3x4xbf16, #tpu.memory_space<vmem>>, %arg3: memref<1x4xf32, #tpu.memory_space<vmem>>, %arg4: memref<1x4xf32, #tpu.memory_space<vmem>>, %arg5: memref<9x4x8xbf16, #tpu.memory_space<vmem>>, %arg6: memref<1x8xf32, #tpu.memory_space<vmem>>, %arg7: memref<1x8xf32, #tpu.memory_space<vmem>>, %arg8: memref<9x8x8xbf16, #tpu.memory_space<vmem>>, %arg9: memref<1x8xf32, #tpu.memory_space<vmem>>, %arg10: memref<1x8xf32, #tpu.memory_space<vmem>>, %arg11: memref<1x288x8xbf16, #tpu.memory_space<vmem>>, %arg12: memref<332x4xf32, #tpu.memory_space<vmem>>, %arg13: memref<332x8xf32, #tpu.memory_space<vmem>>) attributes {dimension_semantics = [#tpu.dimension_semantics<parallel>], iteration_bounds = array<i64: 4>, scalar_prefetch = 0 : i64, scratch_operands = 2 : i64, tpu.core_type = #tpu.core_type<tc>, window_params = [{transform_indices = @transform_0, window_bounds = array<i64: 1, 332, 3>}, {pipeline_mode = #tpu.pipeline_mode<synchronous>, transform_indices = @transform_1, window_bounds = array<i64: 9, 3, 4>}, {pipeline_mode = #tpu.pipeline_mode<synchronous>, transform_indices = @transform_2, window_bounds = array<i64: 1, 4>}, {pipeline_mode = #tpu.pipeline_mode<synchronous>, transform_indices = @transform_3, window_bounds = array<i64: 1, 4>}, {pipeline_mode = #tpu.pipeline_mode<synchronous>, transform_indices = @transform_4, window_bounds = array<i64: 9, 4, 8>}, {pipeline_mode = #tpu.pipeline_mode<synchronous>, transform_indices = @transform_5, window_bounds = array<i64: 1, 8>}, {pipeline_mode = #tpu.pipeline_mode<synchronous>, transform_indices = @transform_6, window_bounds = array<i64: 1, 8>}, {pipeline_mode = #tpu.pipeline_mode<synchronous>, transform_indices = @transform_7, window_bounds = array<i64: 9, 8, 8>}, {pipeline_mode = #tpu.pipeline_mode<synchronous>, transform_indices = @transform_8, window_bounds = array<i64: 1, 8>}, {pipeline_mode = #tpu.pipeline_mode<synchronous>, transform_indices = @transform_9, window_bounds = array<i64: 1, 8>}, {transform_indices = @transform_10, window_bounds = array<i64: 1, 288, 8>}]} {
    %cst = arith.constant 0.000000e+00 : f32
    %0 = vector.broadcast %cst : f32 to vector<288x4xf32>
    %c0 = arith.constant 0 : index
    %c0_0 = arith.constant 0 : index
    %c0_1 = arith.constant 0 : index
    %1 = vector.load %arg1[%c0, %c0_0, %c0_1] : memref<1x332x3xf32, #tpu.memory_space<vmem>>, vector<1x288x3xf32>
    %2 = vector.shape_cast %1 : vector<1x288x3xf32> to vector<288x3xf32>
    %3 = arith.truncf %2 : vector<288x3xf32> to vector<288x3xbf16>
    %c0_2 = arith.constant 0 : index
    %c0_3 = arith.constant 0 : index
    %c0_4 = arith.constant 0 : index
    %4 = vector.load %arg2[%c0_2, %c0_3, %c0_4] : memref<9x3x4xbf16, #tpu.memory_space<vmem>>, vector<1x3x4xbf16>
    %5 = vector.shape_cast %4 : vector<1x3x4xbf16> to vector<3x4xbf16>
    %cst_5 = arith.constant dense<0.000000e+00> : vector<288x4xf32>
    %6 = tpu.matmul %3, %5, %cst_5 {dimension_numbers = #tpu.dot_dimension_numbers<[1], [0], [0], [1], [0, 0, 1, 1], [], []>} : vector<288x3xbf16>, vector<3x4xbf16>, vector<288x4xf32> -> vector<288x4xf32>
    %7 = arith.addf %0, %6 : vector<288x4xf32>
    %c0_6 = arith.constant 0 : index
    %c1 = arith.constant 1 : index
    %c0_7 = arith.constant 0 : index
    %8 = vector.load %arg1[%c0_6, %c1, %c0_7] : memref<1x332x3xf32, #tpu.memory_space<vmem>>, vector<1x288x3xf32>
    %9 = vector.shape_cast %8 : vector<1x288x3xf32> to vector<288x3xf32>
    %10 = arith.truncf %9 : vector<288x3xf32> to vector<288x3xbf16>
    %c1_8 = arith.constant 1 : index
    %c0_9 = arith.constant 0 : index
    %c0_10 = arith.constant 0 : index
    %11 = vector.load %arg2[%c1_8, %c0_9, %c0_10] : memref<9x3x4xbf16, #tpu.memory_space<vmem>>, vector<1x3x4xbf16>
    %12 = vector.shape_cast %11 : vector<1x3x4xbf16> to vector<3x4xbf16>
    %cst_11 = arith.constant dense<0.000000e+00> : vector<288x4xf32>
    %13 = tpu.matmul %10, %12, %cst_11 {dimension_numbers = #tpu.dot_dimension_numbers<[1], [0], [0], [1], [0, 0, 1, 1], [], []>} : vector<288x3xbf16>, vector<3x4xbf16>, vector<288x4xf32> -> vector<288x4xf32>
    %14 = arith.addf %7, %13 : vector<288x4xf32>
    %c0_12 = arith.constant 0 : index
    %c2 = arith.constant 2 : index
    %c0_13 = arith.constant 0 : index
    %15 = vector.load %arg1[%c0_12, %c2, %c0_13] : memref<1x332x3xf32, #tpu.memory_space<vmem>>, vector<1x288x3xf32>
    %16 = vector.shape_cast %15 : vector<1x288x3xf32> to vector<288x3xf32>
    %17 = arith.truncf %16 : vector<288x3xf32> to vector<288x3xbf16>
    %c2_14 = arith.constant 2 : index
    %c0_15 = arith.constant 0 : index
    %c0_16 = arith.constant 0 : index
    %18 = vector.load %arg2[%c2_14, %c0_15, %c0_16] : memref<9x3x4xbf16, #tpu.memory_space<vmem>>, vector<1x3x4xbf16>
    %19 = vector.shape_cast %18 : vector<1x3x4xbf16> to vector<3x4xbf16>
    %cst_17 = arith.constant dense<0.000000e+00> : vector<288x4xf32>
    %20 = tpu.matmul %17, %19, %cst_17 {dimension_numbers = #tpu.dot_dimension_numbers<[1], [0], [0], [1], [0, 0, 1, 1], [], []>} : vector<288x3xbf16>, vector<3x4xbf16>, vector<288x4xf32> -> vector<288x4xf32>
    %21 = arith.addf %14, %20 : vector<288x4xf32>
    %c0_18 = arith.constant 0 : index
    %c18 = arith.constant 18 : index
    %c0_19 = arith.constant 0 : index
    %22 = vector.load %arg1[%c0_18, %c18, %c0_19] : memref<1x332x3xf32, #tpu.memory_space<vmem>>, vector<1x288x3xf32>
    %23 = vector.shape_cast %22 : vector<1x288x3xf32> to vector<288x3xf32>
    %24 = arith.truncf %23 : vector<288x3xf32> to vector<288x3xbf16>
    %c3 = arith.constant 3 : index
    %c0_20 = arith.constant 0 : index
    %c0_21 = arith.constant 0 : index
    %25 = vector.load %arg2[%c3, %c0_20, %c0_21] : memref<9x3x4xbf16, #tpu.memory_space<vmem>>, vector<1x3x4xbf16>
    %26 = vector.shape_cast %25 : vector<1x3x4xbf16> to vector<3x4xbf16>
    %cst_22 = arith.constant dense<0.000000e+00> : vector<288x4xf32>
    %27 = tpu.matmul %24, %26, %cst_22 {dimension_numbers = #tpu.dot_dimension_numbers<[1], [0], [0], [1], [0, 0, 1, 1], [], []>} : vector<288x3xbf16>, vector<3x4xbf16>, vector<288x4xf32> -> vector<288x4xf32>
    %28 = arith.addf %21, %27 : vector<288x4xf32>
    %c0_23 = arith.constant 0 : index
    %c19 = arith.constant 19 : index
    %c0_24 = arith.constant 0 : index
    %29 = vector.load %arg1[%c0_23, %c19, %c0_24] : memref<1x332x3xf32, #tpu.memory_space<vmem>>, vector<1x288x3xf32>
    %30 = vector.shape_cast %29 : vector<1x288x3xf32> to vector<288x3xf32>
    %31 = arith.truncf %30 : vector<288x3xf32> to vector<288x3xbf16>
    %c4 = arith.constant 4 : index
    %c0_25 = arith.constant 0 : index
    %c0_26 = arith.constant 0 : index
    %32 = vector.load %arg2[%c4, %c0_25, %c0_26] : memref<9x3x4xbf16, #tpu.memory_space<vmem>>, vector<1x3x4xbf16>
    %33 = vector.shape_cast %32 : vector<1x3x4xbf16> to vector<3x4xbf16>
    %cst_27 = arith.constant dense<0.000000e+00> : vector<288x4xf32>
    %34 = tpu.matmul %31, %33, %cst_27 {dimension_numbers = #tpu.dot_dimension_numbers<[1], [0], [0], [1], [0, 0, 1, 1], [], []>} : vector<288x3xbf16>, vector<3x4xbf16>, vector<288x4xf32> -> vector<288x4xf32>
    %35 = arith.addf %28, %34 : vector<288x4xf32>
    %c0_28 = arith.constant 0 : index
    %c20 = arith.constant 20 : index
    %c0_29 = arith.constant 0 : index
    %36 = vector.load %arg1[%c0_28, %c20, %c0_29] : memref<1x332x3xf32, #tpu.memory_space<vmem>>, vector<1x288x3xf32>
    %37 = vector.shape_cast %36 : vector<1x288x3xf32> to vector<288x3xf32>
    %38 = arith.truncf %37 : vector<288x3xf32> to vector<288x3xbf16>
    %c5 = arith.constant 5 : index
    %c0_30 = arith.constant 0 : index
    %c0_31 = arith.constant 0 : index
    %39 = vector.load %arg2[%c5, %c0_30, %c0_31] : memref<9x3x4xbf16, #tpu.memory_space<vmem>>, vector<1x3x4xbf16>
    %40 = vector.shape_cast %39 : vector<1x3x4xbf16> to vector<3x4xbf16>
    %cst_32 = arith.constant dense<0.000000e+00> : vector<288x4xf32>
    %41 = tpu.matmul %38, %40, %cst_32 {dimension_numbers = #tpu.dot_dimension_numbers<[1], [0], [0], [1], [0, 0, 1, 1], [], []>} : vector<288x3xbf16>, vector<3x4xbf16>, vector<288x4xf32> -> vector<288x4xf32>
    %42 = arith.addf %35, %41 : vector<288x4xf32>
    %c0_33 = arith.constant 0 : index
    %c36 = arith.constant 36 : index
    %c0_34 = arith.constant 0 : index
    %43 = vector.load %arg1[%c0_33, %c36, %c0_34] : memref<1x332x3xf32, #tpu.memory_space<vmem>>, vector<1x288x3xf32>
    %44 = vector.shape_cast %43 : vector<1x288x3xf32> to vector<288x3xf32>
    %45 = arith.truncf %44 : vector<288x3xf32> to vector<288x3xbf16>
    %c6 = arith.constant 6 : index
    %c0_35 = arith.constant 0 : index
    %c0_36 = arith.constant 0 : index
    %46 = vector.load %arg2[%c6, %c0_35, %c0_36] : memref<9x3x4xbf16, #tpu.memory_space<vmem>>, vector<1x3x4xbf16>
    %47 = vector.shape_cast %46 : vector<1x3x4xbf16> to vector<3x4xbf16>
    %cst_37 = arith.constant dense<0.000000e+00> : vector<288x4xf32>
    %48 = tpu.matmul %45, %47, %cst_37 {dimension_numbers = #tpu.dot_dimension_numbers<[1], [0], [0], [1], [0, 0, 1, 1], [], []>} : vector<288x3xbf16>, vector<3x4xbf16>, vector<288x4xf32> -> vector<288x4xf32>
    %49 = arith.addf %42, %48 : vector<288x4xf32>
    %c0_38 = arith.constant 0 : index
    %c37 = arith.constant 37 : index
    %c0_39 = arith.constant 0 : index
    %50 = vector.load %arg1[%c0_38, %c37, %c0_39] : memref<1x332x3xf32, #tpu.memory_space<vmem>>, vector<1x288x3xf32>
    %51 = vector.shape_cast %50 : vector<1x288x3xf32> to vector<288x3xf32>
    %52 = arith.truncf %51 : vector<288x3xf32> to vector<288x3xbf16>
    %c7 = arith.constant 7 : index
    %c0_40 = arith.constant 0 : index
    %c0_41 = arith.constant 0 : index
    %53 = vector.load %arg2[%c7, %c0_40, %c0_41] : memref<9x3x4xbf16, #tpu.memory_space<vmem>>, vector<1x3x4xbf16>
    %54 = vector.shape_cast %53 : vector<1x3x4xbf16> to vector<3x4xbf16>
    %cst_42 = arith.constant dense<0.000000e+00> : vector<288x4xf32>
    %55 = tpu.matmul %52, %54, %cst_42 {dimension_numbers = #tpu.dot_dimension_numbers<[1], [0], [0], [1], [0, 0, 1, 1], [], []>} : vector<288x3xbf16>, vector<3x4xbf16>, vector<288x4xf32> -> vector<288x4xf32>
    %56 = arith.addf %49, %55 : vector<288x4xf32>
    %c0_43 = arith.constant 0 : index
    %c38 = arith.constant 38 : index
    %c0_44 = arith.constant 0 : index
    %57 = vector.load %arg1[%c0_43, %c38, %c0_44] : memref<1x332x3xf32, #tpu.memory_space<vmem>>, vector<1x288x3xf32>
    %58 = vector.shape_cast %57 : vector<1x288x3xf32> to vector<288x3xf32>
    %59 = arith.truncf %58 : vector<288x3xf32> to vector<288x3xbf16>
    %c8 = arith.constant 8 : index
    %c0_45 = arith.constant 0 : index
    %c0_46 = arith.constant 0 : index
    %60 = vector.load %arg2[%c8, %c0_45, %c0_46] : memref<9x3x4xbf16, #tpu.memory_space<vmem>>, vector<1x3x4xbf16>
    %61 = vector.shape_cast %60 : vector<1x3x4xbf16> to vector<3x4xbf16>
    %cst_47 = arith.constant dense<0.000000e+00> : vector<288x4xf32>
    %62 = tpu.matmul %59, %61, %cst_47 {dimension_numbers = #tpu.dot_dimension_numbers<[1], [0], [0], [1], [0, 0, 1, 1], [], []>} : vector<288x3xbf16>, vector<3x4xbf16>, vector<288x4xf32> -> vector<288x4xf32>
    %63 = arith.addf %56, %62 : vector<288x4xf32>
    %c0_48 = arith.constant 0 : index
    %c0_49 = arith.constant 0 : index
    %64 = vector.load %arg3[%c0_48, %c0_49] : memref<1x4xf32, #tpu.memory_space<vmem>>, vector<1x4xf32>
    %65 = vector.broadcast %64 : vector<1x4xf32> to vector<288x4xf32>
    %66 = arith.addf %63, %65 : vector<288x4xf32>
    %cst_50 = arith.constant 0.000000e+00 : f32
    %67 = vector.broadcast %cst_50 : f32 to vector<288x4xf32>
    %68 = arith.maximumf %66, %67 : vector<288x4xf32>
    %c0_51 = arith.constant 0 : index
    %c0_52 = arith.constant 0 : index
    %69 = vector.load %arg4[%c0_51, %c0_52] : memref<1x4xf32, #tpu.memory_space<vmem>>, vector<1x4xf32>
    %70 = vector.broadcast %69 : vector<1x4xf32> to vector<288x4xf32>
    %71 = arith.addf %68, %70 : vector<288x4xf32>
    %cst_53 = arith.constant 0.000000e+00 : f32
    %72 = vector.broadcast %cst_53 : f32 to vector<8x4xf32>
    %c324 = arith.constant 324 : index
    %c0_54 = arith.constant 0 : index
    %73 = vector.load %arg12[%c324, %c0_54] : memref<332x4xf32, #tpu.memory_space<vmem>>, vector<8x4xf32>
    tpu.vector_store %arg12[%c324, %c0_54], %72 {strides = array<i32>} : memref<332x4xf32, #tpu.memory_space<vmem>>, vector<8x4xf32>,
    %c19_55 = arith.constant 19 : index
    %c0_56 = arith.constant 0 : index
    %74 = vector.load %arg12[%c19_55, %c0_56] : memref<332x4xf32, #tpu.memory_space<vmem>>, vector<288x4xf32>
    tpu.vector_store %arg12[%c19_55, %c0_56], %71 {strides = array<i32>} : memref<332x4xf32, #tpu.memory_space<vmem>>, vector<288x4xf32>,
    %c36_57 = arith.constant 36 : index
    %c0_58 = arith.constant 0 : index
    %75 = vector.load %arg12[%c36_57, %c0_58] : memref<332x4xf32, #tpu.memory_space<vmem>>, vector<18x4xf32>
    %c0_59 = arith.constant 0 : index
    %c0_60 = arith.constant 0 : index
    %76 = vector.load %arg12[%c0_59, %c0_60] : memref<332x4xf32, #tpu.memory_space<vmem>>, vector<18x4xf32>
    tpu.vector_store %arg12[%c0_59, %c0_60], %75 {strides = array<i32>} : memref<332x4xf32, #tpu.memory_space<vmem>>, vector<18x4xf32>,
    %c270 = arith.constant 270 : index
    %c0_61 = arith.constant 0 : index
    %77 = vector.load %arg12[%c270, %c0_61] : memref<332x4xf32, #tpu.memory_space<vmem>>, vector<18x4xf32>
    %c306 = arith.constant 306 : index
    %c0_62 = arith.constant 0 : index
    %78 = vector.load %arg12[%c306, %c0_62] : memref<332x4xf32, #tpu.memory_space<vmem>>, vector<18x4xf32>
    tpu.vector_store %arg12[%c306, %c0_62], %77 {strides = array<i32>} : memref<332x4xf32, #tpu.memory_space<vmem>>, vector<18x4xf32>,
    %c0_63 = arith.constant 0 : index
    %c0_64 = arith.constant 0 : index
    %79 = vector.load %arg12[%c0_63, %c0_64] : memref<332x4xf32, #tpu.memory_space<vmem>>, vector<324x4xf32>
    %80 = tpu.iota {dimensions = array<i32: 0>} : vector<324x4xi32>
    %c18_i32 = arith.constant 18 : i32
    %c0_i32 = arith.constant 0 : i32
    %81 = arith.cmpi eq, %c18_i32, %c0_i32 : i32
    %c1_i32 = arith.constant 1 : i32
    %82 = arith.select %81, %c1_i32, %c18_i32 : i32
    %83 = vector.broadcast %82 : i32 to vector<324x4xi32>
    %84 = arith.remsi %80, %83 : vector<324x4xi32>
    %c0_i32_65 = arith.constant 0 : i32
    %85 = vector.broadcast %c0_i32_65 : i32 to vector<324x4xi32>
    %86 = arith.cmpi ne, %84, %85 : vector<324x4xi32>
    %c0_i32_66 = arith.constant 0 : i32
    %87 = vector.broadcast %c0_i32_66 : i32 to vector<324x4xi32>
    %88 = arith.cmpi slt, %84, %87 : vector<324x4xi32>
    %c0_i32_67 = arith.constant 0 : i32
    %89 = arith.cmpi slt, %82, %c0_i32_67 : i32
    %90 = vector.broadcast %89 : i1 to vector<324x4xi1>
    %91 = vector.broadcast %90 : vector<324x4xi1> to vector<324x4xi1>
    %92 = arith.xori %88, %91 : vector<324x4xi1>
    %93 = arith.andi %92, %86 : vector<324x4xi1>
    %94 = vector.broadcast %82 : i32 to vector<324x4xi32>
    %95 = arith.addi %84, %94 : vector<324x4xi32>
    %96 = arith.select %93, %95, %84 : vector<324x4xi1>, vector<324x4xi32>
    %c2_68 = arith.constant 2 : index
    %c0_69 = arith.constant 0 : index
    %97 = vector.load %arg12[%c2_68, %c0_69] : memref<332x4xf32, #tpu.memory_space<vmem>>, vector<324x4xf32>
    %98 = vector.extract_strided_slice %79 {offsets = [322, 0], sizes = [2, 4], strides = [1, 1]} : vector<324x4xf32> to vector<2x4xf32>
    %99 = vector.extract_strided_slice %79 {offsets = [0, 0], sizes = [322, 4], strides = [1, 1]} : vector<324x4xf32> to vector<322x4xf32>
    %100 = tpu.concatenate %98, %99 in 0 : vector<2x4xf32>, vector<322x4xf32> -> vector<324x4xf32>
    %c0_i32_70 = arith.constant 0 : i32
    %101 = vector.broadcast %c0_i32_70 : i32 to vector<324x4xi32>
    %102 = arith.cmpi eq, %96, %101 : vector<324x4xi32>
    %c17_i32 = arith.constant 17 : i32
    %103 = vector.broadcast %c17_i32 : i32 to vector<324x4xi32>
    %104 = arith.cmpi eq, %96, %103 : vector<324x4xi32>
    %105 = arith.select %104, %100, %79 : vector<324x4xi1>, vector<324x4xf32>
    %106 = arith.select %102, %97, %105 : vector<324x4xi1>, vector<324x4xf32>
    %c0_71 = arith.constant 0 : index
    %c0_72 = arith.constant 0 : index
    %107 = vector.load %arg12[%c0_71, %c0_72] : memref<332x4xf32, #tpu.memory_space<vmem>>, vector<324x4xf32>
    tpu.vector_store %arg12[%c0_71, %c0_72], %106 {strides = array<i32>} : memref<332x4xf32, #tpu.memory_space<vmem>>, vector<324x4xf32>,
    %cst_73 = arith.constant 0.000000e+00 : f32
    %108 = vector.broadcast %cst_73 : f32 to vector<288x8xf32>
    %c0_74 = arith.constant 0 : index
    %c0_75 = arith.constant 0 : index
    %109 = vector.load %arg12[%c0_74, %c0_75] : memref<332x4xf32, #tpu.memory_space<vmem>>, vector<288x4xf32>
    %110 = arith.truncf %109 : vector<288x4xf32> to vector<288x4xbf16>
    %c0_76 = arith.constant 0 : index
    %c0_77 = arith.constant 0 : index
    %c0_78 = arith.constant 0 : index
    %111 = vector.load %arg5[%c0_76, %c0_77, %c0_78] : memref<9x4x8xbf16, #tpu.memory_space<vmem>>, vector<1x4x8xbf16>
    %112 = vector.shape_cast %111 : vector<1x4x8xbf16> to vector<4x8xbf16>
    %cst_79 = arith.constant dense<0.000000e+00> : vector<288x8xf32>
    %113 = tpu.matmul %110, %112, %cst_79 {dimension_numbers = #tpu.dot_dimension_numbers<[1], [0], [0], [1], [0, 0, 1, 1], [], []>} : vector<288x4xbf16>, vector<4x8xbf16>, vector<288x8xf32> -> vector<288x8xf32>
    %114 = arith.addf %108, %113 : vector<288x8xf32>
    %c1_80 = arith.constant 1 : index
    %c0_81 = arith.constant 0 : index
    %115 = vector.load %arg12[%c1_80, %c0_81] : memref<332x4xf32, #tpu.memory_space<vmem>>, vector<288x4xf32>
    %116 = arith.truncf %115 : vector<288x4xf32> to vector<288x4xbf16>
    %c1_82 = arith.constant 1 : index
    %c0_83 = arith.constant 0 : index
    %c0_84 = arith.constant 0 : index
    %117 = vector.load %arg5[%c1_82, %c0_83, %c0_84] : memref<9x4x8xbf16, #tpu.memory_space<vmem>>, vector<1x4x8xbf16>
    %118 = vector.shape_cast %117 : vector<1x4x8xbf16> to vector<4x8xbf16>
    %cst_85 = arith.constant dense<0.000000e+00> : vector<288x8xf32>
    %119 = tpu.matmul %116, %118, %cst_85 {dimension_numbers = #tpu.dot_dimension_numbers<[1], [0], [0], [1], [0, 0, 1, 1], [], []>} : vector<288x4xbf16>, vector<4x8xbf16>, vector<288x8xf32> -> vector<288x8xf32>
    %120 = arith.addf %114, %119 : vector<288x8xf32>
    %c2_86 = arith.constant 2 : index
    %c0_87 = arith.constant 0 : index
    %121 = vector.load %arg12[%c2_86, %c0_87] : memref<332x4xf32, #tpu.memory_space<vmem>>, vector<288x4xf32>
    %122 = arith.truncf %121 : vector<288x4xf32> to vector<288x4xbf16>
    %c2_88 = arith.constant 2 : index
    %c0_89 = arith.constant 0 : index
    %c0_90 = arith.constant 0 : index
    %123 = vector.load %arg5[%c2_88, %c0_89, %c0_90] : memref<9x4x8xbf16, #tpu.memory_space<vmem>>, vector<1x4x8xbf16>
    %124 = vector.shape_cast %123 : vector<1x4x8xbf16> to vector<4x8xbf16>
    %cst_91 = arith.constant dense<0.000000e+00> : vector<288x8xf32>
    %125 = tpu.matmul %122, %124, %cst_91 {dimension_numbers = #tpu.dot_dimension_numbers<[1], [0], [0], [1], [0, 0, 1, 1], [], []>} : vector<288x4xbf16>, vector<4x8xbf16>, vector<288x8xf32> -> vector<288x8xf32>
    %126 = arith.addf %120, %125 : vector<288x8xf32>
    %c18_92 = arith.constant 18 : index
    %c0_93 = arith.constant 0 : index
    %127 = vector.load %arg12[%c18_92, %c0_93] : memref<332x4xf32, #tpu.memory_space<vmem>>, vector<288x4xf32>
    %128 = arith.truncf %127 : vector<288x4xf32> to vector<288x4xbf16>
    %c3_94 = arith.constant 3 : index
    %c0_95 = arith.constant 0 : index
    %c0_96 = arith.constant 0 : index
    %129 = vector.load %arg5[%c3_94, %c0_95, %c0_96] : memref<9x4x8xbf16, #tpu.memory_space<vmem>>, vector<1x4x8xbf16>
    %130 = vector.shape_cast %129 : vector<1x4x8xbf16> to vector<4x8xbf16>
    %cst_97 = arith.constant dense<0.000000e+00> : vector<288x8xf32>
    %131 = tpu.matmul %128, %130, %cst_97 {dimension_numbers = #tpu.dot_dimension_numbers<[1], [0], [0], [1], [0, 0, 1, 1], [], []>} : vector<288x4xbf16>, vector<4x8xbf16>, vector<288x8xf32> -> vector<288x8xf32>
    %132 = arith.addf %126, %131 : vector<288x8xf32>
    %c19_98 = arith.constant 19 : index
    %c0_99 = arith.constant 0 : index
    %133 = vector.load %arg12[%c19_98, %c0_99] : memref<332x4xf32, #tpu.memory_space<vmem>>, vector<288x4xf32>
    %134 = arith.truncf %133 : vector<288x4xf32> to vector<288x4xbf16>
    %c4_100 = arith.constant 4 : index
    %c0_101 = arith.constant 0 : index
    %c0_102 = arith.constant 0 : index
    %135 = vector.load %arg5[%c4_100, %c0_101, %c0_102] : memref<9x4x8xbf16, #tpu.memory_space<vmem>>, vector<1x4x8xbf16>
    %136 = vector.shape_cast %135 : vector<1x4x8xbf16> to vector<4x8xbf16>
    %cst_103 = arith.constant dense<0.000000e+00> : vector<288x8xf32>
    %137 = tpu.matmul %134, %136, %cst_103 {dimension_numbers = #tpu.dot_dimension_numbers<[1], [0], [0], [1], [0, 0, 1, 1], [], []>} : vector<288x4xbf16>, vector<4x8xbf16>, vector<288x8xf32> -> vector<288x8xf32>
    %138 = arith.addf %132, %137 : vector<288x8xf32>
    %c20_104 = arith.constant 20 : index
    %c0_105 = arith.constant 0 : index
    %139 = vector.load %arg12[%c20_104, %c0_105] : memref<332x4xf32, #tpu.memory_space<vmem>>, vector<288x4xf32>
    %140 = arith.truncf %139 : vector<288x4xf32> to vector<288x4xbf16>
    %c5_106 = arith.constant 5 : index
    %c0_107 = arith.constant 0 : index
    %c0_108 = arith.constant 0 : index
    %141 = vector.load %arg5[%c5_106, %c0_107, %c0_108] : memref<9x4x8xbf16, #tpu.memory_space<vmem>>, vector<1x4x8xbf16>
    %142 = vector.shape_cast %141 : vector<1x4x8xbf16> to vector<4x8xbf16>
    %cst_109 = arith.constant dense<0.000000e+00> : vector<288x8xf32>
    %143 = tpu.matmul %140, %142, %cst_109 {dimension_numbers = #tpu.dot_dimension_numbers<[1], [0], [0], [1], [0, 0, 1, 1], [], []>} : vector<288x4xbf16>, vector<4x8xbf16>, vector<288x8xf32> -> vector<288x8xf32>
    %144 = arith.addf %138, %143 : vector<288x8xf32>
    %c36_110 = arith.constant 36 : index
    %c0_111 = arith.constant 0 : index
    %145 = vector.load %arg12[%c36_110, %c0_111] : memref<332x4xf32, #tpu.memory_space<vmem>>, vector<288x4xf32>
    %146 = arith.truncf %145 : vector<288x4xf32> to vector<288x4xbf16>
    %c6_112 = arith.constant 6 : index
    %c0_113 = arith.constant 0 : index
    %c0_114 = arith.constant 0 : index
    %147 = vector.load %arg5[%c6_112, %c0_113, %c0_114] : memref<9x4x8xbf16, #tpu.memory_space<vmem>>, vector<1x4x8xbf16>
    %148 = vector.shape_cast %147 : vector<1x4x8xbf16> to vector<4x8xbf16>
    %cst_115 = arith.constant dense<0.000000e+00> : vector<288x8xf32>
    %149 = tpu.matmul %146, %148, %cst_115 {dimension_numbers = #tpu.dot_dimension_numbers<[1], [0], [0], [1], [0, 0, 1, 1], [], []>} : vector<288x4xbf16>, vector<4x8xbf16>, vector<288x8xf32> -> vector<288x8xf32>
    %150 = arith.addf %144, %149 : vector<288x8xf32>
    %c37_116 = arith.constant 37 : index
    %c0_117 = arith.constant 0 : index
    %151 = vector.load %arg12[%c37_116, %c0_117] : memref<332x4xf32, #tpu.memory_space<vmem>>, vector<288x4xf32>
    %152 = arith.truncf %151 : vector<288x4xf32> to vector<288x4xbf16>
    %c7_118 = arith.constant 7 : index
    %c0_119 = arith.constant 0 : index
    %c0_120 = arith.constant 0 : index
    %153 = vector.load %arg5[%c7_118, %c0_119, %c0_120] : memref<9x4x8xbf16, #tpu.memory_space<vmem>>, vector<1x4x8xbf16>
    %154 = vector.shape_cast %153 : vector<1x4x8xbf16> to vector<4x8xbf16>
    %cst_121 = arith.constant dense<0.000000e+00> : vector<288x8xf32>
    %155 = tpu.matmul %152, %154, %cst_121 {dimension_numbers = #tpu.dot_dimension_numbers<[1], [0], [0], [1], [0, 0, 1, 1], [], []>} : vector<288x4xbf16>, vector<4x8xbf16>, vector<288x8xf32> -> vector<288x8xf32>
    %156 = arith.addf %150, %155 : vector<288x8xf32>
    %c38_122 = arith.constant 38 : index
    %c0_123 = arith.constant 0 : index
    %157 = vector.load %arg12[%c38_122, %c0_123] : memref<332x4xf32, #tpu.memory_space<vmem>>, vector<288x4xf32>
    %158 = arith.truncf %157 : vector<288x4xf32> to vector<288x4xbf16>
    %c8_124 = arith.constant 8 : index
    %c0_125 = arith.constant 0 : index
    %c0_126 = arith.constant 0 : index
    %159 = vector.load %arg5[%c8_124, %c0_125, %c0_126] : memref<9x4x8xbf16, #tpu.memory_space<vmem>>, vector<1x4x8xbf16>
    %160 = vector.shape_cast %159 : vector<1x4x8xbf16> to vector<4x8xbf16>
    %cst_127 = arith.constant dense<0.000000e+00> : vector<288x8xf32>
    %161 = tpu.matmul %158, %160, %cst_127 {dimension_numbers = #tpu.dot_dimension_numbers<[1], [0], [0], [1], [0, 0, 1, 1], [], []>} : vector<288x4xbf16>, vector<4x8xbf16>, vector<288x8xf32> -> vector<288x8xf32>
    %162 = arith.addf %156, %161 : vector<288x8xf32>
    %c0_128 = arith.constant 0 : index
    %c0_129 = arith.constant 0 : index
    %163 = vector.load %arg6[%c0_128, %c0_129] : memref<1x8xf32, #tpu.memory_space<vmem>>, vector<1x8xf32>
    %164 = vector.broadcast %163 : vector<1x8xf32> to vector<288x8xf32>
    %165 = arith.addf %162, %164 : vector<288x8xf32>
    %cst_130 = arith.constant 0.000000e+00 : f32
    %166 = vector.broadcast %cst_130 : f32 to vector<288x8xf32>
    %167 = arith.maximumf %165, %166 : vector<288x8xf32>
    %c0_131 = arith.constant 0 : index
    %c0_132 = arith.constant 0 : index
    %168 = vector.load %arg7[%c0_131, %c0_132] : memref<1x8xf32, #tpu.memory_space<vmem>>, vector<1x8xf32>
    %169 = vector.broadcast %168 : vector<1x8xf32> to vector<288x8xf32>
    %170 = arith.addf %167, %169 : vector<288x8xf32>
    %cst_133 = arith.constant 0.000000e+00 : f32
    %171 = vector.broadcast %cst_133 : f32 to vector<8x8xf32>
    %c324_134 = arith.constant 324 : index
    %c0_135 = arith.constant 0 : index
    %172 = vector.load %arg13[%c324_134, %c0_135] : memref<332x8xf32, #tpu.memory_space<vmem>>, vector<8x8xf32>
    tpu.vector_store %arg13[%c324_134, %c0_135], %171 {strides = array<i32>} : memref<332x8xf32, #tpu.memory_space<vmem>>, vector<8x8xf32>,
    %c19_136 = arith.constant 19 : index
    %c0_137 = arith.constant 0 : index
    %173 = vector.load %arg13[%c19_136, %c0_137] : memref<332x8xf32, #tpu.memory_space<vmem>>, vector<288x8xf32>
    tpu.vector_store %arg13[%c19_136, %c0_137], %170 {strides = array<i32>} : memref<332x8xf32, #tpu.memory_space<vmem>>, vector<288x8xf32>,
    %c36_138 = arith.constant 36 : index
    %c0_139 = arith.constant 0 : index
    %174 = vector.load %arg13[%c36_138, %c0_139] : memref<332x8xf32, #tpu.memory_space<vmem>>, vector<18x8xf32>
    %c0_140 = arith.constant 0 : index
    %c0_141 = arith.constant 0 : index
    %175 = vector.load %arg13[%c0_140, %c0_141] : memref<332x8xf32, #tpu.memory_space<vmem>>, vector<18x8xf32>
    tpu.vector_store %arg13[%c0_140, %c0_141], %174 {strides = array<i32>} : memref<332x8xf32, #tpu.memory_space<vmem>>, vector<18x8xf32>,
    %c270_142 = arith.constant 270 : index
    %c0_143 = arith.constant 0 : index
    %176 = vector.load %arg13[%c270_142, %c0_143] : memref<332x8xf32, #tpu.memory_space<vmem>>, vector<18x8xf32>
    %c306_144 = arith.constant 306 : index
    %c0_145 = arith.constant 0 : index
    %177 = vector.load %arg13[%c306_144, %c0_145] : memref<332x8xf32, #tpu.memory_space<vmem>>, vector<18x8xf32>
    tpu.vector_store %arg13[%c306_144, %c0_145], %176 {strides = array<i32>} : memref<332x8xf32, #tpu.memory_space<vmem>>, vector<18x8xf32>,
    %c0_146 = arith.constant 0 : index
    %c0_147 = arith.constant 0 : index
    %178 = vector.load %arg13[%c0_146, %c0_147] : memref<332x8xf32, #tpu.memory_space<vmem>>, vector<324x8xf32>
    %179 = tpu.iota {dimensions = array<i32: 0>} : vector<324x8xi32>
    %c18_i32_148 = arith.constant 18 : i32
    %c0_i32_149 = arith.constant 0 : i32
    %180 = arith.cmpi eq, %c18_i32_148, %c0_i32_149 : i32
    %c1_i32_150 = arith.constant 1 : i32
    %181 = arith.select %180, %c1_i32_150, %c18_i32_148 : i32
    %182 = vector.broadcast %181 : i32 to vector<324x8xi32>
    %183 = arith.remsi %179, %182 : vector<324x8xi32>
    %c0_i32_151 = arith.constant 0 : i32
    %184 = vector.broadcast %c0_i32_151 : i32 to vector<324x8xi32>
    %185 = arith.cmpi ne, %183, %184 : vector<324x8xi32>
    %c0_i32_152 = arith.constant 0 : i32
    %186 = vector.broadcast %c0_i32_152 : i32 to vector<324x8xi32>
    %187 = arith.cmpi slt, %183, %186 : vector<324x8xi32>
    %c0_i32_153 = arith.constant 0 : i32
    %188 = arith.cmpi slt, %181, %c0_i32_153 : i32
    %189 = vector.broadcast %188 : i1 to vector<324x8xi1>
    %190 = vector.broadcast %189 : vector<324x8xi1> to vector<324x8xi1>
    %191 = arith.xori %187, %190 : vector<324x8xi1>
    %192 = arith.andi %191, %185 : vector<324x8xi1>
    %193 = vector.broadcast %181 : i32 to vector<324x8xi32>
    %194 = arith.addi %183, %193 : vector<324x8xi32>
    %195 = arith.select %192, %194, %183 : vector<324x8xi1>, vector<324x8xi32>
    %c2_154 = arith.constant 2 : index
    %c0_155 = arith.constant 0 : index
    %196 = vector.load %arg13[%c2_154, %c0_155] : memref<332x8xf32, #tpu.memory_space<vmem>>, vector<324x8xf32>
    %197 = vector.extract_strided_slice %178 {offsets = [322, 0], sizes = [2, 8], strides = [1, 1]} : vector<324x8xf32> to vector<2x8xf32>
    %198 = vector.extract_strided_slice %178 {offsets = [0, 0], sizes = [322, 8], strides = [1, 1]} : vector<324x8xf32> to vector<322x8xf32>
    %199 = tpu.concatenate %197, %198 in 0 : vector<2x8xf32>, vector<322x8xf32> -> vector<324x8xf32>
    %c0_i32_156 = arith.constant 0 : i32
    %200 = vector.broadcast %c0_i32_156 : i32 to vector<324x8xi32>
    %201 = arith.cmpi eq, %195, %200 : vector<324x8xi32>
    %c17_i32_157 = arith.constant 17 : i32
    %202 = vector.broadcast %c17_i32_157 : i32 to vector<324x8xi32>
    %203 = arith.cmpi eq, %195, %202 : vector<324x8xi32>
    %204 = arith.select %203, %199, %178 : vector<324x8xi1>, vector<324x8xf32>
    %205 = arith.select %201, %196, %204 : vector<324x8xi1>, vector<324x8xf32>
    %c0_158 = arith.constant 0 : index
    %c0_159 = arith.constant 0 : index
    %206 = vector.load %arg13[%c0_158, %c0_159] : memref<332x8xf32, #tpu.memory_space<vmem>>, vector<324x8xf32>
    tpu.vector_store %arg13[%c0_158, %c0_159], %205 {strides = array<i32>} : memref<332x8xf32, #tpu.memory_space<vmem>>, vector<324x8xf32>,
    %cst_160 = arith.constant 0.000000e+00 : f32
    %207 = vector.broadcast %cst_160 : f32 to vector<288x8xf32>
    %c0_161 = arith.constant 0 : index
    %c0_162 = arith.constant 0 : index
    %208 = vector.load %arg13[%c0_161, %c0_162] : memref<332x8xf32, #tpu.memory_space<vmem>>, vector<288x8xf32>
    %209 = arith.truncf %208 : vector<288x8xf32> to vector<288x8xbf16>
    %c0_163 = arith.constant 0 : index
    %c0_164 = arith.constant 0 : index
    %c0_165 = arith.constant 0 : index
    %210 = vector.load %arg8[%c0_163, %c0_164, %c0_165] : memref<9x8x8xbf16, #tpu.memory_space<vmem>>, vector<1x8x8xbf16>
    %211 = vector.shape_cast %210 : vector<1x8x8xbf16> to vector<8x8xbf16>
    %cst_166 = arith.constant dense<0.000000e+00> : vector<288x8xf32>
    %212 = tpu.matmul %209, %211, %cst_166 {dimension_numbers = #tpu.dot_dimension_numbers<[1], [0], [0], [1], [0, 0, 1, 1], [], []>} : vector<288x8xbf16>, vector<8x8xbf16>, vector<288x8xf32> -> vector<288x8xf32>
    %213 = arith.addf %207, %212 : vector<288x8xf32>
    %c1_167 = arith.constant 1 : index
    %c0_168 = arith.constant 0 : index
    %214 = vector.load %arg13[%c1_167, %c0_168] : memref<332x8xf32, #tpu.memory_space<vmem>>, vector<288x8xf32>
    %215 = arith.truncf %214 : vector<288x8xf32> to vector<288x8xbf16>
    %c1_169 = arith.constant 1 : index
    %c0_170 = arith.constant 0 : index
    %c0_171 = arith.constant 0 : index
    %216 = vector.load %arg8[%c1_169, %c0_170, %c0_171] : memref<9x8x8xbf16, #tpu.memory_space<vmem>>, vector<1x8x8xbf16>
    %217 = vector.shape_cast %216 : vector<1x8x8xbf16> to vector<8x8xbf16>
    %cst_172 = arith.constant dense<0.000000e+00> : vector<288x8xf32>
    %218 = tpu.matmul %215, %217, %cst_172 {dimension_numbers = #tpu.dot_dimension_numbers<[1], [0], [0], [1], [0, 0, 1, 1], [], []>} : vector<288x8xbf16>, vector<8x8xbf16>, vector<288x8xf32> -> vector<288x8xf32>
    %219 = arith.addf %213, %218 : vector<288x8xf32>
    %c2_173 = arith.constant 2 : index
    %c0_174 = arith.constant 0 : index
    %220 = vector.load %arg13[%c2_173, %c0_174] : memref<332x8xf32, #tpu.memory_space<vmem>>, vector<288x8xf32>
    %221 = arith.truncf %220 : vector<288x8xf32> to vector<288x8xbf16>
    %c2_175 = arith.constant 2 : index
    %c0_176 = arith.constant 0 : index
    %c0_177 = arith.constant 0 : index
    %222 = vector.load %arg8[%c2_175, %c0_176, %c0_177] : memref<9x8x8xbf16, #tpu.memory_space<vmem>>, vector<1x8x8xbf16>
    %223 = vector.shape_cast %222 : vector<1x8x8xbf16> to vector<8x8xbf16>
    %cst_178 = arith.constant dense<0.000000e+00> : vector<288x8xf32>
    %224 = tpu.matmul %221, %223, %cst_178 {dimension_numbers = #tpu.dot_dimension_numbers<[1], [0], [0], [1], [0, 0, 1, 1], [], []>} : vector<288x8xbf16>, vector<8x8xbf16>, vector<288x8xf32> -> vector<288x8xf32>
    %225 = arith.addf %219, %224 : vector<288x8xf32>
    %c18_179 = arith.constant 18 : index
    %c0_180 = arith.constant 0 : index
    %226 = vector.load %arg13[%c18_179, %c0_180] : memref<332x8xf32, #tpu.memory_space<vmem>>, vector<288x8xf32>
    %227 = arith.truncf %226 : vector<288x8xf32> to vector<288x8xbf16>
    %c3_181 = arith.constant 3 : index
    %c0_182 = arith.constant 0 : index
    %c0_183 = arith.constant 0 : index
    %228 = vector.load %arg8[%c3_181, %c0_182, %c0_183] : memref<9x8x8xbf16, #tpu.memory_space<vmem>>, vector<1x8x8xbf16>
    %229 = vector.shape_cast %228 : vector<1x8x8xbf16> to vector<8x8xbf16>
    %cst_184 = arith.constant dense<0.000000e+00> : vector<288x8xf32>
    %230 = tpu.matmul %227, %229, %cst_184 {dimension_numbers = #tpu.dot_dimension_numbers<[1], [0], [0], [1], [0, 0, 1, 1], [], []>} : vector<288x8xbf16>, vector<8x8xbf16>, vector<288x8xf32> -> vector<288x8xf32>
    %231 = arith.addf %225, %230 : vector<288x8xf32>
    %c19_185 = arith.constant 19 : index
    %c0_186 = arith.constant 0 : index
    %232 = vector.load %arg13[%c19_185, %c0_186] : memref<332x8xf32, #tpu.memory_space<vmem>>, vector<288x8xf32>
    %233 = arith.truncf %232 : vector<288x8xf32> to vector<288x8xbf16>
    %c4_187 = arith.constant 4 : index
    %c0_188 = arith.constant 0 : index
    %c0_189 = arith.constant 0 : index
    %234 = vector.load %arg8[%c4_187, %c0_188, %c0_189] : memref<9x8x8xbf16, #tpu.memory_space<vmem>>, vector<1x8x8xbf16>
    %235 = vector.shape_cast %234 : vector<1x8x8xbf16> to vector<8x8xbf16>
    %cst_190 = arith.constant dense<0.000000e+00> : vector<288x8xf32>
    %236 = tpu.matmul %233, %235, %cst_190 {dimension_numbers = #tpu.dot_dimension_numbers<[1], [0], [0], [1], [0, 0, 1, 1], [], []>} : vector<288x8xbf16>, vector<8x8xbf16>, vector<288x8xf32> -> vector<288x8xf32>
    %237 = arith.addf %231, %236 : vector<288x8xf32>
    %c20_191 = arith.constant 20 : index
    %c0_192 = arith.constant 0 : index
    %238 = vector.load %arg13[%c20_191, %c0_192] : memref<332x8xf32, #tpu.memory_space<vmem>>, vector<288x8xf32>
    %239 = arith.truncf %238 : vector<288x8xf32> to vector<288x8xbf16>
    %c5_193 = arith.constant 5 : index
    %c0_194 = arith.constant 0 : index
    %c0_195 = arith.constant 0 : index
    %240 = vector.load %arg8[%c5_193, %c0_194, %c0_195] : memref<9x8x8xbf16, #tpu.memory_space<vmem>>, vector<1x8x8xbf16>
    %241 = vector.shape_cast %240 : vector<1x8x8xbf16> to vector<8x8xbf16>
    %cst_196 = arith.constant dense<0.000000e+00> : vector<288x8xf32>
    %242 = tpu.matmul %239, %241, %cst_196 {dimension_numbers = #tpu.dot_dimension_numbers<[1], [0], [0], [1], [0, 0, 1, 1], [], []>} : vector<288x8xbf16>, vector<8x8xbf16>, vector<288x8xf32> -> vector<288x8xf32>
    %243 = arith.addf %237, %242 : vector<288x8xf32>
    %c36_197 = arith.constant 36 : index
    %c0_198 = arith.constant 0 : index
    %244 = vector.load %arg13[%c36_197, %c0_198] : memref<332x8xf32, #tpu.memory_space<vmem>>, vector<288x8xf32>
    %245 = arith.truncf %244 : vector<288x8xf32> to vector<288x8xbf16>
    %c6_199 = arith.constant 6 : index
    %c0_200 = arith.constant 0 : index
    %c0_201 = arith.constant 0 : index
    %246 = vector.load %arg8[%c6_199, %c0_200, %c0_201] : memref<9x8x8xbf16, #tpu.memory_space<vmem>>, vector<1x8x8xbf16>
    %247 = vector.shape_cast %246 : vector<1x8x8xbf16> to vector<8x8xbf16>
    %cst_202 = arith.constant dense<0.000000e+00> : vector<288x8xf32>
    %248 = tpu.matmul %245, %247, %cst_202 {dimension_numbers = #tpu.dot_dimension_numbers<[1], [0], [0], [1], [0, 0, 1, 1], [], []>} : vector<288x8xbf16>, vector<8x8xbf16>, vector<288x8xf32> -> vector<288x8xf32>
    %249 = arith.addf %243, %248 : vector<288x8xf32>
    %c37_203 = arith.constant 37 : index
    %c0_204 = arith.constant 0 : index
    %250 = vector.load %arg13[%c37_203, %c0_204] : memref<332x8xf32, #tpu.memory_space<vmem>>, vector<288x8xf32>
    %251 = arith.truncf %250 : vector<288x8xf32> to vector<288x8xbf16>
    %c7_205 = arith.constant 7 : index
    %c0_206 = arith.constant 0 : index
    %c0_207 = arith.constant 0 : index
    %252 = vector.load %arg8[%c7_205, %c0_206, %c0_207] : memref<9x8x8xbf16, #tpu.memory_space<vmem>>, vector<1x8x8xbf16>
    %253 = vector.shape_cast %252 : vector<1x8x8xbf16> to vector<8x8xbf16>
    %cst_208 = arith.constant dense<0.000000e+00> : vector<288x8xf32>
    %254 = tpu.matmul %251, %253, %cst_208 {dimension_numbers = #tpu.dot_dimension_numbers<[1], [0], [0], [1], [0, 0, 1, 1], [], []>} : vector<288x8xbf16>, vector<8x8xbf16>, vector<288x8xf32> -> vector<288x8xf32>
    %255 = arith.addf %249, %254 : vector<288x8xf32>
    %c38_209 = arith.constant 38 : index
    %c0_210 = arith.constant 0 : index
    %256 = vector.load %arg13[%c38_209, %c0_210] : memref<332x8xf32, #tpu.memory_space<vmem>>, vector<288x8xf32>
    %257 = arith.truncf %256 : vector<288x8xf32> to vector<288x8xbf16>
    %c8_211 = arith.constant 8 : index
    %c0_212 = arith.constant 0 : index
    %c0_213 = arith.constant 0 : index
    %258 = vector.load %arg8[%c8_211, %c0_212, %c0_213] : memref<9x8x8xbf16, #tpu.memory_space<vmem>>, vector<1x8x8xbf16>
    %259 = vector.shape_cast %258 : vector<1x8x8xbf16> to vector<8x8xbf16>
    %cst_214 = arith.constant dense<0.000000e+00> : vector<288x8xf32>
    %260 = tpu.matmul %257, %259, %cst_214 {dimension_numbers = #tpu.dot_dimension_numbers<[1], [0], [0], [1], [0, 0, 1, 1], [], []>} : vector<288x8xbf16>, vector<8x8xbf16>, vector<288x8xf32> -> vector<288x8xf32>
    %261 = arith.addf %255, %260 : vector<288x8xf32>
    %c0_215 = arith.constant 0 : index
    %c0_216 = arith.constant 0 : index
    %262 = vector.load %arg9[%c0_215, %c0_216] : memref<1x8xf32, #tpu.memory_space<vmem>>, vector<1x8xf32>
    %263 = vector.broadcast %262 : vector<1x8xf32> to vector<288x8xf32>
    %264 = arith.addf %261, %263 : vector<288x8xf32>
    %cst_217 = arith.constant 0.000000e+00 : f32
    %265 = vector.broadcast %cst_217 : f32 to vector<288x8xf32>
    %266 = arith.maximumf %264, %265 : vector<288x8xf32>
    %c0_218 = arith.constant 0 : index
    %c0_219 = arith.constant 0 : index
    %267 = vector.load %arg10[%c0_218, %c0_219] : memref<1x8xf32, #tpu.memory_space<vmem>>, vector<1x8xf32>
    %268 = vector.broadcast %267 : vector<1x8xf32> to vector<288x8xf32>
    %269 = arith.addf %266, %268 : vector<288x8xf32>
    %270 = tpu.iota {dimensions = array<i32: 0>} : vector<288x8xi32>
    %c18_i32_220 = arith.constant 18 : i32
    %c0_i32_221 = arith.constant 0 : i32
    %271 = arith.cmpi eq, %c18_i32_220, %c0_i32_221 : i32
    %c1_i32_222 = arith.constant 1 : i32
    %272 = arith.select %271, %c1_i32_222, %c18_i32_220 : i32
    %273 = vector.broadcast %272 : i32 to vector<288x8xi32>
    %274 = arith.remsi %270, %273 : vector<288x8xi32>
    %c0_i32_223 = arith.constant 0 : i32
    %275 = vector.broadcast %c0_i32_223 : i32 to vector<288x8xi32>
    %276 = arith.cmpi ne, %274, %275 : vector<288x8xi32>
    %c0_i32_224 = arith.constant 0 : i32
    %277 = vector.broadcast %c0_i32_224 : i32 to vector<288x8xi32>
    %278 = arith.cmpi slt, %274, %277 : vector<288x8xi32>
    %c0_i32_225 = arith.constant 0 : i32
    %279 = arith.cmpi slt, %272, %c0_i32_225 : i32
    %280 = vector.broadcast %279 : i1 to vector<288x8xi1>
    %281 = vector.broadcast %280 : vector<288x8xi1> to vector<288x8xi1>
    %282 = arith.xori %278, %281 : vector<288x8xi1>
    %283 = arith.andi %282, %276 : vector<288x8xi1>
    %284 = vector.broadcast %272 : i32 to vector<288x8xi32>
    %285 = arith.addi %274, %284 : vector<288x8xi32>
    %286 = arith.select %283, %285, %274 : vector<288x8xi1>, vector<288x8xi32>
    %c16_i32 = arith.constant 16 : i32
    %287 = vector.broadcast %c16_i32 : i32 to vector<288x8xi32>
    %288 = arith.cmpi slt, %286, %287 : vector<288x8xi32>
    %cst_226 = arith.constant 0.000000e+00 : f32
    %289 = vector.broadcast %cst_226 : f32 to vector<288x8xf32>
    %290 = arith.select %288, %269, %289 : vector<288x8xi1>, vector<288x8xf32>
    %291 = arith.truncf %290 : vector<288x8xf32> to vector<288x8xbf16>
    %c0_227 = arith.constant 0 : index
    %c0_228 = arith.constant 0 : index
    %c0_229 = arith.constant 0 : index
    %292 = vector.load %arg11[%c0_227, %c0_228, %c0_229] : memref<1x288x8xbf16, #tpu.memory_space<vmem>>, vector<1x288x8xbf16>
    %293 = vector.shape_cast %292 : vector<1x288x8xbf16> to vector<288x8xbf16>
    %294 = vector.shape_cast %291 : vector<288x8xbf16> to vector<1x288x8xbf16>
    tpu.vector_store %arg11[%c0_227, %c0_228, %c0_229], %294 {strides = array<i32>} : memref<1x288x8xbf16, #tpu.memory_space<vmem>>, vector<1x288x8xbf16>,
    return
  }
  func.func @transform_0(%arg0: i32) -> (i32, i32, i32) {
    %c0_i32 = arith.constant 0 : i32
    %c0_i32_0 = arith.constant 0 : i32
    %c0_i32_1 = arith.constant 0 : i32
    return %arg0, %c0_i32, %c0_i32_0 : i32, i32, i32
  }
  func.func @transform_1(%arg0: i32) -> (i32, i32, i32) {
    %c0_i32 = arith.constant 0 : i32
    %c0_i32_0 = arith.constant 0 : i32
    %c0_i32_1 = arith.constant 0 : i32
    %c0_i32_2 = arith.constant 0 : i32
    return %c0_i32, %c0_i32_0, %c0_i32_1 : i32, i32, i32
  }
  func.func @transform_2(%arg0: i32) -> (i32, i32) {
    %c0_i32 = arith.constant 0 : i32
    %c0_i32_0 = arith.constant 0 : i32
    %c0_i32_1 = arith.constant 0 : i32
    return %c0_i32, %c0_i32_0 : i32, i32
  }
  func.func @transform_3(%arg0: i32) -> (i32, i32) {
    %c0_i32 = arith.constant 0 : i32
    %c0_i32_0 = arith.constant 0 : i32
    %c0_i32_1 = arith.constant 0 : i32
    return %c0_i32, %c0_i32_0 : i32, i32
  }
  func.func @transform_4(%arg0: i32) -> (i32, i32, i32) {
    %c0_i32 = arith.constant 0 : i32
    %c0_i32_0 = arith.constant 0 : i32
    %c0_i32_1 = arith.constant 0 : i32
    %c0_i32_2 = arith.constant 0 : i32
    return %c0_i32, %c0_i32_0, %c0_i32_1 : i32, i32, i32
  }
  func.func @transform_5(%arg0: i32) -> (i32, i32) {
    %c0_i32 = arith.constant 0 : i32
    %c0_i32_0 = arith.constant 0 : i32
    %c0_i32_1 = arith.constant 0 : i32
    return %c0_i32, %c0_i32_0 : i32, i32
  }
  func.func @transform_6(%arg0: i32) -> (i32, i32) {
    %c0_i32 = arith.constant 0 : i32
    %c0_i32_0 = arith.constant 0 : i32
    %c0_i32_1 = arith.constant 0 : i32
    return %c0_i32, %c0_i32_0 : i32, i32
  }
  func.func @transform_7(%arg0: i32) -> (i32, i32, i32) {
    %c0_i32 = arith.constant 0 : i32
    %c0_i32_0 = arith.constant 0 : i32
    %c0_i32_1 = arith.constant 0 : i32
    %c0_i32_2 = arith.constant 0 : i32
    return %c0_i32, %c0_i32_0, %c0_i32_1 : i32, i32, i32
  }
  func.func @transform_8(%arg0: i32) -> (i32, i32) {
    %c0_i32 = arith.constant 0 : i32
    %c0_i32_0 = arith.constant 0 : i32
    %c0_i32_1 = arith.constant 0 : i32
    return %c0_i32, %c0_i32_0 : i32, i32
  }
  func.func @transform_9(%arg0: i32) -> (i32, i32) {
    %c0_i32 = arith.constant 0 : i32
    %c0_i32_0 = arith.constant 0 : i32
    %c0_i32_1 = arith.constant 0 : i32
    return %c0_i32, %c0_i32_0 : i32, i32
  }
  func.func @transform_10(%arg0: i32) -> (i32, i32, i32) {
    %c0_i32 = arith.constant 0 : i32
    %c0_i32_0 = arith.constant 0 : i32
    %c0_i32_1 = arith.constant 0 : i32
    return %arg0, %c0_i32, %c0_i32_0 : i32, i32, i32
  }
}

</mosaic_0001>

<bundles_post_ra>
// kernel: siamese_forward.3
= control target key start
LH: loop header
LB: loop body
LE: loop exit
PB: predicated region body
PF: predicated region fallthrough
CT: control target
= control target key end

     0   :  { %12 = vsyncpa [#allocation4], 0  ;;  %s8199_s0 = inlined_call_operand.hbm [shape: bf16[4,2304], index: 0, kind: input, shape index: {}]   ;;  %s8200_s1 = inlined_call_operand.hbm [shape: bf16[2304,512], index: 1, kind: input, shape index: {}]   ;;  %s8201_s2 = inlined_call_operand.hbm [shape: f32[1,512], index: 2, kind: input, shape index: {}]   ;;  %s8202_s3 = inlined_call_operand.hbm [shape: bf16[512,512], index: 3, kind: input, shape index: {}]   ;;  %s8203_s4 = inlined_call_operand.hbm [shape: f32[1,512], index: 4, kind: input, shape index: {}]   ;;  %s8204_s5 = inlined_call_operand.hbm [shape: bf16[512,5], index: 5, kind: input, shape index: {}]   ;;  %s8205_s6 = inlined_call_operand.hbm [shape: f32[1,5], index: 6, kind: input, shape index: {}]   ;;  %s8206_s7 = inlined_call_operand.hbm [shape: f32[4,5], index: 7, kind: output, shape index: {}]  }
   0x1   :  { %13 = vsyncpa [#allocation7], 0 }
   0x2   :  { %14 = vsyncpa [#allocation10], 0 }
   0x3   :  { %15 = vsyncpa [#allocation13], 0 }
   0x4   :  { %16 = vsyncpa [#allocation5], 0  ;;  %s7948_s24 = smov [#allocation6]   ;;  %s7762_s28 = scalar_lea.hbm %s8200_s1, 73728 }
   0x5   :  { %s32_s25 = sshll.u32 %s7948_s24, 4  ;;  %p7763_p0 = scmp.ne.s32.totalorder %s8200_s1, %s7762_s28  ;;  %s33_s25 = int_to_ptr.vmem [resolvable:$true] %s32_s25 }
   0x6   :  { %p7766_p1 = scmp.lt.u32.totalorder %s7762_s28, %s8200_s1 }
   0x8   :  { %p7768_p2 = pnand %p7766_p1, %p7763_p0 }
   0xa   :  { %7771 = shalt.err (!%p7768_p2)
}
   0xb   :  { %s7772_s10 = scalar_lea.vmem %s33_s25, 73728  ;;  %p7777_p4 = scmp.lt.s32.totalorder %s33_s25, %s33_s25 }
   0xc   :  { %p7773_p3 = scmp.ne.s32.totalorder %s33_s25, %s7772_s10  ;;  %p7778_p5 = scmp.lt.s32.totalorder %s7772_s10, %s7772_s10 }
   0xe   :  { %p7779_p6 = por %p7778_p5, %p7777_p4 }
  0x10   :  { %p7780_p7 = pnand %p7779_p6, %p7773_p3 }
  0x12   :  { %7783 = shalt.err (!%p7780_p7)
}
  0x13   :  { %s7949_s11 = smov 256   ;;  %s7950_s12 = smov 16  }
  0x14   :  { %38 = dma.hbm_to_vmem [thread:$0]  %s8200_s1, 73728, %s33_s25, [#allocation7], %s7949_s11, %s7949_s11, %s7950_s12  }
  0x15   :  { %s7951_s15 = smov [#allocation9]   ;;  %s7952_s17 = smov [#allocation12]  }
  0x16   :  { %s54_s16 = sshll.u32 %s7951_s15, 4  ;;  %s76_s18 = sshll.u32 %s7952_s17, 4  ;;  %s55_s16 = int_to_ptr.vmem [resolvable:$true] %s54_s16  ;;  %s77_s18 = int_to_ptr.vmem [resolvable:$true] %s76_s18 }
  0x17   :  { %s7784_s21 = scalar_lea.hbm %s8202_s3, 16384 }
  0x18   :  { %p7785_p8 = scmp.ne.s32.totalorder %s8202_s3, %s7784_s21  ;;  %p7788_p9 = scmp.lt.u32.totalorder %s7784_s21, %s8202_s3 }
  0x1a   :  { %p7790_p10 = pnand %p7788_p9, %p7785_p8 }
  0x1c   :  { %7793 = shalt.err (!%p7790_p10)
}
  0x1d   :  { %s7794_s1 = scalar_lea.vmem %s55_s16, 16384  ;;  %p7799_p12 = scmp.lt.s32.totalorder %s55_s16, %s55_s16 }
  0x1e   :  { %p7795_p11 = scmp.ne.s32.totalorder %s55_s16, %s7794_s1  ;;  %p7800_p13 = scmp.lt.s32.totalorder %s7794_s1, %s7794_s1 }
  0x20   :  { %p7801_p0 = por %p7800_p13, %p7799_p12 }
  0x22   :  { %p7802_p1 = pnand %p7801_p0, %p7795_p11 }
  0x24   :  { %7805 = shalt.err (!%p7802_p1)
}
  0x25   :  { %60 = dma.hbm_to_vmem [thread:$0]  %s8202_s3, 16384, %s55_s16, [#allocation10], %s7949_s11, %s7949_s11, %s7950_s12  }
  0x26   :  { %s7806_s30 = scalar_lea.hbm %s8204_s5, 4096 }
  0x27   :  { %p7807_p2 = scmp.ne.s32.totalorder %s8204_s5, %s7806_s30  ;;  %p7810_p3 = scmp.lt.u32.totalorder %s7806_s30, %s8204_s5 }
  0x29   :  { %p7812_p4 = pnand %p7810_p3, %p7807_p2 }
  0x2b   :  { %7815 = shalt.err (!%p7812_p4)
}
  0x2c   :  { %s7816_s14 = scalar_lea.vmem %s77_s18, 4096  ;;  %p7821_p6 = scmp.lt.s32.totalorder %s77_s18, %s77_s18 }
  0x2d   :  { %p7817_p5 = scmp.ne.s32.totalorder %s77_s18, %s7816_s14  ;;  %p7822_p7 = scmp.lt.s32.totalorder %s7816_s14, %s7816_s14 }
  0x2f   :  { %p7823_p8 = por %p7822_p7, %p7821_p6 }
  0x31   :  { %p7824_p9 = pnand %p7823_p8, %p7817_p5 }
  0x33   :  { %7827 = shalt.err (!%p7824_p9)
}
  0x34   :  { %s7953_s3 = smov 64   ;;  %s7954_s11 = smov 4  }
  0x35   :  { %82 = dma.hbm_to_vmem [thread:$0]  %s8204_s5, 4096, %s77_s18, [#allocation13], %s7953_s3, %s7953_s3, %s7954_s11  }
  0x36   :  { %s7955_s16 = smov [#allocation3]   ;;  %s7956_s19 = smov [#allocation8]  }
  0x37   :  { %s23_s17 = sshll.u32 %s7955_s16, 4  ;;  %s45_s20 = sshll.u32 %s7956_s19, 4  ;;  %s24_s17 = int_to_ptr.vmem [resolvable:$true] %s23_s17  ;;  %s46_s20 = int_to_ptr.vmem [resolvable:$true] %s45_s20 }
  0x38   :  { %s7828_s23 = scalar_lea.hbm %s8199_s0, 576 }
  0x39   :  { %p7829_p10 = scmp.ne.s32.totalorder %s8199_s0, %s7828_s23  ;;  %p7832_p11 = scmp.lt.u32.totalorder %s7828_s23, %s8199_s0 }
  0x3b   :  { %p7834_p12 = pnand %p7832_p11, %p7829_p10 }
  0x3d   :  { %7837 = shalt.err (!%p7834_p12)
}
  0x3e   :  { %s7838_s5 = scalar_lea.vmem %s24_s17, 576  ;;  %p7843_p0 = scmp.lt.s32.totalorder %s24_s17, %s24_s17 }
  0x3f   :  { %p7839_p13 = scmp.ne.s32.totalorder %s24_s17, %s7838_s5  ;;  %p7844_p1 = scmp.lt.s32.totalorder %s7838_s5, %s7838_s5 }
  0x41   :  { %p7845_p2 = por %p7844_p1, %p7843_p0 }
  0x43   :  { %p7846_p3 = pnand %p7845_p2, %p7839_p13 }
  0x45   :  { %7849 = shalt.err (!%p7846_p3)
}
  0x46   :  { %26 = dma.hbm_to_vmem [thread:$0]  %s8199_s0, 576, %s24_s17, [#allocation4]  }
  0x47   :  { %s7850_s30 = scalar_lea.hbm %s8201_s2, 64 }
  0x48   :  { %p7851_p4 = scmp.ne.s32.totalorder %s8201_s2, %s7850_s30  ;;  %p7854_p5 = scmp.lt.u32.totalorder %s7850_s30, %s8201_s2 }
  0x4a   :  { %p7856_p6 = pnand %p7854_p5, %p7851_p4 }
  0x4c   :  { %7859 = shalt.err (!%p7856_p6)
}
  0x4d   :  { %s7860_s14 = scalar_lea.vmem %s46_s20, 64  ;;  %p7865_p8 = scmp.lt.s32.totalorder %s46_s20, %s46_s20 }
  0x4e   :  { %p7861_p7 = scmp.ne.s32.totalorder %s46_s20, %s7860_s14  ;;  %p7866_p9 = scmp.lt.s32.totalorder %s7860_s14, %s7860_s14 }
  0x50   :  { %p7867_p10 = por %p7866_p9, %p7865_p8 }
  0x52   :  { %p7868_p11 = pnand %p7867_p10, %p7861_p7 }
  0x54   :  { %7871 = shalt.err (!%p7868_p11)
}
  0x55   :  { %48 = dma.hbm_to_vmem [thread:$0]  %s8201_s2, 64, %s46_s20, [#allocation7]  }
  0x56   :  { %s7957_s11 = smov [#allocation11]   ;;  %s7958_s15 = smov [#allocation14]  }
  0x57   :  { %s67_s12 = sshll.u32 %s7957_s11, 4  ;;  %s89_s16 = sshll.u32 %s7958_s15, 4  ;;  %s68_s12 = int_to_ptr.vmem [resolvable:$true] %s67_s12  ;;  %s90_s16 = int_to_ptr.vmem [resolvable:$true] %s89_s16 }
  0x58   :  { %s7872_s21 = scalar_lea.hbm %s8203_s4, 64 }
  0x59   :  { %p7873_p12 = scmp.ne.s32.totalorder %s8203_s4, %s7872_s21  ;;  %p7876_p13 = scmp.lt.u32.totalorder %s7872_s21, %s8203_s4 }
  0x5b   :  { %p7878_p0 = pnand %p7876_p13, %p7873_p12 }
  0x5d   :  { %7881 = shalt.err (!%p7878_p0)
}
  0x5e   :  { %s7882_s2 = scalar_lea.vmem %s68_s12, 64  ;;  %p7887_p2 = scmp.lt.s32.totalorder %s68_s12, %s68_s12 }
  0x5f   :  { %p7883_p1 = scmp.ne.s32.totalorder %s68_s12, %s7882_s2  ;;  %p7888_p3 = scmp.lt.s32.totalorder %s7882_s2, %s7882_s2 }
  0x61   :  { %p7889_p4 = por %p7888_p3, %p7887_p2 }
  0x63   :  { %p7890_p5 = pnand %p7889_p4, %p7883_p1 }
  0x65   :  { %7893 = shalt.err (!%p7890_p5)
}
  0x66   :  { %70 = dma.hbm_to_vmem [thread:$0]  %s8203_s4, 64, %s68_s12, [#allocation10]  }
  0x67   :  { %s7894_s18 = scalar_lea.hbm %s8205_s6, 16 }
  0x68   :  { %p7895_p6 = scmp.ne.s32.totalorder %s8205_s6, %s7894_s18  ;;  %p7898_p7 = scmp.lt.u32.totalorder %s7894_s18, %s8205_s6 }
  0x6a   :  { %p7900_p8 = pnand %p7898_p7, %p7895_p6 }
  0x6c   :  { %7903 = shalt.err (!%p7900_p8)
}
  0x6d   :  { %s7904_s8 = scalar_lea.vmem %s90_s16, 16  ;;  %s7908_s9 = scalar_lea.vmem %s90_s16, 32 }
  0x6e   :  { %p7905_p9 = scmp.ne.s32.totalorder %s90_s16, %s7904_s8  ;;  %p7909_p10 = scmp.lt.s32.totalorder %s90_s16, %s90_s16 }
  0x6f   :  { %p7910_p11 = scmp.lt.s32.totalorder %s7908_s9, %s7904_s8 }
  0x71   :  { %p7911_p12 = por %p7910_p11, %p7909_p10 }
  0x73   :  { %p7912_p13 = pnand %p7911_p12, %p7905_p9 }
  0x75   :  { %7915 = shalt.err (!%p7912_p13)
}
  0x76   :  { %92 = dma.hbm_to_vmem [thread:$0]  %s8205_s6, 16, %s90_s16, [#allocation13]  }
  0x77   :  { %7938 = dma.done.wait [#allocation4], 576  }
  0x78   :  { %7939 = vsyncadd [#allocation4], 4294966720 }
  0x79   :  { %7940 = dma.done.wait [#allocation7], 73792  }
  0x7a   :  { %7941 = vsyncadd [#allocation7], 4294893504 }
  0x7b   :  { %7942 = dma.done.wait [#allocation10], 16448  }
  0x7c   :  { %7943 = vsyncadd [#allocation10], 4294950848 }
  0x7d   :  { %7944 = dma.done.wait [#allocation13], 4112  }
  0x7e   :  { %7945 = vsyncadd [#allocation13], 4294963184  ;;  %v6670_v0 = vld [vmem:[#allocation6 + $0x4] ss:$16 sps:$4 sm:$0xff]   ;;  %v6672_v1 = vld [vmem:[#allocation6 + $0xc] ss:$16 sps:$4 sm:$0xff]   ;;  %v713_v38 = vlaneseq }
  0x7f   :  { %3683 = vmatprep.subr.bf16.mxu0 %v6670_v0  ;;  %v6674_v2 = vld [vmem:[#allocation6] ss:$16 sps:$4 sm:$0xff]   ;;  %v6675_v3 = vld [vmem:[#allocation6 + $0x8] ss:$16 sps:$4 sm:$0xff]   ;;  %4052 = vmatprep.subr.bf16.mxu1 %v6672_v1  ;;  %v6676_v4 = vld [vmem:[#allocation6 + $0x24] ss:$16 sps:$4 sm:$0xff]  }
  0x80   :  { %3684 = vmatpush1.bf16.msra.mxu0 %v6674_v2  ;;  %4053 = vmatpush1.bf16.msra.mxu1 %v6675_v3  ;;  %v6678_v5 = vld [vmem:[#allocation6 + $0x2c] ss:$16 sps:$4 sm:$0xff]   ;;  %v6680_v6 = vld [vmem:[#allocation6 + $0x20] ss:$16 sps:$4 sm:$0xff]   ;;  %v6681_v7 = vld [vmem:[#allocation6 + $0x28] ss:$16 sps:$4 sm:$0xff]  }
  0x81   :  { %3685 = vmatprep.subr.bf16.mxu0 %v6676_v4  ;;  %4054 = vmatprep.subr.bf16.mxu1 %v6678_v5  ;;  %v6682_v8 = vld [vmem:[#allocation6 + $0x44] ss:$16 sps:$4 sm:$0xff]   ;;  %v6684_v9 = vld [vmem:[#allocation6 + $0x4c] ss:$16 sps:$4 sm:$0xff]   ;;  %v6686_v10 = vld [vmem:[#allocation6 + $0x40] ss:$16 sps:$4 sm:$0xff]  }
  0x82   :  { %v6687_v11 = vld [vmem:[#allocation6 + $0x48] ss:$16 sps:$4 sm:$0xff]   ;;  %v6688_v12 = vld [vmem:[#allocation6 + $0x64] ss:$16 sps:$4 sm:$0xff]   ;;  %v6690_v13 = vld [vmem:[#allocation6 + $0x6c] ss:$16 sps:$4 sm:$0xff]  }
  0x83   :  { %v6692_v14 = vld [vmem:[#allocation6 + $0x60] ss:$16 sps:$4 sm:$0xff]   ;;  %v6693_v15 = vld [vmem:[#allocation6 + $0x68] ss:$16 sps:$4 sm:$0xff]   ;;  %v6694_v16 = vld [vmem:[#allocation6 + $0x84] ss:$16 sps:$4 sm:$0xff]  }
  0x84   :  { %3686 = vmatpush1.bf16.msra.mxu0 %v6680_v6  ;;  %4055 = vmatpush1.bf16.msra.mxu1 %v6681_v7  ;;  %v6696_v17 = vld [vmem:[#allocation6 + $0x8c] ss:$16 sps:$4 sm:$0xff]   ;;  %v6698_v18 = vld [vmem:[#allocation6 + $0x80] ss:$16 sps:$4 sm:$0xff]   ;;  %v6699_v19 = vld [vmem:[#allocation6 + $0x88] ss:$16 sps:$4 sm:$0xff]  }
  0x85   :  { %3687 = vmatprep.subr.bf16.mxu0 %v6682_v8  ;;  %4056 = vmatprep.subr.bf16.mxu1 %v6684_v9  ;;  %v6700_v20 = vld [vmem:[#allocation6 + $0xa4] ss:$16 sps:$4 sm:$0xff]   ;;  %v6702_v21 = vld [vmem:[#allocation6 + $0xac] ss:$16 sps:$4 sm:$0xff]   ;;  %v6704_v22 = vld [vmem:[#allocation6 + $0xa0] ss:$16 sps:$4 sm:$0xff]  }
  0x86   :  { %v6705_v23 = vld [vmem:[#allocation6 + $0xa8] ss:$16 sps:$4 sm:$0xff]   ;;  %v6706_v24 = vld [vmem:[#allocation6 + $0xc4] ss:$16 sps:$4 sm:$0xff]   ;;  %v6708_v25 = vld [vmem:[#allocation6 + $0xcc] ss:$16 sps:$4 sm:$0xff]  }
  0x87   :  { %v6710_v26 = vld [vmem:[#allocation6 + $0xc0] ss:$16 sps:$4 sm:$0xff]   ;;  %v6711_v27 = vld [vmem:[#allocation6 + $0xc8] ss:$16 sps:$4 sm:$0xff]   ;;  %v6712_v28 = vld [vmem:[#allocation6 + $0xe4] ss:$16 sps:$4 sm:$0xff]  }
  0x88   :  { %3688 = vmatpush1.bf16.msra.mxu0 %v6686_v10  ;;  %4057 = vmatpush1.bf16.msra.mxu1 %v6687_v11  ;;  %v6714_v29 = vld [vmem:[#allocation6 + $0xec] ss:$16 sps:$4 sm:$0xff]   ;;  %v6716_v30 = vld [vmem:[#allocation6 + $0xe0] ss:$16 sps:$4 sm:$0xff]   ;;  %v6717_v31 = vld [vmem:[#allocation6 + $0xe8] ss:$16 sps:$4 sm:$0xff]  }
  0x89   :  { %3689 = vmatprep.subr.bf16.mxu0 %v6688_v12  ;;  %4058 = vmatprep.subr.bf16.mxu1 %v6690_v13  ;;  %v6718_v32 = vld [vmem:[#allocation6 + $0x104] ss:$16 sps:$4 sm:$0xff]   ;;  %v6720_v33 = vld [vmem:[#allocation6 + $0x10c] ss:$16 sps:$4 sm:$0xff]   ;;  %v6722_v34 = vld [vmem:[#allocation6 + $0x100] ss:$16 sps:$4 sm:$0xff]  }
  0x8a   :  { %v6723_v35 = vld [vmem:[#allocation6 + $0x108] ss:$16 sps:$4 sm:$0xff]   ;;  %v7959_v36 = vmov 1983009808   ;;  %v6724_v39 = vld [vmem:[#allocation6 + $0x124] ss:$16 sps:$4 sm:$0xff]  }
  0x8b   :  { %v711_v37 = vunpack.c.l.s4 %v7959_v36  ;;  %v6726_v40 = vld [vmem:[#allocation6 + $0x12c] ss:$16 sps:$4 sm:$0xff]   ;;  %v6728_v41 = vld [vmem:[#allocation6 + $0x120] ss:$16 sps:$4 sm:$0xff]   ;;  %v8085_v43 = vshrl.u32 %v713_v38, 7  ;;  %s7960_s6 = smov [#allocation15]  }
  0x8c   :  { %3690 = vmatpush1.bf16.msra.mxu0 %v6692_v14  ;;  %4059 = vmatpush1.bf16.msra.mxu1 %v6693_v15  ;;  %v6729_v44 = vld [vmem:[#allocation6 + $0x128] ss:$16 sps:$4 sm:$0xff]   ;;  %v6730_v45 = vld [vmem:[#allocation6 + $0x144] ss:$16 sps:$4 sm:$0xff]   ;;  %v6732_v46 = vld [vmem:[#allocation6 + $0x14c] ss:$16 sps:$4 sm:$0xff]  }
  0x8d   :  { %3691 = vmatprep.subr.bf16.mxu0 %v6694_v16  ;;  %4060 = vmatprep.subr.bf16.mxu1 %v6696_v17  ;;  %v712_v42 = vunpack.c.0.s8 %v711_v37  ;;  %v6734_v47 = vld [vmem:[#allocation6 + $0x140] ss:$16 sps:$4 sm:$0xff]   ;;  %v6735_v48 = vld [vmem:[#allocation6 + $0x148] ss:$16 sps:$4 sm:$0xff]   ;;  %v6736_v50 = vld [vmem:[#allocation6 + $0x164] ss:$16 sps:$4 sm:$0xff]  }
  0x8e   :  { %v6738_v51 = vld [vmem:[#allocation6 + $0x16c] ss:$16 sps:$4 sm:$0xff]   ;;  %v6740_v53 = vld [vmem:[#allocation6 + $0x160] ss:$16 sps:$4 sm:$0xff]   ;;  %v6741_v55 = vld [vmem:[#allocation6 + $0x168] ss:$16 sps:$4 sm:$0xff]  }
  0x8f   :  { %v8088_v49 = vsub.s32 %v712_v42, %v8085_v43  ;;  %v123_v52 = vld [vmem:[#allocation3] sm:$0xff]  ;;  %v6742_v56 = vld [vmem:[#allocation6 + $0x184] ss:$16 sps:$4 sm:$0xff]   ;;  %v6747_v60 = vld [vmem:[#allocation6 + $0x188] ss:$16 sps:$4 sm:$0xff]   ;;  %s5787_s13 = sshll.u32 %s7960_s6, 4  ;;  %s5788_s13 = int_to_ptr.vmem [resolvable:$true] %s5787_s13 }
  0x90   :  { %3692 = vmatpush1.bf16.msra.mxu0 %v6698_v18  ;;  %4061 = vmatpush1.bf16.msra.mxu1 %v6699_v19  ;;  %v6744_v57 = vld [vmem:[#allocation6 + $0x18c] ss:$16 sps:$4 sm:$0xff]   ;;  %v6746_v59 = vld [vmem:[#allocation6 + $0x180] ss:$16 sps:$4 sm:$0xff]   ;;  %v6748_v61 = vld [vmem:[#allocation6 + $0x1a4] ss:$16 sps:$4 sm:$0xff]   ;;  %v709_v7 = vcombine.high %v123_v52, %v123_v52  ;;  %p7921_p1 = scmp.lt.s32.totalorder %s5788_s13, %s5788_s13 }
  0x91   :  { %3693 = vmatprep.subr.bf16.mxu0 %v6700_v20  ;;  %4062 = vmatprep.subr.bf16.mxu1 %v6702_v21  ;;  %v716_v54 = vrot.slane %v123_v52, %v8088_v49  ;;  %v6750_v62 = vld [vmem:[#allocation6 + $0x1ac] ss:$16 sps:$4 sm:$0xff]   ;;  %v6752_v63 = vld [vmem:[#allocation6 + $0x1a0] ss:$16 sps:$4 sm:$0xff]   ;;  %v6753_v0 = vld [vmem:[#allocation6 + $0x1a8] ss:$16 sps:$4 sm:$0xff]  }
  0x92   :  { %v6754_v1 = vld [vmem:[#allocation6 + $0x1c4] ss:$16 sps:$4 sm:$0xff]   ;;  %v6756_v2 = vld [vmem:[#allocation6 + $0x1cc] ss:$16 sps:$4 sm:$0xff]   ;;  %v6758_v3 = vld [vmem:[#allocation6 + $0x1c0] ss:$16 sps:$4 sm:$0xff]   ;;  %v8092_v12 = vrot.slane %v709_v7, %v8088_v49 }
  0x93   :  { %v724_v58 = vcombine.high %v716_v54, %v716_v54  ;;  %v6759_v4 = vld [vmem:[#allocation6 + $0x1c8] ss:$16 sps:$4 sm:$0xff]   ;;  %v6760_v5 = vld [vmem:[#allocation6 + $0x1e4] ss:$16 sps:$4 sm:$0xff]   ;;  %v6762_v6 = vld [vmem:[#allocation6 + $0x1ec] ss:$16 sps:$4 sm:$0xff]  }
  0x94   :  { %3694 = vmatpush1.bf16.msra.mxu0 %v6704_v22  ;;  %4063 = vmatpush1.bf16.msra.mxu1 %v6705_v23  ;;  %v6764_v8 = vld [vmem:[#allocation6 + $0x1e0] ss:$16 sps:$4 sm:$0xff]   ;;  %v6765_v9 = vld [vmem:[#allocation6 + $0x1e8] ss:$16 sps:$4 sm:$0xff]   ;;  %v6769_v10 = vld [vmem:[#allocation6 + $0x204] ss:$16 sps:$4 sm:$0xff]   ;;  %v725_v17 = vcombine.high %v8092_v12, %v8092_v12 }
  0x95   :  { %3695 = vmatprep.subr.bf16.mxu0 %v6706_v24  ;;  %4064 = vmatprep.subr.bf16.mxu1 %v6708_v25  ;;  %v6772_v11 = vld [vmem:[#allocation6 + $0x20c] ss:$16 sps:$4 sm:$0xff]   ;;  %v6767_v13 = vld [vmem:[#allocation6 + $0x200] ss:$16 sps:$4 sm:$0xff]   ;;  %v6770_v14 = vld [vmem:[#allocation6 + $0x208] ss:$16 sps:$4 sm:$0xff]  }
  0x96   :  { %3715 = vmatprep.mubr.bf16.mxu0 %v724_v58  ;;  %4084 = vmatprep.mubr.bf16.mxu1 %v724_v58  ;;  %v6775_v15 = vld [vmem:[#allocation6 + $0x224] ss:$16 sps:$4 sm:$0xff]   ;;  %v6778_v16 = vld [vmem:[#allocation6 + $0x22c] ss:$16 sps:$4 sm:$0xff]   ;;  %v6773_v18 = vld [vmem:[#allocation6 + $0x220] ss:$16 sps:$4 sm:$0xff]  }
  0x97   :  { %v6776_v19 = vld [vmem:[#allocation6 + $0x228] ss:$16 sps:$4 sm:$0xff]   ;;  %v6781_v20 = vld [vmem:[#allocation6 + $0x244] ss:$16 sps:$4 sm:$0xff]   ;;  %v6784_v21 = vld [vmem:[#allocation6 + $0x24c] ss:$16 sps:$4 sm:$0xff]  }
  0x98   :  { %3696 = vmatpush1.bf16.msra.mxu0 %v6710_v26  ;;  %4065 = vmatpush1.bf16.msra.mxu1 %v6711_v27  ;;  %v6779_v22 = vld [vmem:[#allocation6 + $0x240] ss:$16 sps:$4 sm:$0xff]   ;;  %v6782_v23 = vld [vmem:[#allocation6 + $0x248] ss:$16 sps:$4 sm:$0xff]   ;;  %v6787_v24 = vld [vmem:[#allocation6 + $0x264] ss:$16 sps:$4 sm:$0xff]  }
  0x99   :  { %3697 = vmatprep.subr.bf16.mxu0 %v6712_v28  ;;  %4066 = vmatprep.subr.bf16.mxu1 %v6714_v29  ;;  %v6790_v25 = vld [vmem:[#allocation6 + $0x26c] ss:$16 sps:$4 sm:$0xff]   ;;  %v6785_v26 = vld [vmem:[#allocation6 + $0x260] ss:$16 sps:$4 sm:$0xff]   ;;  %v6788_v27 = vld [vmem:[#allocation6 + $0x268] ss:$16 sps:$4 sm:$0xff]  }
  0x9a   :  { %v6793_v28 = vld [vmem:[#allocation6 + $0x284] ss:$16 sps:$4 sm:$0xff]   ;;  %v6796_v29 = vld [vmem:[#allocation6 + $0x28c] ss:$16 sps:$4 sm:$0xff]   ;;  %v6803_v38 = vld [vmem:[#allocation6 + $0x2c0] ss:$16 sps:$4 sm:$0xff]  }
  0x9b   :  { %v6805_v36 = vld [vmem:[#allocation6 + $0x2c4] ss:$16 sps:$4 sm:$0xff]   ;;  %v6808_v37 = vld [vmem:[#allocation6 + $0x2cc] ss:$16 sps:$4 sm:$0xff]   ;;  %v6809_v42 = vld [vmem:[#allocation6 + $0x2e0] ss:$16 sps:$4 sm:$0xff]  }
  0x9c   :  { %3698 = vmatpush1.bf16.msra.mxu0 %v6716_v30  ;;  %4067 = vmatpush1.bf16.msra.mxu1 %v6717_v31  ;;  %v6791_v30 = vld [vmem:[#allocation6 + $0x280] ss:$16 sps:$4 sm:$0xff]   ;;  %v6794_v31 = vld [vmem:[#allocation6 + $0x288] ss:$16 sps:$4 sm:$0xff]   ;;  %v6835_v58 = vld [vmem:[#allocation6 + $0x364] ss:$16 sps:$4 sm:$0xff]  }
  0x9d   :  { %3699 = vmatprep.subr.bf16.mxu0 %v6718_v32  ;;  %4068 = vmatprep.subr.bf16.mxu1 %v6720_v33  ;;  %v6799_v32 = vld [vmem:[#allocation6 + $0x2a4] ss:$16 sps:$4 sm:$0xff]   ;;  %v6802_v33 = vld [vmem:[#allocation6 + $0x2ac] ss:$16 sps:$4 sm:$0xff]   ;;  %v6821_v52 = vld [vmem:[#allocation6 + $0x320] ss:$16 sps:$4 sm:$0xff]  }
  0x9e   :  { %v6856_v7 = vld [vmem:[#allocation6 + $0x3cc] ss:$16 sps:$4 sm:$0xff]   ;;  %vm5779_vm0 = vcmask 35840   ;;  %s7916_s14 = scalar_lea.vmem %s5788_s13, 64 }
  0x9f   :  { %p7917_p0 = scmp.ne.s32.totalorder %s5788_s13, %s7916_s14  ;;  %p7922_p2 = scmp.lt.s32.totalorder %s7916_s14, %s7916_s14 }
  0xa0   :  { %3700 = vmatpush1.bf16.msra.mxu0 %v6722_v34  ;;  %4069 = vmatpush1.bf16.msra.mxu1 %v6723_v35  ;;  %v6797_v34 = vld [vmem:[#allocation6 + $0x2a0] ss:$16 sps:$4 sm:$0xff]   ;;  %v6800_v35 = vld [vmem:[#allocation6 + $0x2a8] ss:$16 sps:$4 sm:$0xff]  }
  0xa1   :  { %3701 = vmatprep.subr.bf16.mxu0 %v6724_v39  ;;  %4070 = vmatprep.subr.bf16.mxu1 %v6726_v40  ;;  %v6806_v39 = vld [vmem:[#allocation6 + $0x2c8] ss:$16 sps:$4 sm:$0xff]   ;;  %v6811_v40 = vld [vmem:[#allocation6 + $0x2e4] ss:$16 sps:$4 sm:$0xff]   ;;  %p7923_p3 = por %p7922_p2, %p7921_p1 }
  0xa3   :  { %p7924_p4 = pnand %p7923_p3, %p7917_p0 }
  0xa4   :  { %3702 = vmatpush1.bf16.msra.mxu0 %v6728_v41  ;;  %4071 = vmatpush1.bf16.msra.mxu1 %v6729_v44  ;;  %v6814_v41 = vld [vmem:[#allocation6 + $0x2ec] ss:$16 sps:$4 sm:$0xff]   ;;  %v6812_v44 = vld [vmem:[#allocation6 + $0x2e8] ss:$16 sps:$4 sm:$0xff]  }
  0xa5   :  { %3703 = vmatprep.subr.bf16.mxu0 %v6730_v45  ;;  %4072 = vmatprep.subr.bf16.mxu1 %v6732_v46  ;;  %v6817_v45 = vld [vmem:[#allocation6 + $0x304] ss:$16 sps:$4 sm:$0xff]   ;;  %v6820_v46 = vld [vmem:[#allocation6 + $0x30c] ss:$16 sps:$4 sm:$0xff]  }
  0xa8   :  { %3704 = vmatpush1.bf16.msra.mxu0 %v6734_v47  ;;  %4073 = vmatpush1.bf16.msra.mxu1 %v6735_v48  ;;  %v6815_v47 = vld [vmem:[#allocation6 + $0x300] ss:$16 sps:$4 sm:$0xff]   ;;  %v6818_v48 = vld [vmem:[#allocation6 + $0x308] ss:$16 sps:$4 sm:$0xff]  }
  0xa9   :  { %3705 = vmatprep.subr.bf16.mxu0 %v6736_v50  ;;  %4074 = vmatprep.subr.bf16.mxu1 %v6738_v51  ;;  %v6823_v50 = vld [vmem:[#allocation6 + $0x324] ss:$16 sps:$4 sm:$0xff]   ;;  %v6826_v51 = vld [vmem:[#allocation6 + $0x32c] ss:$16 sps:$4 sm:$0xff]  }
  0xac   :  { %3706 = vmatpush1.bf16.msra.mxu0 %v6740_v53  ;;  %4075 = vmatpush1.bf16.msra.mxu1 %v6741_v55  ;;  %v6824_v53 = vld [vmem:[#allocation6 + $0x328] ss:$16 sps:$4 sm:$0xff]   ;;  %v6832_v55 = vld [vmem:[#allocation6 + $0x34c] ss:$16 sps:$4 sm:$0xff]  }
  0xad   :  { %3707 = vmatprep.subr.bf16.mxu0 %v6742_v56  ;;  %4076 = vmatprep.subr.bf16.mxu1 %v6744_v57  ;;  %v6827_v56 = vld [vmem:[#allocation6 + $0x340] ss:$16 sps:$4 sm:$0xff]   ;;  %v6830_v57 = vld [vmem:[#allocation6 + $0x348] ss:$16 sps:$4 sm:$0xff]  }
  0xb0   :  { %3708 = vmatpush1.bf16.msra.mxu0 %v6746_v59  ;;  %4077 = vmatpush1.bf16.msra.mxu1 %v6747_v60  ;;  %v6838_v59 = vld [vmem:[#allocation6 + $0x36c] ss:$16 sps:$4 sm:$0xff]   ;;  %v6833_v60 = vld [vmem:[#allocation6 + $0x360] ss:$16 sps:$4 sm:$0xff]  }
  0xb1   :  { %3709 = vmatprep.subr.bf16.mxu0 %v6748_v61  ;;  %4078 = vmatprep.subr.bf16.mxu1 %v6750_v62  ;;  %v6836_v61 = vld [vmem:[#allocation6 + $0x368] ss:$16 sps:$4 sm:$0xff]   ;;  %v6841_v62 = vld [vmem:[#allocation6 + $0x384] ss:$16 sps:$4 sm:$0xff]  }
  0xb4   :  { %3710 = vmatpush1.bf16.msra.mxu0 %v6752_v63  ;;  %4079 = vmatpush1.bf16.msra.mxu1 %v6753_v0  ;;  %v6844_v63 = vld [vmem:[#allocation6 + $0x38c] ss:$16 sps:$4 sm:$0xff]   ;;  %v6839_v0 = vld [vmem:[#allocation6 + $0x380] ss:$16 sps:$4 sm:$0xff]  }
  0xb5   :  { %3711 = vmatprep.subr.bf16.mxu0 %v6754_v1  ;;  %4080 = vmatprep.subr.bf16.mxu1 %v6756_v2  ;;  %v6842_v1 = vld [vmem:[#allocation6 + $0x388] ss:$16 sps:$4 sm:$0xff]   ;;  %v6847_v2 = vld [vmem:[#allocation6 + $0x3a4] ss:$16 sps:$4 sm:$0xff]  }
  0xb8   :  { %3712 = vmatpush1.bf16.msra.mxu0 %v6758_v3  ;;  %4081 = vmatpush1.bf16.msra.mxu1 %v6759_v4  ;;  %v6850_v3 = vld [vmem:[#allocation6 + $0x3ac] ss:$16 sps:$4 sm:$0xff]   ;;  %v6845_v4 = vld [vmem:[#allocation6 + $0x3a0] ss:$16 sps:$4 sm:$0xff]  }
  0xb9   :  { %3713 = vmatprep.subr.bf16.mxu0 %v6760_v5  ;;  %4082 = vmatprep.subr.bf16.mxu1 %v6762_v6  ;;  %v6848_v5 = vld [vmem:[#allocation6 + $0x3a8] ss:$16 sps:$4 sm:$0xff]   ;;  %v6853_v6 = vld [vmem:[#allocation6 + $0x3c4] ss:$16 sps:$4 sm:$0xff]  }
  0xbc   :  { %3714 = vmatpush1.bf16.msra.mxu0 %v6764_v8  ;;  %4083 = vmatpush1.bf16.msra.mxu1 %v6765_v9  ;;  %v6851_v8 = vld [vmem:[#allocation6 + $0x3c0] ss:$16 sps:$4 sm:$0xff]   ;;  %v6854_v9 = vld [vmem:[#allocation6 + $0x3c8] ss:$16 sps:$4 sm:$0xff]  }
  0xbd   :  { %3724 = vmatprep.subr.bf16.mxu0 %v6769_v10  ;;  %4093 = vmatprep.subr.bf16.mxu1 %v6772_v11  ;;  %v6859_v10 = vld [vmem:[#allocation6 + $0x3e4] ss:$16 sps:$4 sm:$0xff]   ;;  %v6862_v11 = vld [vmem:[#allocation6 + $0x3ec] ss:$16 sps:$4 sm:$0xff]  }
  0xbf   :  { %3716 = vmatmul.mubr.bf16.vlgmr.msra.gmra.mrb[0].mxu0 %v716_v54  ;;  %4085 = vmatmul.mubr.bf16.vlgmr.msra.gmra.mrb[0].mxu1 %v716_v54  ;;  %v6829_v54 = vld [vmem:[#allocation6 + $0x344] ss:$16 sps:$4 sm:$0xff]  }
  0xc0   :  { %3725 = vmatpush1.bf16.msra.mxu0 %v6767_v13  ;;  %4094 = vmatpush1.bf16.msra.mxu1 %v6770_v14  ;;  %v6857_v13 = vld [vmem:[#allocation6 + $0x3e0] ss:$16 sps:$4 sm:$0xff]   ;;  %v6860_v14 = vld [vmem:[#allocation6 + $0x3e8] ss:$16 sps:$4 sm:$0xff]  }
  0xc1   :  { %3726 = vmatprep.subr.bf16.mxu0 %v6775_v15  ;;  %4095 = vmatprep.subr.bf16.mxu1 %v6778_v16  ;;  %v6865_v15 = vld [vmem:[#allocation6 + $0x404] ss:$16 sps:$4 sm:$0xff]   ;;  %v6868_v16 = vld [vmem:[#allocation6 + $0x40c] ss:$16 sps:$4 sm:$0xff]  }
  0xc2   :  { %3756 = vmatprep.mubr.bf16.mxu0 %v725_v17  ;;  %4125 = vmatprep.mubr.bf16.mxu1 %v725_v17  ;;  %v6863_v17 = vld [vmem:[#allocation6 + $0x400] ss:$16 sps:$4 sm:$0xff]  }
  0xc4   :  { %3727 = vmatpush1.bf16.msra.mxu0 %v6773_v18  ;;  %4096 = vmatpush1.bf16.msra.mxu1 %v6776_v19  ;;  %v6866_v18 = vld [vmem:[#allocation6 + $0x408] ss:$16 sps:$4 sm:$0xff]  }
  0xc5   :  { %3728 = vmatprep.subr.bf16.mxu0 %v6781_v20  ;;  %4097 = vmatprep.subr.bf16.mxu1 %v6784_v21  ;;  %v8096_v19 = vld [vmem:[#allocation3 + $0x8] sm:$0xff]  ;;  %v6874_v21 = vld [vmem:[#allocation6 + $0x42c] ss:$16 sps:$4 sm:$0xff]  }
  0xc6   :  { %v6871_v20 = vld [vmem:[#allocation6 + $0x424] ss:$16 sps:$4 sm:$0xff]  }
  0xc8   :  { %3729 = vmatpush1.bf16.msra.mxu0 %v6779_v22  ;;  %4098 = vmatpush1.bf16.msra.mxu1 %v6782_v23  ;;  %v8100_v22 = vrot.slane %v8096_v19, %v8088_v49 }
  0xc9   :  { %3730 = vmatprep.subr.bf16.mxu0 %v6787_v24  ;;  %4099 = vmatprep.subr.bf16.mxu1 %v6790_v25  ;;  %v6869_v24 = vld [vmem:[#allocation6 + $0x420] ss:$16 sps:$4 sm:$0xff]   ;;  %v6872_v25 = vld [vmem:[#allocation6 + $0x428] ss:$16 sps:$4 sm:$0xff]  }
  0xca   :  { %v741_v23 = vcombine.high %v8100_v22, %v8100_v22 }
  0xcc   :  { %3731 = vmatpush1.bf16.msra.mxu0 %v6785_v26  ;;  %4100 = vmatpush1.bf16.msra.mxu1 %v6788_v27  ;;  %v6877_v26 = vld [vmem:[#allocation6 + $0x444] ss:$16 sps:$4 sm:$0xff]   ;;  %v6880_v27 = vld [vmem:[#allocation6 + $0x44c] ss:$16 sps:$4 sm:$0xff]  }
  0xcd   :  { %3732 = vmatprep.subr.bf16.mxu0 %v6793_v28  ;;  %4101 = vmatprep.subr.bf16.mxu1 %v6796_v29  ;;  %v6875_v28 = vld [vmem:[#allocation6 + $0x440] ss:$16 sps:$4 sm:$0xff]   ;;  %v6878_v29 = vld [vmem:[#allocation6 + $0x448] ss:$16 sps:$4 sm:$0xff]  }
  0xd0   :  { %3733 = vmatpush1.bf16.msra.mxu0 %v6791_v30  ;;  %4102 = vmatpush1.bf16.msra.mxu1 %v6794_v31  ;;  %v6886_v30 = vld [vmem:[#allocation6 + $0x46c] ss:$16 sps:$4 sm:$0xff]   ;;  %v6881_v31 = vld [vmem:[#allocation6 + $0x460] ss:$16 sps:$4 sm:$0xff]  }
  0xd1   :  { %3734 = vmatprep.subr.bf16.mxu0 %v6799_v32  ;;  %4103 = vmatprep.subr.bf16.mxu1 %v6802_v33  ;;  %v6884_v32 = vld [vmem:[#allocation6 + $0x468] ss:$16 sps:$4 sm:$0xff]   ;;  %v6889_v33 = vld [vmem:[#allocation6 + $0x484] ss:$16 sps:$4 sm:$0xff]  }
  0xd4   :  { %3735 = vmatpush1.bf16.msra.mxu0 %v6797_v34  ;;  %4104 = vmatpush1.bf16.msra.mxu1 %v6800_v35  ;;  %v6892_v34 = vld [vmem:[#allocation6 + $0x48c] ss:$16 sps:$4 sm:$0xff]   ;;  %v6887_v35 = vld [vmem:[#allocation6 + $0x480] ss:$16 sps:$4 sm:$0xff]  }
  0xd5   :  { %3736 = vmatprep.subr.bf16.mxu0 %v6805_v36  ;;  %4105 = vmatprep.subr.bf16.mxu1 %v6808_v37  ;;  %v6890_v36 = vld [vmem:[#allocation6 + $0x488] ss:$16 sps:$4 sm:$0xff]   ;;  %v6895_v37 = vld [vmem:[#allocation6 + $0x4a4] ss:$16 sps:$4 sm:$0xff]  }
  0xd8   :  { %3737 = vmatpush1.bf16.msra.mxu0 %v6803_v38  ;;  %4106 = vmatpush1.bf16.msra.mxu1 %v6806_v39  ;;  %v6898_v38 = vld [vmem:[#allocation6 + $0x4ac] ss:$16 sps:$4 sm:$0xff]   ;;  %v6893_v39 = vld [vmem:[#allocation6 + $0x4a0] ss:$16 sps:$4 sm:$0xff]  }
  0xd9   :  { %3738 = vmatprep.subr.bf16.mxu0 %v6811_v40  ;;  %4107 = vmatprep.subr.bf16.mxu1 %v6814_v41  ;;  %v6896_v40 = vld [vmem:[#allocation6 + $0x4a8] ss:$16 sps:$4 sm:$0xff]   ;;  %v6901_v41 = vld [vmem:[#allocation6 + $0x4c4] ss:$16 sps:$4 sm:$0xff]  }
  0xdc   :  { %3739 = vmatpush1.bf16.msra.mxu0 %v6809_v42  ;;  %4108 = vmatpush1.bf16.msra.mxu1 %v6812_v44  ;;  %v6904_v42 = vld [vmem:[#allocation6 + $0x4cc] ss:$16 sps:$4 sm:$0xff]   ;;  %v6899_v44 = vld [vmem:[#allocation6 + $0x4c0] ss:$16 sps:$4 sm:$0xff]  }
  0xdd   :  { %3740 = vmatprep.subr.bf16.mxu0 %v6817_v45  ;;  %4109 = vmatprep.subr.bf16.mxu1 %v6820_v46  ;;  %v6902_v45 = vld [vmem:[#allocation6 + $0x4c8] ss:$16 sps:$4 sm:$0xff]   ;;  %v6907_v46 = vld [vmem:[#allocation6 + $0x4e4] ss:$16 sps:$4 sm:$0xff]  }
  0xe0   :  { %3741 = vmatpush1.bf16.msra.mxu0 %v6815_v47  ;;  %4110 = vmatpush1.bf16.msra.mxu1 %v6818_v48  ;;  %v6910_v47 = vld [vmem:[#allocation6 + $0x4ec] ss:$16 sps:$4 sm:$0xff]   ;;  %v6905_v48 = vld [vmem:[#allocation6 + $0x4e0] ss:$16 sps:$4 sm:$0xff]  }
  0xe1   :  { %3742 = vmatprep.subr.bf16.mxu0 %v6823_v50  ;;  %4111 = vmatprep.subr.bf16.mxu1 %v6826_v51  ;;  %v6908_v50 = vld [vmem:[#allocation6 + $0x4e8] ss:$16 sps:$4 sm:$0xff]   ;;  %v6913_v51 = vld [vmem:[#allocation6 + $0x504] ss:$16 sps:$4 sm:$0xff]  }
  0xe4   :  { %3743 = vmatpush1.bf16.msra.mxu0 %v6821_v52  ;;  %4112 = vmatpush1.bf16.msra.mxu1 %v6824_v53  ;;  %v6916_v52 = vld [vmem:[#allocation6 + $0x50c] ss:$16 sps:$4 sm:$0xff]   ;;  %v6911_v53 = vld [vmem:[#allocation6 + $0x500] ss:$16 sps:$4 sm:$0xff]  }
  0xe5   :  { %3744 = vmatprep.subr.bf16.mxu0 %v6829_v54  ;;  %4113 = vmatprep.subr.bf16.mxu1 %v6832_v55  ;;  %v6914_v54 = vld [vmem:[#allocation6 + $0x508] ss:$16 sps:$4 sm:$0xff]   ;;  %v6919_v55 = vld [vmem:[#allocation6 + $0x524] ss:$16 sps:$4 sm:$0xff]  }
  0xe8   :  { %3745 = vmatpush1.bf16.msra.mxu0 %v6827_v56  ;;  %4114 = vmatpush1.bf16.msra.mxu1 %v6830_v57  ;;  %v6922_v56 = vld [vmem:[#allocation6 + $0x52c] ss:$16 sps:$4 sm:$0xff]   ;;  %v6917_v57 = vld [vmem:[#allocation6 + $0x520] ss:$16 sps:$4 sm:$0xff]  }
  0xe9   :  { %3746 = vmatprep.subr.bf16.mxu0 %v6835_v58  ;;  %4115 = vmatprep.subr.bf16.mxu1 %v6838_v59  ;;  %v6920_v58 = vld [vmem:[#allocation6 + $0x528] ss:$16 sps:$4 sm:$0xff]   ;;  %v6925_v59 = vld [vmem:[#allocation6 + $0x544] ss:$16 sps:$4 sm:$0xff]  }
  0xec   :  { %3747 = vmatpush1.bf16.msra.mxu0 %v6833_v60  ;;  %4116 = vmatpush1.bf16.msra.mxu1 %v6836_v61  ;;  %v6928_v60 = vld [vmem:[#allocation6 + $0x54c] ss:$16 sps:$4 sm:$0xff]   ;;  %v6923_v61 = vld [vmem:[#allocation6 + $0x540] ss:$16 sps:$4 sm:$0xff]  }
  0xed   :  { %3748 = vmatprep.subr.bf16.mxu0 %v6841_v62  ;;  %4117 = vmatprep.subr.bf16.mxu1 %v6844_v63  ;;  %v6926_v62 = vld [vmem:[#allocation6 + $0x548] ss:$16 sps:$4 sm:$0xff]   ;;  %v6931_v63 = vld [vmem:[#allocation6 + $0x564] ss:$16 sps:$4 sm:$0xff]  }
  0xf0   :  { %3749 = vmatpush1.bf16.msra.mxu0 %v6839_v0  ;;  %4118 = vmatpush1.bf16.msra.mxu1 %v6842_v1  ;;  %v6934_v0 = vld [vmem:[#allocation6 + $0x56c] ss:$16 sps:$4 sm:$0xff]   ;;  %v6929_v1 = vld [vmem:[#allocation6 + $0x560] ss:$16 sps:$4 sm:$0xff]  }
  0xf1   :  { %3750 = vmatprep.subr.bf16.mxu0 %v6847_v2  ;;  %4119 = vmatprep.subr.bf16.mxu1 %v6850_v3  ;;  %v6932_v2 = vld [vmem:[#allocation6 + $0x568] ss:$16 sps:$4 sm:$0xff]   ;;  %v6937_v3 = vld [vmem:[#allocation6 + $0x584] ss:$16 sps:$4 sm:$0xff]  }
  0xf4   :  { %3751 = vmatpush1.bf16.msra.mxu0 %v6845_v4  ;;  %4120 = vmatpush1.bf16.msra.mxu1 %v6848_v5  ;;  %v6940_v4 = vld [vmem:[#allocation6 + $0x58c] ss:$16 sps:$4 sm:$0xff]   ;;  %v6935_v5 = vld [vmem:[#allocation6 + $0x580] ss:$16 sps:$4 sm:$0xff]  }
  0xf5   :  { %3752 = vmatprep.subr.bf16.mxu0 %v6853_v6  ;;  %4121 = vmatprep.subr.bf16.mxu1 %v6856_v7  ;;  %v6938_v6 = vld [vmem:[#allocation6 + $0x588] ss:$16 sps:$4 sm:$0xff]   ;;  %v6943_v7 = vld [vmem:[#allocation6 + $0x5a4] ss:$16 sps:$4 sm:$0xff]  }
  0xf8   :  { %3753 = vmatpush1.bf16.msra.mxu0 %v6851_v8  ;;  %4122 = vmatpush1.bf16.msra.mxu1 %v6854_v9  ;;  %v6946_v8 = vld [vmem:[#allocation6 + $0x5ac] ss:$16 sps:$4 sm:$0xff]   ;;  %v6941_v9 = vld [vmem:[#allocation6 + $0x5a0] ss:$16 sps:$4 sm:$0xff]  }
  0xf9   :  { %3754 = vmatprep.subr.bf16.mxu0 %v6859_v10  ;;  %4123 = vmatprep.subr.bf16.mxu1 %v6862_v11  ;;  %v6944_v10 = vld [vmem:[#allocation6 + $0x5a8] ss:$16 sps:$4 sm:$0xff]   ;;  %v6949_v11 = vld [vmem:[#allocation6 + $0x5c4] ss:$16 sps:$4 sm:$0xff]  }
  0xfc   :  { %3755 = vmatpush1.bf16.msra.mxu0 %v6857_v13  ;;  %4124 = vmatpush1.bf16.msra.mxu1 %v6860_v14  ;;  %v6952_v13 = vld [vmem:[#allocation6 + $0x5cc] ss:$16 sps:$4 sm:$0xff]   ;;  %v6947_v14 = vld [vmem:[#allocation6 + $0x5c0] ss:$16 sps:$4 sm:$0xff]  }
  0xfd   :  { %3765 = vmatprep.subr.bf16.mxu0 %v6865_v15  ;;  %4134 = vmatprep.subr.bf16.mxu1 %v6868_v16  ;;  %v6950_v15 = vld [vmem:[#allocation6 + $0x5c8] ss:$16 sps:$4 sm:$0xff]   ;;  %v6955_v16 = vld [vmem:[#allocation6 + $0x5e4] ss:$16 sps:$4 sm:$0xff]  }
  0xff   :  { %3757 = vmatmul.mubr.bf16.vlgmr.msra.gmra.mrb[0].mxu0 %v8092_v12  ;;  %4126 = vmatmul.mubr.bf16.vlgmr.msra.gmra.mrb[0].mxu1 %v8092_v12  ;;  %v6883_v12 = vld [vmem:[#allocation6 + $0x464] ss:$16 sps:$4 sm:$0xff]  }
 0x100   :  { %3766 = vmatpush1.bf16.msra.mxu0 %v6863_v17  ;;  %4135 = vmatpush1.bf16.msra.mxu1 %v6866_v18  ;;  %v6958_v17 = vld [vmem:[#allocation6 + $0x5ec] ss:$16 sps:$4 sm:$0xff]   ;;  %v726_v18 = vcombine.high %v8096_v19, %v8096_v19 }
 0x101   :  { %3767 = vmatprep.subr.bf16.mxu0 %v6871_v20  ;;  %4136 = vmatprep.subr.bf16.mxu1 %v6874_v21  ;;  %v6953_v20 = vld [vmem:[#allocation6 + $0x5e0] ss:$16 sps:$4 sm:$0xff]   ;;  %v6956_v21 = vld [vmem:[#allocation6 + $0x5e8] ss:$16 sps:$4 sm:$0xff]  }
 0x102   :  { %3797 = vmatprep.mubr.bf16.mxu0 %v741_v23  ;;  %4166 = vmatprep.mubr.bf16.mxu1 %v741_v23  ;;  %v6961_v23 = vld [vmem:[#allocation6 + $0x604] ss:$16 sps:$4 sm:$0xff]  }
 0x104   :  { %3768 = vmatpush1.bf16.msra.mxu0 %v6869_v24  ;;  %4137 = vmatpush1.bf16.msra.mxu1 %v6872_v25  ;;  %v6964_v24 = vld [vmem:[#allocation6 + $0x60c] ss:$16 sps:$4 sm:$0xff]   ;;  %v8109_v25 = vrot.slane %v726_v18, %v8088_v49 }
 0x105   :  { %3769 = vmatprep.subr.bf16.mxu0 %v6877_v26  ;;  %4138 = vmatprep.subr.bf16.mxu1 %v6880_v27  ;;  %v6959_v26 = vld [vmem:[#allocation6 + $0x600] ss:$16 sps:$4 sm:$0xff]   ;;  %v6962_v27 = vld [vmem:[#allocation6 + $0x608] ss:$16 sps:$4 sm:$0xff]   ;;  %v7048_v18 = vld [vmem:[#allocation6 + $0x7cc] ss:$16 sps:$4 sm:$0xff]  }
 0x106   :  { %v742_v19 = vcombine.high %v8109_v25, %v8109_v25 }
 0x108   :  { %3770 = vmatpush1.bf16.msra.mxu0 %v6875_v28  ;;  %4139 = vmatpush1.bf16.msra.mxu1 %v6878_v29  ;;  %v6967_v28 = vld [vmem:[#allocation6 + $0x624] ss:$16 sps:$4 sm:$0xff]   ;;  %v6970_v29 = vld [vmem:[#allocation6 + $0x62c] ss:$16 sps:$4 sm:$0xff]  }
 0x109   :  { %3771 = vmatprep.subr.bf16.mxu0 %v6883_v12  ;;  %4140 = vmatprep.subr.bf16.mxu1 %v6886_v30  ;;  %v6965_v12 = vld [vmem:[#allocation6 + $0x620] ss:$16 sps:$4 sm:$0xff]   ;;  %v6968_v30 = vld [vmem:[#allocation6 + $0x628] ss:$16 sps:$4 sm:$0xff]  }
 0x10c   :  { %3772 = vmatpush1.bf16.msra.mxu0 %v6881_v31  ;;  %4141 = vmatpush1.bf16.msra.mxu1 %v6884_v32  ;;  %v6973_v31 = vld [vmem:[#allocation6 + $0x644] ss:$16 sps:$4 sm:$0xff]   ;;  %v6976_v32 = vld [vmem:[#allocation6 + $0x64c] ss:$16 sps:$4 sm:$0xff]  }
 0x10d   :  { %3773 = vmatprep.subr.bf16.mxu0 %v6889_v33  ;;  %4142 = vmatprep.subr.bf16.mxu1 %v6892_v34  ;;  %v6971_v33 = vld [vmem:[#allocation6 + $0x640] ss:$16 sps:$4 sm:$0xff]   ;;  %v6974_v34 = vld [vmem:[#allocation6 + $0x648] ss:$16 sps:$4 sm:$0xff]  }
 0x110   :  { %3774 = vmatpush1.bf16.msra.mxu0 %v6887_v35  ;;  %4143 = vmatpush1.bf16.msra.mxu1 %v6890_v36  ;;  %v6979_v35 = vld [vmem:[#allocation6 + $0x664] ss:$16 sps:$4 sm:$0xff]   ;;  %v6982_v36 = vld [vmem:[#allocation6 + $0x66c] ss:$16 sps:$4 sm:$0xff]  }
 0x111   :  { %3775 = vmatprep.subr.bf16.mxu0 %v6895_v37  ;;  %4144 = vmatprep.subr.bf16.mxu1 %v6898_v38  ;;  %v6980_v37 = vld [vmem:[#allocation6 + $0x668] ss:$16 sps:$4 sm:$0xff]   ;;  %v6985_v38 = vld [vmem:[#allocation6 + $0x684] ss:$16 sps:$4 sm:$0xff]  }
 0x114   :  { %3776 = vmatpush1.bf16.msra.mxu0 %v6893_v39  ;;  %4145 = vmatpush1.bf16.msra.mxu1 %v6896_v40  ;;  %v6988_v39 = vld [vmem:[#allocation6 + $0x68c] ss:$16 sps:$4 sm:$0xff]   ;;  %v6983_v40 = vld [vmem:[#allocation6 + $0x680] ss:$16 sps:$4 sm:$0xff]  }
 0x115   :  { %3777 = vmatprep.subr.bf16.mxu0 %v6901_v41  ;;  %4146 = vmatprep.subr.bf16.mxu1 %v6904_v42  ;;  %v6986_v41 = vld [vmem:[#allocation6 + $0x688] ss:$16 sps:$4 sm:$0xff]   ;;  %v6991_v42 = vld [vmem:[#allocation6 + $0x6a4] ss:$16 sps:$4 sm:$0xff]  }
 0x118   :  { %3778 = vmatpush1.bf16.msra.mxu0 %v6899_v44  ;;  %4147 = vmatpush1.bf16.msra.mxu1 %v6902_v45  ;;  %v6994_v44 = vld [vmem:[#allocation6 + $0x6ac] ss:$16 sps:$4 sm:$0xff]   ;;  %v6989_v45 = vld [vmem:[#allocation6 + $0x6a0] ss:$16 sps:$4 sm:$0xff]  }
 0x119   :  { %3779 = vmatprep.subr.bf16.mxu0 %v6907_v46  ;;  %4148 = vmatprep.subr.bf16.mxu1 %v6910_v47  ;;  %v6992_v46 = vld [vmem:[#allocation6 + $0x6a8] ss:$16 sps:$4 sm:$0xff]   ;;  %v6997_v47 = vld [vmem:[#allocation6 + $0x6c4] ss:$16 sps:$4 sm:$0xff]  }
 0x11c   :  { %3780 = vmatpush1.bf16.msra.mxu0 %v6905_v48  ;;  %4149 = vmatpush1.bf16.msra.mxu1 %v6908_v50  ;;  %v7000_v48 = vld [vmem:[#allocation6 + $0x6cc] ss:$16 sps:$4 sm:$0xff]   ;;  %v6995_v50 = vld [vmem:[#allocation6 + $0x6c0] ss:$16 sps:$4 sm:$0xff]  }
 0x11d   :  { %3781 = vmatprep.subr.bf16.mxu0 %v6913_v51  ;;  %4150 = vmatprep.subr.bf16.mxu1 %v6916_v52  ;;  %v6998_v51 = vld [vmem:[#allocation6 + $0x6c8] ss:$16 sps:$4 sm:$0xff]   ;;  %v7003_v52 = vld [vmem:[#allocation6 + $0x6e4] ss:$16 sps:$4 sm:$0xff]  }
 0x120   :  { %3782 = vmatpush1.bf16.msra.mxu0 %v6911_v53  ;;  %4151 = vmatpush1.bf16.msra.mxu1 %v6914_v54  ;;  %v7006_v53 = vld [vmem:[#allocation6 + $0x6ec] ss:$16 sps:$4 sm:$0xff]   ;;  %v7001_v54 = vld [vmem:[#allocation6 + $0x6e0] ss:$16 sps:$4 sm:$0xff]  }
 0x121   :  { %3783 = vmatprep.subr.bf16.mxu0 %v6919_v55  ;;  %4152 = vmatprep.subr.bf16.mxu1 %v6922_v56  ;;  %v7004_v55 = vld [vmem:[#allocation6 + $0x6e8] ss:$16 sps:$4 sm:$0xff]   ;;  %v7009_v56 = vld [vmem:[#allocation6 + $0x704] ss:$16 sps:$4 sm:$0xff]  }
 0x124   :  { %3784 = vmatpush1.bf16.msra.mxu0 %v6917_v57  ;;  %4153 = vmatpush1.bf16.msra.mxu1 %v6920_v58  ;;  %v7012_v57 = vld [vmem:[#allocation6 + $0x70c] ss:$16 sps:$4 sm:$0xff]   ;;  %v7007_v58 = vld [vmem:[#allocation6 + $0x700] ss:$16 sps:$4 sm:$0xff]  }
 0x125   :  { %3785 = vmatprep.subr.bf16.mxu0 %v6925_v59  ;;  %4154 = vmatprep.subr.bf16.mxu1 %v6928_v60  ;;  %v7010_v59 = vld [vmem:[#allocation6 + $0x708] ss:$16 sps:$4 sm:$0xff]   ;;  %v7015_v60 = vld [vmem:[#allocation6 + $0x724] ss:$16 sps:$4 sm:$0xff]  }
 0x128   :  { %3786 = vmatpush1.bf16.msra.mxu0 %v6923_v61  ;;  %4155 = vmatpush1.bf16.msra.mxu1 %v6926_v62  ;;  %v7018_v61 = vld [vmem:[#allocation6 + $0x72c] ss:$16 sps:$4 sm:$0xff]   ;;  %v7013_v62 = vld [vmem:[#allocation6 + $0x720] ss:$16 sps:$4 sm:$0xff]  }
 0x129   :  { %3787 = vmatprep.subr.bf16.mxu0 %v6931_v63  ;;  %4156 = vmatprep.subr.bf16.mxu1 %v6934_v0  ;;  %v7016_v63 = vld [vmem:[#allocation6 + $0x728] ss:$16 sps:$4 sm:$0xff]   ;;  %v7021_v0 = vld [vmem:[#allocation6 + $0x744] ss:$16 sps:$4 sm:$0xff]  }
 0x12c   :  { %3788 = vmatpush1.bf16.msra.mxu0 %v6929_v1  ;;  %4157 = vmatpush1.bf16.msra.mxu1 %v6932_v2  ;;  %v7024_v1 = vld [vmem:[#allocation6 + $0x74c] ss:$16 sps:$4 sm:$0xff]   ;;  %v7019_v2 = vld [vmem:[#allocation6 + $0x740] ss:$16 sps:$4 sm:$0xff]  }
 0x12d   :  { %3789 = vmatprep.subr.bf16.mxu0 %v6937_v3  ;;  %4158 = vmatprep.subr.bf16.mxu1 %v6940_v4  ;;  %v7022_v3 = vld [vmem:[#allocation6 + $0x748] ss:$16 sps:$4 sm:$0xff]   ;;  %v7027_v4 = vld [vmem:[#allocation6 + $0x764] ss:$16 sps:$4 sm:$0xff]  }
 0x130   :  { %3790 = vmatpush1.bf16.msra.mxu0 %v6935_v5  ;;  %4159 = vmatpush1.bf16.msra.mxu1 %v6938_v6  ;;  %v7030_v5 = vld [vmem:[#allocation6 + $0x76c] ss:$16 sps:$4 sm:$0xff]   ;;  %v7025_v6 = vld [vmem:[#allocation6 + $0x760] ss:$16 sps:$4 sm:$0xff]  }
 0x131   :  { %3791 = vmatprep.subr.bf16.mxu0 %v6943_v7  ;;  %4160 = vmatprep.subr.bf16.mxu1 %v6946_v8  ;;  %v7028_v7 = vld [vmem:[#allocation6 + $0x768] ss:$16 sps:$4 sm:$0xff]   ;;  %v7033_v8 = vld [vmem:[#allocation6 + $0x784] ss:$16 sps:$4 sm:$0xff]  }
 0x134   :  { %3792 = vmatpush1.bf16.msra.mxu0 %v6941_v9  ;;  %4161 = vmatpush1.bf16.msra.mxu1 %v6944_v10  ;;  %v7036_v9 = vld [vmem:[#allocation6 + $0x78c] ss:$16 sps:$4 sm:$0xff]   ;;  %v7031_v10 = vld [vmem:[#allocation6 + $0x780] ss:$16 sps:$4 sm:$0xff]  }
 0x135   :  { %3793 = vmatprep.subr.bf16.mxu0 %v6949_v11  ;;  %4162 = vmatprep.subr.bf16.mxu1 %v6952_v13  ;;  %v7034_v11 = vld [vmem:[#allocation6 + $0x788] ss:$16 sps:$4 sm:$0xff]   ;;  %v7039_v13 = vld [vmem:[#allocation6 + $0x7a4] ss:$16 sps:$4 sm:$0xff]  }
 0x138   :  { %3794 = vmatpush1.bf16.msra.mxu0 %v6947_v14  ;;  %4163 = vmatpush1.bf16.msra.mxu1 %v6950_v15  ;;  %v7042_v14 = vld [vmem:[#allocation6 + $0x7ac] ss:$16 sps:$4 sm:$0xff]   ;;  %v7037_v15 = vld [vmem:[#allocation6 + $0x7a0] ss:$16 sps:$4 sm:$0xff]  }
 0x139   :  { %3795 = vmatprep.subr.bf16.mxu0 %v6955_v16  ;;  %4164 = vmatprep.subr.bf16.mxu1 %v6958_v17  ;;  %v7040_v16 = vld [vmem:[#allocation6 + $0x7a8] ss:$16 sps:$4 sm:$0xff]   ;;  %v7045_v17 = vld [vmem:[#allocation6 + $0x7c4] ss:$16 sps:$4 sm:$0xff]  }
 0x13c   :  { %3796 = vmatpush1.bf16.msra.mxu0 %v6953_v20  ;;  %4165 = vmatpush1.bf16.msra.mxu1 %v6956_v21  ;;  %v7043_v20 = vld [vmem:[#allocation6 + $0x7c0] ss:$16 sps:$4 sm:$0xff]   ;;  %v7046_v21 = vld [vmem:[#allocation6 + $0x7c8] ss:$16 sps:$4 sm:$0xff]  }
 0x13d   :  { %3806 = vmatprep.subr.bf16.mxu0 %v6961_v23  ;;  %4175 = vmatprep.subr.bf16.mxu1 %v6964_v24  ;;  %v7051_v23 = vld [vmem:[#allocation6 + $0x7e4] ss:$16 sps:$4 sm:$0xff]   ;;  %v7054_v24 = vld [vmem:[#allocation6 + $0x7ec] ss:$16 sps:$4 sm:$0xff]  }
 0x13f   :  { %3798 = vmatmul.mubr.bf16.vlgmr.msra.gmra.mrb[0].mxu0 %v8100_v22  ;;  %4167 = vmatmul.mubr.bf16.vlgmr.msra.gmra.mrb[0].mxu1 %v8100_v22  ;;  %v6977_v22 = vld [vmem:[#allocation6 + $0x660] ss:$16 sps:$4 sm:$0xff]  }
 0x140   :  { %3807 = vmatpush1.bf16.msra.mxu0 %v6959_v26  ;;  %4176 = vmatpush1.bf16.msra.mxu1 %v6962_v27  ;;  %v7049_v26 = vld [vmem:[#allocation6 + $0x7e0] ss:$16 sps:$4 sm:$0xff]  }
 0x141   :  { %3808 = vmatprep.subr.bf16.mxu0 %v6967_v28  ;;  %4177 = vmatprep.subr.bf16.mxu1 %v6970_v29  ;;  %v8115_v27 = vld [vmem:[#allocation3 + $0x10] sm:$0xff]  ;;  %v7052_v28 = vld [vmem:[#allocation6 + $0x7e8] ss:$16 sps:$4 sm:$0xff]   ;;  %v7058_v29 = vld [vmem:[#allocation6 + $0x804] ss:$16 sps:$4 sm:$0xff]  }
 0x142   :  { %3838 = vmatprep.mubr.bf16.mxu0 %v742_v19  ;;  %4207 = vmatprep.mubr.bf16.mxu1 %v742_v19  ;;  %v7061_v19 = vld [vmem:[#allocation6 + $0x80c] ss:$16 sps:$4 sm:$0xff]  }
 0x144   :  { %3809 = vmatpush1.bf16.msra.mxu0 %v6965_v12  ;;  %4178 = vmatpush1.bf16.msra.mxu1 %v6968_v30  ;;  %v8119_v12 = vrot.slane %v8115_v27, %v8088_v49  ;;  %v7056_v30 = vld [vmem:[#allocation6 + $0x800] ss:$16 sps:$4 sm:$0xff]  }
 0x145   :  { %3810 = vmatprep.subr.bf16.mxu0 %v6973_v31  ;;  %4179 = vmatprep.subr.bf16.mxu1 %v6976_v32  ;;  %v7059_v31 = vld [vmem:[#allocation6 + $0x808] ss:$16 sps:$4 sm:$0xff]   ;;  %v7064_v32 = vld [vmem:[#allocation6 + $0x824] ss:$16 sps:$4 sm:$0xff]  }
 0x148   :  { %3811 = vmatpush1.bf16.msra.mxu0 %v6971_v33  ;;  %4180 = vmatpush1.bf16.msra.mxu1 %v6974_v34  ;;  %v7067_v33 = vld [vmem:[#allocation6 + $0x82c] ss:$16 sps:$4 sm:$0xff]   ;;  %v758_v34 = vcombine.high %v8119_v12, %v8119_v12 }
 0x149   :  { %3812 = vmatprep.subr.bf16.mxu0 %v6979_v35  ;;  %4181 = vmatprep.subr.bf16.mxu1 %v6982_v36  ;;  %v7062_v35 = vld [vmem:[#allocation6 + $0x820] ss:$16 sps:$4 sm:$0xff]   ;;  %v7065_v36 = vld [vmem:[#allocation6 + $0x828] ss:$16 sps:$4 sm:$0xff]  }
 0x14c   :  { %3813 = vmatpush1.bf16.msra.mxu0 %v6977_v22  ;;  %4182 = vmatpush1.bf16.msra.mxu1 %v6980_v37  ;;  %v7070_v22 = vld [vmem:[#allocation6 + $0x844] ss:$16 sps:$4 sm:$0xff]   ;;  %v7073_v37 = vld [vmem:[#allocation6 + $0x84c] ss:$16 sps:$4 sm:$0xff]  }
 0x14d   :  { %3814 = vmatprep.subr.bf16.mxu0 %v6985_v38  ;;  %4183 = vmatprep.subr.bf16.mxu1 %v6988_v39  ;;  %v7068_v38 = vld [vmem:[#allocation6 + $0x840] ss:$16 sps:$4 sm:$0xff]   ;;  %v7071_v39 = vld [vmem:[#allocation6 + $0x848] ss:$16 sps:$4 sm:$0xff]  }
 0x150   :  { %3815 = vmatpush1.bf16.msra.mxu0 %v6983_v40  ;;  %4184 = vmatpush1.bf16.msra.mxu1 %v6986_v41  ;;  %v7076_v40 = vld [vmem:[#allocation6 + $0x864] ss:$16 sps:$4 sm:$0xff]   ;;  %v7079_v41 = vld [vmem:[#allocation6 + $0x86c] ss:$16 sps:$4 sm:$0xff]  }
 0x151   :  { %3816 = vmatprep.subr.bf16.mxu0 %v6991_v42  ;;  %4185 = vmatprep.subr.bf16.mxu1 %v6994_v44  ;;  %v7077_v42 = vld [vmem:[#allocation6 + $0x868] ss:$16 sps:$4 sm:$0xff]   ;;  %v7082_v44 = vld [vmem:[#allocation6 + $0x884] ss:$16 sps:$4 sm:$0xff]  }
 0x154   :  { %3817 = vmatpush1.bf16.msra.mxu0 %v6989_v45  ;;  %4186 = vmatpush1.bf16.msra.mxu1 %v6992_v46  ;;  %v7085_v45 = vld [vmem:[#allocation6 + $0x88c] ss:$16 sps:$4 sm:$0xff]   ;;  %v7080_v46 = vld [vmem:[#allocation6 + $0x880] ss:$16 sps:$4 sm:$0xff]  }
 0x155   :  { %3818 = vmatprep.subr.bf16.mxu0 %v6997_v47  ;;  %4187 = vmatprep.subr.bf16.mxu1 %v7000_v48  ;;  %v7083_v47 = vld [vmem:[#allocation6 + $0x888] ss:$16 sps:$4 sm:$0xff]   ;;  %v7088_v48 = vld [vmem:[#allocation6 + $0x8a4] ss:$16 sps:$4 sm:$0xff]  }
 0x158   :  { %3819 = vmatpush1.bf16.msra.mxu0 %v6995_v50  ;;  %4188 = vmatpush1.bf16.msra.mxu1 %v6998_v51  ;;  %v7091_v50 = vld [vmem:[#allocation6 + $0x8ac] ss:$16 sps:$4 sm:$0xff]   ;;  %v7086_v51 = vld [vmem:[#allocation6 + $0x8a0] ss:$16 sps:$4 sm:$0xff]  }
 0x159   :  { %3820 = vmatprep.subr.bf16.mxu0 %v7003_v52  ;;  %4189 = vmatprep.subr.bf16.mxu1 %v7006_v53  ;;  %v7089_v52 = vld [vmem:[#allocation6 + $0x8a8] ss:$16 sps:$4 sm:$0xff]   ;;  %v7094_v53 = vld [vmem:[#allocation6 + $0x8c4] ss:$16 sps:$4 sm:$0xff]  }
 0x15c   :  { %3821 = vmatpush1.bf16.msra.mxu0 %v7001_v54  ;;  %4190 = vmatpush1.bf16.msra.mxu1 %v7004_v55  ;;  %v7097_v54 = vld [vmem:[#allocation6 + $0x8cc] ss:$16 sps:$4 sm:$0xff]   ;;  %v7092_v55 = vld [vmem:[#allocation6 + $0x8c0] ss:$16 sps:$4 sm:$0xff]  }
 0x15d   :  { %3822 = vmatprep.subr.bf16.mxu0 %v7009_v56  ;;  %4191 = vmatprep.subr.bf16.mxu1 %v7012_v57  ;;  %v7095_v56 = vld [vmem:[#allocation6 + $0x8c8] ss:$16 sps:$4 sm:$0xff]   ;;  %v7100_v57 = vld [vmem:[#allocation6 + $0x8e4] ss:$16 sps:$4 sm:$0xff]  }
 0x160   :  { %3823 = vmatpush1.bf16.msra.mxu0 %v7007_v58  ;;  %4192 = vmatpush1.bf16.msra.mxu1 %v7010_v59  ;;  %v7103_v58 = vld [vmem:[#allocation6 + $0x8ec] ss:$16 sps:$4 sm:$0xff]   ;;  %v7098_v59 = vld [vmem:[#allocation6 + $0x8e0] ss:$16 sps:$4 sm:$0xff]  }
 0x161   :  { %3824 = vmatprep.subr.bf16.mxu0 %v7015_v60  ;;  %4193 = vmatprep.subr.bf16.mxu1 %v7018_v61  ;;  %v7101_v60 = vld [vmem:[#allocation6 + $0x8e8] ss:$16 sps:$4 sm:$0xff]   ;;  %v7106_v61 = vld [vmem:[#allocation6 + $0x904] ss:$16 sps:$4 sm:$0xff]  }
 0x164   :  { %3825 = vmatpush1.bf16.msra.mxu0 %v7013_v62  ;;  %4194 = vmatpush1.bf16.msra.mxu1 %v7016_v63  ;;  %v7109_v62 = vld [vmem:[#allocation6 + $0x90c] ss:$16 sps:$4 sm:$0xff]   ;;  %v7104_v63 = vld [vmem:[#allocation6 + $0x900] ss:$16 sps:$4 sm:$0xff]  }
 0x165   :  { %3826 = vmatprep.subr.bf16.mxu0 %v7021_v0  ;;  %4195 = vmatprep.subr.bf16.mxu1 %v7024_v1  ;;  %v7107_v0 = vld [vmem:[#allocation6 + $0x908] ss:$16 sps:$4 sm:$0xff]   ;;  %v7112_v1 = vld [vmem:[#allocation6 + $0x924] ss:$16 sps:$4 sm:$0xff]  }
 0x168   :  { %3827 = vmatpush1.bf16.msra.mxu0 %v7019_v2  ;;  %4196 = vmatpush1.bf16.msra.mxu1 %v7022_v3  ;;  %v7115_v2 = vld [vmem:[#allocation6 + $0x92c] ss:$16 sps:$4 sm:$0xff]   ;;  %v7110_v3 = vld [vmem:[#allocation6 + $0x920] ss:$16 sps:$4 sm:$0xff]  }
 0x169   :  { %3828 = vmatprep.subr.bf16.mxu0 %v7027_v4  ;;  %4197 = vmatprep.subr.bf16.mxu1 %v7030_v5  ;;  %v7113_v4 = vld [vmem:[#allocation6 + $0x928] ss:$16 sps:$4 sm:$0xff]   ;;  %v7118_v5 = vld [vmem:[#allocation6 + $0x944] ss:$16 sps:$4 sm:$0xff]  }
 0x16c   :  { %3829 = vmatpush1.bf16.msra.mxu0 %v7025_v6  ;;  %4198 = vmatpush1.bf16.msra.mxu1 %v7028_v7  ;;  %v7121_v6 = vld [vmem:[#allocation6 + $0x94c] ss:$16 sps:$4 sm:$0xff]   ;;  %v7116_v7 = vld [vmem:[#allocation6 + $0x940] ss:$16 sps:$4 sm:$0xff]  }
 0x16d   :  { %3830 = vmatprep.subr.bf16.mxu0 %v7033_v8  ;;  %4199 = vmatprep.subr.bf16.mxu1 %v7036_v9  ;;  %v7119_v8 = vld [vmem:[#allocation6 + $0x948] ss:$16 sps:$4 sm:$0xff]   ;;  %v7124_v9 = vld [vmem:[#allocation6 + $0x964] ss:$16 sps:$4 sm:$0xff]  }
 0x170   :  { %3831 = vmatpush1.bf16.msra.mxu0 %v7031_v10  ;;  %4200 = vmatpush1.bf16.msra.mxu1 %v7034_v11  ;;  %v7127_v10 = vld [vmem:[#allocation6 + $0x96c] ss:$16 sps:$4 sm:$0xff]   ;;  %v7122_v11 = vld [vmem:[#allocation6 + $0x960] ss:$16 sps:$4 sm:$0xff]  }
 0x171   :  { %3832 = vmatprep.subr.bf16.mxu0 %v7039_v13  ;;  %4201 = vmatprep.subr.bf16.mxu1 %v7042_v14  ;;  %v7125_v13 = vld [vmem:[#allocation6 + $0x968] ss:$16 sps:$4 sm:$0xff]   ;;  %v7130_v14 = vld [vmem:[#allocation6 + $0x984] ss:$16 sps:$4 sm:$0xff]  }
 0x174   :  { %3833 = vmatpush1.bf16.msra.mxu0 %v7037_v15  ;;  %4202 = vmatpush1.bf16.msra.mxu1 %v7040_v16  ;;  %v7133_v15 = vld [vmem:[#allocation6 + $0x98c] ss:$16 sps:$4 sm:$0xff]   ;;  %v7128_v16 = vld [vmem:[#allocation6 + $0x980] ss:$16 sps:$4 sm:$0xff]  }
 0x175   :  { %3834 = vmatprep.subr.bf16.mxu0 %v7045_v17  ;;  %4203 = vmatprep.subr.bf16.mxu1 %v7048_v18  ;;  %v7131_v17 = vld [vmem:[#allocation6 + $0x988] ss:$16 sps:$4 sm:$0xff]   ;;  %v7136_v18 = vld [vmem:[#allocation6 + $0x9a4] ss:$16 sps:$4 sm:$0xff]  }
 0x178   :  { %3835 = vmatpush1.bf16.msra.mxu0 %v7043_v20  ;;  %4204 = vmatpush1.bf16.msra.mxu1 %v7046_v21  ;;  %v7139_v20 = vld [vmem:[#allocation6 + $0x9ac] ss:$16 sps:$4 sm:$0xff]   ;;  %v7134_v21 = vld [vmem:[#allocation6 + $0x9a0] ss:$16 sps:$4 sm:$0xff]  }
 0x179   :  { %3836 = vmatprep.subr.bf16.mxu0 %v7051_v23  ;;  %4205 = vmatprep.subr.bf16.mxu1 %v7054_v24  ;;  %v7137_v23 = vld [vmem:[#allocation6 + $0x9a8] ss:$16 sps:$4 sm:$0xff]   ;;  %v7142_v24 = vld [vmem:[#allocation6 + $0x9c4] ss:$16 sps:$4 sm:$0xff]  }
 0x17c   :  { %3837 = vmatpush1.bf16.msra.mxu0 %v7049_v26  ;;  %4206 = vmatpush1.bf16.msra.mxu1 %v7052_v28  ;;  %v7145_v26 = vld [vmem:[#allocation6 + $0x9cc] ss:$16 sps:$4 sm:$0xff]   ;;  %v7140_v28 = vld [vmem:[#allocation6 + $0x9c0] ss:$16 sps:$4 sm:$0xff]  }
 0x17d   :  { %3847 = vmatprep.subr.bf16.mxu0 %v7058_v29  ;;  %4216 = vmatprep.subr.bf16.mxu1 %v7061_v19  ;;  %v7143_v29 = vld [vmem:[#allocation6 + $0x9c8] ss:$16 sps:$4 sm:$0xff]   ;;  %v7148_v19 = vld [vmem:[#allocation6 + $0x9e4] ss:$16 sps:$4 sm:$0xff]  }
 0x17f   :  { %3839 = vmatmul.mubr.bf16.vlgmr.msra.gmra.mrb[0].mxu0 %v8109_v25  ;;  %4208 = vmatmul.mubr.bf16.vlgmr.msra.gmra.mrb[0].mxu1 %v8109_v25  ;;  %v7074_v25 = vld [vmem:[#allocation6 + $0x860] ss:$16 sps:$4 sm:$0xff]  }
 0x180   :  { %3848 = vmatpush1.bf16.msra.mxu0 %v7056_v30  ;;  %4217 = vmatpush1.bf16.msra.mxu1 %v7059_v31  ;;  %v7151_v30 = vld [vmem:[#allocation6 + $0x9ec] ss:$16 sps:$4 sm:$0xff]   ;;  %v743_v31 = vcombine.high %v8115_v27, %v8115_v27 }
 0x181   :  { %3849 = vmatprep.subr.bf16.mxu0 %v7064_v32  ;;  %4218 = vmatprep.subr.bf16.mxu1 %v7067_v33  ;;  %v7146_v32 = vld [vmem:[#allocation6 + $0x9e0] ss:$16 sps:$4 sm:$0xff]   ;;  %v7149_v33 = vld [vmem:[#allocation6 + $0x9e8] ss:$16 sps:$4 sm:$0xff]  }
 0x182   :  { %3879 = vmatprep.mubr.bf16.mxu0 %v758_v34  ;;  %4248 = vmatprep.mubr.bf16.mxu1 %v758_v34  ;;  %v7154_v34 = vld [vmem:[#allocation6 + $0xa04] ss:$16 sps:$4 sm:$0xff]  }
 0x184   :  { %3850 = vmatpush1.bf16.msra.mxu0 %v7062_v35  ;;  %4219 = vmatpush1.bf16.msra.mxu1 %v7065_v36  ;;  %v7157_v35 = vld [vmem:[#allocation6 + $0xa0c] ss:$16 sps:$4 sm:$0xff]   ;;  %v8128_v36 = vrot.slane %v743_v31, %v8088_v49 }
 0x185   :  { %3851 = vmatprep.subr.bf16.mxu0 %v7070_v22  ;;  %4220 = vmatprep.subr.bf16.mxu1 %v7073_v37  ;;  %v7152_v22 = vld [vmem:[#allocation6 + $0xa00] ss:$16 sps:$4 sm:$0xff]   ;;  %v7155_v37 = vld [vmem:[#allocation6 + $0xa08] ss:$16 sps:$4 sm:$0xff]   ;;  %v7241_v31 = vld [vmem:[#allocation6 + $0xbcc] ss:$16 sps:$4 sm:$0xff]  }
 0x186   :  { %v759_v27 = vcombine.high %v8128_v36, %v8128_v36 }
 0x188   :  { %3852 = vmatpush1.bf16.msra.mxu0 %v7068_v38  ;;  %4221 = vmatpush1.bf16.msra.mxu1 %v7071_v39  ;;  %v7160_v38 = vld [vmem:[#allocation6 + $0xa24] ss:$16 sps:$4 sm:$0xff]   ;;  %v7163_v39 = vld [vmem:[#allocation6 + $0xa2c] ss:$16 sps:$4 sm:$0xff]  }
 0x189   :  { %3853 = vmatprep.subr.bf16.mxu0 %v7076_v40  ;;  %4222 = vmatprep.subr.bf16.mxu1 %v7079_v41  ;;  %v7158_v40 = vld [vmem:[#allocation6 + $0xa20] ss:$16 sps:$4 sm:$0xff]   ;;  %v7161_v41 = vld [vmem:[#allocation6 + $0xa28] ss:$16 sps:$4 sm:$0xff]  }
 0x18c   :  { %3854 = vmatpush1.bf16.msra.mxu0 %v7074_v25  ;;  %4223 = vmatpush1.bf16.msra.mxu1 %v7077_v42  ;;  %v7166_v25 = vld [vmem:[#allocation6 + $0xa44] ss:$16 sps:$4 sm:$0xff]   ;;  %v7169_v42 = vld [vmem:[#allocation6 + $0xa4c] ss:$16 sps:$4 sm:$0xff]  }
 0x18d   :  { %3855 = vmatprep.subr.bf16.mxu0 %v7082_v44  ;;  %4224 = vmatprep.subr.bf16.mxu1 %v7085_v45  ;;  %v7164_v44 = vld [vmem:[#allocation6 + $0xa40] ss:$16 sps:$4 sm:$0xff]   ;;  %v7167_v45 = vld [vmem:[#allocation6 + $0xa48] ss:$16 sps:$4 sm:$0xff]  }
 0x190   :  { %3856 = vmatpush1.bf16.msra.mxu0 %v7080_v46  ;;  %4225 = vmatpush1.bf16.msra.mxu1 %v7083_v47  ;;  %v7172_v46 = vld [vmem:[#allocation6 + $0xa64] ss:$16 sps:$4 sm:$0xff]   ;;  %v7175_v47 = vld [vmem:[#allocation6 + $0xa6c] ss:$16 sps:$4 sm:$0xff]  }
 0x191   :  { %3857 = vmatprep.subr.bf16.mxu0 %v7088_v48  ;;  %4226 = vmatprep.subr.bf16.mxu1 %v7091_v50  ;;  %v7173_v48 = vld [vmem:[#allocation6 + $0xa68] ss:$16 sps:$4 sm:$0xff]   ;;  %v7178_v50 = vld [vmem:[#allocation6 + $0xa84] ss:$16 sps:$4 sm:$0xff]  }
 0x194   :  { %3858 = vmatpush1.bf16.msra.mxu0 %v7086_v51  ;;  %4227 = vmatpush1.bf16.msra.mxu1 %v7089_v52  ;;  %v7181_v51 = vld [vmem:[#allocation6 + $0xa8c] ss:$16 sps:$4 sm:$0xff]   ;;  %v7176_v52 = vld [vmem:[#allocation6 + $0xa80] ss:$16 sps:$4 sm:$0xff]  }
 0x195   :  { %3859 = vmatprep.subr.bf16.mxu0 %v7094_v53  ;;  %4228 = vmatprep.subr.bf16.mxu1 %v7097_v54  ;;  %v7179_v53 = vld [vmem:[#allocation6 + $0xa88] ss:$16 sps:$4 sm:$0xff]   ;;  %v7184_v54 = vld [vmem:[#allocation6 + $0xaa4] ss:$16 sps:$4 sm:$0xff]  }
 0x198   :  { %3860 = vmatpush1.bf16.msra.mxu0 %v7092_v55  ;;  %4229 = vmatpush1.bf16.msra.mxu1 %v7095_v56  ;;  %v7187_v55 = vld [vmem:[#allocation6 + $0xaac] ss:$16 sps:$4 sm:$0xff]   ;;  %v7182_v56 = vld [vmem:[#allocation6 + $0xaa0] ss:$16 sps:$4 sm:$0xff]  }
 0x199   :  { %3861 = vmatprep.subr.bf16.mxu0 %v7100_v57  ;;  %4230 = vmatprep.subr.bf16.mxu1 %v7103_v58  ;;  %v7185_v57 = vld [vmem:[#allocation6 + $0xaa8] ss:$16 sps:$4 sm:$0xff]   ;;  %v7190_v58 = vld [vmem:[#allocation6 + $0xac4] ss:$16 sps:$4 sm:$0xff]  }
 0x19c   :  { %3862 = vmatpush1.bf16.msra.mxu0 %v7098_v59  ;;  %4231 = vmatpush1.bf16.msra.mxu1 %v7101_v60  ;;  %v7193_v59 = vld [vmem:[#allocation6 + $0xacc] ss:$16 sps:$4 sm:$0xff]   ;;  %v7188_v60 = vld [vmem:[#allocation6 + $0xac0] ss:$16 sps:$4 sm:$0xff]  }
 0x19d   :  { %3863 = vmatprep.subr.bf16.mxu0 %v7106_v61  ;;  %4232 = vmatprep.subr.bf16.mxu1 %v7109_v62  ;;  %v7191_v61 = vld [vmem:[#allocation6 + $0xac8] ss:$16 sps:$4 sm:$0xff]   ;;  %v7196_v62 = vld [vmem:[#allocation6 + $0xae4] ss:$16 sps:$4 sm:$0xff]  }
 0x1a0   :  { %3864 = vmatpush1.bf16.msra.mxu0 %v7104_v63  ;;  %4233 = vmatpush1.bf16.msra.mxu1 %v7107_v0  ;;  %v7199_v63 = vld [vmem:[#allocation6 + $0xaec] ss:$16 sps:$4 sm:$0xff]   ;;  %v7194_v0 = vld [vmem:[#allocation6 + $0xae0] ss:$16 sps:$4 sm:$0xff]  }
 0x1a1   :  { %3865 = vmatprep.subr.bf16.mxu0 %v7112_v1  ;;  %4234 = vmatprep.subr.bf16.mxu1 %v7115_v2  ;;  %v7197_v1 = vld [vmem:[#allocation6 + $0xae8] ss:$16 sps:$4 sm:$0xff]   ;;  %v7202_v2 = vld [vmem:[#allocation6 + $0xb04] ss:$16 sps:$4 sm:$0xff]  }
 0x1a4   :  { %3866 = vmatpush1.bf16.msra.mxu0 %v7110_v3  ;;  %4235 = vmatpush1.bf16.msra.mxu1 %v7113_v4  ;;  %v7205_v3 = vld [vmem:[#allocation6 + $0xb0c] ss:$16 sps:$4 sm:$0xff]   ;;  %v7200_v4 = vld [vmem:[#allocation6 + $0xb00] ss:$16 sps:$4 sm:$0xff]  }
 0x1a5   :  { %3867 = vmatprep.subr.bf16.mxu0 %v7118_v5  ;;  %4236 = vmatprep.subr.bf16.mxu1 %v7121_v6  ;;  %v7203_v5 = vld [vmem:[#allocation6 + $0xb08] ss:$16 sps:$4 sm:$0xff]   ;;  %v7208_v6 = vld [vmem:[#allocation6 + $0xb24] ss:$16 sps:$4 sm:$0xff]  }
 0x1a8   :  { %3868 = vmatpush1.bf16.msra.mxu0 %v7116_v7  ;;  %4237 = vmatpush1.bf16.msra.mxu1 %v7119_v8  ;;  %v7211_v7 = vld [vmem:[#allocation6 + $0xb2c] ss:$16 sps:$4 sm:$0xff]   ;;  %v7206_v8 = vld [vmem:[#allocation6 + $0xb20] ss:$16 sps:$4 sm:$0xff]  }
 0x1a9   :  { %3869 = vmatprep.subr.bf16.mxu0 %v7124_v9  ;;  %4238 = vmatprep.subr.bf16.mxu1 %v7127_v10  ;;  %v7209_v9 = vld [vmem:[#allocation6 + $0xb28] ss:$16 sps:$4 sm:$0xff]   ;;  %v7214_v10 = vld [vmem:[#allocation6 + $0xb44] ss:$16 sps:$4 sm:$0xff]  }
 0x1ac   :  { %3870 = vmatpush1.bf16.msra.mxu0 %v7122_v11  ;;  %4239 = vmatpush1.bf16.msra.mxu1 %v7125_v13  ;;  %v7217_v11 = vld [vmem:[#allocation6 + $0xb4c] ss:$16 sps:$4 sm:$0xff]   ;;  %v7212_v13 = vld [vmem:[#allocation6 + $0xb40] ss:$16 sps:$4 sm:$0xff]  }
 0x1ad   :  { %3871 = vmatprep.subr.bf16.mxu0 %v7130_v14  ;;  %4240 = vmatprep.subr.bf16.mxu1 %v7133_v15  ;;  %v7215_v14 = vld [vmem:[#allocation6 + $0xb48] ss:$16 sps:$4 sm:$0xff]   ;;  %v7220_v15 = vld [vmem:[#allocation6 + $0xb64] ss:$16 sps:$4 sm:$0xff]  }
 0x1b0   :  { %3872 = vmatpush1.bf16.msra.mxu0 %v7128_v16  ;;  %4241 = vmatpush1.bf16.msra.mxu1 %v7131_v17  ;;  %v7223_v16 = vld [vmem:[#allocation6 + $0xb6c] ss:$16 sps:$4 sm:$0xff]   ;;  %v7218_v17 = vld [vmem:[#allocation6 + $0xb60] ss:$16 sps:$4 sm:$0xff]  }
 0x1b1   :  { %3873 = vmatprep.subr.bf16.mxu0 %v7136_v18  ;;  %4242 = vmatprep.subr.bf16.mxu1 %v7139_v20  ;;  %v7221_v18 = vld [vmem:[#allocation6 + $0xb68] ss:$16 sps:$4 sm:$0xff]   ;;  %v7226_v20 = vld [vmem:[#allocation6 + $0xb84] ss:$16 sps:$4 sm:$0xff]  }
 0x1b4   :  { %3874 = vmatpush1.bf16.msra.mxu0 %v7134_v21  ;;  %4243 = vmatpush1.bf16.msra.mxu1 %v7137_v23  ;;  %v7229_v21 = vld [vmem:[#allocation6 + $0xb8c] ss:$16 sps:$4 sm:$0xff]   ;;  %v7224_v23 = vld [vmem:[#allocation6 + $0xb80] ss:$16 sps:$4 sm:$0xff]  }
 0x1b5   :  { %3875 = vmatprep.subr.bf16.mxu0 %v7142_v24  ;;  %4244 = vmatprep.subr.bf16.mxu1 %v7145_v26  ;;  %v7227_v24 = vld [vmem:[#allocation6 + $0xb88] ss:$16 sps:$4 sm:$0xff]   ;;  %v7232_v26 = vld [vmem:[#allocation6 + $0xba4] ss:$16 sps:$4 sm:$0xff]  }
 0x1b8   :  { %3876 = vmatpush1.bf16.msra.mxu0 %v7140_v28  ;;  %4245 = vmatpush1.bf16.msra.mxu1 %v7143_v29  ;;  %v7235_v28 = vld [vmem:[#allocation6 + $0xbac] ss:$16 sps:$4 sm:$0xff]   ;;  %v7230_v29 = vld [vmem:[#allocation6 + $0xba0] ss:$16 sps:$4 sm:$0xff]  }
 0x1b9   :  { %3877 = vmatprep.subr.bf16.mxu0 %v7148_v19  ;;  %4246 = vmatprep.subr.bf16.mxu1 %v7151_v30  ;;  %v7233_v19 = vld [vmem:[#allocation6 + $0xba8] ss:$16 sps:$4 sm:$0xff]   ;;  %v7238_v30 = vld [vmem:[#allocation6 + $0xbc4] ss:$16 sps:$4 sm:$0xff]  }
 0x1bc   :  { %3878 = vmatpush1.bf16.msra.mxu0 %v7146_v32  ;;  %4247 = vmatpush1.bf16.msra.mxu1 %v7149_v33  ;;  %v7236_v32 = vld [vmem:[#allocation6 + $0xbc0] ss:$16 sps:$4 sm:$0xff]   ;;  %v7239_v33 = vld [vmem:[#allocation6 + $0xbc8] ss:$16 sps:$4 sm:$0xff]  }
 0x1bd   :  { %3888 = vmatprep.subr.bf16.mxu0 %v7154_v34  ;;  %4257 = vmatprep.subr.bf16.mxu1 %v7157_v35  ;;  %v7244_v34 = vld [vmem:[#allocation6 + $0xbe4] ss:$16 sps:$4 sm:$0xff]   ;;  %v7247_v35 = vld [vmem:[#allocation6 + $0xbec] ss:$16 sps:$4 sm:$0xff]  }
 0x1bf   :  { %3880 = vmatmul.mubr.bf16.vlgmr.msra.gmra.mrb[0].mxu0 %v8119_v12  ;;  %4249 = vmatmul.mubr.bf16.vlgmr.msra.gmra.mrb[0].mxu1 %v8119_v12  ;;  %v7170_v12 = vld [vmem:[#allocation6 + $0xa60] ss:$16 sps:$4 sm:$0xff]  }
 0x1c0   :  { %3889 = vmatpush1.bf16.msra.mxu0 %v7152_v22  ;;  %4258 = vmatpush1.bf16.msra.mxu1 %v7155_v37  ;;  %v8134_v22 = vld [vmem:[#allocation3 + $0x18] sm:$0xff]  ;;  %v7242_v37 = vld [vmem:[#allocation6 + $0xbe0] ss:$16 sps:$4 sm:$0xff]  }
 0x1c1   :  { %3890 = vmatprep.subr.bf16.mxu0 %v7160_v38  ;;  %4259 = vmatprep.subr.bf16.mxu1 %v7163_v39  ;;  %v7245_v38 = vld [vmem:[#allocation6 + $0xbe8] ss:$16 sps:$4 sm:$0xff]   ;;  %v7251_v39 = vld [vmem:[#allocation6 + $0xc04] ss:$16 sps:$4 sm:$0xff]  }
 0x1c2   :  { %3920 = vmatprep.mubr.bf16.mxu0 %v759_v27  ;;  %4289 = vmatprep.mubr.bf16.mxu1 %v759_v27  ;;  %v7254_v27 = vld [vmem:[#allocation6 + $0xc0c] ss:$16 sps:$4 sm:$0xff]  }
 0x1c4   :  { %3891 = vmatpush1.bf16.msra.mxu0 %v7158_v40  ;;  %4260 = vmatpush1.bf16.msra.mxu1 %v7161_v41  ;;  %v8138_v40 = vrot.slane %v8134_v22, %v8088_v49  ;;  %v7249_v41 = vld [vmem:[#allocation6 + $0xc00] ss:$16 sps:$4 sm:$0xff]  }
 0x1c5   :  { %3892 = vmatprep.subr.bf16.mxu0 %v7166_v25  ;;  %4261 = vmatprep.subr.bf16.mxu1 %v7169_v42  ;;  %v7252_v25 = vld [vmem:[#allocation6 + $0xc08] ss:$16 sps:$4 sm:$0xff]   ;;  %v7257_v42 = vld [vmem:[#allocation6 + $0xc24] ss:$16 sps:$4 sm:$0xff]  }
 0x1c8   :  { %3893 = vmatpush1.bf16.msra.mxu0 %v7164_v44  ;;  %4262 = vmatpush1.bf16.msra.mxu1 %v7167_v45  ;;  %v7260_v44 = vld [vmem:[#allocation6 + $0xc2c] ss:$16 sps:$4 sm:$0xff]   ;;  %v775_v45 = vcombine.high %v8138_v40, %v8138_v40 }
 0x1c9   :  { %3894 = vmatprep.subr.bf16.mxu0 %v7172_v46  ;;  %4263 = vmatprep.subr.bf16.mxu1 %v7175_v47  ;;  %v7255_v46 = vld [vmem:[#allocation6 + $0xc20] ss:$16 sps:$4 sm:$0xff]   ;;  %v7258_v47 = vld [vmem:[#allocation6 + $0xc28] ss:$16 sps:$4 sm:$0xff]  }
 0x1cc   :  { %3895 = vmatpush1.bf16.msra.mxu0 %v7170_v12  ;;  %4264 = vmatpush1.bf16.msra.mxu1 %v7173_v48  ;;  %v7263_v12 = vld [vmem:[#allocation6 + $0xc44] ss:$16 sps:$4 sm:$0xff]   ;;  %v7266_v48 = vld [vmem:[#allocation6 + $0xc4c] ss:$16 sps:$4 sm:$0xff]  }
 0x1cd   :  { %3896 = vmatprep.subr.bf16.mxu0 %v7178_v50  ;;  %4265 = vmatprep.subr.bf16.mxu1 %v7181_v51  ;;  %v7261_v50 = vld [vmem:[#allocation6 + $0xc40] ss:$16 sps:$4 sm:$0xff]   ;;  %v7264_v51 = vld [vmem:[#allocation6 + $0xc48] ss:$16 sps:$4 sm:$0xff]  }
 0x1d0   :  { %3897 = vmatpush1.bf16.msra.mxu0 %v7176_v52  ;;  %4266 = vmatpush1.bf16.msra.mxu1 %v7179_v53  ;;  %v7269_v52 = vld [vmem:[#allocation6 + $0xc64] ss:$16 sps:$4 sm:$0xff]   ;;  %v7272_v53 = vld [vmem:[#allocation6 + $0xc6c] ss:$16 sps:$4 sm:$0xff]  }
 0x1d1   :  { %3898 = vmatprep.subr.bf16.mxu0 %v7184_v54  ;;  %4267 = vmatprep.subr.bf16.mxu1 %v7187_v55  ;;  %v7270_v54 = vld [vmem:[#allocation6 + $0xc68] ss:$16 sps:$4 sm:$0xff]   ;;  %v7275_v55 = vld [vmem:[#allocation6 + $0xc84] ss:$16 sps:$4 sm:$0xff]  }
 0x1d4   :  { %3899 = vmatpush1.bf16.msra.mxu0 %v7182_v56  ;;  %4268 = vmatpush1.bf16.msra.mxu1 %v7185_v57  ;;  %v7278_v56 = vld [vmem:[#allocation6 + $0xc8c] ss:$16 sps:$4 sm:$0xff]   ;;  %v7273_v57 = vld [vmem:[#allocation6 + $0xc80] ss:$16 sps:$4 sm:$0xff]  }
 0x1d5   :  { %3900 = vmatprep.subr.bf16.mxu0 %v7190_v58  ;;  %4269 = vmatprep.subr.bf16.mxu1 %v7193_v59  ;;  %v7276_v58 = vld [vmem:[#allocation6 + $0xc88] ss:$16 sps:$4 sm:$0xff]   ;;  %v7281_v59 = vld [vmem:[#allocation6 + $0xca4] ss:$16 sps:$4 sm:$0xff]  }
 0x1d8   :  { %3901 = vmatpush1.bf16.msra.mxu0 %v7188_v60  ;;  %4270 = vmatpush1.bf16.msra.mxu1 %v7191_v61  ;;  %v7284_v60 = vld [vmem:[#allocation6 + $0xcac] ss:$16 sps:$4 sm:$0xff]   ;;  %v7279_v61 = vld [vmem:[#allocation6 + $0xca0] ss:$16 sps:$4 sm:$0xff]  }
 0x1d9   :  { %3902 = vmatprep.subr.bf16.mxu0 %v7196_v62  ;;  %4271 = vmatprep.subr.bf16.mxu1 %v7199_v63  ;;  %v7282_v62 = vld [vmem:[#allocation6 + $0xca8] ss:$16 sps:$4 sm:$0xff]   ;;  %v7287_v63 = vld [vmem:[#allocation6 + $0xcc4] ss:$16 sps:$4 sm:$0xff]  }
 0x1dc   :  { %3903 = vmatpush1.bf16.msra.mxu0 %v7194_v0  ;;  %4272 = vmatpush1.bf16.msra.mxu1 %v7197_v1  ;;  %v7290_v0 = vld [vmem:[#allocation6 + $0xccc] ss:$16 sps:$4 sm:$0xff]   ;;  %v7285_v1 = vld [vmem:[#allocation6 + $0xcc0] ss:$16 sps:$4 sm:$0xff]  }
 0x1dd   :  { %3904 = vmatprep.subr.bf16.mxu0 %v7202_v2  ;;  %4273 = vmatprep.subr.bf16.mxu1 %v7205_v3  ;;  %v7288_v2 = vld [vmem:[#allocation6 + $0xcc8] ss:$16 sps:$4 sm:$0xff]   ;;  %v7293_v3 = vld [vmem:[#allocation6 + $0xce4] ss:$16 sps:$4 sm:$0xff]  }
 0x1e0   :  { %3905 = vmatpush1.bf16.msra.mxu0 %v7200_v4  ;;  %4274 = vmatpush1.bf16.msra.mxu1 %v7203_v5  ;;  %v7296_v4 = vld [vmem:[#allocation6 + $0xcec] ss:$16 sps:$4 sm:$0xff]   ;;  %v7291_v5 = vld [vmem:[#allocation6 + $0xce0] ss:$16 sps:$4 sm:$0xff]  }
 0x1e1   :  { %3906 = vmatprep.subr.bf16.mxu0 %v7208_v6  ;;  %4275 = vmatprep.subr.bf16.mxu1 %v7211_v7  ;;  %v7294_v6 = vld [vmem:[#allocation6 + $0xce8] ss:$16 sps:$4 sm:$0xff]   ;;  %v7299_v7 = vld [vmem:[#allocation6 + $0xd04] ss:$16 sps:$4 sm:$0xff]  }
 0x1e4   :  { %3907 = vmatpush1.bf16.msra.mxu0 %v7206_v8  ;;  %4276 = vmatpush1.bf16.msra.mxu1 %v7209_v9  ;;  %v7302_v8 = vld [vmem:[#allocation6 + $0xd0c] ss:$16 sps:$4 sm:$0xff]   ;;  %v7297_v9 = vld [vmem:[#allocation6 + $0xd00] ss:$16 sps:$4 sm:$0xff]  }
 0x1e5   :  { %3908 = vmatprep.subr.bf16.mxu0 %v7214_v10  ;;  %4277 = vmatprep.subr.bf16.mxu1 %v7217_v11  ;;  %v7300_v10 = vld [vmem:[#allocation6 + $0xd08] ss:$16 sps:$4 sm:$0xff]   ;;  %v7305_v11 = vld [vmem:[#allocation6 + $0xd24] ss:$16 sps:$4 sm:$0xff]  }
 0x1e8   :  { %3909 = vmatpush1.bf16.msra.mxu0 %v7212_v13  ;;  %4278 = vmatpush1.bf16.msra.mxu1 %v7215_v14  ;;  %v7308_v13 = vld [vmem:[#allocation6 + $0xd2c] ss:$16 sps:$4 sm:$0xff]   ;;  %v7303_v14 = vld [vmem:[#allocation6 + $0xd20] ss:$16 sps:$4 sm:$0xff]  }
 0x1e9   :  { %3910 = vmatprep.subr.bf16.mxu0 %v7220_v15  ;;  %4279 = vmatprep.subr.bf16.mxu1 %v7223_v16  ;;  %v7306_v15 = vld [vmem:[#allocation6 + $0xd28] ss:$16 sps:$4 sm:$0xff]   ;;  %v7311_v16 = vld [vmem:[#allocation6 + $0xd44] ss:$16 sps:$4 sm:$0xff]  }
 0x1ec   :  { %3911 = vmatpush1.bf16.msra.mxu0 %v7218_v17  ;;  %4280 = vmatpush1.bf16.msra.mxu1 %v7221_v18  ;;  %v7314_v17 = vld [vmem:[#allocation6 + $0xd4c] ss:$16 sps:$4 sm:$0xff]   ;;  %v7309_v18 = vld [vmem:[#allocation6 + $0xd40] ss:$16 sps:$4 sm:$0xff]  }
 0x1ed   :  { %3912 = vmatprep.subr.bf16.mxu0 %v7226_v20  ;;  %4281 = vmatprep.subr.bf16.mxu1 %v7229_v21  ;;  %v7312_v20 = vld [vmem:[#allocation6 + $0xd48] ss:$16 sps:$4 sm:$0xff]   ;;  %v7317_v21 = vld [vmem:[#allocation6 + $0xd64] ss:$16 sps:$4 sm:$0xff]  }
 0x1f0   :  { %3913 = vmatpush1.bf16.msra.mxu0 %v7224_v23  ;;  %4282 = vmatpush1.bf16.msra.mxu1 %v7227_v24  ;;  %v7320_v23 = vld [vmem:[#allocation6 + $0xd6c] ss:$16 sps:$4 sm:$0xff]   ;;  %v7315_v24 = vld [vmem:[#allocation6 + $0xd60] ss:$16 sps:$4 sm:$0xff]  }
 0x1f1   :  { %3914 = vmatprep.subr.bf16.mxu0 %v7232_v26  ;;  %4283 = vmatprep.subr.bf16.mxu1 %v7235_v28  ;;  %v7318_v26 = vld [vmem:[#allocation6 + $0xd68] ss:$16 sps:$4 sm:$0xff]   ;;  %v7323_v28 = vld [vmem:[#allocation6 + $0xd84] ss:$16 sps:$4 sm:$0xff]  }
 0x1f4   :  { %3915 = vmatpush1.bf16.msra.mxu0 %v7230_v29  ;;  %4284 = vmatpush1.bf16.msra.mxu1 %v7233_v19  ;;  %v7326_v29 = vld [vmem:[#allocation6 + $0xd8c] ss:$16 sps:$4 sm:$0xff]   ;;  %v7321_v19 = vld [vmem:[#allocation6 + $0xd80] ss:$16 sps:$4 sm:$0xff]  }
 0x1f5   :  { %3916 = vmatprep.subr.bf16.mxu0 %v7238_v30  ;;  %4285 = vmatprep.subr.bf16.mxu1 %v7241_v31  ;;  %v7324_v30 = vld [vmem:[#allocation6 + $0xd88] ss:$16 sps:$4 sm:$0xff]   ;;  %v7329_v31 = vld [vmem:[#allocation6 + $0xda4] ss:$16 sps:$4 sm:$0xff]  }
 0x1f8   :  { %3917 = vmatpush1.bf16.msra.mxu0 %v7236_v32  ;;  %4286 = vmatpush1.bf16.msra.mxu1 %v7239_v33  ;;  %v7332_v32 = vld [vmem:[#allocation6 + $0xdac] ss:$16 sps:$4 sm:$0xff]   ;;  %v7327_v33 = vld [vmem:[#allocation6 + $0xda0] ss:$16 sps:$4 sm:$0xff]  }
 0x1f9   :  { %3918 = vmatprep.subr.bf16.mxu0 %v7244_v34  ;;  %4287 = vmatprep.subr.bf16.mxu1 %v7247_v35  ;;  %v7330_v34 = vld [vmem:[#allocation6 + $0xda8] ss:$16 sps:$4 sm:$0xff]   ;;  %v7335_v35 = vld [vmem:[#allocation6 + $0xdc4] ss:$16 sps:$4 sm:$0xff]  }
 0x1fc   :  { %3919 = vmatpush1.bf16.msra.mxu0 %v7242_v37  ;;  %4288 = vmatpush1.bf16.msra.mxu1 %v7245_v38  ;;  %v7338_v37 = vld [vmem:[#allocation6 + $0xdcc] ss:$16 sps:$4 sm:$0xff]   ;;  %v7333_v38 = vld [vmem:[#allocation6 + $0xdc0] ss:$16 sps:$4 sm:$0xff]  }
 0x1fd   :  { %3929 = vmatprep.subr.bf16.mxu0 %v7251_v39  ;;  %4298 = vmatprep.subr.bf16.mxu1 %v7254_v27  ;;  %v7336_v39 = vld [vmem:[#allocation6 + $0xdc8] ss:$16 sps:$4 sm:$0xff]   ;;  %v7341_v27 = vld [vmem:[#allocation6 + $0xde4] ss:$16 sps:$4 sm:$0xff]  }
 0x1ff   :  { %3921 = vmatmul.mubr.bf16.vlgmr.msra.gmra.mrb[0].mxu0 %v8128_v36  ;;  %4290 = vmatmul.mubr.bf16.vlgmr.msra.gmra.mrb[0].mxu1 %v8128_v36  ;;  %v7267_v36 = vld [vmem:[#allocation6 + $0xc60] ss:$16 sps:$4 sm:$0xff]  }
 0x200   :  { %3930 = vmatpush1.bf16.msra.mxu0 %v7249_v41  ;;  %4299 = vmatpush1.bf16.msra.mxu1 %v7252_v25  ;;  %v7344_v41 = vld [vmem:[#allocation6 + $0xdec] ss:$16 sps:$4 sm:$0xff]   ;;  %v760_v25 = vcombine.high %v8134_v22, %v8134_v22 }
 0x201   :  { %3931 = vmatprep.subr.bf16.mxu0 %v7257_v42  ;;  %4300 = vmatprep.subr.bf16.mxu1 %v7260_v44  ;;  %v7339_v42 = vld [vmem:[#allocation6 + $0xde0] ss:$16 sps:$4 sm:$0xff]   ;;  %v7342_v44 = vld [vmem:[#allocation6 + $0xde8] ss:$16 sps:$4 sm:$0xff]  }
 0x202   :  { %3961 = vmatprep.mubr.bf16.mxu0 %v775_v45  ;;  %4330 = vmatprep.mubr.bf16.mxu1 %v775_v45  ;;  %v7347_v45 = vld [vmem:[#allocation6 + $0xe04] ss:$16 sps:$4 sm:$0xff]  }
 0x204   :  { %3932 = vmatpush1.bf16.msra.mxu0 %v7255_v46  ;;  %4301 = vmatpush1.bf16.msra.mxu1 %v7258_v47  ;;  %v7350_v46 = vld [vmem:[#allocation6 + $0xe0c] ss:$16 sps:$4 sm:$0xff]   ;;  %v7345_v47 = vld [vmem:[#allocation6 + $0xe00] ss:$16 sps:$4 sm:$0xff]  }
 0x205   :  { %3933 = vmatprep.subr.bf16.mxu0 %v7263_v12  ;;  %4302 = vmatprep.subr.bf16.mxu1 %v7266_v48  ;;  %v7348_v12 = vld [vmem:[#allocation6 + $0xe08] ss:$16 sps:$4 sm:$0xff]   ;;  %v8147_v48 = vrot.slane %v760_v25, %v8088_v49  ;;  %v7359_v49 = vld [vmem:[#allocation6 + $0xe44] ss:$16 sps:$4 sm:$0xff]   ;;  %v7429_v25 = vld [vmem:[#allocation6 + $0xfc0] ss:$16 sps:$4 sm:$0xff]  }
 0x207   :  { %v776_v22 = vcombine.high %v8147_v48, %v8147_v48 }
 0x208   :  { %3934 = vmatpush1.bf16.msra.mxu0 %v7261_v50  ;;  %4303 = vmatpush1.bf16.msra.mxu1 %v7264_v51  ;;  %v7353_v50 = vld [vmem:[#allocation6 + $0xe24] ss:$16 sps:$4 sm:$0xff]   ;;  %v7356_v51 = vld [vmem:[#allocation6 + $0xe2c] ss:$16 sps:$4 sm:$0xff]  }
 0x209   :  { %3935 = vmatprep.subr.bf16.mxu0 %v7269_v52  ;;  %4304 = vmatprep.subr.bf16.mxu1 %v7272_v53  ;;  %v7351_v52 = vld [vmem:[#allocation6 + $0xe20] ss:$16 sps:$4 sm:$0xff]   ;;  %v7354_v53 = vld [vmem:[#allocation6 + $0xe28] ss:$16 sps:$4 sm:$0xff]  }
 0x20c   :  { %3936 = vmatpush1.bf16.msra.mxu0 %v7267_v36  ;;  %4305 = vmatpush1.bf16.msra.mxu1 %v7270_v54  ;;  %v7362_v36 = vld [vmem:[#allocation6 + $0xe4c] ss:$16 sps:$4 sm:$0xff]   ;;  %v7357_v54 = vld [vmem:[#allocation6 + $0xe40] ss:$16 sps:$4 sm:$0xff]  }
 0x20d   :  { %3937 = vmatprep.subr.bf16.mxu0 %v7275_v55  ;;  %4306 = vmatprep.subr.bf16.mxu1 %v7278_v56  ;;  %v7360_v55 = vld [vmem:[#allocation6 + $0xe48] ss:$16 sps:$4 sm:$0xff]   ;;  %v7365_v56 = vld [vmem:[#allocation6 + $0xe64] ss:$16 sps:$4 sm:$0xff]  }
 0x210   :  { %3938 = vmatpush1.bf16.msra.mxu0 %v7273_v57  ;;  %4307 = vmatpush1.bf16.msra.mxu1 %v7276_v58  ;;  %v7368_v57 = vld [vmem:[#allocation6 + $0xe6c] ss:$16 sps:$4 sm:$0xff]   ;;  %v7366_v58 = vld [vmem:[#allocation6 + $0xe68] ss:$16 sps:$4 sm:$0xff]  }
 0x211   :  { %3939 = vmatprep.subr.bf16.mxu0 %v7281_v59  ;;  %4308 = vmatprep.subr.bf16.mxu1 %v7284_v60  ;;  %v7371_v59 = vld [vmem:[#allocation6 + $0xe84] ss:$16 sps:$4 sm:$0xff]   ;;  %v7374_v60 = vld [vmem:[#allocation6 + $0xe8c] ss:$16 sps:$4 sm:$0xff]  }
 0x214   :  { %3940 = vmatpush1.bf16.msra.mxu0 %v7279_v61  ;;  %4309 = vmatpush1.bf16.msra.mxu1 %v7282_v62  ;;  %v7369_v61 = vld [vmem:[#allocation6 + $0xe80] ss:$16 sps:$4 sm:$0xff]   ;;  %v7372_v62 = vld [vmem:[#allocation6 + $0xe88] ss:$16 sps:$4 sm:$0xff]  }
 0x215   :  { %3941 = vmatprep.subr.bf16.mxu0 %v7287_v63  ;;  %4310 = vmatprep.subr.bf16.mxu1 %v7290_v0  ;;  %v7377_v63 = vld [vmem:[#allocation6 + $0xea4] ss:$16 sps:$4 sm:$0xff]   ;;  %v7380_v0 = vld [vmem:[#allocation6 + $0xeac] ss:$16 sps:$4 sm:$0xff]  }
 0x218   :  { %3942 = vmatpush1.bf16.msra.mxu0 %v7285_v1  ;;  %4311 = vmatpush1.bf16.msra.mxu1 %v7288_v2  ;;  %v7375_v1 = vld [vmem:[#allocation6 + $0xea0] ss:$16 sps:$4 sm:$0xff]   ;;  %v7378_v2 = vld [vmem:[#allocation6 + $0xea8] ss:$16 sps:$4 sm:$0xff]  }
 0x219   :  { %3943 = vmatprep.subr.bf16.mxu0 %v7293_v3  ;;  %4312 = vmatprep.subr.bf16.mxu1 %v7296_v4  ;;  %v7383_v3 = vld [vmem:[#allocation6 + $0xec4] ss:$16 sps:$4 sm:$0xff]   ;;  %v7386_v4 = vld [vmem:[#allocation6 + $0xecc] ss:$16 sps:$4 sm:$0xff]  }
 0x21c   :  { %3944 = vmatpush1.bf16.msra.mxu0 %v7291_v5  ;;  %4313 = vmatpush1.bf16.msra.mxu1 %v7294_v6  ;;  %v7381_v5 = vld [vmem:[#allocation6 + $0xec0] ss:$16 sps:$4 sm:$0xff]   ;;  %v7384_v6 = vld [vmem:[#allocation6 + $0xec8] ss:$16 sps:$4 sm:$0xff]  }
 0x21d   :  { %3945 = vmatprep.subr.bf16.mxu0 %v7299_v7  ;;  %4314 = vmatprep.subr.bf16.mxu1 %v7302_v8  ;;  %v7389_v7 = vld [vmem:[#allocation6 + $0xee4] ss:$16 sps:$4 sm:$0xff]   ;;  %v7392_v8 = vld [vmem:[#allocation6 + $0xeec] ss:$16 sps:$4 sm:$0xff]  }
 0x220   :  { %3946 = vmatpush1.bf16.msra.mxu0 %v7297_v9  ;;  %4315 = vmatpush1.bf16.msra.mxu1 %v7300_v10  ;;  %v7387_v9 = vld [vmem:[#allocation6 + $0xee0] ss:$16 sps:$4 sm:$0xff]   ;;  %v7390_v10 = vld [vmem:[#allocation6 + $0xee8] ss:$16 sps:$4 sm:$0xff]  }
 0x221   :  { %3947 = vmatprep.subr.bf16.mxu0 %v7305_v11  ;;  %4316 = vmatprep.subr.bf16.mxu1 %v7308_v13  ;;  %v7395_v11 = vld [vmem:[#allocation6 + $0xf04] ss:$16 sps:$4 sm:$0xff]   ;;  %v7398_v13 = vld [vmem:[#allocation6 + $0xf0c] ss:$16 sps:$4 sm:$0xff]  }
 0x224   :  { %3948 = vmatpush1.bf16.msra.mxu0 %v7303_v14  ;;  %4317 = vmatpush1.bf16.msra.mxu1 %v7306_v15  ;;  %v7393_v14 = vld [vmem:[#allocation6 + $0xf00] ss:$16 sps:$4 sm:$0xff]   ;;  %v7396_v15 = vld [vmem:[#allocation6 + $0xf08] ss:$16 sps:$4 sm:$0xff]  }
 0x225   :  { %3949 = vmatprep.subr.bf16.mxu0 %v7311_v16  ;;  %4318 = vmatprep.subr.bf16.mxu1 %v7314_v17  ;;  %v7401_v16 = vld [vmem:[#allocation6 + $0xf24] ss:$16 sps:$4 sm:$0xff]   ;;  %v7404_v17 = vld [vmem:[#allocation6 + $0xf2c] ss:$16 sps:$4 sm:$0xff]  }
 0x228   :  { %3950 = vmatpush1.bf16.msra.mxu0 %v7309_v18  ;;  %4319 = vmatpush1.bf16.msra.mxu1 %v7312_v20  ;;  %v7399_v18 = vld [vmem:[#allocation6 + $0xf20] ss:$16 sps:$4 sm:$0xff]   ;;  %v7402_v20 = vld [vmem:[#allocation6 + $0xf28] ss:$16 sps:$4 sm:$0xff]  }
 0x229   :  { %3951 = vmatprep.subr.bf16.mxu0 %v7317_v21  ;;  %4320 = vmatprep.subr.bf16.mxu1 %v7320_v23  ;;  %v7407_v21 = vld [vmem:[#allocation6 + $0xf44] ss:$16 sps:$4 sm:$0xff]   ;;  %v7410_v23 = vld [vmem:[#allocation6 + $0xf4c] ss:$16 sps:$4 sm:$0xff]  }
 0x22c   :  { %3952 = vmatpush1.bf16.msra.mxu0 %v7315_v24  ;;  %4321 = vmatpush1.bf16.msra.mxu1 %v7318_v26  ;;  %v7405_v24 = vld [vmem:[#allocation6 + $0xf40] ss:$16 sps:$4 sm:$0xff]   ;;  %v7408_v26 = vld [vmem:[#allocation6 + $0xf48] ss:$16 sps:$4 sm:$0xff]  }
 0x22d   :  { %3953 = vmatprep.subr.bf16.mxu0 %v7323_v28  ;;  %4322 = vmatprep.subr.bf16.mxu1 %v7326_v29  ;;  %v7413_v28 = vld [vmem:[#allocation6 + $0xf64] ss:$16 sps:$4 sm:$0xff]   ;;  %v7416_v29 = vld [vmem:[#allocation6 + $0xf6c] ss:$16 sps:$4 sm:$0xff]  }
 0x230   :  { %3954 = vmatpush1.bf16.msra.mxu0 %v7321_v19  ;;  %4323 = vmatpush1.bf16.msra.mxu1 %v7324_v30  ;;  %v7411_v19 = vld [vmem:[#allocation6 + $0xf60] ss:$16 sps:$4 sm:$0xff]   ;;  %v7414_v30 = vld [vmem:[#allocation6 + $0xf68] ss:$16 sps:$4 sm:$0xff]  }
 0x231   :  { %3955 = vmatprep.subr.bf16.mxu0 %v7329_v31  ;;  %4324 = vmatprep.subr.bf16.mxu1 %v7332_v32  ;;  %v7419_v31 = vld [vmem:[#allocation6 + $0xf84] ss:$16 sps:$4 sm:$0xff]   ;;  %v7422_v32 = vld [vmem:[#allocation6 + $0xf8c] ss:$16 sps:$4 sm:$0xff]  }
 0x234   :  { %3956 = vmatpush1.bf16.msra.mxu0 %v7327_v33  ;;  %4325 = vmatpush1.bf16.msra.mxu1 %v7330_v34  ;;  %v7417_v33 = vld [vmem:[#allocation6 + $0xf80] ss:$16 sps:$4 sm:$0xff]   ;;  %v7420_v34 = vld [vmem:[#allocation6 + $0xf88] ss:$16 sps:$4 sm:$0xff]  }
 0x235   :  { %3957 = vmatprep.subr.bf16.mxu0 %v7335_v35  ;;  %4326 = vmatprep.subr.bf16.mxu1 %v7338_v37  ;;  %v7425_v35 = vld [vmem:[#allocation6 + $0xfa4] ss:$16 sps:$4 sm:$0xff]   ;;  %v7428_v37 = vld [vmem:[#allocation6 + $0xfac] ss:$16 sps:$4 sm:$0xff]  }
 0x238   :  { %3958 = vmatpush1.bf16.msra.mxu0 %v7333_v38  ;;  %4327 = vmatpush1.bf16.msra.mxu1 %v7336_v39  ;;  %v7423_v38 = vld [vmem:[#allocation6 + $0xfa0] ss:$16 sps:$4 sm:$0xff]   ;;  %v7426_v39 = vld [vmem:[#allocation6 + $0xfa8] ss:$16 sps:$4 sm:$0xff]  }
 0x239   :  { %3959 = vmatprep.subr.bf16.mxu0 %v7341_v27  ;;  %4328 = vmatprep.subr.bf16.mxu1 %v7344_v41  ;;  %v7431_v27 = vld [vmem:[#allocation6 + $0xfc4] ss:$16 sps:$4 sm:$0xff]   ;;  %v7434_v41 = vld [vmem:[#allocation6 + $0xfcc] ss:$16 sps:$4 sm:$0xff]  }
 0x23c   :  { %3960 = vmatpush1.bf16.msra.mxu0 %v7339_v42  ;;  %4329 = vmatpush1.bf16.msra.mxu1 %v7342_v44  ;;  %v7432_v42 = vld [vmem:[#allocation6 + $0xfc8] ss:$16 sps:$4 sm:$0xff]   ;;  %v7437_v44 = vld [vmem:[#allocation6 + $0xfe4] ss:$16 sps:$4 sm:$0xff]  }
 0x23d   :  { %3970 = vmatprep.subr.bf16.mxu0 %v7347_v45  ;;  %4339 = vmatprep.subr.bf16.mxu1 %v7350_v46  ;;  %v7440_v45 = vld [vmem:[#allocation6 + $0xfec] ss:$16 sps:$4 sm:$0xff]   ;;  %v7435_v46 = vld [vmem:[#allocation6 + $0xfe0] ss:$16 sps:$4 sm:$0xff]  }
 0x23f   :  { %3962 = vmatmul.mubr.bf16.vlgmr.msra.gmra.mrb[0].mxu0 %v8138_v40  ;;  %4331 = vmatmul.mubr.bf16.vlgmr.msra.gmra.mrb[0].mxu1 %v8138_v40  ;;  %v7363_v40 = vld [vmem:[#allocation6 + $0xe60] ss:$16 sps:$4 sm:$0xff]  }
 0x240   :  { %3971 = vmatpush1.bf16.msra.mxu0 %v7345_v47  ;;  %4340 = vmatpush1.bf16.msra.mxu1 %v7348_v12  ;;  %v7438_v47 = vld [vmem:[#allocation6 + $0xfe8] ss:$16 sps:$4 sm:$0xff]   ;;  %v7444_v12 = vld [vmem:[#allocation6 + $0x1004] ss:$16 sps:$4 sm:$0xff]  }
 0x241   :  { %3972 = vmatprep.subr.bf16.mxu0 %v7353_v50  ;;  %4341 = vmatprep.subr.bf16.mxu1 %v7356_v51  ;;  %v7447_v50 = vld [vmem:[#allocation6 + $0x100c] ss:$16 sps:$4 sm:$0xff]  }
 0x242   :  { %4002 = vmatprep.mubr.bf16.mxu0 %v776_v22  ;;  %4371 = vmatprep.mubr.bf16.mxu1 %v776_v22  ;;  %v8153_v51 = vld.sshfl [vmem:[#allocation3 + $0x20] sm:$0x33 pattern:$0x76325410]  ;;  %v7442_v22 = vld [vmem:[#allocation6 + $0x1000] ss:$16 sps:$4 sm:$0xff]  }
 0x244   :  { %3973 = vmatpush1.bf16.msra.mxu0 %v7351_v52  ;;  %4342 = vmatpush1.bf16.msra.mxu1 %v7354_v53  ;;  %v7445_v52 = vld [vmem:[#allocation6 + $0x1008] ss:$16 sps:$4 sm:$0xff]   ;;  %v7450_v53 = vld [vmem:[#allocation6 + $0x1024] ss:$16 sps:$4 sm:$0xff]  }
 0x245   :  { %3974 = vmatprep.subr.bf16.mxu0 %v7359_v49  ;;  %4343 = vmatprep.subr.bf16.mxu1 %v7362_v36  ;;  %v7453_v49 = vld [vmem:[#allocation6 + $0x102c] ss:$16 sps:$4 sm:$0xff]   ;;  %v784_v36 = vcombine.high %v8153_v51, %v8153_v51 }
 0x248   :  { %3975 = vmatpush1.bf16.msra.mxu0 %v7357_v54  ;;  %4344 = vmatpush1.bf16.msra.mxu1 %v7360_v55  ;;  %v7448_v54 = vld [vmem:[#allocation6 + $0x1020] ss:$16 sps:$4 sm:$0xff]   ;;  %v7451_v55 = vld [vmem:[#allocation6 + $0x1028] ss:$16 sps:$4 sm:$0xff]  }
 0x249   :  { %3976 = vmatprep.subr.bf16.mxu0 %v7365_v56  ;;  %4345 = vmatprep.subr.bf16.mxu1 %v7368_v57  ;;  %v7456_v56 = vld [vmem:[#allocation6 + $0x1044] ss:$16 sps:$4 sm:$0xff]   ;;  %v7459_v57 = vld [vmem:[#allocation6 + $0x104c] ss:$16 sps:$4 sm:$0xff]  }
 0x24c   :  { %3977 = vmatpush1.bf16.msra.mxu0 %v7363_v40  ;;  %4346 = vmatpush1.bf16.msra.mxu1 %v7366_v58  ;;  %v7454_v40 = vld [vmem:[#allocation6 + $0x1040] ss:$16 sps:$4 sm:$0xff]   ;;  %v7457_v58 = vld [vmem:[#allocation6 + $0x1048] ss:$16 sps:$4 sm:$0xff]  }
 0x24d   :  { %3978 = vmatprep.subr.bf16.mxu0 %v7371_v59  ;;  %4347 = vmatprep.subr.bf16.mxu1 %v7374_v60  ;;  %v7462_v59 = vld [vmem:[#allocation6 + $0x1064] ss:$16 sps:$4 sm:$0xff]   ;;  %v7465_v60 = vld [vmem:[#allocation6 + $0x106c] ss:$16 sps:$4 sm:$0xff]  }
 0x250   :  { %3979 = vmatpush1.bf16.msra.mxu0 %v7369_v61  ;;  %4348 = vmatpush1.bf16.msra.mxu1 %v7372_v62  ;;  %v7463_v61 = vld [vmem:[#allocation6 + $0x1068] ss:$16 sps:$4 sm:$0xff]   ;;  %v7468_v62 = vld [vmem:[#allocation6 + $0x1084] ss:$16 sps:$4 sm:$0xff]  }
 0x251   :  { %3980 = vmatprep.subr.bf16.mxu0 %v7377_v63  ;;  %4349 = vmatprep.subr.bf16.mxu1 %v7380_v0  ;;  %v7471_v63 = vld [vmem:[#allocation6 + $0x108c] ss:$16 sps:$4 sm:$0xff]   ;;  %v7466_v0 = vld [vmem:[#allocation6 + $0x1080] ss:$16 sps:$4 sm:$0xff]  }
 0x254   :  { %3981 = vmatpush1.bf16.msra.mxu0 %v7375_v1  ;;  %4350 = vmatpush1.bf16.msra.mxu1 %v7378_v2  ;;  %v7469_v1 = vld [vmem:[#allocation6 + $0x1088] ss:$16 sps:$4 sm:$0xff]   ;;  %v7474_v2 = vld [vmem:[#allocation6 + $0x10a4] ss:$16 sps:$4 sm:$0xff]  }
 0x255   :  { %3982 = vmatprep.subr.bf16.mxu0 %v7383_v3  ;;  %4351 = vmatprep.subr.bf16.mxu1 %v7386_v4  ;;  %v7477_v3 = vld [vmem:[#allocation6 + $0x10ac] ss:$16 sps:$4 sm:$0xff]   ;;  %v7472_v4 = vld [vmem:[#allocation6 + $0x10a0] ss:$16 sps:$4 sm:$0xff]  }
 0x258   :  { %3983 = vmatpush1.bf16.msra.mxu0 %v7381_v5  ;;  %4352 = vmatpush1.bf16.msra.mxu1 %v7384_v6  ;;  %v7475_v5 = vld [vmem:[#allocation6 + $0x10a8] ss:$16 sps:$4 sm:$0xff]   ;;  %v7480_v6 = vld [vmem:[#allocation6 + $0x10c4] ss:$16 sps:$4 sm:$0xff]  }
 0x259   :  { %3984 = vmatprep.subr.bf16.mxu0 %v7389_v7  ;;  %4353 = vmatprep.subr.bf16.mxu1 %v7392_v8  ;;  %v7483_v7 = vld [vmem:[#allocation6 + $0x10cc] ss:$16 sps:$4 sm:$0xff]   ;;  %v7478_v8 = vld [vmem:[#allocation6 + $0x10c0] ss:$16 sps:$4 sm:$0xff]  }
 0x25c   :  { %3985 = vmatpush1.bf16.msra.mxu0 %v7387_v9  ;;  %4354 = vmatpush1.bf16.msra.mxu1 %v7390_v10  ;;  %v7481_v9 = vld [vmem:[#allocation6 + $0x10c8] ss:$16 sps:$4 sm:$0xff]   ;;  %v7486_v10 = vld [vmem:[#allocation6 + $0x10e4] ss:$16 sps:$4 sm:$0xff]  }
 0x25d   :  { %3986 = vmatprep.subr.bf16.mxu0 %v7395_v11  ;;  %4355 = vmatprep.subr.bf16.mxu1 %v7398_v13  ;;  %v7489_v11 = vld [vmem:[#allocation6 + $0x10ec] ss:$16 sps:$4 sm:$0xff]   ;;  %v7484_v13 = vld [vmem:[#allocation6 + $0x10e0] ss:$16 sps:$4 sm:$0xff]  }
 0x260   :  { %3987 = vmatpush1.bf16.msra.mxu0 %v7393_v14  ;;  %4356 = vmatpush1.bf16.msra.mxu1 %v7396_v15  ;;  %v7487_v14 = vld [vmem:[#allocation6 + $0x10e8] ss:$16 sps:$4 sm:$0xff]   ;;  %v7492_v15 = vld [vmem:[#allocation6 + $0x1104] ss:$16 sps:$4 sm:$0xff]  }
 0x261   :  { %3988 = vmatprep.subr.bf16.mxu0 %v7401_v16  ;;  %4357 = vmatprep.subr.bf16.mxu1 %v7404_v17  ;;  %v7495_v16 = vld [vmem:[#allocation6 + $0x110c] ss:$16 sps:$4 sm:$0xff]   ;;  %v7490_v17 = vld [vmem:[#allocation6 + $0x1100] ss:$16 sps:$4 sm:$0xff]  }
 0x264   :  { %3989 = vmatpush1.bf16.msra.mxu0 %v7399_v18  ;;  %4358 = vmatpush1.bf16.msra.mxu1 %v7402_v20  ;;  %v7493_v18 = vld [vmem:[#allocation6 + $0x1108] ss:$16 sps:$4 sm:$0xff]   ;;  %v7498_v20 = vld [vmem:[#allocation6 + $0x1124] ss:$16 sps:$4 sm:$0xff]  }
 0x265   :  { %3990 = vmatprep.subr.bf16.mxu0 %v7407_v21  ;;  %4359 = vmatprep.subr.bf16.mxu1 %v7410_v23  ;;  %v7501_v21 = vld [vmem:[#allocation6 + $0x112c] ss:$16 sps:$4 sm:$0xff]   ;;  %v7496_v23 = vld [vmem:[#allocation6 + $0x1120] ss:$16 sps:$4 sm:$0xff]  }
 0x268   :  { %3991 = vmatpush1.bf16.msra.mxu0 %v7405_v24  ;;  %4360 = vmatpush1.bf16.msra.mxu1 %v7408_v26  ;;  %v7499_v24 = vld [vmem:[#allocation6 + $0x1128] ss:$16 sps:$4 sm:$0xff]   ;;  %v7504_v26 = vld [vmem:[#allocation6 + $0x1144] ss:$16 sps:$4 sm:$0xff]  }
 0x269   :  { %3992 = vmatprep.subr.bf16.mxu0 %v7413_v28  ;;  %4361 = vmatprep.subr.bf16.mxu1 %v7416_v29  ;;  %v7507_v28 = vld [vmem:[#allocation6 + $0x114c] ss:$16 sps:$4 sm:$0xff]   ;;  %v7502_v29 = vld [vmem:[#allocation6 + $0x1140] ss:$16 sps:$4 sm:$0xff]  }
 0x26c   :  { %3993 = vmatpush1.bf16.msra.mxu0 %v7411_v19  ;;  %4362 = vmatpush1.bf16.msra.mxu1 %v7414_v30  ;;  %v7505_v19 = vld [vmem:[#allocation6 + $0x1148] ss:$16 sps:$4 sm:$0xff]   ;;  %v7510_v30 = vld [vmem:[#allocation6 + $0x1164] ss:$16 sps:$4 sm:$0xff]  }
 0x26d   :  { %3994 = vmatprep.subr.bf16.mxu0 %v7419_v31  ;;  %4363 = vmatprep.subr.bf16.mxu1 %v7422_v32  ;;  %v7513_v31 = vld [vmem:[#allocation6 + $0x116c] ss:$16 sps:$4 sm:$0xff]   ;;  %v7508_v32 = vld [vmem:[#allocation6 + $0x1160] ss:$16 sps:$4 sm:$0xff]  }
 0x270   :  { %3995 = vmatpush1.bf16.msra.mxu0 %v7417_v33  ;;  %4364 = vmatpush1.bf16.msra.mxu1 %v7420_v34  ;;  %v7511_v33 = vld [vmem:[#allocation6 + $0x1168] ss:$16 sps:$4 sm:$0xff]   ;;  %v7516_v34 = vld [vmem:[#allocation6 + $0x1184] ss:$16 sps:$4 sm:$0xff]  }
 0x271   :  { %3996 = vmatprep.subr.bf16.mxu0 %v7425_v35  ;;  %4365 = vmatprep.subr.bf16.mxu1 %v7428_v37  ;;  %v7519_v35 = vld [vmem:[#allocation6 + $0x118c] ss:$16 sps:$4 sm:$0xff]   ;;  %v7514_v37 = vld [vmem:[#allocation6 + $0x1180] ss:$16 sps:$4 sm:$0xff]  }
 0x274   :  { %3997 = vmatpush1.bf16.msra.mxu0 %v7423_v38  ;;  %4366 = vmatpush1.bf16.msra.mxu1 %v7426_v39  ;;  %v7517_v38 = vld [vmem:[#allocation6 + $0x1188] ss:$16 sps:$4 sm:$0xff]   ;;  %v7522_v39 = vld [vmem:[#allocation6 + $0x11a4] ss:$16 sps:$4 sm:$0xff]  }
 0x275   :  { %3998 = vmatprep.subr.bf16.mxu0 %v7431_v27  ;;  %4367 = vmatprep.subr.bf16.mxu1 %v7434_v41  ;;  %v7525_v27 = vld [vmem:[#allocation6 + $0x11ac] ss:$16 sps:$4 sm:$0xff]   ;;  %v7520_v41 = vld [vmem:[#allocation6 + $0x11a0] ss:$16 sps:$4 sm:$0xff]  }
 0x278   :  { %3999 = vmatpush1.bf16.msra.mxu0 %v7429_v25  ;;  %4368 = vmatpush1.bf16.msra.mxu1 %v7432_v42  ;;  %v7523_v25 = vld [vmem:[#allocation6 + $0x11a8] ss:$16 sps:$4 sm:$0xff]   ;;  %v7528_v42 = vld [vmem:[#allocation6 + $0x11c4] ss:$16 sps:$4 sm:$0xff]  }
 0x279   :  { %4000 = vmatprep.subr.bf16.mxu0 %v7437_v44  ;;  %4369 = vmatprep.subr.bf16.mxu1 %v7440_v45  ;;  %v7531_v44 = vld [vmem:[#allocation6 + $0x11cc] ss:$16 sps:$4 sm:$0xff]   ;;  %v7526_v45 = vld [vmem:[#allocation6 + $0x11c0] ss:$16 sps:$4 sm:$0xff]  }
 0x27c   :  { %4001 = vmatpush1.bf16.msra.mxu0 %v7435_v46  ;;  %4370 = vmatpush1.bf16.msra.mxu1 %v7438_v47  ;;  %v7529_v46 = vld [vmem:[#allocation6 + $0x11c8] ss:$16 sps:$4 sm:$0xff]   ;;  %v7534_v47 = vld [vmem:[#allocation6 + $0x11e4] ss:$16 sps:$4 sm:$0xff]  }
 0x27d   :  { %4011 = vmatprep.subr.bf16.mxu0 %v7444_v12  ;;  %4380 = vmatprep.subr.bf16.mxu1 %v7447_v50  ;;  %v7537_v12 = vld [vmem:[#allocation6 + $0x11ec] ss:$16 sps:$4 sm:$0xff]   ;;  %v7532_v50 = vld [vmem:[#allocation6 + $0x11e0] ss:$16 sps:$4 sm:$0xff]  }
 0x27f   :  { %4003 = vmatmul.mubr.bf16.vlgmr.msra.gmra.mrb[0].mxu0 %v8147_v48  ;;  %4372 = vmatmul.mubr.bf16.vlgmr.msra.gmra.mrb[0].mxu1 %v8147_v48  ;;  %v7460_v48 = vld [vmem:[#allocation6 + $0x1060] ss:$16 sps:$4 sm:$0xff]  }
 0x280   :  { %4012 = vmatpush1.bf16.msra.mxu0 %v7442_v22  ;;  %4381 = vmatpush1.bf16.msra.mxu1 %v7445_v52  ;;  %v7535_v22 = vld [vmem:[#allocation6 + $0x11e8] ss:$16 sps:$4 sm:$0xff]  }
 0x281   :  { %4013 = vmatprep.subr.bf16.mxu0 %v7450_v53  ;;  %4382 = vmatprep.subr.bf16.mxu1 %v7453_v49  ;;  %v7540_v52 = vld [vmem:[#allocation9 + $0x4] ss:$16 sps:$4 sm:$0xff]   ;;  %v7543_v53 = vld [vmem:[#allocation9 + $0xc] ss:$16 sps:$4 sm:$0xff]   ;;  %v7538_v49 = vld [vmem:[#allocation9] ss:$16 sps:$4 sm:$0xff]  }
 0x282   :  { %4043 = vmatprep.mubr.bf16.mxu0 %v784_v36  ;;  %4412 = vmatprep.mubr.bf16.mxu1 %v784_v36  ;;  %v7541_v36 = vld [vmem:[#allocation9 + $0x8] ss:$16 sps:$4 sm:$0xff]  }
 0x284   :  { %4014 = vmatpush1.bf16.msra.mxu0 %v7448_v54  ;;  %4383 = vmatpush1.bf16.msra.mxu1 %v7451_v55  ;;  %v7546_v54 = vld [vmem:[#allocation9 + $0x24] ss:$16 sps:$4 sm:$0xff]   ;;  %v7549_v55 = vld [vmem:[#allocation9 + $0x2c] ss:$16 sps:$4 sm:$0xff]  }
 0x285   :  { %4015 = vmatprep.subr.bf16.mxu0 %v7456_v56  ;;  %4384 = vmatprep.subr.bf16.mxu1 %v7459_v57  ;;  %v7544_v56 = vld [vmem:[#allocation9 + $0x20] ss:$16 sps:$4 sm:$0xff]   ;;  %v7547_v57 = vld [vmem:[#allocation9 + $0x28] ss:$16 sps:$4 sm:$0xff]  }
 0x288   :  { %4016 = vmatpush1.bf16.msra.mxu0 %v7454_v40  ;;  %4385 = vmatpush1.bf16.msra.mxu1 %v7457_v58  ;;  %v7552_v40 = vld [vmem:[#allocation9 + $0x44] ss:$16 sps:$4 sm:$0xff]   ;;  %v7555_v58 = vld [vmem:[#allocation9 + $0x4c] ss:$16 sps:$4 sm:$0xff]  }
 0x289   :  { %4017 = vmatprep.subr.bf16.mxu0 %v7462_v59  ;;  %4386 = vmatprep.subr.bf16.mxu1 %v7465_v60  ;;  %v7550_v59 = vld [vmem:[#allocation9 + $0x40] ss:$16 sps:$4 sm:$0xff]   ;;  %v7553_v60 = vld [vmem:[#allocation9 + $0x48] ss:$16 sps:$4 sm:$0xff]  }
 0x28c   :  { %4018 = vmatpush1.bf16.msra.mxu0 %v7460_v48  ;;  %4387 = vmatpush1.bf16.msra.mxu1 %v7463_v61  ;;  %v7558_v48 = vld [vmem:[#allocation9 + $0x64] ss:$16 sps:$4 sm:$0xff]   ;;  %v7561_v61 = vld [vmem:[#allocation9 + $0x6c] ss:$16 sps:$4 sm:$0xff]  }
 0x28d   :  { %4019 = vmatprep.subr.bf16.mxu0 %v7468_v62  ;;  %4388 = vmatprep.subr.bf16.mxu1 %v7471_v63  ;;  %v7556_v62 = vld [vmem:[#allocation9 + $0x60] ss:$16 sps:$4 sm:$0xff]   ;;  %v7564_v63 = vld [vmem:[#allocation9 + $0x84] ss:$16 sps:$4 sm:$0xff]  }
 0x290   :  { %4020 = vmatpush1.bf16.msra.mxu0 %v7466_v0  ;;  %4389 = vmatpush1.bf16.msra.mxu1 %v7469_v1  ;;  %v7567_v0 = vld [vmem:[#allocation9 + $0x8c] ss:$16 sps:$4 sm:$0xff]   ;;  %v7562_v1 = vld [vmem:[#allocation9 + $0x80] ss:$16 sps:$4 sm:$0xff]  }
 0x291   :  { %4021 = vmatprep.subr.bf16.mxu0 %v7474_v2  ;;  %4390 = vmatprep.subr.bf16.mxu1 %v7477_v3  ;;  %v7565_v2 = vld [vmem:[#allocation9 + $0x88] ss:$16 sps:$4 sm:$0xff]   ;;  %v7570_v3 = vld [vmem:[#allocation9 + $0xa4] ss:$16 sps:$4 sm:$0xff]  }
 0x294   :  { %4022 = vmatpush1.bf16.msra.mxu0 %v7472_v4  ;;  %4391 = vmatpush1.bf16.msra.mxu1 %v7475_v5  ;;  %v7573_v4 = vld [vmem:[#allocation9 + $0xac] ss:$16 sps:$4 sm:$0xff]   ;;  %v7568_v5 = vld [vmem:[#allocation9 + $0xa0] ss:$16 sps:$4 sm:$0xff]  }
 0x295   :  { %4023 = vmatprep.subr.bf16.mxu0 %v7480_v6  ;;  %4392 = vmatprep.subr.bf16.mxu1 %v7483_v7  ;;  %v7571_v6 = vld [vmem:[#allocation9 + $0xa8] ss:$16 sps:$4 sm:$0xff]   ;;  %v7576_v7 = vld [vmem:[#allocation9 + $0xc4] ss:$16 sps:$4 sm:$0xff]  }
 0x298   :  { %4024 = vmatpush1.bf16.msra.mxu0 %v7478_v8  ;;  %4393 = vmatpush1.bf16.msra.mxu1 %v7481_v9  ;;  %v7579_v8 = vld [vmem:[#allocation9 + $0xcc] ss:$16 sps:$4 sm:$0xff]   ;;  %v7574_v9 = vld [vmem:[#allocation9 + $0xc0] ss:$16 sps:$4 sm:$0xff]  }
 0x299   :  { %4025 = vmatprep.subr.bf16.mxu0 %v7486_v10  ;;  %4394 = vmatprep.subr.bf16.mxu1 %v7489_v11  ;;  %v7577_v10 = vld [vmem:[#allocation9 + $0xc8] ss:$16 sps:$4 sm:$0xff]   ;;  %v7582_v11 = vld [vmem:[#allocation9 + $0xe4] ss:$16 sps:$4 sm:$0xff]  }
 0x29c   :  { %4026 = vmatpush1.bf16.msra.mxu0 %v7484_v13  ;;  %4395 = vmatpush1.bf16.msra.mxu1 %v7487_v14  ;;  %v7585_v13 = vld [vmem:[#allocation9 + $0xec] ss:$16 sps:$4 sm:$0xff]   ;;  %v7580_v14 = vld [vmem:[#allocation9 + $0xe0] ss:$16 sps:$4 sm:$0xff]  }
 0x29d   :  { %4027 = vmatprep.subr.bf16.mxu0 %v7492_v15  ;;  %4396 = vmatprep.subr.bf16.mxu1 %v7495_v16  ;;  %v7583_v15 = vld [vmem:[#allocation9 + $0xe8] ss:$16 sps:$4 sm:$0xff]   ;;  %v7588_v16 = vld [vmem:[#allocation9 + $0x104] ss:$16 sps:$4 sm:$0xff]  }
 0x2a0   :  { %4028 = vmatpush1.bf16.msra.mxu0 %v7490_v17  ;;  %4397 = vmatpush1.bf16.msra.mxu1 %v7493_v18  ;;  %v7591_v17 = vld [vmem:[#allocation9 + $0x10c] ss:$16 sps:$4 sm:$0xff]   ;;  %v7586_v18 = vld [vmem:[#allocation9 + $0x100] ss:$16 sps:$4 sm:$0xff]  }
 0x2a1   :  { %4029 = vmatprep.subr.bf16.mxu0 %v7498_v20  ;;  %4398 = vmatprep.subr.bf16.mxu1 %v7501_v21  ;;  %v7589_v20 = vld [vmem:[#allocation9 + $0x108] ss:$16 sps:$4 sm:$0xff]   ;;  %v7594_v21 = vld [vmem:[#allocation9 + $0x124] ss:$16 sps:$4 sm:$0xff]  }
 0x2a4   :  { %4030 = vmatpush1.bf16.msra.mxu0 %v7496_v23  ;;  %4399 = vmatpush1.bf16.msra.mxu1 %v7499_v24  ;;  %v7597_v23 = vld [vmem:[#allocation9 + $0x12c] ss:$16 sps:$4 sm:$0xff]   ;;  %v7592_v24 = vld [vmem:[#allocation9 + $0x120] ss:$16 sps:$4 sm:$0xff]  }
 0x2a5   :  { %4031 = vmatprep.subr.bf16.mxu0 %v7504_v26  ;;  %4400 = vmatprep.subr.bf16.mxu1 %v7507_v28  ;;  %v7595_v26 = vld [vmem:[#allocation9 + $0x128] ss:$16 sps:$4 sm:$0xff]   ;;  %v7600_v28 = vld [vmem:[#allocation9 + $0x144] ss:$16 sps:$4 sm:$0xff]  }
 0x2a8   :  { %4032 = vmatpush1.bf16.msra.mxu0 %v7502_v29  ;;  %4401 = vmatpush1.bf16.msra.mxu1 %v7505_v19  ;;  %v7603_v29 = vld [vmem:[#allocation9 + $0x14c] ss:$16 sps:$4 sm:$0xff]   ;;  %v7598_v19 = vld [vmem:[#allocation9 + $0x140] ss:$16 sps:$4 sm:$0xff]  }
 0x2a9   :  { %4033 = vmatprep.subr.bf16.mxu0 %v7510_v30  ;;  %4402 = vmatprep.subr.bf16.mxu1 %v7513_v31  ;;  %v7601_v30 = vld [vmem:[#allocation9 + $0x148] ss:$16 sps:$4 sm:$0xff]   ;;  %v7606_v31 = vld [vmem:[#allocation9 + $0x164] ss:$16 sps:$4 sm:$0xff]  }
 0x2ac   :  { %4034 = vmatpush1.bf16.msra.mxu0 %v7508_v32  ;;  %4403 = vmatpush1.bf16.msra.mxu1 %v7511_v33  ;;  %v7609_v32 = vld [vmem:[#allocation9 + $0x16c] ss:$16 sps:$4 sm:$0xff]   ;;  %v7604_v33 = vld [vmem:[#allocation9 + $0x160] ss:$16 sps:$4 sm:$0xff]  }
 0x2ad   :  { %4035 = vmatprep.subr.bf16.mxu0 %v7516_v34  ;;  %4404 = vmatprep.subr.bf16.mxu1 %v7519_v35  ;;  %v7607_v34 = vld [vmem:[#allocation9 + $0x168] ss:$16 sps:$4 sm:$0xff]   ;;  %v7612_v35 = vld [vmem:[#allocation9 + $0x184] ss:$16 sps:$4 sm:$0xff]  }
 0x2b0   :  { %4036 = vmatpush1.bf16.msra.mxu0 %v7514_v37  ;;  %4405 = vmatpush1.bf16.msra.mxu1 %v7517_v38  ;;  %v7615_v37 = vld [vmem:[#allocation9 + $0x18c] ss:$16 sps:$4 sm:$0xff]   ;;  %v7610_v38 = vld [vmem:[#allocation9 + $0x180] ss:$16 sps:$4 sm:$0xff]  }
 0x2b1   :  { %4037 = vmatprep.subr.bf16.mxu0 %v7522_v39  ;;  %4406 = vmatprep.subr.bf16.mxu1 %v7525_v27  ;;  %v7613_v39 = vld [vmem:[#allocation9 + $0x188] ss:$16 sps:$4 sm:$0xff]   ;;  %v7618_v27 = vld [vmem:[#allocation9 + $0x1a4] ss:$16 sps:$4 sm:$0xff]  }
 0x2b4   :  { %4038 = vmatpush1.bf16.msra.mxu0 %v7520_v41  ;;  %4407 = vmatpush1.bf16.msra.mxu1 %v7523_v25  ;;  %v7621_v41 = vld [vmem:[#allocation9 + $0x1ac] ss:$16 sps:$4 sm:$0xff]   ;;  %v7616_v25 = vld [vmem:[#allocation9 + $0x1a0] ss:$16 sps:$4 sm:$0xff]  }
 0x2b5   :  { %4039 = vmatprep.subr.bf16.mxu0 %v7528_v42  ;;  %4408 = vmatprep.subr.bf16.mxu1 %v7531_v44  ;;  %v7619_v42 = vld [vmem:[#allocation9 + $0x1a8] ss:$16 sps:$4 sm:$0xff]   ;;  %v7624_v44 = vld [vmem:[#allocation9 + $0x1c4] ss:$16 sps:$4 sm:$0xff]  }
 0x2b8   :  { %4040 = vmatpush1.bf16.msra.mxu0 %v7526_v45  ;;  %4409 = vmatpush1.bf16.msra.mxu1 %v7529_v46  ;;  %v7627_v45 = vld [vmem:[#allocation9 + $0x1cc] ss:$16 sps:$4 sm:$0xff]   ;;  %v7622_v46 = vld [vmem:[#allocation9 + $0x1c0] ss:$16 sps:$4 sm:$0xff]  }
 0x2b9   :  { %4041 = vmatprep.subr.bf16.mxu0 %v7534_v47  ;;  %4410 = vmatprep.subr.bf16.mxu1 %v7537_v12  ;;  %v7625_v47 = vld [vmem:[#allocation9 + $0x1c8] ss:$16 sps:$4 sm:$0xff]   ;;  %v7630_v12 = vld [vmem:[#allocation9 + $0x1e4] ss:$16 sps:$4 sm:$0xff]  }
 0x2bc   :  { %4042 = vmatpush1.bf16.msra.mxu0 %v7532_v50  ;;  %4411 = vmatpush1.bf16.msra.mxu1 %v7535_v22  ;;  %v7633_v50 = vld [vmem:[#allocation9 + $0x1ec] ss:$16 sps:$4 sm:$0xff]   ;;  %v7628_v22 = vld [vmem:[#allocation9 + $0x1e0] ss:$16 sps:$4 sm:$0xff]  }
 0x2bd   :  { %5264 = vmatprep.subr.bf16.mxu0 %v7540_v52  ;;  %5346 = vmatprep.subr.bf16.mxu1 %v7543_v53  ;;  %v7631_v52 = vld [vmem:[#allocation9 + $0x1e8] ss:$16 sps:$4 sm:$0xff]   ;;  %v7636_v53 = vld [vmem:[#allocation9 + $0x204] ss:$16 sps:$4 sm:$0xff]  }
 0x2bf   :  { %4044 = vmatmul.mubr.bf16.vlgmr.msra.gmra.mrb[0].mxu0 %v8153_v51  ;;  %4413 = vmatmul.mubr.bf16.vlgmr.msra.gmra.mrb[0].mxu1 %v8153_v51  ;;  %v7559_v51 = vld [vmem:[#allocation9 + $0x68] ss:$16 sps:$4 sm:$0xff]  }
 0x2c0   :  { %5265 = vmatpush1.bf16.msra.mxu0 %v7538_v49  ;;  %5347 = vmatpush1.bf16.msra.mxu1 %v7541_v36  ;;  %v7639_v49 = vld [vmem:[#allocation9 + $0x20c] ss:$16 sps:$4 sm:$0xff]   ;;  %v4442_v36 = vsub.s32 0, %v8085_v43 }
 0x2c1   :  { %5266 = vmatprep.subr.bf16.mxu0 %v7546_v54  ;;  %5348 = vmatprep.subr.bf16.mxu1 %v7549_v55  ;;  %v4446_v54 = vsub.s32 1, %v8085_v43  ;;  %v4450_v55 = vsub.s32 2, %v8085_v43 }
 0x2c4   :  { %5267 = vmatpush1.bf16.msra.mxu0 %v7544_v56  ;;  %5349 = vmatpush1.bf16.msra.mxu1 %v7547_v57  ;;  %v4454_v56 = vsub.s32 3, %v8085_v43  ;;  %v4438_v57 = vld [vmem:[#allocation8] sm:$0xf] }
 0x2c5   :  { %5268 = vmatprep.subr.bf16.mxu0 %v7552_v40  ;;  %5350 = vmatprep.subr.bf16.mxu1 %v7555_v58  ;;  %v4443_v40 = vrot.slane %v4438_v57, %v4442_v36  ;;  %v4447_v58 = vrot.slane %v4438_v57, %v4446_v54 }
 0x2c8   :  { %5269 = vmatpush1.bf16.msra.mxu0 %v7550_v59  ;;  %5351 = vmatpush1.bf16.msra.mxu1 %v7553_v60  ;;  %v4451_v59 = vrot.slane %v4438_v57, %v4450_v55  ;;  %v4455_v60 = vrot.slane %v4438_v57, %v4454_v56  ;;  %v7685_v57 = vld [vmem:[#allocation9 + $0x308] ss:$16 sps:$4 sm:$0xff]  }
 0x2c9   :  { %5270 = vmatprep.subr.bf16.mxu0 %v7558_v48  ;;  %5352 = vmatprep.subr.bf16.mxu1 %v7561_v61 }
 0x2cc   :  { %5271 = vmatpush1.bf16.msra.mxu0 %v7556_v62  ;;  %5353 = vmatpush1.bf16.msra.mxu1 %v7559_v51  ;;  %v4456_v62 = vcombine.low %v4443_v40, %v4447_v58  ;;  %v4457_v51 = vcombine.low %v4451_v59, %v4455_v60  ;;  %v7690_v40 = vld [vmem:[#allocation9 + $0x324] ss:$16 sps:$4 sm:$0xff]   ;;  %v7693_v58 = vld [vmem:[#allocation9 + $0x32c] ss:$16 sps:$4 sm:$0xff]   ;;  %v7688_v59 = vld [vmem:[#allocation9 + $0x320] ss:$16 sps:$4 sm:$0xff]  }
 0x2cd   :  { %5272 = vmatprep.subr.bf16.mxu0 %v7564_v63  ;;  %5354 = vmatprep.subr.bf16.mxu1 %v7567_v0  ;;  %v7691_v60 = vld [vmem:[#allocation9 + $0x328] ss:$16 sps:$4 sm:$0xff]  }
 0x2d0   :  { %5273 = vmatpush1.bf16.msra.mxu0 %v7562_v1  ;;  %5355 = vmatpush1.bf16.msra.mxu1 %v7565_v2 }
 0x2d1   :  { %5274 = vmatprep.subr.bf16.mxu0 %v7570_v3  ;;  %5356 = vmatprep.subr.bf16.mxu1 %v7573_v4 }
 0x2d4   :  { %5275 = vmatpush1.bf16.msra.mxu0 %v7568_v5  ;;  %5357 = vmatpush1.bf16.msra.mxu1 %v7571_v6 }
 0x2d5   :  { %5276 = vmatprep.subr.bf16.mxu0 %v7576_v7  ;;  %5358 = vmatprep.subr.bf16.mxu1 %v7579_v8 }
 0x2d8   :  { %5277 = vmatpush1.bf16.msra.mxu0 %v7574_v9  ;;  %5359 = vmatpush1.bf16.msra.mxu1 %v7577_v10 }
 0x2d9   :  { %5278 = vmatprep.subr.bf16.mxu0 %v7582_v11  ;;  %5360 = vmatprep.subr.bf16.mxu1 %v7585_v13 }
 0x2dc   :  { %5279 = vmatpush1.bf16.msra.mxu0 %v7580_v14  ;;  %5361 = vmatpush1.bf16.msra.mxu1 %v7583_v15  ;;  %v7634_v15 = vld [vmem:[#allocation9 + $0x200] ss:$16 sps:$4 sm:$0xff]  }
 0x2dd   :  { %5280 = vmatprep.subr.bf16.mxu0 %v7588_v16  ;;  %5362 = vmatprep.subr.bf16.mxu1 %v7591_v17  ;;  %v7637_v16 = vld [vmem:[#allocation9 + $0x208] ss:$16 sps:$4 sm:$0xff]  }
 0x2e0   :  { %5281 = vmatpush1.bf16.msra.mxu0 %v7586_v18  ;;  %5363 = vmatpush1.bf16.msra.mxu1 %v7589_v20  ;;  %v7642_v18 = vld [vmem:[#allocation9 + $0x224] ss:$16 sps:$4 sm:$0xff]   ;;  %v7645_v20 = vld [vmem:[#allocation9 + $0x22c] ss:$16 sps:$4 sm:$0xff]  }
 0x2e1   :  { %5282 = vmatprep.subr.bf16.mxu0 %v7594_v21  ;;  %5364 = vmatprep.subr.bf16.mxu1 %v7597_v23  ;;  %v7640_v23 = vld [vmem:[#allocation9 + $0x220] ss:$16 sps:$4 sm:$0xff]  }
 0x2e4   :  { %5283 = vmatpush1.bf16.msra.mxu0 %v7592_v24  ;;  %5365 = vmatpush1.bf16.msra.mxu1 %v7595_v26  ;;  %v7643_v24 = vld [vmem:[#allocation9 + $0x228] ss:$16 sps:$4 sm:$0xff]   ;;  %v7648_v26 = vld [vmem:[#allocation9 + $0x244] ss:$16 sps:$4 sm:$0xff]  }
 0x2e5   :  { %5284 = vmatprep.subr.bf16.mxu0 %v7600_v28  ;;  %5366 = vmatprep.subr.bf16.mxu1 %v7603_v29  ;;  %v7651_v28 = vld [vmem:[#allocation9 + $0x24c] ss:$16 sps:$4 sm:$0xff]   ;;  %v7646_v29 = vld [vmem:[#allocation9 + $0x240] ss:$16 sps:$4 sm:$0xff]  }
 0x2e8   :  { %5285 = vmatpush1.bf16.msra.mxu0 %v7598_v19  ;;  %5367 = vmatpush1.bf16.msra.mxu1 %v7601_v30  ;;  %v7649_v19 = vld [vmem:[#allocation9 + $0x248] ss:$16 sps:$4 sm:$0xff]   ;;  %v7654_v30 = vld [vmem:[#allocation9 + $0x264] ss:$16 sps:$4 sm:$0xff]  }
 0x2e9   :  { %5286 = vmatprep.subr.bf16.mxu0 %v7606_v31  ;;  %5368 = vmatprep.subr.bf16.mxu1 %v7609_v32  ;;  %v7657_v31 = vld [vmem:[#allocation9 + $0x26c] ss:$16 sps:$4 sm:$0xff]   ;;  %v7652_v32 = vld [vmem:[#allocation9 + $0x260] ss:$16 sps:$4 sm:$0xff]  }
 0x2ec   :  { %5287 = vmatpush1.bf16.msra.mxu0 %v7604_v33  ;;  %5369 = vmatpush1.bf16.msra.mxu1 %v7607_v34  ;;  %v7655_v33 = vld [vmem:[#allocation9 + $0x268] ss:$16 sps:$4 sm:$0xff]   ;;  %v7660_v34 = vld [vmem:[#allocation9 + $0x284] ss:$16 sps:$4 sm:$0xff]  }
 0x2ed   :  { %5288 = vmatprep.subr.bf16.mxu0 %v7612_v35  ;;  %5370 = vmatprep.subr.bf16.mxu1 %v7615_v37  ;;  %v7663_v35 = vld [vmem:[#allocation9 + $0x28c] ss:$16 sps:$4 sm:$0xff]   ;;  %v7658_v37 = vld [vmem:[#allocation9 + $0x280] ss:$16 sps:$4 sm:$0xff]  }
 0x2f0   :  { %5289 = vmatpush1.bf16.msra.mxu0 %v7610_v38  ;;  %5371 = vmatpush1.bf16.msra.mxu1 %v7613_v39  ;;  %v7661_v38 = vld [vmem:[#allocation9 + $0x288] ss:$16 sps:$4 sm:$0xff]   ;;  %v7666_v39 = vld [vmem:[#allocation9 + $0x2a4] ss:$16 sps:$4 sm:$0xff]  }
 0x2f1   :  { %5290 = vmatprep.subr.bf16.mxu0 %v7618_v27  ;;  %5372 = vmatprep.subr.bf16.mxu1 %v7621_v41  ;;  %v7669_v27 = vld [vmem:[#allocation9 + $0x2ac] ss:$16 sps:$4 sm:$0xff]   ;;  %v7664_v41 = vld [vmem:[#allocation9 + $0x2a0] ss:$16 sps:$4 sm:$0xff]  }
 0x2f4   :  { %5291 = vmatpush1.bf16.msra.mxu0 %v7616_v25  ;;  %5373 = vmatpush1.bf16.msra.mxu1 %v7619_v42  ;;  %v7667_v25 = vld [vmem:[#allocation9 + $0x2a8] ss:$16 sps:$4 sm:$0xff]   ;;  %v7672_v42 = vld [vmem:[#allocation9 + $0x2c4] ss:$16 sps:$4 sm:$0xff]  }
 0x2f5   :  { %5292 = vmatprep.subr.bf16.mxu0 %v7624_v44  ;;  %5374 = vmatprep.subr.bf16.mxu1 %v7627_v45  ;;  %v7675_v44 = vld [vmem:[#allocation9 + $0x2cc] ss:$16 sps:$4 sm:$0xff]   ;;  %v7670_v45 = vld [vmem:[#allocation9 + $0x2c0] ss:$16 sps:$4 sm:$0xff]  }
 0x2f8   :  { %5293 = vmatpush1.bf16.msra.mxu0 %v7622_v46  ;;  %5375 = vmatpush1.bf16.msra.mxu1 %v7625_v47  ;;  %v7673_v46 = vld [vmem:[#allocation9 + $0x2c8] ss:$16 sps:$4 sm:$0xff]   ;;  %v7678_v47 = vld [vmem:[#allocation9 + $0x2e4] ss:$16 sps:$4 sm:$0xff]  }
 0x2f9   :  { %5294 = vmatprep.subr.bf16.mxu0 %v7630_v12  ;;  %5376 = vmatprep.subr.bf16.mxu1 %v7633_v50  ;;  %v7681_v12 = vld [vmem:[#allocation9 + $0x2ec] ss:$16 sps:$4 sm:$0xff]   ;;  %v7676_v50 = vld [vmem:[#allocation9 + $0x2e0] ss:$16 sps:$4 sm:$0xff]  }
 0x2fc   :  { %5295 = vmatpush1.bf16.msra.mxu0 %v7628_v22  ;;  %5377 = vmatpush1.bf16.msra.mxu1 %v7631_v52  ;;  %v7679_v22 = vld [vmem:[#allocation9 + $0x2e8] ss:$16 sps:$4 sm:$0xff]   ;;  %v7684_v52 = vld [vmem:[#allocation9 + $0x304] ss:$16 sps:$4 sm:$0xff]  }
 0x2fd   :  { %5305 = vmatprep.subr.bf16.mxu0 %v7636_v53  ;;  %5387 = vmatprep.subr.bf16.mxu1 %v7639_v49  ;;  %v7687_v53 = vld [vmem:[#allocation9 + $0x30c] ss:$16 sps:$4 sm:$0xff]   ;;  %v7682_v49 = vld [vmem:[#allocation9 + $0x300] ss:$16 sps:$4 sm:$0xff]  }
 0x392   :  { %v4045_v48 = vpop.f32.mrb[0].mxu0  ;;  %v4414_v61 = vpop.f32.mrb[0].mxu1 }
 0x393   :  { %v4047_v63 = vpop.f32.mrb[1].mxu0  ;;  %v4416_v0 = vpop.f32.mrb[1].mxu1 }
 0x394   :  { %v4425_v1 = vcombine.low %v4045_v48, %v4047_v63  ;;  %v4426_v2 = vcombine.low %v4414_v61, %v4416_v0  ;;  %v4049_v3 = vpop.f32.mrb[2].mxu0  ;;  %v4418_v4 = vpop.f32.mrb[2].mxu1  ;;  %v7696_v48 = vld [vmem:[#allocation9 + $0x344] ss:$16 sps:$4 sm:$0xff]   ;;  %v7699_v61 = vld [vmem:[#allocation9 + $0x34c] ss:$16 sps:$4 sm:$0xff]  }
 0x395   :  { %v4050_v5 = vpop.f32.mrb[3].mxu0  ;;  %v4419_v6 = vpop.f32.mrb[3].mxu1  ;;  %v7702_v63 = vld [vmem:[#allocation9 + $0x364] ss:$16 sps:$4 sm:$0xff]   ;;  %v7705_v0 = vld [vmem:[#allocation9 + $0x36c] ss:$16 sps:$4 sm:$0xff]  }
 0x396   :  { %v4460_v7 = vadd.f32 %v4456_v62, %v4425_v1  ;;  %v4461_v8 = vadd.f32 %v4457_v51, %v4426_v2  ;;  %v7694_v62 = vld [vmem:[#allocation9 + $0x340] ss:$16 sps:$4 sm:$0xff]   ;;  %v7697_v51 = vld [vmem:[#allocation9 + $0x348] ss:$16 sps:$4 sm:$0xff]   ;;  %v7708_v3 = vld [vmem:[#allocation9 + $0x384] ss:$16 sps:$4 sm:$0xff]  }
 0x397   :  { %v7700_v1 = vld [vmem:[#allocation9 + $0x360] ss:$16 sps:$4 sm:$0xff]   ;;  %v7703_v2 = vld [vmem:[#allocation9 + $0x368] ss:$16 sps:$4 sm:$0xff]   ;;  %v7711_v4 = vld [vmem:[#allocation9 + $0x38c] ss:$16 sps:$4 sm:$0xff]  }
 0x398   :  { %v4462_v9 = vmax.f32 %v4460_v7, 0.0  ;;  %v8173_v10 = vmax.f32 %v4461_v8, 0.0  ;;  %v7706_v5 = vld [vmem:[#allocation9 + $0x380] ss:$16 sps:$4 sm:$0xff]   ;;  %v7709_v6 = vld [vmem:[#allocation9 + $0x388] ss:$16 sps:$4 sm:$0xff]  }
 0x399   :  { %v7714_v7 = vld [vmem:[#allocation9 + $0x3a4] ss:$16 sps:$4 sm:$0xff]   ;;  %v7717_v8 = vld [vmem:[#allocation9 + $0x3ac] ss:$16 sps:$4 sm:$0xff]  }
 0x39a   :  { %v4466_v11 = vcombine.high %v4462_v9, %v4462_v9  ;;  %v4467_v13 = vcombine.high %v8173_v10, %v8173_v10  ;;  %v4470_v17 = vpack.c.bf16 %v4462_v9, %v4462_v9  ;;  %v7712_v9 = vld [vmem:[#allocation9 + $0x3a0] ss:$16 sps:$4 sm:$0xff]  }
 0x39c   :  { %v4471_v14 = vpack.c.bf16 %v4466_v11, %v4466_v11  ;;  %v4473_v21 = vpack.c.bf16 %v4467_v13, %v4467_v13  ;;  %v7715_v11 = vld [vmem:[#allocation9 + $0x3a8] ss:$16 sps:$4 sm:$0xff]   ;;  %v7720_v13 = vld [vmem:[#allocation9 + $0x3c4] ss:$16 sps:$4 sm:$0xff]  }
 0x39e   :  { %5296 = vmatprep.mubr.bf16.mxu0 %v4471_v14  ;;  %5378 = vmatprep.mubr.bf16.mxu1 %v4471_v14  ;;  %v7723_v14 = vld [vmem:[#allocation9 + $0x3cc] ss:$16 sps:$4 sm:$0xff]  }
 0x39f   :  { %5297 = vmatmul.mubr.bf16.vlgmr.msra.gmra.mrb[4].mxu0 %v4470_v17  ;;  %5379 = vmatmul.mubr.bf16.vlgmr.msra.gmra.mrb[4].mxu1 %v4470_v17  ;;  %v7726_v17 = vld [vmem:[#allocation9 + $0x3e4] ss:$16 sps:$4 sm:$0xff]  }
 0x3a0   :  { %5306 = vmatpush1.bf16.msra.mxu0 %v7634_v15  ;;  %5388 = vmatpush1.bf16.msra.mxu1 %v7637_v16  ;;  %v7718_v15 = vld [vmem:[#allocation9 + $0x3c0] ss:$16 sps:$4 sm:$0xff]   ;;  %v7721_v16 = vld [vmem:[#allocation9 + $0x3c8] ss:$16 sps:$4 sm:$0xff]  }
 0x3a1   :  { %5337 = vmatprep.mubr.bf16.mxu0 %v4473_v21  ;;  %5419 = vmatprep.mubr.bf16.mxu1 %v4473_v21  ;;  %v7727_v21 = vld [vmem:[#allocation9 + $0x3e8] ss:$16 sps:$4 sm:$0xff]  }
 0x3a2   :  { %5307 = vmatprep.subr.bf16.mxu0 %v7642_v18  ;;  %5389 = vmatprep.subr.bf16.mxu1 %v7645_v20  ;;  %v7729_v18 = vld [vmem:[#allocation9 + $0x3ec] ss:$16 sps:$4 sm:$0xff]   ;;  %v7724_v20 = vld [vmem:[#allocation9 + $0x3e0] ss:$16 sps:$4 sm:$0xff]  }
 0x3a4   :  { %5308 = vmatpush1.bf16.msra.mxu0 %v7640_v23  ;;  %5390 = vmatpush1.bf16.msra.mxu1 %v7643_v24  ;;  %v7730_v23 = vld [vmem:[#allocation12 + $0x40] sm:$0xff]  }
 0x3a5   :  { %5309 = vmatprep.subr.bf16.mxu0 %v7648_v26  ;;  %5391 = vmatprep.subr.bf16.mxu1 %v7651_v28  ;;  %v7731_v24 = vld [vmem:[#allocation12 + $0xc0] sm:$0xff]  }
 0x3a6   :  { %v7732_v26 = vld [vmem:[#allocation12] sm:$0xff]  }
 0x3a7   :  { %v7733_v28 = vld [vmem:[#allocation12 + $0x80] sm:$0xff]  }
 0x3a8   :  { %5310 = vmatpush1.bf16.msra.mxu0 %v7646_v29  ;;  %5392 = vmatpush1.bf16.msra.mxu1 %v7649_v19  ;;  %v4472_v29 = vpack.c.bf16 %v8173_v10, %v8173_v10  ;;  %v7734_v19 = vld [vmem:[#allocation12 + $0x48] sm:$0xff]   ;;  %v7742_v10 = vld [vmem:[#allocation12 + $0x58] sm:$0xff]  }
 0x3a9   :  { %5311 = vmatprep.subr.bf16.mxu0 %v7654_v30  ;;  %5393 = vmatprep.subr.bf16.mxu1 %v7657_v31  ;;  %v7735_v30 = vld [vmem:[#allocation12 + $0xc8] sm:$0xff]  }
 0x3aa   :  { %v7736_v31 = vld [vmem:[#allocation12 + $0x8] sm:$0xff]  }
 0x3ac   :  { %5312 = vmatpush1.bf16.msra.mxu0 %v7652_v32  ;;  %5394 = vmatpush1.bf16.msra.mxu1 %v7655_v33  ;;  %v7737_v32 = vld [vmem:[#allocation12 + $0x88] sm:$0xff]   ;;  %v7738_v33 = vld [vmem:[#allocation12 + $0x50] sm:$0xff]  }
 0x3ad   :  { %5313 = vmatprep.subr.bf16.mxu0 %v7660_v34  ;;  %5395 = vmatprep.subr.bf16.mxu1 %v7663_v35  ;;  %v7739_v34 = vld [vmem:[#allocation12 + $0xd0] sm:$0xff]  }
 0x3ae   :  { %v7740_v35 = vld [vmem:[#allocation12 + $0x10] sm:$0xff]  }
 0x3b0   :  { %5314 = vmatpush1.bf16.msra.mxu0 %v7658_v37  ;;  %5396 = vmatpush1.bf16.msra.mxu1 %v7661_v38  ;;  %v7741_v37 = vld [vmem:[#allocation12 + $0x90] sm:$0xff]   ;;  %v7743_v38 = vld [vmem:[#allocation12 + $0xd8] sm:$0xff]  }
 0x3b1   :  { %5315 = vmatprep.subr.bf16.mxu0 %v7666_v39  ;;  %5397 = vmatprep.subr.bf16.mxu1 %v7669_v27  ;;  %v7744_v39 = vld [vmem:[#allocation12 + $0x18] sm:$0xff]  }
 0x3b2   :  { %v7745_v27 = vld [vmem:[#allocation12 + $0x98] sm:$0xff]  }
 0x3b4   :  { %5316 = vmatpush1.bf16.msra.mxu0 %v7664_v41  ;;  %5398 = vmatpush1.bf16.msra.mxu1 %v7667_v25  ;;  %v7746_v41 = vld [vmem:[#allocation12 + $0x60] sm:$0xff]  }
 0x3b5   :  { %5317 = vmatprep.subr.bf16.mxu0 %v7672_v42  ;;  %5399 = vmatprep.subr.bf16.mxu1 %v7675_v44  ;;  %v7747_v25 = vld [vmem:[#allocation12 + $0xe0] sm:$0xff]  }
 0x3b6   :  { %v7748_v42 = vld [vmem:[#allocation12 + $0x20] sm:$0xff]  }
 0x3b7   :  { %v7749_v44 = vld [vmem:[#allocation12 + $0xa0] sm:$0xff]  }
 0x3b8   :  { %5318 = vmatpush1.bf16.msra.mxu0 %v7670_v45  ;;  %5400 = vmatpush1.bf16.msra.mxu1 %v7673_v46  ;;  %v7750_v45 = vld [vmem:[#allocation12 + $0x68] sm:$0xff]  }
 0x3b9   :  { %5319 = vmatprep.subr.bf16.mxu0 %v7678_v47  ;;  %5401 = vmatprep.subr.bf16.mxu1 %v7681_v12  ;;  %v7751_v46 = vld [vmem:[#allocation12 + $0xe8] sm:$0xff]  }
 0x3ba   :  { %v7752_v47 = vld [vmem:[#allocation12 + $0x28] sm:$0xff]  }
 0x3bb   :  { %v7753_v12 = vld [vmem:[#allocation12 + $0xa8] sm:$0xff]  }
 0x3bc   :  { %5320 = vmatpush1.bf16.msra.mxu0 %v7676_v50  ;;  %5402 = vmatpush1.bf16.msra.mxu1 %v7679_v22  ;;  %v7754_v50 = vld [vmem:[#allocation12 + $0x70] sm:$0xff]  }
 0x3bd   :  { %5321 = vmatprep.subr.bf16.mxu0 %v7684_v52  ;;  %5403 = vmatprep.subr.bf16.mxu1 %v7687_v53  ;;  %v7755_v22 = vld [vmem:[#allocation12 + $0xf0] sm:$0xff]  }
 0x3be   :  { %v7756_v52 = vld [vmem:[#allocation12 + $0x30] sm:$0xff]  }
 0x3bf   :  { %v7757_v53 = vld [vmem:[#allocation12 + $0xb0] sm:$0xff]  }
 0x3c0   :  { %5322 = vmatpush1.bf16.msra.mxu0 %v7682_v49  ;;  %5404 = vmatpush1.bf16.msra.mxu1 %v7685_v57  ;;  %v7758_v49 = vld [vmem:[#allocation12 + $0x78] sm:$0xff]  }
 0x3c1   :  { %5323 = vmatprep.subr.bf16.mxu0 %v7690_v40  ;;  %5405 = vmatprep.subr.bf16.mxu1 %v7693_v58  ;;  %v7759_v57 = vld [vmem:[#allocation12 + $0xf8] sm:$0xff]  }
 0x3c2   :  { %v7760_v40 = vld [vmem:[#allocation12 + $0x38] sm:$0xff]  }
 0x3c3   :  { %v7761_v58 = vld [vmem:[#allocation12 + $0xb8] sm:$0xff]  }
 0x3c4   :  { %5324 = vmatpush1.bf16.msra.mxu0 %v7688_v59  ;;  %5406 = vmatpush1.bf16.msra.mxu1 %v7691_v60  ;;  %v4602_v59 = vld [vmem:[#allocation11] sm:$0xf] }
 0x3c5   :  { %5325 = vmatprep.subr.bf16.mxu0 %v7696_v48  ;;  %5407 = vmatprep.subr.bf16.mxu1 %v7699_v61  ;;  %v4607_v60 = vrot.slane %v4602_v59, %v4442_v36  ;;  %v4615_v48 = vrot.slane %v4602_v59, %v4450_v55  ;;  %v4611_v61 = vrot.slane %v4602_v59, %v4446_v54 }
 0x3c8   :  { %5326 = vmatpush1.bf16.msra.mxu0 %v7694_v62  ;;  %5408 = vmatpush1.bf16.msra.mxu1 %v7697_v51  ;;  %v4619_v62 = vrot.slane %v4602_v59, %v4454_v56 }
 0x3c9   :  { %5327 = vmatprep.subr.bf16.mxu0 %v7702_v63  ;;  %5409 = vmatprep.subr.bf16.mxu1 %v7705_v0 }
 0x3cc   :  { %5328 = vmatpush1.bf16.msra.mxu0 %v7700_v1  ;;  %5410 = vmatpush1.bf16.msra.mxu1 %v7703_v2 }
 0x3cd   :  { %5329 = vmatprep.subr.bf16.mxu0 %v7708_v3  ;;  %5411 = vmatprep.subr.bf16.mxu1 %v7711_v4 }
 0x3d0   :  { %5330 = vmatpush1.bf16.msra.mxu0 %v7706_v5  ;;  %5412 = vmatpush1.bf16.msra.mxu1 %v7709_v6 }
 0x3d1   :  { %5331 = vmatprep.subr.bf16.mxu0 %v7714_v7  ;;  %5413 = vmatprep.subr.bf16.mxu1 %v7717_v8 }
 0x3d4   :  { %5332 = vmatpush1.bf16.msra.mxu0 %v7712_v9  ;;  %5414 = vmatpush1.bf16.msra.mxu1 %v7715_v11 }
 0x3d5   :  { %5333 = vmatprep.subr.bf16.mxu0 %v7720_v13  ;;  %5415 = vmatprep.subr.bf16.mxu1 %v7723_v14 }
 0x3d8   :  { %5334 = vmatpush1.bf16.msra.mxu0 %v7718_v15  ;;  %5416 = vmatpush1.bf16.msra.mxu1 %v7721_v16 }
 0x3d9   :  { %5335 = vmatprep.subr.bf16.mxu0 %v7726_v17  ;;  %5417 = vmatprep.subr.bf16.mxu1 %v7729_v18  ;;  %v6504_v17 = vld [vmem:[#allocation14] ss:$0 sm:$0xff] }
 0x3dc   :  { %5336 = vmatpush1.bf16.msra.mxu0 %v7724_v20  ;;  %5418 = vmatpush1.bf16.msra.mxu1 %v7727_v21 }
 0x3dd   :  { %6537 = vmatprep.subr.bf16.mxu0 %v7730_v23  ;;  %6559 = vmatprep.subr.bf16.mxu1 %v7731_v24 }
 0x3df   :  { %5338 = vmatmul.mubr.bf16.vlgmr.msra.gmra.mrb[4].mxu0 %v4472_v29  ;;  %5420 = vmatmul.mubr.bf16.vlgmr.msra.gmra.mrb[4].mxu1 %v4472_v29 }
 0x3e0   :  { %6538 = vmatpush3.bf16.msra.mxu0 %v7732_v26  ;;  %6560 = vmatpush3.bf16.msra.mxu1 %v7733_v28 }
 0x3e1   :  { %6539 = vmatprep.subr.bf16.mxu0 %v7734_v19  ;;  %6561 = vmatprep.subr.bf16.mxu1 %v7735_v30 }
 0x3e4   :  { %6540 = vmatpush3.bf16.msra.mxu0 %v7736_v31  ;;  %6562 = vmatpush3.bf16.msra.mxu1 %v7737_v32 }
 0x3e5   :  { %6541 = vmatprep.subr.bf16.mxu0 %v7738_v33  ;;  %6563 = vmatprep.subr.bf16.mxu1 %v7739_v34 }
 0x3e8   :  { %6542 = vmatpush3.bf16.msra.mxu0 %v7740_v35  ;;  %6564 = vmatpush3.bf16.msra.mxu1 %v7741_v37 }
 0x3e9   :  { %6543 = vmatprep.subr.bf16.mxu0 %v7742_v10  ;;  %6565 = vmatprep.subr.bf16.mxu1 %v7743_v38 }
 0x3ec   :  { %6544 = vmatpush3.bf16.msra.mxu0 %v7744_v39  ;;  %6566 = vmatpush3.bf16.msra.mxu1 %v7745_v27 }
 0x3ed   :  { %6545 = vmatprep.subr.bf16.mxu0 %v7746_v41  ;;  %6567 = vmatprep.subr.bf16.mxu1 %v7747_v25 }
 0x3f0   :  { %6546 = vmatpush3.bf16.msra.mxu0 %v7748_v42  ;;  %6568 = vmatpush3.bf16.msra.mxu1 %v7749_v44 }
 0x3f1   :  { %6547 = vmatprep.subr.bf16.mxu0 %v7750_v45  ;;  %6569 = vmatprep.subr.bf16.mxu1 %v7751_v46 }
 0x3f4   :  { %6548 = vmatpush3.bf16.msra.mxu0 %v7752_v47  ;;  %6570 = vmatpush3.bf16.msra.mxu1 %v7753_v12 }
 0x3f5   :  { %6549 = vmatprep.subr.bf16.mxu0 %v7754_v50  ;;  %6571 = vmatprep.subr.bf16.mxu1 %v7755_v22 }
 0x3f8   :  { %6550 = vmatpush3.bf16.msra.mxu0 %v7756_v52  ;;  %6572 = vmatpush3.bf16.msra.mxu1 %v7757_v53 }
 0x3f9   :  { %6551 = vmatprep.subr.bf16.mxu0 %v7758_v49  ;;  %6573 = vmatprep.subr.bf16.mxu1 %v7759_v57 }
 0x3fc   :  { %6552 = vmatpush3.bf16.msra.mxu0 %v7760_v40  ;;  %6574 = vmatpush3.bf16.msra.mxu1 %v7761_v58 }
 0x4b2   :  { %v5339_v51 = vpop.f32.mrb[4].mxu0  ;;  %v5421_v63 = vpop.f32.mrb[4].mxu1 }
 0x4b3   :  { %v6581_v0 = vadd.f32 %v5339_v51, %v4607_v60  ;;  %v6583_v1 = vadd.f32 %v5421_v63, %v4615_v48  ;;  %v5341_v2 = vpop.f32.mrb[5].mxu0  ;;  %v5423_v3 = vpop.f32.mrb[5].mxu1 }
 0x4b4   :  { %v6582_v4 = vadd.f32 %v5341_v2, %v4611_v61  ;;  %v6584_v5 = vadd.f32 %v5423_v3, %v4619_v62  ;;  %v5343_v6 = vpop.f32.mrb[6].mxu0  ;;  %v5425_v7 = vpop.f32.mrb[6].mxu1 }
 0x4b5   :  { %v5428_v36 = vmax.f32 %v6581_v0, 0.0  ;;  %v5430_v8 = vmax.f32 %v6583_v1, 0.0  ;;  %v5344_v9 = vpop.f32.mrb[7].mxu0  ;;  %v5426_v55 = vpop.f32.mrb[7].mxu1 }
 0x4b6   :  { %v5429_v11 = vmax.f32 %v6582_v4, 0.0  ;;  %v5431_v13 = vmax.f32 %v6584_v5, 0.0 }
 0x4b7   :  { %v5432_v43 = vpack.c.bf16 %v5428_v36, %v5428_v36  ;;  %v5434_v56 = vpack.c.bf16 %v5430_v8, %v5430_v8 }
 0x4b8   :  { %v5433_v54 = vpack.c.bf16 %v5429_v11, %v5429_v11  ;;  %v5435_v14 = vpack.c.bf16 %v5431_v13, %v5431_v13 }
 0x4ba   :  { %5731 = vmatprep.mubr.bf16.mxu0 %v5433_v54  ;;  %5771 = vmatprep.mubr.bf16.mxu1 %v5435_v14 }
 0x4bb   :  { %5732 = vmatmul.mubr.bf16.vlgmr.msra.gmra.mrb[8].mxu0 %v5432_v43  ;;  %5772 = vmatmul.mubr.bf16.vlgmr.msra.gmra.mrb[8].mxu1 %v5434_v56 }
 0x58e   :  { %v6553_v15 = vpop.f32.mrb[8].mxu0  ;;  %v6575_v16 = vpop.f32.mrb[8].mxu1 }
 0x58f   :  { %v6554_v18 = vpop.f32.mrb[9].mxu0  ;;  %v6576_v20 = vpop.f32.mrb[9].mxu1 }
 0x590   :  { %v6555_v21 = vadd.f32 %v6554_v18, %v6553_v15  ;;  %v6577_v23 = vadd.f32 %v6576_v20, %v6575_v16  ;;  %v6556_v24 = vpop.f32.mrb[10].mxu0  ;;  %v6578_v26 = vpop.f32.mrb[10].mxu1 }
 0x591   :  { %v6557_v28 = vpop.f32.mrb[11].mxu0  ;;  %v6579_v29 = vpop.f32.mrb[11].mxu1 }
 0x592   :  { %v5734_v19 = vadd.f32 %v6555_v21, %v6504_v17 }
 0x594   :  { %v5774_v30 = vadd.f32 %v6577_v23, %v5734_v19 }
 0x596   :  { %5780 = vst.msk [vmem:[#allocation15] sm:$0xf] %vm5779_vm0, %v5774_v30 }
 0x597   :  { %7927 = shalt.err (!%p7924_p4)
}
 0x598   :  { %s7928_s11 = scalar_lea.hbm %s8206_s7, 64 }
 0x599   :  { %p7929_p5 = scmp.ne.s32.totalorder %s8206_s7, %s7928_s11  ;;  %p7932_p6 = scmp.lt.u32.totalorder %s7928_s11, %s8206_s7 }
 0x59b   :  { %p7934_p7 = pnand %p7932_p6, %p7929_p5 }
 0x59d   :  { %7937 = shalt.err (!%p7934_p7)
}
 0x59e   :  { %5790 = dma.vmem_to_hbm [thread:$0]  %s5788_s13, 64, %s8206_s7, [#allocation5]  }
 0x59f   :  { %7946 = dma.done.wait [#allocation5], 64  }
 0x5a0   :  { %7947 = vsyncadd [#allocation5], 4294967232 }
 0x5a1   :  { %5794 = vsyncpa [#allocation4], 1 }
 0x5a2   :  { %5795 = vsyncpa [#allocation7], 1 }
 0x5a3   :  { %5796 = vsyncpa [#allocation10], 1 }
 0x5a4   :  { %5797 = vsyncpa [#allocation13], 1 }
 0x5a5   :  { %5798 = vsyncpa [#allocation5], 1 }

// kernel: siamese_forward.2
= control target key start
LH: loop header
LB: loop body
LE: loop exit
PB: predicated region body
PF: predicated region fallthrough
CT: control target
= control target key end

     0   :  { %s18708_s0 = inlined_call_operand.hbm [shape: f32[4,332,3], index: 0, kind: input, shape index: {}]   ;;  %s18709_s1 = inlined_call_operand.hbm [shape: bf16[9,3,4], index: 1, kind: input, shape index: {}]   ;;  %s18710_s2 = inlined_call_operand.hbm [shape: f32[1,4], index: 2, kind: input, shape index: {}]   ;;  %s18711_s3 = inlined_call_operand.hbm [shape: f32[1,4], index: 3, kind: input, shape index: {}]   ;;  %s18712_s4 = inlined_call_operand.hbm [shape: bf16[9,4,8], index: 4, kind: input, shape index: {}]   ;;  %s18713_s5 = inlined_call_operand.hbm [shape: f32[1,8], index: 5, kind: input, shape index: {}]   ;;  %s18714_s6 = inlined_call_operand.hbm [shape: f32[1,8], index: 6, kind: input, shape index: {}]   ;;  %s18715_s7 = inlined_call_operand.hbm [shape: bf16[9,8,8], index: 7, kind: input, shape index: {}]   ;;  %s18716_s8 = inlined_call_operand.hbm [shape: f32[1,8], index: 8, kind: input, shape index: {}]   ;;  %s18717_s9 = inlined_call_operand.hbm [shape: f32[1,8], index: 9, kind: input, shape index: {}]   ;;  %s18718_s10 = inlined_call_operand.hbm [shape: bf16[4,288,8], index: 10, kind: output, shape index: {}]  }
   0x1   :  { %18832 = sst [smem:[#allocation56_spill]] %s18709_s1 }
   0x2   :  { %18833 = sst [smem:[#allocation57_spill]] %s18710_s2 }
   0x3   :  { %18834 = sst [smem:[#allocation58_spill]] %s18718_s10 }
   0x4   :  { %15 = vsyncpa [#allocation5], 0 }
   0x5   :  { %17 = vsyncpa [#allocation5 + $0x1], 0 }
   0x6   :  { %18 = vsyncpa [#allocation8], 0 }
   0x7   :  { %19 = vsyncpa [#allocation11], 0 }
   0x8   :  { %20 = vsyncpa [#allocation14], 0 }
   0x9   :  { %21 = vsyncpa [#allocation17], 0 }
   0xa   :  { %22 = vsyncpa [#allocation20], 0 }
   0xb   :  { %23 = vsyncpa [#allocation6], 0 }
   0xc   :  { %25 = vsyncpa [#allocation6 + $0x1], 0  ;;  %s15200_s13 = smov 0   ;;  %s15202_s14 = smov 0  }
   0xd   :  { %s15204_s15 = smov 0   ;;  %s15206_s16 = smov 0  }
   0xe LB: > { %s15124_s17 = smov [#allocation7]   ;;  %s15221_s19 = sadd.s32 4294967295, %s15122_s16   ;;  %s15122_s16 = sphi %s15206_s16, %s19111_s16   ;;  %s15118_s15 = sphi %s15204_s15, %s19110_s15   ;;  %s15114_s14 = sphi %s15202_s14, %s19109_s14   ;;  %s15110_s13 = sphi %s15200_s13, %s19108_s13  }
   0xf   : > { %s289_s18 = sshll.u32 %s15124_s17, 4  ;;  %p11505_p0 = scmp.ge.s32.totalorder %s15122_s16, 1  ;;  %s15226_s18 = int_to_ptr.vmem [resolvable:$true] %s289_s18 }
  0x10   : > { %p18721_p1 = scmp.eq.s32.totalorder %s15221_s19, 0  ;;  %p277_p2 = scmp.lt.s32.totalorder %s15122_s16, 5 }
  0x11   : > { %s15125_s21 = smov [#allocation10]   ;;  %s15126_s24 = smov [#allocation13]  }
  0x12   : > { %p15228_p3 = pnand %p11505_p0, %p277_p2  ;;  %s314_s22 = sshll.u32 %s15125_s21, 4  ;;  %s15240_s22 = int_to_ptr.vmem [resolvable:$true] %s314_s22 }
  0x13   : > { %s338_s25 = sshll.u32 %s15126_s24, 4  ;;  %s18838_s1 = sld [smem:[#allocation56_spill]]  ;;  %s15242_s25 = int_to_ptr.vmem [resolvable:$true] %s338_s25 }
  0x14   : > { %s18835_s20 = scalar_select %p15228_p3, 1, 0 }
  0x15   : > { %p14644_p4 = pneg %p15228_p3 }
  0x16   : > { %18836 = sst [smem:[#allocation29_spill]] %s18835_s20 }
  0x17   : > { %p15236_p5 = pnand %p14644_p4, %p18721_p1 }
  0x19   : > { %s14754_s28 = scalar_lea.hbm %s18838_s1, 288  ;;  %p15252_p7 = pneg %p15236_p5 }
  0x1a   : > { %p14755_p6 = scmp.ne.s32.totalorder %s18838_s1, %s14754_s28  ;;  %p14761_p10 = scmp.lt.u32.totalorder %s14754_s28, %s18838_s1 }
  0x1c   : > { %p14757_p8 = pnand %p15252_p7, %p14755_p6 }
  0x1e   : > { %p14758_p9 = pneg %p14757_p8 }
  0x20   : > { %p14763_p11 = pnand %p14761_p10, %p14758_p9 }
  0x22   : > { %14766 = shalt.err (!%p14763_p11)
}
  0x23   : > { %s14767_s21 = scalar_lea.vmem %s15226_s18, 288  ;;  %p14775_p2 = scmp.lt.s32.totalorder %s15226_s18, %s15226_s18 }
  0x24   : > { %p14768_p12 = scmp.ne.s32.totalorder %s15226_s18, %s14767_s21  ;;  %p14776_p4 = scmp.lt.s32.totalorder %s14767_s21, %s14767_s21 }
  0x26   : > { %p14770_p13 = pnand %p14768_p12, %p15252_p7  ;;  %p14777_p6 = por %p14776_p4, %p14775_p2 }
  0x28   : > { %p14771_p0 = pneg %p14770_p13 }
  0x2a   : > { %p14778_p8 = pnand %p14777_p6, %p14771_p0 }
  0x2c   : > { %14781 = shalt.err (!%p14778_p8)
}
  0x2d   : > { %s18723_s24 = smov 32   ;;  %s18724_s26 = smov 2  }
  0x2e   : > { %14647 = dma.hbm_to_vmem [thread:$0]  (!%p15236_p5), %s18838_s1, 288, %s15226_s18, [#allocation8], %s18723_s24, %s18723_s24, %s18724_s26  }
  0x2f   : > { %s14782_s12 = scalar_lea.hbm %s18711_s3, 16 }
  0x30   : > { %p14783_p9 = scmp.ne.s32.totalorder %s18711_s3, %s14782_s12  ;;  %p14789_p12 = scmp.lt.u32.totalorder %s14782_s12, %s18711_s3 }
  0x32   : > { %p14785_p10 = pnand %p14783_p9, %p15252_p7 }
  0x34   : > { %p14786_p11 = pneg %p14785_p10 }
  0x36   : > { %p14791_p13 = pnand %p14789_p12, %p14786_p11 }
  0x38   : > { %14794 = shalt.err (!%p14791_p13)
}
  0x39   : > { %s14795_s18 = scalar_lea.vmem %s15240_s22, 16  ;;  %s14802_s27 = scalar_lea.vmem %s15240_s22, 32 }
  0x3a   : > { %p14796_p0 = scmp.ne.s32.totalorder %s15240_s22, %s14795_s18  ;;  %p14803_p6 = scmp.lt.s32.totalorder %s15240_s22, %s15240_s22 }
  0x3b   : > { %p14804_p8 = scmp.lt.s32.totalorder %s14802_s27, %s14795_s18 }
  0x3c   : > { %p14798_p2 = pnand %p14796_p0, %p15252_p7 }
  0x3d   : > { %p14805_p9 = por %p14804_p8, %p14803_p6 }
  0x3e   : > { %p14799_p4 = pneg %p14798_p2 }
  0x40   : > { %p14806_p10 = pnand %p14805_p9, %p14799_p4 }
  0x42   : > { %14809 = shalt.err (!%p14806_p10)
}
  0x43   : > { %14653 = dma.hbm_to_vmem [thread:$0]  (!%p15236_p5), %s18711_s3, 16, %s15240_s22, [#allocation11]  }
  0x44   : > { %s14810_s30 = scalar_lea.hbm %s18713_s5, 16 }
  0x45   : > { %p14811_p11 = scmp.ne.s32.totalorder %s18713_s5, %s14810_s30  ;;  %p14817_p0 = scmp.lt.u32.totalorder %s14810_s30, %s18713_s5 }
  0x47   : > { %p14813_p12 = pnand %p14811_p11, %p15252_p7 }
  0x49   : > { %p14814_p13 = pneg %p14813_p12 }
  0x4b   : > { %p14819_p2 = pnand %p14817_p0, %p14814_p13 }
  0x4d   : > { %14822 = shalt.err (!%p14819_p2)
}
  0x4e   : > { %s14823_s22 = scalar_lea.vmem %s15242_s25, 16  ;;  %s14830_s27 = scalar_lea.vmem %s15242_s25, 32 }
  0x4f   : > { %p14824_p4 = scmp.ne.s32.totalorder %s15242_s25, %s14823_s22  ;;  %p14831_p9 = scmp.lt.s32.totalorder %s15242_s25, %s15242_s25 }
  0x50   : > { %p14832_p10 = scmp.lt.s32.totalorder %s14830_s27, %s14823_s22 }
  0x51   : > { %p14826_p6 = pnand %p14824_p4, %p15252_p7 }
  0x52   : > { %p14833_p11 = por %p14832_p10, %p14831_p9 }
  0x53   : > { %p14827_p8 = pneg %p14826_p6 }
  0x55   : > { %p14834_p12 = pnand %p14833_p11, %p14827_p8 }
  0x57   : > { %14837 = shalt.err (!%p14834_p12)
}
  0x58   : > { %14659 = dma.hbm_to_vmem [thread:$0]  (!%p15236_p5), %s18713_s5, 16, %s15242_s25, [#allocation14]  }
  0x59   : > { %s15129_s28 = smov [#allocation16]   ;;  %s14838_s17 = scalar_lea.hbm %s18715_s7, 576 }
  0x5a   : > { %s359_s29 = sshll.u32 %s15129_s28, 4  ;;  %p14839_p13 = scmp.ne.s32.totalorder %s18715_s7, %s14838_s17  ;;  %s360_s29 = int_to_ptr.vmem [resolvable:$true] %s359_s29 }
  0x5b   : > { %p14845_p4 = scmp.lt.u32.totalorder %s14838_s17, %s18715_s7 }
  0x5c   : > { %p14841_p0 = pnand %p14839_p13, %p15252_p7 }
  0x5e   : > { %p14842_p2 = pneg %p14841_p0 }
  0x60   : > { %p14847_p6 = pnand %p14845_p4, %p14842_p2 }
  0x62   : > { %14850 = shalt.err (!%p14847_p6)
}
  0x63   : > { %s14851_s25 = scalar_lea.vmem %s360_s29, 576  ;;  %p14859_p11 = scmp.lt.s32.totalorder %s360_s29, %s360_s29 }
  0x64   : > { %p14852_p8 = scmp.ne.s32.totalorder %s360_s29, %s14851_s25  ;;  %p14860_p12 = scmp.lt.s32.totalorder %s14851_s25, %s14851_s25 }
  0x66   : > { %p14854_p9 = pnand %p14852_p8, %p15252_p7  ;;  %p14861_p1 = por %p14860_p12, %p14859_p11 }
  0x68   : > { %p14855_p10 = pneg %p14854_p9 }
  0x6a   : > { %p14862_p3 = pnand %p14861_p1, %p14855_p10 }
  0x6c   : > { %14865 = shalt.err (!%p14862_p3)
}
  0x6d   : > { %s15130_s10 = smov 64   ;;  %s15131_s20 = smov 4  }
  0x6e   : > { %14665 = dma.hbm_to_vmem [thread:$0]  (!%p15236_p5), %s18715_s7, 576, %s360_s29, [#allocation17], %s15130_s10, %s15130_s10, %s15131_s20  }
  0x6f   : > { %s15132_s12 = smov [#allocation9]   ;;  %s15133_s21 = smov [#allocation12]  }
  0x70   : > { %s303_s17 = sshll.u32 %s15132_s12, 4  ;;  %s324_s18 = sshll.u32 %s15133_s21, 4  ;;  %s304_s17 = int_to_ptr.vmem [resolvable:$true] %s303_s17  ;;  %s15342_s18 = int_to_ptr.vmem [resolvable:$true] %s324_s18 }
  0x71   : > { %s18840_s2 = sld [smem:[#allocation57_spill]] }
  0x77   : > { %s14866_s25 = scalar_lea.hbm %s18840_s2, 16 }
  0x78   : > { %p14867_p1 = scmp.ne.s32.totalorder %s18840_s2, %s14866_s25  ;;  %p14873_p0 = scmp.lt.u32.totalorder %s14866_s25, %s18840_s2 }
  0x7a   : > { %p14869_p3 = pnand %p14867_p1, %p15252_p7 }
  0x7c   : > { %p14870_p13 = pneg %p14869_p3 }
  0x7e   : > { %p14875_p2 = pnand %p14873_p0, %p14870_p13 }
  0x80   : > { %14878 = shalt.err (!%p14875_p2)
}
  0x81   : > { %s14879_s10 = scalar_lea.vmem %s304_s17, 16  ;;  %s14886_s20 = scalar_lea.vmem %s304_s17, 32 }
  0x82   : > { %p14880_p4 = scmp.ne.s32.totalorder %s304_s17, %s14879_s10  ;;  %p14887_p9 = scmp.lt.s32.totalorder %s304_s17, %s304_s17 }
  0x83   : > { %p14888_p10 = scmp.lt.s32.totalorder %s14886_s20, %s14879_s10 }
  0x84   : > { %p14882_p6 = pnand %p14880_p4, %p15252_p7 }
  0x85   : > { %p14889_p11 = por %p14888_p10, %p14887_p9 }
  0x86   : > { %p14883_p8 = pneg %p14882_p6 }
  0x88   : > { %p14890_p12 = pnand %p14889_p11, %p14883_p8 }
  0x8a   : > { %14893 = shalt.err (!%p14890_p12)
}
  0x8b   : > { %14650 = dma.hbm_to_vmem [thread:$0]  (!%p15236_p5), %s18840_s2, 16, %s304_s17, [#allocation8]  }
  0x8c   : > { %s14894_s21 = scalar_lea.hbm %s18712_s4, 288 }
  0x8d   : > { %p14895_p1 = scmp.ne.s32.totalorder %s18712_s4, %s14894_s21  ;;  %p14901_p0 = scmp.lt.u32.totalorder %s14894_s21, %s18712_s4 }
  0x8f   : > { %p14897_p3 = pnand %p14895_p1, %p15252_p7 }
  0x91   : > { %p14898_p13 = pneg %p14897_p3 }
  0x93   : > { %p14903_p2 = pnand %p14901_p0, %p14898_p13 }
  0x95   : > { %14906 = shalt.err (!%p14903_p2)
}
  0x96   : > { %s14907_s17 = scalar_lea.vmem %s15342_s18, 288  ;;  %p14915_p9 = scmp.lt.s32.totalorder %s15342_s18, %s15342_s18 }
  0x97   : > { %p14908_p4 = scmp.ne.s32.totalorder %s15342_s18, %s14907_s17  ;;  %p14916_p10 = scmp.lt.s32.totalorder %s14907_s17, %s14907_s17 }
  0x99   : > { %p14910_p6 = pnand %p14908_p4, %p15252_p7  ;;  %p14917_p11 = por %p14916_p10, %p14915_p9 }
  0x9b   : > { %p14911_p8 = pneg %p14910_p6 }
  0x9d   : > { %p14918_p12 = pnand %p14917_p11, %p14911_p8 }
  0x9f   : > { %14921 = shalt.err (!%p14918_p12)
}
  0xa0   : > { %s18841_s29 = smov 2   ;;  %s18842_s10 = smov 32  }
  0xa1   : > { %14656 = dma.hbm_to_vmem [thread:$0]  (!%p15236_p5), %s18712_s4, 288, %s15342_s18, [#allocation11], %s18842_s10, %s18842_s10, %s18841_s29  }
  0xa2   : > { %s15134_s26 = smov [#allocation15]   ;;  %s15135_s12 = smov [#allocation18]  }
  0xa3   : > { %s349_s30 = sshll.u32 %s15134_s26, 4  ;;  %s373_s21 = sshll.u32 %s15135_s12, 4  ;;  %s350_s30 = int_to_ptr.vmem [resolvable:$true] %s349_s30  ;;  %s15388_s21 = int_to_ptr.vmem [resolvable:$true] %s373_s21 }
  0xa4   : > { %s14922_s25 = scalar_lea.hbm %s18714_s6, 16 }
  0xa5   : > { %p14923_p1 = scmp.ne.s32.totalorder %s18714_s6, %s14922_s25  ;;  %p14929_p0 = scmp.lt.u32.totalorder %s14922_s25, %s18714_s6 }
  0xa7   : > { %p14925_p3 = pnand %p14923_p1, %p15252_p7 }
  0xa9   : > { %p14926_p13 = pneg %p14925_p3 }
  0xab   : > { %p14931_p2 = pnand %p14929_p0, %p14926_p13 }
  0xad   : > { %14934 = shalt.err (!%p14931_p2)
}
  0xae   : > { %s14935_s29 = scalar_lea.vmem %s350_s30, 16  ;;  %s14942_s10 = scalar_lea.vmem %s350_s30, 32 }
  0xaf   : > { %p14936_p4 = scmp.ne.s32.totalorder %s350_s30, %s14935_s29  ;;  %p14943_p9 = scmp.lt.s32.totalorder %s350_s30, %s350_s30 }
  0xb0   : > { %p14944_p10 = scmp.lt.s32.totalorder %s14942_s10, %s14935_s29 }
  0xb1   : > { %p14938_p6 = pnand %p14936_p4, %p15252_p7 }
  0xb2   : > { %p14945_p11 = por %p14944_p10, %p14943_p9 }
  0xb3   : > { %p14939_p8 = pneg %p14938_p6 }
  0xb5   : > { %p14946_p12 = pnand %p14945_p11, %p14939_p8 }
  0xb7   : > { %14949 = shalt.err (!%p14946_p12)
}
  0xb8   : > { %14662 = dma.hbm_to_vmem [thread:$0]  (!%p15236_p5), %s18714_s6, 16, %s350_s30, [#allocation14]  }
  0xb9   : > { %s14950_s27 = scalar_lea.hbm %s18716_s8, 16 }
  0xba   : > { %p14951_p1 = scmp.ne.s32.totalorder %s18716_s8, %s14950_s27  ;;  %p14957_p0 = scmp.lt.u32.totalorder %s14950_s27, %s18716_s8 }
  0xbc   : > { %p14953_p3 = pnand %p14951_p1, %p15252_p7 }
  0xbe   : > { %p14954_p13 = pneg %p14953_p3 }
  0xc0   : > { %p14959_p2 = pnand %p14957_p0, %p14954_p13 }
  0xc2   : > { %14962 = shalt.err (!%p14959_p2)
}
  0xc3   : > { %s14963_s30 = scalar_lea.vmem %s15388_s21, 16  ;;  %s14970_s18 = scalar_lea.vmem %s15388_s21, 32 }
  0xc4   : > { %p14964_p4 = scmp.ne.s32.totalorder %s15388_s21, %s14963_s30  ;;  %p14971_p9 = scmp.lt.s32.totalorder %s15388_s21, %s15388_s21 }
  0xc5   : > { %p14972_p10 = scmp.lt.s32.totalorder %s14970_s18, %s14963_s30 }
  0xc6   : > { %p14966_p6 = pnand %p14964_p4, %p15252_p7 }
  0xc7   : > { %p14973_p11 = por %p14972_p10, %p14971_p9 }
  0xc8   : > { %p14967_p8 = pneg %p14966_p6 }
  0xca   : > { %p14974_p12 = pnand %p14973_p11, %p14967_p8 }
  0xcc   : > { %14977 = shalt.err (!%p14974_p12)
}
  0xcd   : > { %14668 = dma.hbm_to_vmem [thread:$0]  (!%p15236_p5), %s18716_s8, 16, %s15388_s21, [#allocation17]  }
  0xce   : > { %s15136_s24 = smov [#allocation19]   ;;  %s14978_s27 = scalar_lea.hbm %s18717_s9, 16 }
  0xcf   : > { %s384_s26 = sshll.u32 %s15136_s24, 4  ;;  %p14979_p1 = scmp.ne.s32.totalorder %s18717_s9, %s14978_s27  ;;  %s385_s26 = int_to_ptr.vmem [resolvable:$true] %s384_s26 }
  0xd0   : > { %p14985_p0 = scmp.lt.u32.totalorder %s14978_s27, %s18717_s9 }
  0xd1   : > { %p14981_p3 = pnand %p14979_p1, %p15252_p7 }
  0xd3   : > { %p14982_p13 = pneg %p14981_p3 }
  0xd5   : > { %p14987_p2 = pnand %p14985_p0, %p14982_p13 }
  0xd7   : > { %14990 = shalt.err (!%p14987_p2)
}
  0xd8   : > { %s14991_s21 = scalar_lea.vmem %s385_s26, 16  ;;  %s14998_s30 = scalar_lea.vmem %s385_s26, 32 }
  0xd9   : > { %p14992_p4 = scmp.ne.s32.totalorder %s385_s26, %s14991_s21  ;;  %p14999_p9 = scmp.lt.s32.totalorder %s385_s26, %s385_s26 }
  0xda   : > { %p15000_p10 = scmp.lt.s32.totalorder %s14998_s30, %s14991_s21 }
  0xdb   : > { %p14994_p6 = pnand %p14992_p4, %p15252_p7 }
  0xdc   : > { %p15001_p11 = por %p15000_p10, %p14999_p9 }
  0xdd   : > { %p14995_p8 = pneg %p14994_p6 }
  0xdf   : > { %p15002_p12 = pnand %p15001_p11, %p14995_p8 }
  0xe1   : > { %15005 = shalt.err (!%p15002_p12)
}
  0xe2   : > { %14671 = dma.hbm_to_vmem [thread:$0]  (!%p15236_p5), %s18717_s9, 16, %s385_s26, [#allocation20]  }
  0xe3   : > { %s11504_s11 = sadd.s32 4294967294, %s15122_s16   ;;  %s15452_s23 = sadd.s32 1, %s15122_s16  }
  0xe4   : > { %s38_s10 = sadd.s32 1, %s15118_s15  ;;  %s35_s24 = ssub.s32 %s15122_s16, %s15452_s23 }
  0xe5   : > { %p45_p7 = scmp.ne.s32.totalorder %s15118_s15, %s15114_s14  ;;  %p36_p1 = scmp.eq.s32.totalorder %s35_s24, 0 }
  0xe6   : > { %p46_p3 = scmp.eq.s32.totalorder %s15122_s16, 0  ;;  %p51_p13 = scmp.ne.s32.totalorder %s15114_s14, %s15110_s13 }
  0xe7   : > { %p264_p0 = scmp.eq.s32.totalorder %s15221_s19, 3  ;;  %p18843_p4 = scmp.eq.s32.totalorder %s15221_s19, 0 }
  0xe8   : > { %s15464_s12 = scalar_select %p36_p1, %s15118_s15, %s38_s10  }
  0xe9   : > { %p47_p2 = por %p46_p3, %p45_p7  ;;  %p15468_p6 = por %p18843_p4, %p51_p13 }
  0xea   : > { %p15472_p5 = por %p264_p0, %p45_p7  ;;  %p270_p8 = scmp.eq.s32.totalorder %s11504_s11, 3 }
  0xeb   : > { %p14689_p9 = scmp.lt.s32.totalorder %s15122_s16, 4  ;;  %s395_s27 = sand.u32 1, %s15118_s15  }
  0xec   : > { %s18845_s26 = scalar_select %p15472_p5, 1, 0 }
  0xed   : > { %p15478_p10 = por %p270_p8, %p51_p13  ;;  %s14517_s28 = smul.u32 336, %s395_s27 }
  0xee   : > { %p15482_p11 = pnand %p14689_p9, %p47_p2  ;;  %s14518_s20 = smul.u32 5376, %s15122_s16 }
  0xef   : > { %s18846_s25 = scalar_select %p15478_p10, 1, 0 }
  0xf0   : > { %s15490_s18 = scalar_lea.hbm %s18708_s0, %s14518_s20  ;;  %s399_s29 = scalar_lea.vmem [#allocation4], %s14517_s28 }
  0xf1   : > { %s406_s11 = sshll.u32 %s399_s29, 4  ;;  %s15494_s10 = scalar_lea.sflag [#allocation5], %s395_s27  ;;  %s15492_s11 = int_to_ptr.vmem [resolvable:$true] %s406_s11 }
  0xf2   : > { %s15006_s24 = scalar_lea.hbm %s15490_s18, 5376  ;;  %p15008_p7 = pneg %p15482_p11 }
  0xf3   : > { %p15007_p12 = scmp.ne.s32.totalorder %s15490_s18, %s15006_s24  ;;  %s15011_s30 = scalar_lea.hbm %s18708_s0, 21504 }
  0xf4   : > { %p15012_p13 = scmp.lt.u32.totalorder %s15490_s18, %s18708_s0  ;;  %p15013_p0 = scmp.lt.u32.totalorder %s15011_s30, %s15006_s24 }
  0xf5   : > { %p15009_p1 = pnand %p15008_p7, %p15007_p12  ;;  %p15015_p4 = scmp.lt.u32.totalorder %s15006_s24, %s15490_s18 }
  0xf6   : > { %p15014_p2 = por %p15013_p0, %p15012_p13 }
  0xf7   : > { %p15010_p3 = pneg %p15009_p1 }
  0xf8   : > { %p15016_p8 = por %p15015_p4, %p15014_p2 }
  0xfa   : > { %p15017_p9 = pnand %p15016_p8, %p15010_p3 }
  0xfc   : > { %15020 = shalt.err (!%p15017_p9)
}
  0xfd   : > { %s15021_s27 = scalar_lea.vmem %s15492_s11, 5376  ;;  %s15137_s28 = smov [#allocation4]  }
  0xfe   : > { %p15022_p12 = scmp.ne.s32.totalorder %s15492_s11, %s15021_s27  ;;  %s15026_s29 = sshll.u32 %s15137_s28, 4  ;;  %s15027_s29 = int_to_ptr.vmem [resolvable:$false] %s15026_s29 }
  0xff   : > { %s15028_s1 = scalar_lea.vmem %s15027_s29, 10752  ;;  %p15029_p5 = scmp.lt.s32.totalorder %s15492_s11, %s15027_s29 }
 0x100   : > { %p15024_p1 = pnand %p15022_p12, %p15008_p7  ;;  %p15030_p13 = scmp.lt.s32.totalorder %s15028_s1, %s15021_s27 }
 0x102   : > { %p15025_p10 = pneg %p15024_p1  ;;  %p15031_p0 = por %p15030_p13, %p15029_p5 }
 0x104   : > { %p15032_p2 = pnand %p15031_p0, %p15025_p10 }
 0x106   : > { %15035 = shalt.err (!%p15032_p2)
}
 0x107   : > { %s15138_s2 = smov 128   ;;  %s15139_s24 = smov 8  }
 0x108   : > { %14675 = dma.hbm_to_vmem [thread:$0]  (!%p15482_p11), %s15490_s18, 5376, %s15492_s11, %s15494_s10, %s15138_s2, %s15138_s2, %s15139_s24  }
 0x109   : > { %s18848_s20 = sld [smem:[#allocation29_spill]] }
 0x10f   : > { %p18849_p7 = scmp.ne.s32.totalorder %s18848_s20, 0 }
 0x111   : > { %418 = sbr.rel (%p18849_p7) target bundleno = 2696 (0xa88), region = 60 }
 0x118   : > { %s15525_s21 = sand.u32 1, %s15114_s14  }
 0x119   : > { %s14519_s30 = smul.u32 336, %s15525_s21  ;;  %s421_s27 = scalar_lea.sflag [#allocation5], %s15525_s21 }
 0x11b   : > { %s15529_s28 = scalar_lea.vmem [#allocation4], %s14519_s30 }
 0x11c   : > { %15081 = dma.done.wait (%p15468_p6), %s421_s27, 5376  }
 0x11d   : > { %15083 = vsyncadd (%p15468_p6), %s421_s27, 4294961920  ;;  %p18850_p5 = scmp.eq.s32.totalorder %s15221_s19, 0 }
 0x11f   : > { %15085 = dma.done.wait (%p18850_p5), [#allocation8], 304   ;;  %p18851_p10 = pmov %p18850_p5 }
 0x120   : > { %p18852_p11 = pmov %p18850_p5 }
 0x121   : > { %15087 = vsyncadd (%p18851_p10), [#allocation8], 4294966992 }
 0x122   : > { %15089 = dma.done.wait (%p18852_p11), [#allocation11], 304   ;;  %p18853_p3 = pmov %p18850_p5 }
 0x124   : > { %15091 = vsyncadd (%p18853_p3), [#allocation11], 4294966992  ;;  %p18854_p4 = pmov %p18853_p3 }
 0x125   : > { %p18855_p8 = pmov %p18853_p3 }
 0x126   : > { %15093 = dma.done.wait (%p18854_p4), [#allocation14], 32  }
 0x127   : > { %15095 = vsyncadd (%p18855_p8), [#allocation14], 4294967264  ;;  %p18856_p6 = pmov %p18853_p3 }
 0x128   : > { %p18857_p9 = pmov %p18853_p3 }
 0x129   : > { %15097 = dma.done.wait (%p18856_p6), [#allocation17], 592  }
 0x12a   : > { %15099 = vsyncadd (%p18857_p9), [#allocation17], 4294966704  ;;  %p18858_p12 = pmov %p18853_p3 }
 0x12b   : > { %p18859_p1 = pmov %p18853_p3 }
 0x12c   : > { %15101 = dma.done.wait (%p18858_p12), [#allocation20], 16  }
 0x12d   : > { %15103 = vsyncadd (%p18859_p1), [#allocation20], 4294967280  ;;  %vm664_vm0 = vcmask 1040384   ;;  %vm665_vm1 = vcmask 1041408   ;;  %v15140_v0 = vmov 65535   ;;  %v553_v5 = vld [vmem:[%s15529_s28 + $0x1] sm:$0xff] }
 0x12e   : > { %v666_v1 = vsel %vm664_vm0, 4294967295, %v15140_v0  ;;  %v608_v3 = vld [vmem:[#allocation7 + $0x2] sm:$0x3]  ;;  %v1789_v4 = vld [vmem:[#allocation7 + $0x8] sm:$0x3]  ;;  %vm609_vm2 = vcmask 23552  }
 0x12f   : > { %v15556_v2 = vsel %vm665_vm1, %v666_v1, 0  ;;  %v554_v8 = vld [vmem:[%s15529_s28 + $0x9] sm:$0xff]  ;;  %v1734_v9 = vld [vmem:[%s15529_s28 + $0x13] sm:$0xff]  ;;  %v1735_v10 = vld [vmem:[%s15529_s28 + $0x1b] sm:$0xff]  ;;  %s14520_s22 = smul.u32 144, %s15525_s21  ;;  %s19105_s29 = sld [smem:[#allocation58_spill]] }
 0x130   : > { %v669_v6 = vand.u32 %v15556_v2, %v608_v3  ;;  %v15561_v7 = vand.u32 %v1789_v4, %v15556_v2  ;;  %v589_v11 = vpack.c.bf16 %v554_v8, %v553_v5  ;;  %v1770_v12 = vpack.c.bf16 %v1735_v10, %v1734_v9  ;;  %v555_v13 = vld [vmem:[%s15529_s28 + $0x11] sm:$0xff]  ;;  %v556_v14 = vld [vmem:[%s15529_s28 + $0x19] sm:$0xff]  ;;  %v1736_v15 = vld [vmem:[%s15529_s28 + $0x23] sm:$0xff]  ;;  %s14603_s18 = smul.u32 2304, %s15221_s19  ;;  %s11332_s2 = scalar_lea.sflag [#allocation6], %s15525_s21 }
 0x131   : > { %v590_v16 = vpack.c.bf16 %v556_v14, %v555_v13  ;;  %v1737_v17 = vld [vmem:[%s15529_s28 + $0x2b] sm:$0xff]  ;;  %v557_v19 = vld [vmem:[%s15529_s28 + $0x21] sm:$0xff]  ;;  %v1738_v23 = vld [vmem:[%s15529_s28 + $0x33] sm:$0xff]  ;;  %s18489_s17 = scalar_lea.vmem [#allocation21], %s14520_s22  ;;  %p19106_p0 = scmp.ne.s32.totalorder %s18845_s26, 0 }
 0x132   : > { %12607 = vmatprep.subr.bf16.mxu1 %v669_v6  ;;  %12759 = vmatprep.subr.bf16.mxu0 %v15561_v7  ;;  %v2115_v18 = vld [vmem:[#allocation7 + $0xa] sm:$0x3]  ;;  %v1771_v20 = vpack.c.bf16 %v1737_v17, %v1736_v15  ;;  %v552_v27 = vld [vmem:[#allocation7] sm:$0x3]  ;;  %v2441_v49 = vld [vmem:[#allocation7 + $0xc] sm:$0x3] }
 0x133   : > { %12608 = vmatpush3.bf16.msra.mxu1 %v669_v6  ;;  %12760 = vmatpush3.bf16.msra.mxu0 %v15561_v7  ;;  %v2171_v21 = vand.u32 %v2115_v18, %v15556_v2  ;;  %v558_v22 = vld [vmem:[%s15529_s28 + $0x29] sm:$0xff]  ;;  %v1739_v24 = vld [vmem:[%s15529_s28 + $0x3b] sm:$0xff]  ;;  %v903_v28 = vand.u32 %v15556_v2, %v552_v27  ;;  %v559_v29 = vld [vmem:[%s15529_s28 + $0x31] sm:$0xff]  ;;  %v2497_v50 = vand.u32 %v2441_v49, %v15556_v2  ;;  %s11345_s11 = sshll.u32 %s18489_s17, 4  ;;  %s15142_s20 = smov [#allocation21]   ;;  %s18661_s11 = int_to_ptr.vmem [resolvable:$true] %s11345_s11 }
 0x134   : > { %12609 = vmatprep.mubr.msk.bf16.mxu1 %vm609_vm2, %v589_v11  ;;  %12761 = vmatprep.mubr.msk.bf16.mxu0 %vm609_vm2, %v1770_v12  ;;  %v591_v25 = vpack.c.bf16 %v558_v22, %v557_v19  ;;  %v1772_v26 = vpack.c.bf16 %v1739_v24, %v1738_v23  ;;  %v560_v30 = vld [vmem:[%s15529_s28 + $0x39] sm:$0xff]  ;;  %v1740_v31 = vld [vmem:[%s15529_s28 + $0x43] sm:$0xff]  ;;  %v1741_v32 = vld [vmem:[%s15529_s28 + $0x4b] sm:$0xff]  ;;  %s15036_s24 = scalar_lea.vmem %s18661_s11, 2304  ;;  %s15040_s30 = sshll.u32 %s15142_s20, 4  ;;  %s15041_s30 = int_to_ptr.vmem [resolvable:$false] %s15040_s30 }
 0x135   : > { %12797 = vmatprep.subr.bf16.mxu0 %v2171_v21  ;;  %v561_v33 = vld [vmem:[%s15529_s28 + $0x41] sm:$0xff]  ;;  %12645 = vmatprep.subr.bf16.mxu1 %v903_v28  ;;  %v562_v34 = vld [vmem:[%s15529_s28 + $0x49] sm:$0xff]  ;;  %v1742_v35 = vld [vmem:[%s15529_s28 + $0x53] sm:$0xff]  ;;  %v592_v37 = vpack.c.bf16 %v560_v30, %v559_v29  ;;  %v1773_v38 = vpack.c.bf16 %v1741_v32, %v1740_v31  ;;  %s18657_s1 = scalar_lea.hbm %s19105_s29, %s14603_s18  ;;  %p15037_p13 = scmp.ne.s32.totalorder %s18661_s11, %s15036_s24 }
 0x136   : > { %12610 = vmatmul.mubr.msk.bf16.vlgmr.msra.gmra.mrb[0].mxu1 %vm609_vm2, %v590_v16  ;;  %12762 = vmatmul.mubr.msk.bf16.vlgmr.msra.gmra.mrb[0].mxu0 %vm609_vm2, %v1771_v20  ;;  %v1743_v36 = vld [vmem:[%s15529_s28 + $0x5b] sm:$0xff]  ;;  %v593_v39 = vpack.c.bf16 %v562_v34, %v561_v33  ;;  %v563_v41 = vld [vmem:[%s15529_s28 + $0x51] sm:$0xff]  ;;  %v1744_v43 = vld [vmem:[%s15529_s28 + $0x63] sm:$0xff]  ;;  %s15042_s27 = scalar_lea.vmem %s15041_s30, 4608  ;;  %p15043_p5 = scmp.lt.s32.totalorder %s18661_s11, %s15041_s30 }
 0x137   : > { %12798 = vmatpush3.bf16.msra.mxu0 %v2171_v21  ;;  %12613 = vmatprep.mubr.msk.bf16.mxu1 %vm609_vm2, %v591_v25  ;;  %v1774_v40 = vpack.c.bf16 %v1743_v36, %v1742_v35  ;;  %v564_v42 = vld [vmem:[%s15529_s28 + $0x59] sm:$0xff]  ;;  %v1745_v44 = vld [vmem:[%s15529_s28 + $0x6b] sm:$0xff]  ;;  %v565_v45 = vld [vmem:[%s15529_s28 + $0x61] sm:$0xff]  ;;  %p15038_p2 = pnand %p15037_p13, %p19106_p0  ;;  %p15044_p10 = scmp.lt.s32.totalorder %s15042_s27, %s15036_s24 }
 0x138   : > { %12765 = vmatprep.mubr.msk.bf16.mxu0 %vm609_vm2, %v1772_v26  ;;  %12646 = vmatpush3.bf16.msra.mxu1 %v903_v28  ;;  %v566_v46 = vld [vmem:[%s15529_s28 + $0x69] sm:$0xff]  ;;  %v1746_v47 = vld [vmem:[%s15529_s28 + $0x73] sm:$0xff]  ;;  %v1747_v48 = vld [vmem:[%s15529_s28 + $0x7b] sm:$0xff]  ;;  %v594_v51 = vpack.c.bf16 %v564_v42, %v563_v41  ;;  %v1775_v52 = vpack.c.bf16 %v1745_v44, %v1744_v43 }
 0x139   : > { %v595_v53 = vpack.c.bf16 %v566_v46, %v565_v45  ;;  %v1776_v54 = vpack.c.bf16 %v1747_v48, %v1746_v47  ;;  %12835 = vmatprep.subr.bf16.mxu0 %v2497_v50  ;;  %v567_v55 = vld [vmem:[%s15529_s28 + $0x71] sm:$0xff]  ;;  %v568_v56 = vld [vmem:[%s15529_s28 + $0x79] sm:$0xff]  ;;  %v1748_v57 = vld [vmem:[%s15529_s28 + $0x83] sm:$0xff]  ;;  %p15039_p7 = pneg %p15038_p2  ;;  %p15045_p11 = por %p15044_p10, %p15043_p5 }
 0x13a   : > { %v1749_v58 = vld [vmem:[%s15529_s28 + $0x8b] sm:$0xff]  ;;  %v569_v59 = vld [vmem:[%s15529_s28 + $0x81] sm:$0xff]  ;;  %v1750_v61 = vld [vmem:[%s15529_s28 + $0x93] sm:$0xff]  ;;  %v596_v63 = vpack.c.bf16 %v568_v56, %v567_v55 }
 0x13b   : > { %v570_v60 = vld [vmem:[%s15529_s28 + $0x89] sm:$0xff]  ;;  %v1751_v62 = vld [vmem:[%s15529_s28 + $0x9b] sm:$0xff]  ;;  %v1777_v0 = vpack.c.bf16 %v1749_v58, %v1748_v57  ;;  %v1137_v4 = vld [vmem:[#allocation7 + $0x4] sm:$0x3]  ;;  %p15046_p3 = pnand %p15045_p11, %p15039_p7 }
 0x13c   : > { %v597_v1 = vpack.c.bf16 %v570_v60, %v569_v59  ;;  %v1778_v3 = vpack.c.bf16 %v1751_v62, %v1750_v61  ;;  %v571_v5 = vld [vmem:[%s15529_s28 + $0x91] sm:$0xff]  ;;  %v572_v6 = vld [vmem:[%s15529_s28 + $0x99] sm:$0xff]  ;;  %v15622_v8 = vand.u32 %v1137_v4, %v15556_v2  ;;  %v1752_v9 = vld [vmem:[%s15529_s28 + $0xa3] sm:$0xff] }
 0x13d   : > { %v1753_v10 = vld [vmem:[%s15529_s28 + $0xab] sm:$0xff]  ;;  %v573_v11 = vld [vmem:[%s15529_s28 + $0xa1] sm:$0xff]  ;;  %v2060_v13 = vld [vmem:[%s15529_s28 + $0x14] sm:$0xff]  ;;  %v598_v15 = vpack.c.bf16 %v572_v6, %v571_v5 }
 0x13e   : > { %12614 = vmatmul.mubr.msk.bf16.gmra.mrb[4].mxu1 %vm609_vm2, %v592_v37  ;;  %12766 = vmatmul.mubr.msk.bf16.gmra.mrb[4].mxu0 %vm609_vm2, %v1773_v38  ;;  %v574_v12 = vld [vmem:[%s15529_s28 + $0xa9] sm:$0xff]  ;;  %v2061_v14 = vld [vmem:[%s15529_s28 + $0x1c] sm:$0xff]  ;;  %v1779_v16 = vpack.c.bf16 %v1753_v10, %v1752_v9  ;;  %v575_v19 = vld [vmem:[%s15529_s28 + $0xb1] sm:$0xff] }
 0x13f   : > { %12617 = vmatprep.mubr.msk.bf16.mxu1 %vm609_vm2, %v593_v39  ;;  %12769 = vmatprep.mubr.msk.bf16.mxu0 %vm609_vm2, %v1774_v40  ;;  %v599_v17 = vpack.c.bf16 %v574_v12, %v573_v11  ;;  %v2096_v18 = vpack.c.bf16 %v2061_v14, %v2060_v13  ;;  %v576_v20 = vld [vmem:[%s15529_s28 + $0xb9] sm:$0xff]  ;;  %v2062_v21 = vld [vmem:[%s15529_s28 + $0x24] sm:$0xff]  ;;  %v2063_v22 = vld [vmem:[%s15529_s28 + $0x2c] sm:$0xff] }
 0x140   : > { %12683 = vmatprep.subr.bf16.mxu1 %v15622_v8  ;;  %v577_v23 = vld [vmem:[%s15529_s28 + $0xc1] sm:$0xff]  ;;  %v578_v24 = vld [vmem:[%s15529_s28 + $0xc9] sm:$0xff]  ;;  %v2064_v25 = vld [vmem:[%s15529_s28 + $0x34] sm:$0xff]  ;;  %v600_v28 = vpack.c.bf16 %v576_v20, %v575_v19  ;;  %v15645_v29 = vpack.c.bf16 %v2063_v22, %v2062_v21 }
 0x141   : > { %v2065_v26 = vld [vmem:[%s15529_s28 + $0x3c] sm:$0xff]  ;;  %v601_v30 = vpack.c.bf16 %v578_v24, %v577_v23  ;;  %v579_v33 = vld [vmem:[%s15529_s28 + $0xd1] sm:$0xff]  ;;  %v2066_v35 = vld [vmem:[%s15529_s28 + $0x44] sm:$0xff] }
 0x142   : > { %v2767_v27 = vld [vmem:[#allocation7 + $0xe] sm:$0x3]  ;;  %v15647_v31 = vpack.c.bf16 %v2065_v26, %v2064_v25  ;;  %v581_v37 = vld [vmem:[%s15529_s28 + $0xe1] sm:$0xff]  ;;  %v2068_v39 = vld [vmem:[%s15529_s28 + $0x54] sm:$0xff] }
 0x143   : > { %v15650_v32 = vand.u32 %v2767_v27, %v15556_v2  ;;  %v580_v34 = vld [vmem:[%s15529_s28 + $0xd9] sm:$0xff]  ;;  %v2067_v36 = vld [vmem:[%s15529_s28 + $0x4c] sm:$0xff]  ;;  %v2070_v47 = vld [vmem:[%s15529_s28 + $0x64] sm:$0xff] }
 0x144   : > { %v582_v38 = vld [vmem:[%s15529_s28 + $0xe9] sm:$0xff]  ;;  %v2069_v40 = vld [vmem:[%s15529_s28 + $0x5c] sm:$0xff]  ;;  %v602_v41 = vpack.c.bf16 %v580_v34, %v579_v33  ;;  %v15667_v42 = vpack.c.bf16 %v2067_v36, %v2066_v35  ;;  %v583_v45 = vld [vmem:[%s15529_s28 + $0xf1] sm:$0xff] }
 0x145   : > { %v603_v43 = vpack.c.bf16 %v582_v38, %v581_v37  ;;  %v15669_v44 = vpack.c.bf16 %v2069_v40, %v2068_v39  ;;  %v584_v46 = vld [vmem:[%s15529_s28 + $0xf9] sm:$0xff]  ;;  %v2071_v48 = vld [vmem:[%s15529_s28 + $0x6c] sm:$0xff]  ;;  %v585_v49 = vld [vmem:[%s15529_s28 + $0x101] sm:$0xff] }
 0x146   : > { %12618 = vmatmul.mubr.msk.bf16.gmra.mrb[8].mxu1 %vm609_vm2, %v594_v51  ;;  %12770 = vmatmul.mubr.msk.bf16.gmra.mrb[8].mxu0 %vm609_vm2, %v1775_v52  ;;  %v2072_v51 = vld [vmem:[%s15529_s28 + $0x74] sm:$0xff]  ;;  %v2073_v52 = vld [vmem:[%s15529_s28 + $0x7c] sm:$0xff]  ;;  %v2074_v59 = vld [vmem:[%s15529_s28 + $0x84] sm:$0xff] }
 0x147   : > { %12621 = vmatprep.mubr.msk.bf16.mxu1 %vm609_vm2, %v595_v53  ;;  %12773 = vmatprep.mubr.msk.bf16.mxu0 %vm609_vm2, %v1776_v54  ;;  %v604_v53 = vpack.c.bf16 %v584_v46, %v583_v45  ;;  %v15685_v54 = vpack.c.bf16 %v2071_v48, %v2070_v47  ;;  %v15687_v56 = vpack.c.bf16 %v2073_v52, %v2072_v51  ;;  %v587_v57 = vld [vmem:[%s15529_s28 + $0x111] sm:$0xff]  ;;  %v588_v58 = vld [vmem:[%s15529_s28 + $0x119] sm:$0xff]  ;;  %v499_v62 = vld [vmem:[%s15529_s28 + $0x8] sm:$0xff] }
 0x148   : > { %v2075_v60 = vld [vmem:[%s15529_s28 + $0x8c] sm:$0xff]  ;;  %v498_v61 = vld [vmem:[%s15529_s28] sm:$0xff]  ;;  %v501_v9 = vld [vmem:[%s15529_s28 + $0x18] sm:$0xff] }
 0x149   : > { %v534_v4 = vpack.c.bf16 %v499_v62, %v498_v61  ;;  %v500_v6 = vld [vmem:[%s15529_s28 + $0x10] sm:$0xff]  ;;  %v2078_v10 = vld [vmem:[%s15529_s28 + $0xa4] sm:$0xff]  ;;  %v505_v23 = vld [vmem:[%s15529_s28 + $0x38] sm:$0xff] }
 0x14a   : > { %v2079_v11 = vld [vmem:[%s15529_s28 + $0xac] sm:$0xff]  ;;  %v502_v12 = vld [vmem:[%s15529_s28 + $0x20] sm:$0xff]  ;;  %v2080_v14 = vld [vmem:[%s15529_s28 + $0xb4] sm:$0xff] }
 0x14b   : > { %v503_v13 = vld [vmem:[%s15529_s28 + $0x28] sm:$0xff]  ;;  %v504_v22 = vld [vmem:[%s15529_s28 + $0x30] sm:$0xff]  ;;  %v506_v26 = vld [vmem:[%s15529_s28 + $0x40] sm:$0xff] }
 0x14c   : > { %v536_v19 = vpack.c.bf16 %v503_v13, %v502_v12  ;;  %v2082_v24 = vld [vmem:[%s15529_s28 + $0xc4] sm:$0xff]  ;;  %v2083_v25 = vld [vmem:[%s15529_s28 + $0xcc] sm:$0xff]  ;;  %v537_v33 = vpack.c.bf16 %v505_v23, %v504_v22  ;;  %v509_v37 = vld [vmem:[%s15529_s28 + $0x58] sm:$0xff] }
 0x14d   : > { %v507_v27 = vld [vmem:[%s15529_s28 + $0x48] sm:$0xff]  ;;  %v15744_v34 = vpack.c.bf16 %v2083_v25, %v2082_v24  ;;  %v510_v40 = vld [vmem:[%s15529_s28 + $0x60] sm:$0xff]  ;;  %v513_v51 = vld [vmem:[%s15529_s28 + $0x78] sm:$0xff] }
 0x14e   : > { %12622 = vmatmul.mubr.msk.bf16.gmra.mrb[12].mxu1 %vm609_vm2, %v596_v63  ;;  %12774 = vmatmul.mubr.msk.bf16.gmra.mrb[12].mxu0 %vm609_vm2, %v1777_v0  ;;  %v2076_v63 = vld [vmem:[%s15529_s28 + $0x94] sm:$0xff]  ;;  %v2077_v0 = vld [vmem:[%s15529_s28 + $0x9c] sm:$0xff]  ;;  %v538_v35 = vpack.c.bf16 %v507_v27, %v506_v26  ;;  %v2086_v38 = vld [vmem:[%s15529_s28 + $0xe4] sm:$0xff] }
 0x14f   : > { %12625 = vmatprep.mubr.msk.bf16.mxu1 %vm609_vm2, %v597_v1  ;;  %12777 = vmatprep.mubr.msk.bf16.mxu0 %vm609_vm2, %v1778_v3  ;;  %v606_v1 = vpack.c.bf16 %v588_v58, %v587_v57  ;;  %v15703_v3 = vpack.c.bf16 %v2075_v60, %v2074_v59  ;;  %v15705_v5 = vpack.c.bf16 %v2077_v0, %v2076_v63  ;;  %v2087_v39 = vld [vmem:[%s15529_s28 + $0xec] sm:$0xff]  ;;  %v2089_v45 = vld [vmem:[%s15529_s28 + $0xfc] sm:$0xff]  ;;  %v2090_v52 = vld [vmem:[%s15529_s28 + $0x104] sm:$0xff] }
 0x150   : > { %v15762_v47 = vpack.c.bf16 %v2087_v39, %v2086_v38  ;;  %v515_v57 = vld [vmem:[%s15529_s28 + $0x88] sm:$0xff]  ;;  %v2092_v58 = vld [vmem:[%s15529_s28 + $0x114] sm:$0xff]  ;;  %v2093_v59 = vld [vmem:[%s15529_s28 + $0x11c] sm:$0xff] }
 0x151   : > { %v15782_v63 = vpack.c.bf16 %v2093_v59, %v2092_v58  ;;  %v516_v0 = vld [vmem:[%s15529_s28 + $0x90] sm:$0xff]  ;;  %v525_v25 = vld [vmem:[%s15529_s28 + $0xd8] sm:$0xff]  ;;  %v527_v26 = vld [vmem:[%s15529_s28 + $0xe8] sm:$0xff] }
 0x152   : > { %v1099_v58 = vld [vmem:[%s15529_s28 + $0x8a] sm:$0xff] }
 0x156   : > { %12626 = vmatmul.mubr.msk.bf16.gmra.mrb[16].mxu1 %vm609_vm2, %v598_v15  ;;  %12778 = vmatmul.mubr.msk.bf16.gmra.mrb[16].mxu0 %vm609_vm2, %v1779_v16  ;;  %v2081_v15 = vld [vmem:[%s15529_s28 + $0xbc] sm:$0xff]  ;;  %v535_v16 = vpack.c.bf16 %v501_v9, %v500_v6  ;;  %v2095_v6 = vld [vmem:[%s15529_s28 + $0x12c] sm:$0xff] }
 0x157   : > { %12629 = vmatprep.mubr.msk.bf16.mxu1 %vm609_vm2, %v599_v17  ;;  %12799 = vmatprep.mubr.msk.bf16.mxu0 %vm609_vm2, %v2096_v18  ;;  %v15721_v17 = vpack.c.bf16 %v2079_v11, %v2078_v10  ;;  %v1463_v18 = vld [vmem:[#allocation7 + $0x6] sm:$0x3]  ;;  %v15723_v20 = vpack.c.bf16 %v2081_v15, %v2080_v14  ;;  %v519_v10 = vld [vmem:[%s15529_s28 + $0xa8] sm:$0xff]  ;;  %v521_v15 = vld [vmem:[%s15529_s28 + $0xb8] sm:$0xff] }
 0x158   : > { %v15726_v21 = vand.u32 %v1463_v18, %v15556_v2  ;;  %v518_v9 = vld [vmem:[%s15529_s28 + $0xa0] sm:$0xff]  ;;  %v520_v14 = vld [vmem:[%s15529_s28 + $0xb0] sm:$0xff]  ;;  %v523_v18 = vld [vmem:[%s15529_s28 + $0xc8] sm:$0xff] }
 0x159   : > { %v544_v13 = vpack.c.bf16 %v519_v10, %v518_v9  ;;  %v545_v22 = vpack.c.bf16 %v521_v15, %v520_v14  ;;  %v1105_v14 = vld [vmem:[%s15529_s28 + $0xba] sm:$0xff] }
 0x15a   : > { %v2714_v15 = vld [vmem:[%s15529_s28 + $0x35] sm:$0xff] }
 0x15e   : > { %12630 = vmatmul.mubr.msk.bf16.gmra.mrb[20].mxu1 %vm609_vm2, %v600_v28  ;;  %12800 = vmatmul.mubr.msk.bf16.vlgmr.msra.gmra.mrb[0].mxu0 %vm609_vm2, %v15645_v29  ;;  %v2084_v28 = vld [vmem:[%s15529_s28 + $0xd4] sm:$0xff] }
 0x15f   : > { %12836 = vmatpush3.bf16.msra.mxu0 %v2497_v50  ;;  %12633 = vmatprep.mubr.msk.bf16.mxu1 %vm609_vm2, %v601_v30  ;;  %v586_v50 = vld [vmem:[%s15529_s28 + $0x109] sm:$0xff]  ;;  %v2085_v30 = vld [vmem:[%s15529_s28 + $0xdc] sm:$0xff] }
 0x160   : > { %12803 = vmatprep.mubr.msk.bf16.mxu0 %vm609_vm2, %v15647_v31  ;;  %12873 = vmatprep.subr.bf16.mxu0 %v15650_v32  ;;  %v605_v55 = vpack.c.bf16 %v586_v50, %v585_v49  ;;  %v15746_v36 = vpack.c.bf16 %v2085_v30, %v2084_v28  ;;  %v512_v50 = vld [vmem:[%s15529_s28 + $0x70] sm:$0xff]  ;;  %v531_v30 = vld [vmem:[%s15529_s28 + $0x108] sm:$0xff] }
 0x161   : > { %v541_v60 = vpack.c.bf16 %v513_v51, %v512_v50  ;;  %v1094_v51 = vld [vmem:[%s15529_s28 + $0x62] sm:$0xff] }
 0x166   : > { %12634 = vmatmul.mubr.msk.bf16.gmra.mrb[24].mxu1 %vm609_vm2, %v602_v41  ;;  %12804 = vmatmul.mubr.msk.bf16.gmra.mrb[4].mxu0 %vm609_vm2, %v15667_v42  ;;  %v511_v41 = vld [vmem:[%s15529_s28 + $0x68] sm:$0xff] }
 0x167   : > { %12637 = vmatprep.mubr.msk.bf16.mxu1 %vm609_vm2, %v603_v43  ;;  %12807 = vmatprep.mubr.msk.bf16.mxu0 %vm609_vm2, %v15669_v44  ;;  %v2088_v43 = vld [vmem:[%s15529_s28 + $0xf4] sm:$0xff]  ;;  %v540_v48 = vpack.c.bf16 %v511_v41, %v510_v40  ;;  %v1086_v40 = vld [vmem:[%s15529_s28 + $0x22] sm:$0xff]  ;;  %v1087_v41 = vld [vmem:[%s15529_s28 + $0x2a] sm:$0xff] }
 0x168   : > { %v15764_v49 = vpack.c.bf16 %v2089_v45, %v2088_v43  ;;  %v15855_v45 = vpack.c.bf16 %v1087_v41, %v1086_v40  ;;  %v1115_v40 = vld [vmem:[%s15529_s28 + $0x10a] sm:$0xff] }
 0x169   : > { %v2724_v41 = vld [vmem:[%s15529_s28 + $0x85] sm:$0xff] }
 0x16e   : > { %12638 = vmatmul.mubr.msk.bf16.gmra.mrb[28].mxu1 %vm609_vm2, %v604_v53  ;;  %12808 = vmatmul.mubr.msk.bf16.gmra.mrb[8].mxu0 %vm609_vm2, %v15685_v54  ;;  %v2091_v53 = vld [vmem:[%s15529_s28 + $0x10c] sm:$0xff] }
 0x16f   : > { %12641 = vmatprep.mubr.msk.bf16.mxu1 %vm609_vm2, %v605_v55  ;;  %12811 = vmatprep.mubr.msk.bf16.mxu0 %vm609_vm2, %v15687_v56  ;;  %v514_v55 = vld [vmem:[%s15529_s28 + $0x80] sm:$0xff]  ;;  %v15780_v61 = vpack.c.bf16 %v2091_v53, %v2090_v52  ;;  %v1095_v52 = vld [vmem:[%s15529_s28 + $0x6a] sm:$0xff] }
 0x170   : > { %v542_v62 = vpack.c.bf16 %v515_v57, %v514_v55  ;;  %v15889_v55 = vpack.c.bf16 %v1095_v52, %v1094_v51  ;;  %v1098_v57 = vld [vmem:[%s15529_s28 + $0x82] sm:$0xff]  ;;  %v1117_v51 = vld [vmem:[%s15529_s28 + $0x11a] sm:$0xff] }
 0x171   : > { %v2726_v52 = vld [vmem:[%s15529_s28 + $0x95] sm:$0xff] }
 0x176   : > { %12642 = vmatmul.mubr.msk.bf16.gmra.mrb[32].mxu1 %vm609_vm2, %v606_v1  ;;  %12812 = vmatmul.mubr.msk.bf16.gmra.mrb[12].mxu0 %vm609_vm2, %v15703_v3  ;;  %v517_v1 = vld [vmem:[%s15529_s28 + $0x98] sm:$0xff] }
 0x177   : > { %12647 = vmatprep.mubr.msk.bf16.mxu1 %vm609_vm2, %v534_v4  ;;  %12815 = vmatprep.mubr.msk.bf16.mxu0 %vm609_vm2, %v15705_v5  ;;  %v2094_v4 = vld [vmem:[%s15529_s28 + $0x124] sm:$0xff]  ;;  %v543_v11 = vpack.c.bf16 %v517_v1, %v516_v0  ;;  %v2421_v0 = vld [vmem:[%s15529_s28 + $0x13c] sm:$0xff] }
 0x178   : > { %v15796_v12 = vpack.c.bf16 %v2095_v6, %v2094_v4  ;;  %v1102_v1 = vld [vmem:[%s15529_s28 + $0xa2] sm:$0xff]  ;;  %v1103_v4 = vld [vmem:[%s15529_s28 + $0xaa] sm:$0xff] }
 0x179   : > { %v2712_v6 = vld [vmem:[%s15529_s28 + $0x25] sm:$0xff] }
 0x17e   : > { %12648 = vmatmul.mubr.msk.bf16.vlgmr.msra.gmra.mrb[0].mxu1 %vm609_vm2, %v535_v16  ;;  %12816 = vmatmul.mubr.msk.bf16.gmra.mrb[16].mxu0 %vm609_vm2, %v15721_v17  ;;  %v522_v16 = vld [vmem:[%s15529_s28 + $0xc0] sm:$0xff] }
 0x17f   : > { %12651 = vmatprep.mubr.msk.bf16.mxu1 %vm609_vm2, %v536_v19  ;;  %12819 = vmatprep.mubr.msk.bf16.mxu0 %vm609_vm2, %v15723_v20  ;;  %v3093_v19 = vld [vmem:[#allocation7 + $0x10] sm:$0x3]  ;;  %v546_v23 = vpack.c.bf16 %v523_v18, %v522_v16  ;;  %v1106_v18 = vld [vmem:[%s15529_s28 + $0xc2] sm:$0xff] }
 0x180   : > { %12684 = vmatpush3.bf16.msra.mxu1 %v15622_v8  ;;  %v508_v8 = vld [vmem:[%s15529_s28 + $0x50] sm:$0xff]  ;;  %v15809_v24 = vand.u32 %v3093_v19, %v15556_v2  ;;  %v526_v2 = vld [vmem:[%s15529_s28 + $0xe0] sm:$0xff] }
 0x181   : > { %12721 = vmatprep.subr.bf16.mxu1 %v15726_v21  ;;  %v539_v46 = vpack.c.bf16 %v509_v37, %v508_v8  ;;  %v548_v28 = vpack.c.bf16 %v527_v26, %v526_v2  ;;  %v1082_v8 = vld [vmem:[%s15529_s28 + $0x2] sm:$0xff]  ;;  %v1083_v37 = vld [vmem:[%s15529_s28 + $0xa] sm:$0xff] }
 0x182   : > { %v1118_v39 = vpack.c.bf16 %v1083_v37, %v1082_v8  ;;  %v2715_v16 = vld [vmem:[%s15529_s28 + $0x3d] sm:$0xff]  ;;  %v1107_v19 = vld [vmem:[%s15529_s28 + $0xca] sm:$0xff]  ;;  %v1112_v37 = vld [vmem:[%s15529_s28 + $0xf2] sm:$0xff] }
 0x183   : > { %v15943_v2 = vpack.c.bf16 %v1107_v19, %v1106_v18 }
 0x186   : > { %12652 = vmatmul.mubr.msk.bf16.gmra.mrb[4].mxu1 %vm609_vm2, %v537_v33  ;;  %12820 = vmatmul.mubr.msk.bf16.gmra.mrb[20].mxu0 %vm609_vm2, %v15744_v34 }
 0x187   : > { %12655 = vmatprep.mubr.msk.bf16.mxu1 %vm609_vm2, %v538_v35  ;;  %12823 = vmatprep.mubr.msk.bf16.mxu0 %vm609_vm2, %v15746_v36 }
 0x18e   : > { %12656 = vmatmul.mubr.msk.bf16.gmra.mrb[8].mxu1 %vm609_vm2, %v539_v46  ;;  %12824 = vmatmul.mubr.msk.bf16.gmra.mrb[24].mxu0 %vm609_vm2, %v15762_v47  ;;  %v1090_v46 = vld [vmem:[%s15529_s28 + $0x42] sm:$0xff] }
 0x18f   : > { %12659 = vmatprep.mubr.msk.bf16.mxu1 %vm609_vm2, %v540_v48  ;;  %12827 = vmatprep.mubr.msk.bf16.mxu0 %vm609_vm2, %v15764_v49  ;;  %v1091_v48 = vld [vmem:[%s15529_s28 + $0x4a] sm:$0xff] }
 0x196   : > { %12660 = vmatmul.mubr.msk.bf16.gmra.mrb[12].mxu1 %vm609_vm2, %v541_v60  ;;  %12828 = vmatmul.mubr.msk.bf16.gmra.mrb[28].mxu0 %vm609_vm2, %v15780_v61  ;;  %v15905_v60 = vpack.c.bf16 %v1099_v58, %v1098_v57  ;;  %v2729_v57 = vld [vmem:[%s15529_s28 + $0xad] sm:$0xff] }
 0x197   : > { %12663 = vmatprep.mubr.msk.bf16.mxu1 %vm609_vm2, %v542_v62  ;;  %12831 = vmatprep.mubr.msk.bf16.mxu0 %vm609_vm2, %v15782_v63  ;;  %v2420_v62 = vld [vmem:[%s15529_s28 + $0x134] sm:$0xff] }
 0x198   : > { %v2439_v10 = vpack.c.bf16 %v2421_v0, %v2420_v62  ;;  %v2730_v62 = vld [vmem:[%s15529_s28 + $0xb5] sm:$0xff]  ;;  %v2731_v0 = vld [vmem:[%s15529_s28 + $0xbd] sm:$0xff] }
 0x19e   : > { %12664 = vmatmul.mubr.msk.bf16.gmra.mrb[16].mxu1 %vm609_vm2, %v543_v11  ;;  %12832 = vmatmul.mubr.msk.bf16.gmra.mrb[32].mxu0 %vm609_vm2, %v15796_v12  ;;  %v15925_v11 = vpack.c.bf16 %v1103_v4, %v1102_v1  ;;  %v2732_v1 = vld [vmem:[%s15529_s28 + $0xc5] sm:$0xff]  ;;  %v2733_v4 = vld [vmem:[%s15529_s28 + $0xcd] sm:$0xff] }
 0x19f   : > { %12667 = vmatprep.mubr.msk.bf16.mxu1 %vm609_vm2, %v544_v13  ;;  %12837 = vmatprep.mubr.msk.bf16.mxu0 %vm609_vm2, %v15645_v29  ;;  %v524_v29 = vld [vmem:[%s15529_s28 + $0xd0] sm:$0xff] }
 0x1a0   : > { %v547_v27 = vpack.c.bf16 %v525_v25, %v524_v29  ;;  %v2749_v25 = vpack.c.bf16 %v2715_v16, %v2714_v15  ;;  %v2741_v16 = vld [vmem:[%s15529_s28 + $0x10d] sm:$0xff] }
 0x1a6   : > { %12668 = vmatmul.mubr.msk.bf16.gmra.mrb[20].mxu1 %vm609_vm2, %v545_v22  ;;  %12838 = vmatmul.mubr.msk.bf16.vlgmr.msra.gmra.mrb[0].mxu0 %vm609_vm2, %v15647_v31  ;;  %v528_v31 = vld [vmem:[%s15529_s28 + $0xf0] sm:$0xff]  ;;  %v2716_v22 = vld [vmem:[%s15529_s28 + $0x45] sm:$0xff] }
 0x1a7   : > { %12874 = vmatpush3.bf16.msra.mxu0 %v15650_v32  ;;  %12671 = vmatprep.mubr.msk.bf16.mxu1 %vm609_vm2, %v546_v23  ;;  %v529_v32 = vld [vmem:[%s15529_s28 + $0xf8] sm:$0xff]  ;;  %v2717_v23 = vld [vmem:[%s15529_s28 + $0x4d] sm:$0xff] }
 0x1a8   : > { %12841 = vmatprep.mubr.msk.bf16.mxu0 %vm609_vm2, %v15667_v42  ;;  %12911 = vmatprep.subr.bf16.mxu0 %v15809_v24  ;;  %v530_v42 = vld [vmem:[%s15529_s28 + $0x100] sm:$0xff]  ;;  %v549_v33 = vpack.c.bf16 %v529_v32, %v528_v31  ;;  %v2750_v26 = vpack.c.bf16 %v2717_v23, %v2716_v22  ;;  %v2718_v31 = vld [vmem:[%s15529_s28 + $0x55] sm:$0xff]  ;;  %v2745_v23 = vld [vmem:[%s15529_s28 + $0x12d] sm:$0xff] }
 0x1a9   : > { %v550_v35 = vpack.c.bf16 %v531_v30, %v530_v42  ;;  %v2719_v32 = vld [vmem:[%s15529_s28 + $0x5d] sm:$0xff]  ;;  %v1111_v30 = vld [vmem:[%s15529_s28 + $0xea] sm:$0xff] }
 0x1aa   : > { %v1110_v42 = vld [vmem:[%s15529_s28 + $0xe2] sm:$0xff] }
 0x1ab   : > { %v2744_v22 = vld [vmem:[%s15529_s28 + $0x125] sm:$0xff] }
 0x1ae   : > { %12672 = vmatmul.mubr.msk.bf16.gmra.mrb[24].mxu1 %vm609_vm2, %v547_v27  ;;  %12842 = vmatmul.mubr.msk.bf16.gmra.mrb[4].mxu0 %vm609_vm2, %v15669_v44  ;;  %v532_v44 = vld [vmem:[%s15529_s28 + $0x110] sm:$0xff] }
 0x1af   : > { %12675 = vmatprep.mubr.msk.bf16.mxu1 %vm609_vm2, %v548_v28  ;;  %12845 = vmatprep.mubr.msk.bf16.mxu0 %vm609_vm2, %v15685_v54  ;;  %v533_v54 = vld [vmem:[%s15529_s28 + $0x118] sm:$0xff] }
 0x1b0   : > { %v551_v38 = vpack.c.bf16 %v533_v54, %v532_v44  ;;  %v1108_v27 = vld [vmem:[%s15529_s28 + $0xd2] sm:$0xff]  ;;  %v1109_v28 = vld [vmem:[%s15529_s28 + $0xda] sm:$0xff]  ;;  %v15962_v54 = vpack.c.bf16 %v1111_v30, %v1110_v42  ;;  %v3042_v42 = vld [vmem:[%s15529_s28 + $0x46] sm:$0xff] }
 0x1b1   : > { %v15960_v44 = vpack.c.bf16 %v1109_v28, %v1108_v27  ;;  %v3038_v27 = vld [vmem:[%s15529_s28 + $0x26] sm:$0xff]  ;;  %v3039_v28 = vld [vmem:[%s15529_s28 + $0x2e] sm:$0xff] }
 0x1b2   : > { %v3043_v30 = vld [vmem:[%s15529_s28 + $0x4e] sm:$0xff] }
 0x1b6   : > { %12676 = vmatmul.mubr.msk.bf16.gmra.mrb[28].mxu1 %vm609_vm2, %v549_v33  ;;  %12846 = vmatmul.mubr.msk.bf16.gmra.mrb[8].mxu0 %vm609_vm2, %v15687_v56  ;;  %v1084_v56 = vld [vmem:[%s15529_s28 + $0x12] sm:$0xff]  ;;  %v2720_v33 = vld [vmem:[%s15529_s28 + $0x65] sm:$0xff] }
 0x1b7   : > { %12679 = vmatprep.mubr.msk.bf16.mxu1 %vm609_vm2, %v550_v35  ;;  %12849 = vmatprep.mubr.msk.bf16.mxu0 %vm609_vm2, %v15703_v3  ;;  %v1085_v3 = vld [vmem:[%s15529_s28 + $0x1a] sm:$0xff]  ;;  %v2721_v35 = vld [vmem:[%s15529_s28 + $0x6d] sm:$0xff] }
 0x1b8   : > { %v15853_v43 = vpack.c.bf16 %v1085_v3, %v1084_v56  ;;  %v2752_v8 = vpack.c.bf16 %v2721_v35, %v2720_v33  ;;  %v2723_v56 = vld [vmem:[%s15529_s28 + $0x7d] sm:$0xff]  ;;  %v3076_v35 = vpack.c.bf16 %v3043_v30, %v3042_v42  ;;  %v1769_v30 = vld [vmem:[%s15529_s28 + $0x12b] sm:$0xff] }
 0x1b9   : > { %v1114_v3 = vld [vmem:[%s15529_s28 + $0x102] sm:$0xff] }
 0x1ba   : > { %v1768_v42 = vld [vmem:[%s15529_s28 + $0x123] sm:$0xff] }
 0x1be   : > { %12680 = vmatmul.mubr.msk.bf16.gmra.mrb[32].mxu1 %vm609_vm2, %v551_v38  ;;  %12850 = vmatmul.mubr.msk.bf16.gmra.mrb[12].mxu0 %vm609_vm2, %v15705_v5  ;;  %v1088_v5 = vld [vmem:[%s15529_s28 + $0x32] sm:$0xff]  ;;  %v1113_v38 = vld [vmem:[%s15529_s28 + $0xfa] sm:$0xff] }
 0x1bf   : > { %12685 = vmatprep.mubr.msk.bf16.mxu1 %vm609_vm2, %v1118_v39  ;;  %12853 = vmatprep.mubr.msk.bf16.mxu0 %vm609_vm2, %v15721_v17  ;;  %v1089_v17 = vld [vmem:[%s15529_s28 + $0x3a] sm:$0xff] }
 0x1c0   : > { %v15871_v50 = vpack.c.bf16 %v1089_v17, %v1088_v5  ;;  %v2722_v39 = vld [vmem:[%s15529_s28 + $0x75] sm:$0xff]  ;;  %v2725_v5 = vld [vmem:[%s15529_s28 + $0x8d] sm:$0xff]  ;;  %v15978_v17 = vpack.c.bf16 %v1113_v38, %v1112_v37 }
 0x1c6   : > { %12686 = vmatmul.mubr.msk.bf16.vlgmr.msra.gmra.mrb[0].mxu1 %vm609_vm2, %v15853_v43  ;;  %12854 = vmatmul.mubr.msk.bf16.gmra.mrb[16].mxu0 %vm609_vm2, %v15723_v20  ;;  %v15873_v20 = vpack.c.bf16 %v1091_v48, %v1090_v46  ;;  %v2753_v46 = vpack.c.bf16 %v2723_v56, %v2722_v39  ;;  %v15980_v48 = vpack.c.bf16 %v1115_v40, %v1114_v3  ;;  %v3050_v39 = vld [vmem:[%s15529_s28 + $0x86] sm:$0xff]  ;;  %v3051_v56 = vld [vmem:[%s15529_s28 + $0x8e] sm:$0xff] }
 0x1c7   : > { %12689 = vmatprep.mubr.msk.bf16.mxu1 %vm609_vm2, %v15855_v45  ;;  %12857 = vmatprep.mubr.msk.bf16.mxu0 %vm609_vm2, %v15744_v34  ;;  %v1093_v34 = vld [vmem:[%s15529_s28 + $0x5a] sm:$0xff]  ;;  %v3080_v40 = vpack.c.bf16 %v3051_v56, %v3050_v39  ;;  %v3578_v39 = vlaneseq }
 0x1c8   : > { %12722 = vmatpush3.bf16.msra.mxu1 %v15726_v21  ;;  %v1092_v21 = vld [vmem:[%s15529_s28 + $0x52] sm:$0xff] }
 0x1c9   : > { %13633 = vmatprep.subr.bf16.mxu1 %v15561_v7  ;;  %v15887_v53 = vpack.c.bf16 %v1093_v34, %v1092_v21  ;;  %v2754_v21 = vpack.c.bf16 %v2725_v5, %v2724_v41  ;;  %v1116_v34 = vld [vmem:[%s15529_s28 + $0x112] sm:$0xff]  ;;  %v1443_v41 = vld [vmem:[%s15529_s28 + $0x12a] sm:$0xff]  ;;  %v16143_v56 = vshrl.u32 %v3578_v39, 7 }
 0x1ca   : > { %v15994_v58 = vpack.c.bf16 %v1117_v51, %v1116_v34  ;;  %v3052_v5 = vld [vmem:[%s15529_s28 + $0x96] sm:$0xff]  ;;  %v3055_v34 = vld [vmem:[%s15529_s28 + $0xae] sm:$0xff] }
 0x1ce   : > { %12690 = vmatmul.mubr.msk.bf16.gmra.mrb[4].mxu1 %vm609_vm2, %v15871_v50  ;;  %12858 = vmatmul.mubr.msk.bf16.gmra.mrb[20].mxu0 %vm609_vm2, %v15746_v36  ;;  %v1096_v36 = vld [vmem:[%s15529_s28 + $0x72] sm:$0xff] }
 0x1cf   : > { %12693 = vmatprep.mubr.msk.bf16.mxu1 %vm609_vm2, %v15873_v20  ;;  %12861 = vmatprep.mubr.msk.bf16.mxu0 %vm609_vm2, %v15762_v47  ;;  %v1097_v47 = vld [vmem:[%s15529_s28 + $0x7a] sm:$0xff] }
 0x1d0   : > { %v15903_v59 = vpack.c.bf16 %v1097_v47, %v1096_v36  ;;  %v2727_v36 = vld [vmem:[%s15529_s28 + $0x9d] sm:$0xff]  ;;  %v2728_v47 = vld [vmem:[%s15529_s28 + $0xa5] sm:$0xff] }
 0x1d6   : > { %12694 = vmatmul.mubr.msk.bf16.gmra.mrb[8].mxu1 %vm609_vm2, %v15887_v53  ;;  %12862 = vmatmul.mubr.msk.bf16.gmra.mrb[24].mxu0 %vm609_vm2, %v15764_v49  ;;  %v1100_v49 = vld [vmem:[%s15529_s28 + $0x92] sm:$0xff] }
 0x1d7   : > { %12697 = vmatprep.mubr.msk.bf16.mxu1 %vm609_vm2, %v15889_v55  ;;  %12865 = vmatprep.mubr.msk.bf16.mxu0 %vm609_vm2, %v15780_v61  ;;  %v1101_v61 = vld [vmem:[%s15529_s28 + $0x9a] sm:$0xff] }
 0x1d8   : > { %v15923_v9 = vpack.c.bf16 %v1101_v61, %v1100_v49  ;;  %v2755_v49 = vpack.c.bf16 %v2727_v36, %v2726_v52  ;;  %v2756_v61 = vpack.c.bf16 %v2729_v57, %v2728_v47  ;;  %v1756_v57 = vld [vmem:[%s15529_s28 + $0xc3] sm:$0xff] }
 0x1de   : > { %12698 = vmatmul.mubr.msk.bf16.gmra.mrb[12].mxu1 %vm609_vm2, %v15903_v59  ;;  %12866 = vmatmul.mubr.msk.bf16.gmra.mrb[28].mxu0 %vm609_vm2, %v15782_v63  ;;  %v2713_v63 = vld [vmem:[%s15529_s28 + $0x2d] sm:$0xff] }
 0x1df   : > { %12701 = vmatprep.mubr.msk.bf16.mxu1 %vm609_vm2, %v15905_v60  ;;  %12869 = vmatprep.mubr.msk.bf16.mxu0 %vm609_vm2, %v15796_v12  ;;  %v2748_v13 = vpack.c.bf16 %v2713_v63, %v2712_v6  ;;  %v1104_v12 = vld [vmem:[%s15529_s28 + $0xb2] sm:$0xff]  ;;  %v2757_v6 = vpack.c.bf16 %v2731_v0, %v2730_v62  ;;  %v2758_v63 = vpack.c.bf16 %v2733_v4, %v2732_v1  ;;  %v1759_v0 = vld [vmem:[%s15529_s28 + $0xdb] sm:$0xff]  ;;  %v3058_v1 = vld [vmem:[%s15529_s28 + $0xc6] sm:$0xff] }
 0x1e0   : > { %v15941_v29 = vpack.c.bf16 %v1105_v14, %v1104_v12  ;;  %v2737_v12 = vld [vmem:[%s15529_s28 + $0xed] sm:$0xff] }
 0x1e1   : > { %v1758_v62 = vld [vmem:[%s15529_s28 + $0xd3] sm:$0xff] }
 0x1e2   : > { %v3059_v4 = vld [vmem:[%s15529_s28 + $0xce] sm:$0xff] }
 0x1e6   : > { %12702 = vmatmul.mubr.msk.bf16.gmra.mrb[16].mxu1 %vm609_vm2, %v15923_v9  ;;  %12870 = vmatmul.mubr.msk.bf16.gmra.mrb[32].mxu0 %vm609_vm2, %v2439_v10  ;;  %v2735_v10 = vld [vmem:[%s15529_s28 + $0xdd] sm:$0xff] }
 0x1e7   : > { %12705 = vmatprep.mubr.msk.bf16.mxu1 %vm609_vm2, %v15925_v11  ;;  %12875 = vmatprep.mubr.msk.bf16.mxu0 %vm609_vm2, %v2748_v13  ;;  %v2736_v13 = vld [vmem:[%s15529_s28 + $0xe5] sm:$0xff] }
 0x1e8   : > { %v2760_v15 = vpack.c.bf16 %v2737_v12, %v2736_v13  ;;  %v1760_v13 = vld [vmem:[%s15529_s28 + $0xe3] sm:$0xff]  ;;  %v1761_v12 = vld [vmem:[%s15529_s28 + $0xeb] sm:$0xff] }
 0x1ee   : > { %12706 = vmatmul.mubr.msk.bf16.gmra.mrb[20].mxu1 %vm609_vm2, %v15941_v29  ;;  %12876 = vmatmul.mubr.msk.bf16.vlgmr.msra.gmra.mrb[0].mxu0 %vm609_vm2, %v2749_v25 }
 0x1ef   : > { %12912 = vmatpush3.bf16.msra.mxu0 %v15809_v24  ;;  %12709 = vmatprep.mubr.msk.bf16.mxu1 %vm609_vm2, %v15943_v2  ;;  %v2751_v24 = vpack.c.bf16 %v2719_v32, %v2718_v31  ;;  %v3074_v32 = vpack.c.bf16 %v3039_v28, %v3038_v27  ;;  %v3066_v27 = vld [vmem:[%s15529_s28 + $0x106] sm:$0xff]  ;;  %v3067_v28 = vld [vmem:[%s15529_s28 + $0x10e] sm:$0xff] }
 0x1f0   : > { %12879 = vmatprep.mubr.msk.bf16.mxu0 %vm609_vm2, %v2750_v26  ;;  %v2764_v26 = vpack.c.bf16 %v2745_v23, %v2744_v22  ;;  %v1764_v22 = vld [vmem:[%s15529_s28 + $0x103] sm:$0xff]  ;;  %v1765_v23 = vld [vmem:[%s15529_s28 + $0x10b] sm:$0xff] }
 0x1f6   : > { %12710 = vmatmul.mubr.msk.bf16.gmra.mrb[24].mxu1 %vm609_vm2, %v15960_v44  ;;  %12880 = vmatmul.mubr.msk.bf16.gmra.mrb[4].mxu0 %vm609_vm2, %v2751_v24  ;;  %v3046_v24 = vld [vmem:[%s15529_s28 + $0x66] sm:$0xff] }
 0x1f7   : > { %12713 = vmatprep.mubr.msk.bf16.mxu1 %vm609_vm2, %v15962_v54  ;;  %12883 = vmatprep.mubr.msk.bf16.mxu0 %vm609_vm2, %v2752_v8  ;;  %v3047_v8 = vld [vmem:[%s15529_s28 + $0x6e] sm:$0xff] }
 0x1f8   : > { %v3078_v38 = vpack.c.bf16 %v3047_v8, %v3046_v24  ;;  %v1787_v24 = vpack.c.bf16 %v1769_v30, %v1768_v42 }
 0x1fe   : > { %12714 = vmatmul.mubr.msk.bf16.gmra.mrb[28].mxu1 %vm609_vm2, %v15978_v17  ;;  %12884 = vmatmul.mubr.msk.bf16.gmra.mrb[8].mxu0 %vm609_vm2, %v2753_v46  ;;  %v1754_v46 = vld [vmem:[%s15529_s28 + $0xb3] sm:$0xff] }
 0x1ff   : > { %12717 = vmatprep.mubr.msk.bf16.mxu1 %vm609_vm2, %v15980_v48  ;;  %12887 = vmatprep.mubr.msk.bf16.mxu0 %vm609_vm2, %v2754_v21  ;;  %v1755_v21 = vld [vmem:[%s15529_s28 + $0xbb] sm:$0xff] }
 0x200   : > { %v1780_v36 = vpack.c.bf16 %v1755_v21, %v1754_v46  ;;  %v3585_v46 = vadd.s32 48, %v16143_v56  ;;  %v3586_v21 = vadd.s32 56, %v16143_v56 }
 0x206   : > { %12718 = vmatmul.mubr.msk.bf16.gmra.mrb[32].mxu1 %vm609_vm2, %v15994_v58  ;;  %12888 = vmatmul.mubr.msk.bf16.gmra.mrb[12].mxu0 %vm609_vm2, %v2755_v49  ;;  %v3056_v49 = vld [vmem:[%s15529_s28 + $0xb6] sm:$0xff] }
 0x207   : > { %12723 = vmatprep.mubr.msk.bf16.mxu1 %vm609_vm2, %v15853_v43  ;;  %12891 = vmatprep.mubr.msk.bf16.mxu0 %vm609_vm2, %v2756_v61  ;;  %v2734_v43 = vld [vmem:[%s15529_s28 + $0xd5] sm:$0xff]  ;;  %v3057_v61 = vld [vmem:[%s15529_s28 + $0xbe] sm:$0xff] }
 0x208   : > { %v2759_v14 = vpack.c.bf16 %v2735_v10, %v2734_v43  ;;  %v1782_v43 = vpack.c.bf16 %v1759_v0, %v1758_v62  ;;  %v3084_v10 = vpack.c.bf16 %v3059_v4, %v3058_v1  ;;  %v16169_v62 = vadd.s32 80, %v16143_v56 }
 0x20e   : > { %12724 = vmatmul.mubr.msk.bf16.vlgmr.msra.gmra.mrb[0].mxu1 %vm609_vm2, %v15855_v45  ;;  %12892 = vmatmul.mubr.msk.bf16.gmra.mrb[16].mxu0 %vm609_vm2, %v2757_v6  ;;  %v2738_v45 = vld [vmem:[%s15529_s28 + $0xf5] sm:$0xff] }
 0x20f   : > { %12727 = vmatprep.mubr.msk.bf16.mxu1 %vm609_vm2, %v15871_v50  ;;  %12895 = vmatprep.mubr.msk.bf16.mxu0 %vm609_vm2, %v2758_v63  ;;  %v2740_v50 = vld [vmem:[%s15529_s28 + $0x105] sm:$0xff]  ;;  %v3083_v63 = vpack.c.bf16 %v3057_v61, %v3056_v49 }
 0x210   : > { %13634 = vmatpush3.bf16.msra.mxu1 %v15561_v7  ;;  %v2739_v7 = vld [vmem:[%s15529_s28 + $0xfd] sm:$0xff]  ;;  %v2762_v19 = vpack.c.bf16 %v2741_v16, %v2740_v50  ;;  %v3062_v50 = vld [vmem:[%s15529_s28 + $0xe6] sm:$0xff]  ;;  %v3063_v16 = vld [vmem:[%s15529_s28 + $0xee] sm:$0xff] }
 0x211   : > { %v2761_v18 = vpack.c.bf16 %v2739_v7, %v2738_v45  ;;  %v1762_v45 = vld [vmem:[%s15529_s28 + $0xf3] sm:$0xff]  ;;  %v1763_v7 = vld [vmem:[%s15529_s28 + $0xfb] sm:$0xff] }
 0x216   : > { %12728 = vmatmul.mubr.msk.bf16.gmra.mrb[4].mxu1 %vm609_vm2, %v15873_v20  ;;  %12896 = vmatmul.mubr.msk.bf16.gmra.mrb[20].mxu0 %vm609_vm2, %v2759_v14  ;;  %v2742_v20 = vld [vmem:[%s15529_s28 + $0x115] sm:$0xff] }
 0x217   : > { %12731 = vmatprep.mubr.msk.bf16.mxu1 %vm609_vm2, %v15887_v53  ;;  %12899 = vmatprep.mubr.msk.bf16.mxu0 %vm609_vm2, %v2760_v15  ;;  %v2743_v53 = vld [vmem:[%s15529_s28 + $0x11d] sm:$0xff] }
 0x218   : > { %v2763_v25 = vpack.c.bf16 %v2743_v53, %v2742_v20  ;;  %v3060_v14 = vld [vmem:[%s15529_s28 + $0xd6] sm:$0xff]  ;;  %v3061_v15 = vld [vmem:[%s15529_s28 + $0xde] sm:$0xff]  ;;  %v1784_v20 = vpack.c.bf16 %v1763_v7, %v1762_v45  ;;  %v3086_v53 = vpack.c.bf16 %v3063_v16, %v3062_v50  ;;  %v16182_v7 = vadd.s32 88, %v16143_v56 }
 0x21e   : > { %12732 = vmatmul.mubr.msk.bf16.gmra.mrb[8].mxu1 %vm609_vm2, %v15889_v55  ;;  %12900 = vmatmul.mubr.msk.bf16.gmra.mrb[24].mxu0 %vm609_vm2, %v2761_v18  ;;  %v2746_v55 = vld [vmem:[%s15529_s28 + $0x135] sm:$0xff]  ;;  %v1783_v18 = vpack.c.bf16 %v1761_v12, %v1760_v13 }
 0x21f   : > { %12735 = vmatprep.mubr.msk.bf16.mxu1 %vm609_vm2, %v15903_v59  ;;  %12903 = vmatprep.mubr.msk.bf16.mxu0 %vm609_vm2, %v2762_v19  ;;  %v2747_v59 = vld [vmem:[%s15529_s28 + $0x13d] sm:$0xff]  ;;  %v3085_v19 = vpack.c.bf16 %v3061_v15, %v3060_v14 }
 0x220   : > { %v2765_v31 = vpack.c.bf16 %v2747_v59, %v2746_v55  ;;  %v1766_v55 = vld [vmem:[%s15529_s28 + $0x113] sm:$0xff]  ;;  %v1767_v59 = vld [vmem:[%s15529_s28 + $0x11b] sm:$0xff] }
 0x226   : > { %12736 = vmatmul.mubr.msk.bf16.gmra.mrb[12].mxu1 %vm609_vm2, %v15905_v60  ;;  %12904 = vmatmul.mubr.msk.bf16.gmra.mrb[28].mxu0 %vm609_vm2, %v2763_v25  ;;  %v3040_v60 = vld [vmem:[%s15529_s28 + $0x36] sm:$0xff] }
 0x227   : > { %12739 = vmatprep.mubr.msk.bf16.mxu1 %vm609_vm2, %v15923_v9  ;;  %12907 = vmatprep.mubr.msk.bf16.mxu0 %vm609_vm2, %v2764_v26  ;;  %v3041_v9 = vld [vmem:[%s15529_s28 + $0x3e] sm:$0xff]  ;;  %v3064_v25 = vld [vmem:[%s15529_s28 + $0xf6] sm:$0xff] }
 0x228   : > { %v3075_v33 = vpack.c.bf16 %v3041_v9, %v3040_v60  ;;  %v3065_v26 = vld [vmem:[%s15529_s28 + $0xfe] sm:$0xff]  ;;  %v1786_v60 = vpack.c.bf16 %v1767_v59, %v1766_v55  ;;  %v3088_v9 = vpack.c.bf16 %v3067_v28, %v3066_v27  ;;  %v16200_v27 = vadd.s32 120, %v16143_v56 }
 0x22e   : > { %12740 = vmatmul.mubr.msk.bf16.gmra.mrb[16].mxu1 %vm609_vm2, %v15925_v11  ;;  %12908 = vmatmul.mubr.msk.bf16.gmra.mrb[32].mxu0 %vm609_vm2, %v2765_v31  ;;  %v3044_v11 = vld [vmem:[%s15529_s28 + $0x56] sm:$0xff]  ;;  %v1785_v31 = vpack.c.bf16 %v1765_v23, %v1764_v22  ;;  %v16192_v22 = vmul.u32.u64.low 3817748708, %v16182_v7  ;;  %v16193_v23 = vmul.u32.u64.high 3817748708, %v16182_v7, %v16192_v22 }
 0x22f   : > { %12743 = vmatprep.mubr.msk.bf16.mxu1 %vm609_vm2, %v15941_v29  ;;  %12913 = vmatprep.mubr.msk.bf16.mxu0 %vm609_vm2, %v3074_v32  ;;  %v3045_v29 = vld [vmem:[%s15529_s28 + $0x5e] sm:$0xff]  ;;  %v3087_v32 = vpack.c.bf16 %v3065_v26, %v3064_v25  ;;  %v16196_v25 = vadd.s32 112, %v16143_v56 }
 0x230   : > { %v3077_v37 = vpack.c.bf16 %v3045_v29, %v3044_v11  ;;  %v3070_v11 = vld [vmem:[%s15529_s28 + $0x126] sm:$0xff]  ;;  %v3071_v29 = vld [vmem:[%s15529_s28 + $0x12e] sm:$0xff] }
 0x236   : > { %12744 = vmatmul.mubr.msk.bf16.gmra.mrb[20].mxu1 %vm609_vm2, %v15943_v2  ;;  %12914 = vmatmul.mubr.msk.bf16.vlgmr.msra.gmra.mrb[0].mxu0 %vm609_vm2, %v3075_v33  ;;  %v3048_v2 = vld [vmem:[%s15529_s28 + $0x76] sm:$0xff] }
 0x237   : > { %12747 = vmatprep.mubr.msk.bf16.mxu1 %vm609_vm2, %v15960_v44  ;;  %12917 = vmatprep.mubr.msk.bf16.mxu0 %vm609_vm2, %v3076_v35  ;;  %v3049_v44 = vld [vmem:[%s15529_s28 + $0x7e] sm:$0xff]  ;;  %v3068_v33 = vld [vmem:[%s15529_s28 + $0x116] sm:$0xff] }
 0x238   : > { %v3079_v3 = vpack.c.bf16 %v3049_v44, %v3048_v2  ;;  %v3069_v35 = vld [vmem:[%s15529_s28 + $0x11e] sm:$0xff] }
 0x239   : > { %v3089_v8 = vpack.c.bf16 %v3069_v35, %v3068_v33  ;;  %v3073_v2 = vld [vmem:[%s15529_s28 + $0x13e] sm:$0xff]  ;;  %v16214_v33 = vmul.u32.u64.low 3817748708, %v16196_v25  ;;  %v16215_v35 = vmul.u32.u64.high 3817748708, %v16196_v25, %v16214_v33 }
 0x23e   : > { %12748 = vmatmul.mubr.msk.bf16.gmra.mrb[24].mxu1 %vm609_vm2, %v15962_v54  ;;  %12918 = vmatmul.mubr.msk.bf16.gmra.mrb[4].mxu0 %vm609_vm2, %v3077_v37  ;;  %v1442_v54 = vld [vmem:[%s15529_s28 + $0x122] sm:$0xff]  ;;  %v3090_v37 = vpack.c.bf16 %v3071_v29, %v3070_v11  ;;  %v16218_v11 = vadd.s32 136, %v16143_v56 }
 0x23f   : > { %12751 = vmatprep.mubr.msk.bf16.mxu1 %vm609_vm2, %v15978_v17  ;;  %12921 = vmatprep.mubr.msk.bf16.mxu0 %vm609_vm2, %v3078_v38  ;;  %v3053_v17 = vld [vmem:[%s15529_s28 + $0x9e] sm:$0xff]  ;;  %v1461_v51 = vpack.c.bf16 %v1443_v41, %v1442_v54  ;;  %v3072_v38 = vld [vmem:[%s15529_s28 + $0x136] sm:$0xff] }
 0x240   : > { %v3081_v52 = vpack.c.bf16 %v3053_v17, %v3052_v5  ;;  %v3091_v44 = vpack.c.bf16 %v3073_v2, %v3072_v38 }
 0x246   : > { %12752 = vmatmul.mubr.msk.bf16.gmra.mrb[28].mxu1 %vm609_vm2, %v15980_v48  ;;  %12922 = vmatmul.mubr.msk.bf16.gmra.mrb[8].mxu0 %vm609_vm2, %v3079_v3  ;;  %v3054_v48 = vld [vmem:[%s15529_s28 + $0xa6] sm:$0xff]  ;;  %v3583_v3 = vadd.s32 32, %v16143_v56 }
 0x247   : > { %12755 = vmatprep.mubr.msk.bf16.mxu1 %vm609_vm2, %v15994_v58  ;;  %12925 = vmatprep.mubr.msk.bf16.mxu0 %vm609_vm2, %v3080_v40  ;;  %v3082_v47 = vpack.c.bf16 %v3055_v34, %v3054_v48  ;;  %v1757_v58 = vld [vmem:[%s15529_s28 + $0xcb] sm:$0xff]  ;;  %v3584_v40 = vadd.s32 40, %v16143_v56  ;;  %v16155_v48 = vmul.u32.u64.low 3817748708, %v3585_v46  ;;  %v16156_v34 = vmul.u32.u64.high 3817748708, %v3585_v46, %v16155_v48 }
 0x248   : > { %v1781_v6 = vpack.c.bf16 %v1757_v58, %v1756_v57  ;;  %v16147_v54 = vmul.u32.u64.low 3817748708, %v3583_v3  ;;  %v16148_v41 = vmul.u32.u64.high 3817748708, %v3583_v3, %v16147_v54 }
 0x249   : > { %v16150_v5 = vmul.u32.u64.low 3817748708, %v3584_v40  ;;  %v16151_v17 = vmul.u32.u64.high 3817748708, %v3584_v40, %v16150_v5  ;;  %v16162_v57 = vmul.u32.u64.low 3817748708, %v3586_v21  ;;  %v16163_v58 = vmul.u32.u64.high 3817748708, %v3586_v21, %v16162_v57 }
 0x24a   : > { %v3747_v5 = vshrl.u32 %v16193_v23, 4  ;;  %v16300_v23 = vadd.s32 24, %v16143_v56 }
 0x24b   : > { %v3703_v14 = vshrl.u32 %v16163_v58, 4 }
 0x24d   : > { %v3704_v16 = vmul.u32 18, %v3703_v14  ;;  %v16287_v14 = vadd.s32 160, %v16143_v56 }
 0x24e   : > { %12756 = vmatmul.mubr.msk.bf16.gmra.mrb[32].mxu1 %vm609_vm2, %v1461_v51  ;;  %12926 = vmatmul.mubr.msk.bf16.gmra.mrb[12].mxu0 %vm609_vm2, %v3081_v52  ;;  %v3587_v51 = vadd.s32 64, %v16143_v56  ;;  %v3588_v52 = vadd.s32 72, %v16143_v56 }
 0x24f   : > { %12781 = vmatprep.mubr.msk.bf16.mxu1 %vm609_vm2, %v1780_v36  ;;  %12929 = vmatprep.mubr.msk.bf16.mxu0 %vm609_vm2, %v3082_v47  ;;  %v3670_v36 = vshrl.u32 %v16148_v41, 4  ;;  %v3681_v47 = vshrl.u32 %v16151_v17, 4  ;;  %v3705_v28 = vsub.s32 %v3586_v21, %v3704_v16  ;;  %v16292_v16 = vadd.s32 16, %v16143_v56 }
 0x250   : > { %v16165_v49 = vmul.u32.u64.low 3817748708, %v3587_v51  ;;  %v16166_v61 = vmul.u32.u64.high 3817748708, %v3587_v51, %v16165_v49  ;;  %v16171_v0 = vmul.u32.u64.low 3817748708, %v3588_v52  ;;  %v16172_v1 = vmul.u32.u64.high 3817748708, %v3588_v52, %v16171_v0 }
 0x251   : > { %v3671_v4 = vmul.u32 18, %v3670_v36  ;;  %vm4078_vm10 = vcmp.ne.s32.totalorder %v3705_v28, 0  ;;  %vm4119_vm11 = vcmp.lt.s32.totalorder %v3705_v28, 0  ;;  %v4201_v41 = vadd.s32 18, %v3705_v28 }
 0x252   : > { %v3714_v45 = vshrl.u32 %v16166_v61, 4  ;;  %v3725_v50 = vshrl.u32 %v16172_v1, 4  ;;  %vm4160_vm0 = vmand %vm4119_vm11, %vm4078_vm10  ;;  %v3748_v49 = vmul.u32 18, %v3747_v5  ;;  %v3780_v61 = vshrl.u32 %v16215_v35, 4 }
 0x253   : > { %v3672_v13 = vsub.s32 %v3583_v3, %v3671_v4  ;;  %v16268_v58 = vsel %vm4160_vm0, %v4201_v41, %v3705_v28  ;;  %v16278_v4 = vadd.s32 144, %v16143_v56 }
 0x254   : > { %v3726_v55 = vmul.u32 18, %v3725_v50  ;;  %18869 = vst [vmem:[#allocation33_spill] sm:$0xff] %v16268_v58 }
 0x255   : > { %vm4075_vm3 = vcmp.ne.s32.totalorder %v3672_v13, 0  ;;  %vm4116_vm5 = vcmp.lt.s32.totalorder %v3672_v13, 0  ;;  %v4198_v26 = vadd.s32 18, %v3672_v13 }
 0x256   : > { %12782 = vmatmul.mubr.msk.bf16.vlgmr.msra.gmra.mrb[20].mxu1 %vm609_vm2, %v1781_v6  ;;  %12930 = vmatmul.mubr.msk.bf16.gmra.mrb[16].mxu0 %vm609_vm2, %v3083_v63  ;;  %v3682_v6 = vmul.u32 18, %v3681_v47  ;;  %v3692_v63 = vshrl.u32 %v16156_v34, 4  ;;  %v3727_v29 = vsub.s32 %v3588_v52, %v3726_v55  ;;  %vm16226_vm9 = vmand %vm4116_vm5, %vm4075_vm3 }
 0x257   : > { %12785 = vmatprep.mubr.msk.bf16.mxu1 %vm609_vm2, %v1782_v43  ;;  %12933 = vmatprep.mubr.msk.bf16.mxu0 %vm609_vm2, %v3084_v10  ;;  %v16176_v43 = vmul.u32.u64.low 3817748708, %v16169_v62  ;;  %v16177_v10 = vmul.u32.u64.high 3817748708, %v16169_v62, %v16176_v43  ;;  %v16255_v34 = vsel %vm16226_vm9, %v4198_v26, %v3672_v13 }
 0x258   : > { %v3683_v12 = vsub.s32 %v3584_v40, %v3682_v6  ;;  %v3693_v15 = vmul.u32 18, %v3692_v63  ;;  %vm4121_vm3 = vcmp.lt.s32.totalorder %v3727_v29, 0  ;;  %18866 = vst [vmem:[#allocation30_spill] sm:$0xff] %v16255_v34  ;;  %v4203_v47 = vadd.s32 18, %v3727_v29 }
 0x259   : > { %v3736_v59 = vshrl.u32 %v16177_v10, 4  ;;  %v16282_v43 = vadd.s32 152, %v16143_v56 }
 0x25a   : > { %vm4076_vm4 = vcmp.ne.s32.totalorder %v3683_v12, 0  ;;  %vm4117_vm6 = vcmp.lt.s32.totalorder %v3683_v12, 0  ;;  %v4199_v3 = vadd.s32 18, %v3683_v12 }
 0x25b   : > { %vm16236_vm12 = vmand %vm4117_vm6, %vm4076_vm4 }
 0x25c   : > { %v16261_v52 = vsel %vm16236_vm12, %v4199_v3, %v3683_v12 }
 0x25d   : > { %18867 = vst [vmem:[#allocation31_spill] sm:$0xff] %v16261_v52 }
 0x25e   : > { %12786 = vmatmul.mubr.msk.bf16.gmra.mrb[24].mxu1 %vm609_vm2, %v1783_v18  ;;  %12934 = vmatmul.mubr.msk.bf16.gmra.mrb[20].mxu0 %vm609_vm2, %v3085_v19  ;;  %v16186_v18 = vadd.s32 96, %v16143_v56  ;;  %v3694_v19 = vsub.s32 %v3585_v46, %v3693_v15  ;;  %v16248_v17 = vmul.u32.u64.low 3817748708, %v16218_v11  ;;  %v16249_v46 = vmul.u32.u64.high 3817748708, %v16218_v11, %v16248_v17 }
 0x25f   : > { %12789 = vmatprep.mubr.msk.bf16.mxu1 %vm609_vm2, %v1784_v20  ;;  %12937 = vmatprep.mubr.msk.bf16.mxu0 %vm609_vm2, %v3086_v53  ;;  %v3715_v20 = vmul.u32 18, %v3714_v45  ;;  %v16189_v53 = vadd.s32 104, %v16143_v56  ;;  %v3749_v15 = vsub.s32 %v16182_v7, %v3748_v49  ;;  %v3781_v45 = vmul.u32 18, %v3780_v61 }
 0x260   : > { %vm4077_vm7 = vcmp.ne.s32.totalorder %v3694_v19, 0  ;;  %vm4118_vm8 = vcmp.lt.s32.totalorder %v3694_v19, 0  ;;  %v4200_v40 = vadd.s32 18, %v3694_v19  ;;  %v3813_v50 = vshrl.u32 %v16249_v46, 4 }
 0x261   : > { %v16210_v42 = vmul.u32.u64.low 3817748708, %v16189_v53  ;;  %v16211_v30 = vmul.u32.u64.high 3817748708, %v16189_v53, %v16210_v42  ;;  %vm16242_vm15 = vmand %vm4118_vm8, %vm4077_vm7  ;;  %vm4082_vm9 = vcmp.ne.s32.totalorder %v3749_v15, 0  ;;  %vm4123_vm10 = vcmp.lt.s32.totalorder %v3749_v15, 0 }
 0x262   : > { %v16265_v36 = vsel %vm16242_vm15, %v4200_v40, %v3694_v19  ;;  %v4205_v33 = vadd.s32 18, %v3749_v15  ;;  %v16488_v46 = vadd.s32 240, %v16143_v56 }
 0x263   : > { %18868 = vst [vmem:[#allocation32_spill] sm:$0xff] %v16265_v36  ;;  %v3769_v57 = vshrl.u32 %v16211_v30, 4  ;;  %v3814_v30 = vmul.u32 18, %v3813_v50 }
 0x265   : > { %v3770_v12 = vmul.u32 18, %v3769_v57 }
 0x266   : > { %12790 = vmatmul.mubr.msk.bf16.gmra.mrb[28].mxu1 %vm609_vm2, %v1785_v31  ;;  %12938 = vmatmul.mubr.msk.bf16.gmra.mrb[24].mxu0 %vm609_vm2, %v3087_v32  ;;  %v16203_v31 = vmul.u32.u64.low 3817748708, %v16186_v18  ;;  %v16204_v32 = vmul.u32.u64.high 3817748708, %v16186_v18, %v16203_v31 }
 0x267   : > { %12793 = vmatprep.mubr.msk.bf16.mxu1 %vm609_vm2, %v1786_v60  ;;  %12941 = vmatprep.mubr.msk.bf16.mxu0 %vm609_vm2, %v3088_v9  ;;  %v16207_v60 = vadd.s32 128, %v16143_v56  ;;  %v3716_v9 = vsub.s32 %v3587_v51, %v3715_v20  ;;  %v16296_v20 = vmul.u32.u64.low 3817748708, %v16278_v4  ;;  %v16297_v22 = vmul.u32.u64.high 3817748708, %v16278_v4, %v16296_v20 }
 0x268   : > { %v3758_v51 = vshrl.u32 %v16204_v32, 4  ;;  %v16308_v28 = vsub.s32 %v16189_v53, %v3770_v12  ;;  %v16311_v31 = vmul.u32.u64.low 3817748708, %v16287_v14  ;;  %v16312_v32 = vmul.u32.u64.high 3817748708, %v16287_v14, %v16311_v31 }
 0x269   : > { %vm4079_vm13 = vcmp.ne.s32.totalorder %v3716_v9, 0  ;;  %vm4120_vm14 = vcmp.lt.s32.totalorder %v3716_v9, 0  ;;  %v4202_v21 = vadd.s32 18, %v3716_v9  ;;  %v16324_v53 = vadd.s32 176, %v16143_v56 }
 0x26a   : > { %vm4161_vm4 = vmand %vm4120_vm14, %vm4079_vm13  ;;  %v3759_v6 = vmul.u32 18, %v3758_v51  ;;  %vm4084_vm13 = vcmp.ne.s32.totalorder %v16308_v28, 0  ;;  %vm4125_vm15 = vcmp.lt.s32.totalorder %v16308_v28, 0  ;;  %v3846_v54 = vshrl.u32 %v16312_v32, 4 }
 0x26b   : > { %v16274_v0 = vsel %vm4161_vm4, %v4202_v21, %v3716_v9  ;;  %v16315_v9 = vadd.s32 168, %v16143_v56  ;;  %v4207_v21 = vadd.s32 18, %v16308_v28  ;;  %v16429_v31 = vadd.s32 208, %v16143_v56 }
 0x26c   : > { %18870 = vst [vmem:[#allocation34_spill] sm:$0xff] %v16274_v0  ;;  %v3760_v26 = vsub.s32 %v16186_v18, %v3759_v6  ;;  %v3782_v18 = vsub.s32 %v16196_v25, %v3781_v45  ;;  %v16333_v25 = vadd.s32 184, %v16143_v56 }
 0x26e   : > { %12794 = vmatmul.mubr.msk.bf16.gmra.mrb[32].mxu1 %vm609_vm2, %v1787_v24  ;;  %12942 = vmatmul.mubr.msk.bf16.gmra.mrb[28].mxu0 %vm609_vm2, %v3089_v8  ;;  %v3737_v24 = vmul.u32 18, %v3736_v59  ;;  %v16304_v7 = vmul.u32.u64.low 3817748708, %v16282_v43  ;;  %v16305_v59 = vmul.u32.u64.high 3817748708, %v16282_v43, %v16304_v7  ;;  %vm4083_vm11 = vcmp.ne.s32.totalorder %v3760_v26, 0 }
 0x26f   : > { %12945 = vmatprep.mubr.msk.bf16.mxu0 %vm609_vm2, %v3090_v37  ;;  %v16221_v8 = vmul.u32.u64.low 3817748708, %v16200_v27  ;;  %v16222_v37 = vmul.u32.u64.high 3817748708, %v16200_v27, %v16221_v8  ;;  %vm4124_vm12 = vcmp.lt.s32.totalorder %v3760_v26, 0  ;;  %vm4085_vm14 = vcmp.ne.s32.totalorder %v3782_v18, 0 }
 0x270   : > { %v3738_v48 = vsub.s32 %v16169_v62, %v3737_v24  ;;  %v16272_v62 = vadd.s32 8, %v16143_v56  ;;  %vm4126_vm0 = vcmp.lt.s32.totalorder %v3782_v18, 0  ;;  %vm16351_vm4 = vmand %vm4124_vm12, %vm4083_vm11  ;;  %v3835_v40 = vshrl.u32 %v16305_v59, 4 }
 0x271   : > { %v3791_v1 = vshrl.u32 %v16222_v37, 4  ;;  %v16329_v8 = vmul.u32.u64.low 3817748708, %v16315_v9  ;;  %v16330_v37 = vmul.u32.u64.high 3817748708, %v16315_v9, %v16329_v8 }
 0x272   : > { %vm4081_vm6 = vcmp.ne.s32.totalorder %v3738_v48, 0  ;;  %vm4122_vm7 = vcmp.lt.s32.totalorder %v3738_v48, 0  ;;  %v4204_v10 = vadd.s32 18, %v3738_v48  ;;  %v3836_v20 = vmul.u32 18, %v3835_v40 }
 0x273   : > { %vm4163_vm8 = vmand %vm4122_vm7, %vm4081_vm6  ;;  %v3792_v19 = vmul.u32 18, %v3791_v1  ;;  %v16368_v41 = vmul.u32.u64.low 3817748708, %v16333_v25  ;;  %v16369_v5 = vmul.u32.u64.high 3817748708, %v16333_v25, %v16368_v41  ;;  %v16396_v1 = vadd.s32 200, %v16143_v56 }
 0x274   : > { %v16317_v42 = vsel %vm4163_vm8, %v4204_v10, %v3738_v48  ;;  %vm16361_vm8 = vmand %vm4125_vm15, %vm4084_vm13  ;;  %v4208_v48 = vadd.s32 18, %v3782_v18 }
 0x275   : > { %18872 = vst [vmem:[#allocation36_spill] sm:$0xff] %v16317_v42  ;;  %v16321_v35 = vsub.s32 %v16200_v27, %v3792_v19  ;;  %v3815_v27 = vsub.s32 %v16218_v11, %v3814_v30  ;;  %v16357_v11 = vadd.s32 192, %v16143_v56  ;;  %v16422_v7 = vsel %vm16361_vm8, %v4207_v21, %v16308_v28 }
 0x276   : > { %12946 = vmatmul.mubr.msk.bf16.gmra.mrb[32].mxu0 %vm609_vm2, %v3091_v44  ;;  %v16231_v2 = vmul.u32.u64.low 3817748708, %v16207_v60  ;;  %v16232_v44 = vmul.u32.u64.high 3817748708, %v16207_v60, %v16231_v2  ;;  %vm4080_vm2 = vcmp.ne.s32.totalorder %v3727_v29, 0  ;;  %18887 = vst [vmem:[#allocation39_spill] sm:$0xff] %v16422_v7 }
 0x277   : > { %vm4162_vm5 = vmand %vm4121_vm3, %vm4080_vm2  ;;  %vm4086_vm3 = vcmp.ne.s32.totalorder %v16321_v35, 0  ;;  %vm4127_vm6 = vcmp.lt.s32.totalorder %v16321_v35, 0  ;;  %vm4129_vm11 = vcmp.lt.s32.totalorder %v3815_v27, 0  ;;  %v4209_v49 = vadd.s32 18, %v16321_v35 }
 0x278   : > { %v3802_v63 = vshrl.u32 %v16232_v44, 4  ;;  %v16284_v13 = vsel %vm4162_vm5, %v4203_v47, %v3727_v29  ;;  %v4206_v29 = vadd.s32 18, %v3760_v26  ;;  %vm16339_vm2 = vmand %vm4123_vm10, %vm4082_vm9  ;;  %vm4088_vm10 = vcmp.ne.s32.totalorder %v3815_v27, 0 }
 0x279   : > { %18871 = vst [vmem:[#allocation35_spill] sm:$0xff] %v16284_v13  ;;  %v16346_v2 = vmul.u32.u64.low 3817748708, %v16324_v53  ;;  %v16347_v44 = vmul.u32.u64.high 3817748708, %v16324_v53, %v16346_v2  ;;  %vm16375_vm9 = vmand %vm4126_vm0, %vm4085_vm14  ;;  %v16384_v47 = vsel %vm16339_vm2, %v4205_v33, %v3749_v15  ;;  %v4211_v12 = vadd.s32 18, %v3815_v27 }
 0x27a   : > { %v3803_v55 = vmul.u32 18, %v3802_v63  ;;  %18881 = vst [vmem:[#allocation37_spill] sm:$0xff] %v16384_v47  ;;  %vm16390_vm12 = vmand %vm4127_vm6, %vm4086_vm3  ;;  %v16407_v15 = vmul.u32.u64.low 3817748708, %v16357_v11  ;;  %v16408_v45 = vmul.u32.u64.high 3817748708, %v16357_v11, %v16407_v15  ;;  %v16414_v19 = vsel %vm16351_vm4, %v4206_v29, %v3760_v26 }
 0x27b   : > { %18886 = vst [vmem:[#allocation38_spill] sm:$0xff] %v16414_v19  ;;  %vm4170_vm14 = vmand %vm4129_vm11, %vm4088_vm10  ;;  %v16426_v59 = vsel %vm16375_vm9, %v4208_v48, %v3782_v18  ;;  %v16432_v26 = vadd.s32 216, %v16143_v56  ;;  %v3868_v30 = vshrl.u32 %v16347_v44, 4  ;;  %v16445_v28 = vsel %vm16390_vm12, %v4209_v49, %v16321_v35 }
 0x27c   : > { %v3804_v24 = vsub.s32 %v16207_v60, %v3803_v55  ;;  %v3824_v60 = vshrl.u32 %v16297_v22, 4  ;;  %v3847_v22 = vmul.u32 18, %v3846_v54  ;;  %v3857_v55 = vshrl.u32 %v16330_v37, 4  ;;  %18888 = vst [vmem:[#allocation40_spill] sm:$0xff] %v16426_v59  ;;  %18889 = vst [vmem:[#allocation41_spill] sm:$0xff] %v16445_v28 }
 0x27d   : > { %v16439_v33 = vmul.u32.u64.low 3817748708, %v16396_v1  ;;  %v16440_v29 = vmul.u32.u64.high 3817748708, %v16396_v1, %v16439_v33  ;;  %v16451_v8 = vsel %vm4170_vm14, %v4211_v12, %v3815_v27  ;;  %v16457_v37 = vsub.s32 %v16282_v43, %v3836_v20 }
 0x27e   : > { %vm4087_vm5 = vcmp.ne.s32.totalorder %v3804_v24, 0  ;;  %vm4128_vm7 = vcmp.lt.s32.totalorder %v3804_v24, 0  ;;  %v3825_v61 = vmul.u32 18, %v3824_v60  ;;  %v4210_v10 = vadd.s32 18, %v3804_v24  ;;  %18891 = vst [vmem:[#allocation43_spill] sm:$0xff] %v16451_v8 }
 0x27f   : > { %vm16402_vm13 = vmand %vm4128_vm7, %vm4087_vm5  ;;  %v16460_v38 = vsub.s32 %v16287_v14, %v3847_v22  ;;  %v3858_v60 = vmul.u32 18, %v3857_v55  ;;  %v3879_v2 = vshrl.u32 %v16369_v5, 4  ;;  %v3869_v43 = vmul.u32 18, %v3868_v30 }
 0x280   : > { %v16435_v32 = vsub.s32 %v16278_v4, %v3825_v61  ;;  %v16449_v18 = vsel %vm16402_vm13, %v4210_v10, %v3804_v24  ;;  %v16454_v4 = vadd.s32 224, %v16143_v56  ;;  %v16478_v14 = vadd.s32 232, %v16143_v56 }
 0x281   : > { %18890 = vst [vmem:[#allocation42_spill] sm:$0xff] %v16449_v18  ;;  %v16466_v44 = vmul.u32.u64.low 3817748708, %v16429_v31  ;;  %v16467_v24 = vmul.u32.u64.high 3817748708, %v16429_v31, %v16466_v44  ;;  %v16470_v27 = vmul.u32.u64.low 3817748708, %v16432_v26  ;;  %v16471_v39 = vmul.u32.u64.high 3817748708, %v16432_v26, %v16470_v27 }
 0x282   : > { %vm4089_vm15 = vcmp.ne.s32.totalorder %v16435_v32, 0  ;;  %vm4130_vm0 = vcmp.lt.s32.totalorder %v16435_v32, 0  ;;  %v3890_v54 = vshrl.u32 %v16408_v45, 4  ;;  %v4212_v48 = vadd.s32 18, %v16435_v32 }
 0x283   : > { %v16484_v41 = vmul.u32.u64.low 3817748708, %v16454_v4  ;;  %v16485_v5 = vmul.u32.u64.high 3817748708, %v16454_v4, %v16484_v41  ;;  %vm4090_vm2 = vcmp.ne.s32.totalorder %v16457_v37, 0  ;;  %v16495_v57 = vsub.s32 %v16315_v9, %v3858_v60  ;;  %v4799_v9 = vld [vmem:[#allocation12 + $0x2] sm:$0x3]  ;;  %vm16521_vm5 = vmand %vm4130_vm0, %vm4089_vm15 }
 0x284   : > { %v16498_v49 = vadd.s32 248, %v16143_v56  ;;  %vm4091_vm3 = vcmp.ne.s32.totalorder %v16460_v38, 0  ;;  %vm4131_vm4 = vcmp.lt.s32.totalorder %v16457_v37, 0  ;;  %v4213_v61 = vadd.s32 18, %v16457_v37  ;;  %14499 = vmatprep.subr.msk.bf16.mxu1 %vm665_vm1, %v4799_v9 }
 0x285   : > { %v3880_v63 = vmul.u32 18, %v3879_v2  ;;  %v3901_v10 = vshrl.u32 %v16440_v29, 4  ;;  %v16505_v12 = vmul.u32.u64.low 3817748708, %v16478_v14  ;;  %v16506_v15 = vmul.u32.u64.high 3817748708, %v16478_v14, %v16505_v12  ;;  %vm16537_vm8 = vmand %vm4131_vm4, %vm4090_vm2 }
 0x286   : > { %v16509_v45 = vadd.s32 256, %v16143_v56  ;;  %v3870_v20 = vsub.s32 %v16324_v53, %v3869_v43  ;;  %v3891_v22 = vmul.u32 18, %v3890_v54  ;;  %vm4132_vm6 = vcmp.lt.s32.totalorder %v16460_v38, 0 }
 0x287   : > { %v16513_v55 = vmul.u32.u64.low 3817748708, %v16488_v46  ;;  %v16514_v30 = vmul.u32.u64.high 3817748708, %v16488_v46, %v16513_v55  ;;  %vm4092_vm7 = vcmp.ne.s32.totalorder %v16495_v57, 0  ;;  %v3881_v44 = vsub.s32 %v16333_v25, %v3880_v63  ;;  %vm16567_vm12 = vmand %vm4132_vm6, %vm4091_vm3 }
 0x288   : > { %v16528_v53 = vmul.u32.u64.low 3817748708, %v16498_v49  ;;  %v16529_v29 = vmul.u32.u64.high 3817748708, %v16498_v49, %v16528_v53  ;;  %v3912_v27 = vshrl.u32 %v16467_v24, 4  ;;  %v3923_v43 = vshrl.u32 %v16471_v39, 4 }
 0x289   : > { %v4855_v54 = vsel %vm665_vm1, %v4799_v9, 0  ;;  %vm4133_vm9 = vcmp.lt.s32.totalorder %v16495_v57, 0  ;;  %v3902_v12 = vmul.u32 18, %v3901_v10  ;;  %vm4093_vm10 = vcmp.ne.s32.totalorder %v3870_v20, 0 }
 0x28a   : > { %v16549_v55 = vmul.u32.u64.low 3817748708, %v16509_v45  ;;  %v16550_v53 = vmul.u32.u64.high 3817748708, %v16509_v45, %v16549_v55  ;;  %12950 = vmatpush3.bf16.msra.mxu1 %v4855_v54  ;;  %vm4134_vm11 = vcmp.lt.s32.totalorder %v3870_v20, 0  ;;  %v3892_v25 = vsub.s32 %v16357_v11, %v3891_v22  ;;  %vm16582_vm13 = vmand %vm4133_vm9, %vm4092_vm7 }
 0x28b   : > { %v3934_v24 = vshrl.u32 %v16485_v5, 4  ;;  %v16561_v63 = vsel %vm16521_vm5, %v4212_v48, %v16435_v32  ;;  %v4214_v9 = vadd.s32 18, %v16460_v38  ;;  %v16575_v11 = vsel %vm16537_vm8, %v4213_v61, %v16457_v37  ;;  %vm4175_vm15 = vmand %vm4134_vm11, %vm4093_vm10 }
 0x28c   : > { %18896 = vst [vmem:[#allocation44_spill] sm:$0xff] %v16561_v63  ;;  %18899 = vst [vmem:[#allocation45_spill] sm:$0xff] %v16575_v11  ;;  %v4215_v5 = vadd.s32 18, %v16495_v57  ;;  %v4216_v48 = vadd.s32 18, %v3870_v20  ;;  %vm4094_vm14 = vcmp.ne.s32.totalorder %v3881_v44, 0  ;;  %v3913_v22 = vmul.u32 18, %v3912_v27 }
 0x28d   : > { %v3924_v33 = vmul.u32 18, %v3923_v43  ;;  %vm4135_vm0 = vcmp.lt.s32.totalorder %v3881_v44, 0  ;;  %v16589_v37 = vsub.s32 %v16396_v1, %v3902_v12  ;;  %v3945_v61 = vshrl.u32 %v16506_v15, 4 }
 0x28e   : > { %v16593_v2 = vadd.s32 264, %v16143_v56  ;;  %vm4095_vm2 = vcmp.ne.s32.totalorder %v3892_v25, 0  ;;  %vm4136_vm3 = vcmp.lt.s32.totalorder %v3892_v25, 0  ;;  %v3935_v54 = vmul.u32 18, %v3934_v24  ;;  %vm4176_vm4 = vmand %vm4135_vm0, %vm4094_vm14 }
 0x28f   : > { %v3956_v55 = vshrl.u32 %v16514_v30, 4  ;;  %v16599_v27 = vsel %vm16567_vm12, %v4214_v9, %v16460_v38  ;;  %v16604_v1 = vsel %vm16582_vm13, %v4215_v5, %v16495_v57  ;;  %v4217_v43 = vadd.s32 18, %v3881_v44  ;;  %vm4177_vm5 = vmand %vm4136_vm3, %vm4095_vm2 }
 0x290   : > { %18902 = vst [vmem:[#allocation46_spill] sm:$0xff] %v16599_v27  ;;  %18903 = vst [vmem:[#allocation47_spill] sm:$0xff] %v16604_v1  ;;  %v3967_v15 = vshrl.u32 %v16529_v29, 4  ;;  %v16609_v11 = vsel %vm4175_vm15, %v4216_v48, %v3870_v20  ;;  %v4218_v30 = vadd.s32 18, %v3892_v25  ;;  %v16614_v24 = vsub.s32 %v16429_v31, %v3913_v22 }
 0x291   : > { %18904 = vst [vmem:[#allocation48_spill] sm:$0xff] %v16609_v11  ;;  %v16617_v38 = vsub.s32 %v16432_v26, %v3924_v33  ;;  %v3946_v57 = vmul.u32 18, %v3945_v61  ;;  %v3978_v29 = vshrl.u32 %v16550_v53, 4  ;;  %vm4096_vm6 = vcmp.ne.s32.totalorder %v16589_v37, 0  ;;  %v4743_v61 = vld [vmem:[#allocation12] sm:$0x3] }
 0x292   : > { %v16624_v20 = vmul.u32.u64.low 3817748708, %v16593_v2  ;;  %v16625_v9 = vmul.u32.u64.high 3817748708, %v16593_v2, %v16624_v20  ;;  %v16631_v31 = vsub.s32 %v16454_v4, %v3935_v54  ;;  %v3957_v26 = vmul.u32 18, %v3956_v55  ;;  %14500 = vmatprep.subr.msk.bf16.mxu1 %vm665_vm1, %v4743_v61 }
 0x293   : > { %v16634_v32 = vadd.s32 272, %v16143_v56  ;;  %v16638_v22 = vsel %vm4176_vm4, %v4217_v43, %v3881_v44  ;;  %vm4137_vm7 = vcmp.lt.s32.totalorder %v16589_v37, 0  ;;  %v4219_v53 = vadd.s32 18, %v16589_v37 }
 0x294   : > { %18906 = vst [vmem:[#allocation50_spill] sm:$0xff] %v16638_v22  ;;  %v3968_v33 = vmul.u32 18, %v3967_v15  ;;  %v16642_v20 = vsel %vm4177_vm5, %v4218_v30, %v3892_v25  ;;  %vm4097_vm8 = vcmp.ne.s32.totalorder %v16614_v24, 0  ;;  %vm4138_vm9 = vcmp.lt.s32.totalorder %v16614_v24, 0  ;;  %vm16683_vm14 = vmand %vm4137_vm7, %vm4096_vm6 }
 0x295   : > { %18907 = vst [vmem:[#allocation51_spill] sm:$0xff] %v16642_v20  ;;  %v16647_v4 = vadd.s32 304, %v16143_v56  ;;  %v4220_v44 = vadd.s32 18, %v16614_v24  ;;  %vm4098_vm10 = vcmp.ne.s32.totalorder %v16617_v38, 0  ;;  %v3947_v54 = vsub.s32 %v16478_v14, %v3946_v57  ;;  %vm16696_vm0 = vmand %vm4138_vm9, %vm4097_vm8 }
 0x296   : > { %v3979_v55 = vmul.u32 18, %v3978_v29  ;;  %vm4099_vm11 = vcmp.ne.s32.totalorder %v16631_v31, 0  ;;  %v16655_v25 = vsub.s32 %v16488_v46, %v3957_v26  ;;  %vm4139_vm12 = vcmp.lt.s32.totalorder %v16617_v38, 0 }
 0x297   : > { %v16658_v43 = vmul.u32.u64.low 3817748708, %v16634_v32  ;;  %v16659_v15 = vmul.u32.u64.high 3817748708, %v16634_v32, %v16658_v43  ;;  %vm4140_vm13 = vcmp.lt.s32.totalorder %v16631_v31, 0  ;;  %v3969_v30 = vsub.s32 %v16498_v49, %v3968_v33  ;;  %vm16708_vm5 = vmand %vm4139_vm12, %vm4098_vm10 }
 0x298   : > { %v16665_v61 = vadd.s32 280, %v16143_v56  ;;  %v4221_v57 = vadd.s32 18, %v16617_v38  ;;  %v16671_v46 = vmul.u32.u64.low 3817748708, %v16647_v4  ;;  %v16672_v29 = vmul.u32.u64.high 3817748708, %v16647_v4, %v16671_v46  ;;  %vm16720_vm8 = vmand %vm4140_vm13, %vm4099_vm11 }
 0x299   : > { %v16675_v26 = vadd.s32 288, %v16143_v56  ;;  %v4222_v33 = vadd.s32 18, %v16631_v31  ;;  %vm4100_vm15 = vcmp.ne.s32.totalorder %v3947_v54, 0  ;;  %v3980_v20 = vsub.s32 %v16509_v45, %v3979_v55 }
 0x29a   : > { %v3989_v46 = vshrl.u32 %v16625_v9, 4  ;;  %vm4101_vm2 = vcmp.ne.s32.totalorder %v16655_v25, 0  ;;  %vm4141_vm3 = vcmp.lt.s32.totalorder %v3947_v54, 0  ;;  %vm4142_vm4 = vcmp.lt.s32.totalorder %v16655_v25, 0 }
 0x29b   : > { %v4223_v1 = vadd.s32 18, %v3947_v54  ;;  %vm4102_vm6 = vcmp.ne.s32.totalorder %v3969_v30, 0  ;;  %vm4143_vm7 = vcmp.lt.s32.totalorder %v3969_v30, 0  ;;  %vm16733_vm9 = vmand %vm4141_vm3, %vm4100_vm15  ;;  %vm4103_vm10 = vcmp.ne.s32.totalorder %v3980_v20, 0 }
 0x29c   : > { %v16713_v9 = vmul.u32.u64.low 3817748708, %v16665_v61  ;;  %v16714_v55 = vmul.u32.u64.high 3817748708, %v16665_v61, %v16713_v9  ;;  %vm4144_vm11 = vcmp.lt.s32.totalorder %v3980_v20, 0  ;;  %vm3486_vm12 = vcmask 31744   ;;  %vm16742_vm13 = vmand %vm4142_vm4, %vm4101_vm2 }
 0x29d   : > { %v4224_v9 = vadd.s32 18, %v16655_v25  ;;  %v16759_v19 = vsel %vm16696_vm0, %v4220_v44, %v16614_v24  ;;  %v16764_v47 = vsel %vm16708_vm5, %v4221_v57, %v16617_v38  ;;  %vm16768_vm15 = vmand %vm4143_vm7, %vm4102_vm6  ;;  %v16777_v11 = vsel %vm16720_vm8, %v4222_v33, %v16631_v31 }
 0x29e   : > { %v16781_v24 = vsel %vm16733_vm9, %v4223_v1, %v3947_v54  ;;  %v16791_v44 = vadd.s32 296, %v16143_v56  ;;  %v16796_v59 = vmul.u32.u64.low 3817748708, %v16300_v23  ;;  %v16797_v1 = vmul.u32.u64.high 3817748708, %v16300_v23, %v16796_v59 }
 0x29f   : > { %v16803_v45 = vsel %vm16742_vm13, %v4224_v9, %v16655_v25  ;;  %vm18743_vm4 = vcmp.eq.s32.totalorder %v16255_v34, 17  ;;  %vm18742_vm5 = vcmp.eq.s32.totalorder %v16261_v52, 17  ;;  %vm18741_vm6 = vcmp.eq.s32.totalorder %v16255_v34, 0 }
 0x2a0   : > { %vm18740_vm7 = vcmp.eq.s32.totalorder %v16261_v52, 0  ;;  %vm18744_vm8 = vcmask 25600   ;;  %vm18747_vm13 = vcmp.eq.s32.totalorder %v16274_v0, 0 }
 0x2e1   : > { %v16371_v17 = vpop.f32.mrb[0].mxu1 }
 0x2e2   : > { %v16380_v51 = vpop.f32.mrb[1].mxu1 }
 0x2e3   : > { %v16398_v6 = vpop.f32.mrb[2].mxu1 }
 0x2e4   : > { %v16410_v50 = vpop.f32.mrb[3].mxu1 }
 0x2e9   : > { %v16463_v35 = vpop.f32.mrb[4].mxu1 }
 0x2ea   : > { %v16473_v3 = vpop.f32.mrb[5].mxu1 }
 0x2eb   : > { %v16480_v40 = vpop.f32.mrb[6].mxu1 }
 0x2ec   : > { %v16490_v21 = vpop.f32.mrb[7].mxu1 }
 0x2f1   : > { %v16531_v60 = vpop.f32.mrb[8].mxu1 }
 0x2f2   : > { %v16545_v41 = vpop.f32.mrb[9].mxu1 }
 0x2f3   : > { %v16552_v8 = vpop.f32.mrb[10].mxu1 }
 0x2f4   : > { %v16556_v39 = vpop.f32.mrb[11].mxu1 }
 0x2f9   : > { %v16607_v12 = vpop.f32.mrb[12].mxu1 }
 0x2fa   : > { %v16619_v10 = vpop.f32.mrb[13].mxu1 }
 0x2fb   : > { %v16627_v5 = vpop.f32.mrb[14].mxu1 }
 0x2fc   : > { %v16636_v48 = vpop.f32.mrb[15].mxu1 }
 0x2fd   : > { %18905 = vst [vmem:[#allocation49_spill] sm:$0xff] %v16636_v48  ;;  %v16748_v48 = vmul.u32.u64.low 3817748708, %v16292_v16  ;;  %v16749_v7 = vmul.u32.u64.high 3817748708, %v16292_v16, %v16748_v48 }
 0x2fe   : > { %v4226_v48 = vadd.s32 18, %v3980_v20 }
 0x301   : > { %v16667_v14 = vpop.f32.mrb[16].mxu1 }
 0x302   : > { %18908 = vst [vmem:[#allocation52_spill] sm:$0xff] %v16667_v14  ;;  %v16677_v43 = vpop.f32.mrb[17].mxu1  ;;  %v4000_v14 = vshrl.u32 %v16659_v15, 4 }
 0x303   : > { %18909 = vst [vmem:[#allocation53_spill] sm:$0xff] %v16677_v43  ;;  %v16690_v22 = vpop.f32.mrb[18].mxu1  ;;  %v3990_v43 = vmul.u32 18, %v3989_v46  ;;  %v16754_v46 = vsel %vm16683_vm14, %v4219_v53, %v16589_v37  ;;  %v16772_v37 = vld [vmem:[#allocation9] ss:$0 sm:$0xff]  ;;  %vm16785_vm14 = vmand %vm4144_vm11, %vm4103_vm10  ;;  %v4044_v53 = vshrl.u32 %v16672_v29, 4 }
 0x304   : > { %18912 = vst [vmem:[#allocation54_spill] sm:$0xff] %v16690_v22  ;;  %v16702_v27 = vpop.f32.mrb[19].mxu1  ;;  %v16729_v28 = vmul.u32.u64.low 3817748708, %v16272_v62  ;;  %v16730_v22 = vmul.u32.u64.high 3817748708, %v16272_v62, %v16729_v28  ;;  %v16813_v59 = vsel %vm16785_vm14, %v4226_v48, %v3980_v20 }
 0x305   : > { %18915 = vst [vmem:[#allocation55_spill] sm:$0xff] %v16702_v27  ;;  %v16725_v27 = vmul.u32.u64.low 3817748708, %v16675_v26  ;;  %v16726_v18 = vmul.u32.u64.high 3817748708, %v16675_v26, %v16725_v27  ;;  %v4225_v28 = vadd.s32 18, %v3969_v30  ;;  %v3991_v31 = vsub.s32 %v16593_v2, %v3990_v43 }
 0x307   : > { %v16807_v29 = vsel %vm16768_vm15, %v4225_v28, %v3969_v30  ;;  %v4045_v30 = vmul.u32 18, %v4044_v53  ;;  %vm4104_vm0 = vcmp.ne.s32.totalorder %v3991_v31, 0  ;;  %vm4145_vm2 = vcmp.lt.s32.totalorder %v3991_v31, 0 }
 0x308   : > { %vm16835_vm3 = vmand %vm4145_vm2, %vm4104_vm0  ;;  %vm18765_vm0 = vcmp.eq.s32.totalorder %v16268_v58, 17  ;;  %vm18758_vm2 = vcmp.eq.s32.totalorder %v16274_v0, 17  ;;  %vm18748_vm15 = vcmp.eq.s32.totalorder %v16268_v58, 0 }
 0x309   : > { %v12915_v49 = vpop.f32.mrb[0].mxu0 }
 0x30a   : > { %v13635_v57 = vadd.f32 %v12915_v49, %v16371_v17  ;;  %v3185_v63 = vpop.f32.mrb[1].mxu0  ;;  %v4001_v17 = vmul.u32 18, %v4000_v14  ;;  %v3637_v14 = vshrl.u32 %v16730_v22, 4 }
 0x30b   : > { %v13636_v54 = vadd.f32 %v3185_v63, %v16380_v51  ;;  %v12916_v33 = vpop.f32.mrb[2].mxu0  ;;  %v4011_v51 = vshrl.u32 %v16714_v55, 4  ;;  %v16816_v63 = vld [vmem:[#allocation10] ss:$0 sm:$0xff]  ;;  %v3648_v55 = vshrl.u32 %v16749_v7, 4 }
 0x30c   : > { %v3373_v49 = vadd.f32 %v13635_v57, %v16772_v37  ;;  %v13637_v2 = vadd.f32 %v12916_v33, %v16398_v6  ;;  %v3188_v43 = vpop.f32.mrb[3].mxu0  ;;  %v4022_v6 = vshrl.u32 %v16726_v18, 4  ;;  %v4227_v33 = vadd.s32 18, %v3991_v31 }
 0x30d   : > { %v3371_v25 = vadd.f32 %v13636_v54, %v16772_v37  ;;  %v13638_v9 = vadd.f32 %v3188_v43, %v16410_v50  ;;  %v16827_v50 = vmul.u32.u64.low 3817748708, %v16791_v44  ;;  %v16828_v53 = vmul.u32.u64.high 3817748708, %v16791_v44, %v16827_v50 }
 0x30e   : > { %v3409_v27 = vmax.f32 %v3373_v49, 0.0  ;;  %v3374_v28 = vadd.f32 %v13637_v2, %v16772_v37  ;;  %v3638_v49 = vmul.u32 18, %v3637_v14 }
 0x30f   : > { %v3407_v15 = vmax.f32 %v3371_v25, 0.0  ;;  %v3372_v20 = vadd.f32 %v13638_v9, %v16772_v37  ;;  %v4012_v25 = vmul.u32 18, %v4011_v51  ;;  %v3659_v9 = vshrl.u32 %v16797_v1, 4 }
 0x310   : > { %v3452_v48 = vadd.f32 %v16816_v63, %v3409_v27  ;;  %v3410_v38 = vmax.f32 %v3374_v28, 0.0  ;;  %v16847_v51 = vsub.s32 %v16634_v32, %v4001_v17  ;;  %v16850_v1 = vsub.s32 %v16647_v4, %v4045_v30 }
 0x311   : > { %v3450_v22 = vadd.f32 %v16816_v63, %v3407_v15  ;;  %v3408_v57 = vmax.f32 %v3372_v20, 0.0  ;;  %v12919_v54 = vpop.f32.mrb[4].mxu0  ;;  %v4023_v15 = vmul.u32 18, %v4022_v6  ;;  %v3649_v20 = vmul.u32 18, %v3648_v55 }
 0x312   : > { %3490 = vst.msk [vmem:[#allocation2 + $0x23] sm:$0xff] %vm3486_vm12, %v3452_v48  ;;  %v3453_v18 = vadd.f32 %v16816_v63, %v3410_v38  ;;  %v13639_v2 = vadd.f32 %v12919_v54, %v16463_v35  ;;  %v3201_v7 = vpop.f32.mrb[5].mxu0  ;;  %v16862_v32 = vsub.s32 %v16272_v62, %v3638_v49  ;;  %v16868_v30 = vsub.s32 %v16665_v61, %v4012_v25 }
 0x313   : > { %3488 = vst.msk [vmem:[#allocation2 + $0x13] sm:$0xff] %vm3486_vm12, %v3450_v22  ;;  %v3451_v27 = vadd.f32 %v16816_v63, %v3408_v57  ;;  %v13640_v14 = vadd.f32 %v3201_v7, %v16473_v3  ;;  %v12920_v28 = vpop.f32.mrb[6].mxu0  ;;  %v3660_v55 = vmul.u32 18, %v3659_v9  ;;  %v16875_v62 = vsub.s32 %v16292_v16, %v3649_v20 }
 0x314   : > { %3491 = vst.msk [vmem:[#allocation2 + $0x2b] sm:$0xff] %vm3486_vm12, %v3453_v18  ;;  %v3377_v35 = vadd.f32 %v13639_v2, %v16772_v37  ;;  %v13641_v48 = vadd.f32 %v12920_v28, %v16480_v40  ;;  %v3204_v38 = vpop.f32.mrb[7].mxu0  ;;  %v16859_v40 = vsel %vm16835_vm3, %v4227_v33, %v3991_v31  ;;  %v16872_v31 = vsub.s32 %v16675_v26, %v4023_v15 }
 0x315   : > { %3489 = vst.msk [vmem:[#allocation2 + $0x1b] sm:$0xff] %vm3486_vm12, %v3451_v27  ;;  %v3375_v3 = vadd.f32 %v13640_v14, %v16772_v37  ;;  %v13642_v6 = vadd.f32 %v3204_v38, %v16490_v21  ;;  %v16879_v54 = vmul.u32.u64.low 3817748708, %v16143_v56  ;;  %v16880_v33 = vmul.u32.u64.high 3817748708, %v16143_v56, %v16879_v54 }
 0x316   : > { %v3413_v4 = vmax.f32 %v3377_v35, 0.0  ;;  %v3378_v17 = vadd.f32 %v13641_v48, %v16772_v37  ;;  %vm4072_vm9 = vcmp.ne.s32.totalorder %v16862_v32, 0  ;;  %v16890_v43 = vsub.s32 %v16300_v23, %v3660_v55 }
 0x317   : > { %v3411_v50 = vmax.f32 %v3375_v3, 0.0  ;;  %v3376_v21 = vadd.f32 %v13642_v6, %v16772_v37  ;;  %vm4113_vm10 = vcmp.lt.s32.totalorder %v16862_v32, 0  ;;  %vm18752_vm3 = vcmp.eq.s32.totalorder %v16284_v13, 17 }
 0x318   : > { %v3456_v22 = vadd.f32 %v16816_v63, %v3413_v4  ;;  %v3414_v57 = vmax.f32 %v3378_v17, 0.0  ;;  %vm4074_vm11 = vcmp.ne.s32.totalorder %v16890_v43, 0  ;;  %vm16933_vm14 = vmand %vm4113_vm10, %vm4072_vm9  ;;  %vm4115_vm9 = vcmp.lt.s32.totalorder %v16890_v43, 0 }
 0x319   : > { %v3454_v61 = vadd.f32 %v16816_v63, %v3411_v50  ;;  %v3412_v49 = vmax.f32 %v3376_v21, 0.0  ;;  %v12923_v18 = vpop.f32.mrb[8].mxu0  ;;  %vm17012_vm10 = vmand %vm4115_vm9, %vm4074_vm11  ;;  %vm18950_vm9 = vcmp.eq.s32.totalorder %v16317_v42, 0 }
 0x31a   : > { %3494 = vst.msk [vmem:[#allocation2 + $0x43] sm:$0xff] %vm3486_vm12, %v3456_v22  ;;  %v3457_v16 = vadd.f32 %v16816_v63, %v3414_v57  ;;  %v13643_v26 = vadd.f32 %v12923_v18, %v16531_v60  ;;  %v3217_v7 = vpop.f32.mrb[9].mxu0  ;;  %v4195_v60 = vadd.s32 18, %v16862_v32  ;;  %v18745_v57 = vmov 0.0  }
 0x31b   : > { %v3524_v25 = vld [vmem:[#allocation2 + $0x24] sm:$0xff]  ;;  %3492 = vst.msk [vmem:[#allocation2 + $0x33] sm:$0xff] %vm3486_vm12, %v3454_v61  ;;  %v3455_v27 = vadd.f32 %v16816_v63, %v3412_v49  ;;  %v13644_v14 = vadd.f32 %v3217_v7, %v16545_v41  ;;  %v12924_v28 = vpop.f32.mrb[10].mxu0  ;;  %3487 = vst.msk [vmem:[#allocation2 + $0x144] sm:$0xff] %vm3486_vm12, %v18745_v57 }
 0x31c   : > { %v16893_v9 = vld [vmem:[#allocation2 + $0x28] sm:$0xff]  ;;  %3527 = vst.msk [vmem:[#allocation2] sm:$0xff] %vm3486_vm12, %v3524_v25  ;;  %v16903_v15 = vld [vmem:[#allocation2 + $0x18] sm:$0xff]  ;;  %v3541_v20 = vld [vmem:[#allocation2 + $0x20] sm:$0xff]  ;;  %v3381_v35 = vadd.f32 %v13643_v26, %v16772_v37  ;;  %v13645_v41 = vadd.f32 %v12924_v28, %v16552_v8  ;;  %v3220_v48 = vpop.f32.mrb[11].mxu0 }
 0x31d   : > { %v4369_v23 = vrot.slane %v16893_v9, 6  ;;  %3495 = vst.msk [vmem:[#allocation2 + $0x4b] sm:$0xff] %vm3486_vm12, %v3457_v16  ;;  %v18746_v38 = vrot.slane %v16903_v15, 6  ;;  %v4367_v3 = vrot.slane %v3541_v20, 6  ;;  %3493 = vst.msk [vmem:[#allocation2 + $0x3b] sm:$0xff] %vm3486_vm12, %v3455_v27  ;;  %v3379_v6 = vadd.f32 %v13644_v14, %v16772_v37  ;;  %v4281_v54 = vld [vmem:[#allocation2 + $0x2a] sm:$0xff] }
 0x31e   : > { %v13646_v4 = vadd.f32 %v3220_v48, %v16556_v39  ;;  %v3417_v8 = vmax.f32 %v3381_v35, 0.0  ;;  %v3382_v17 = vadd.f32 %v13645_v41, %v16772_v37  ;;  %v4280_v61 = vld [vmem:[#allocation2 + $0x22] sm:$0xff]  ;;  %v16945_v7 = vld [vmem:[#allocation2 + $0x1a] sm:$0xff] }
 0x31f   : > { %v4368_v55 = vsel %vm665_vm1, %v18746_v38, %v4367_v3  ;;  %v4370_v50 = vsel %vm665_vm1, %v4367_v3, %v4369_v23  ;;  %v3415_v39 = vmax.f32 %v3379_v6, 0.0 }
 0x320   : > { %v3380_v21 = vadd.f32 %v13646_v4, %v16772_v37  ;;  %v4569_v49 = vsel %vm18743_vm4, %v4368_v55, %v3541_v20  ;;  %v4570_v18 = vsel %vm18742_vm5, %v4370_v50, %v16893_v9  ;;  %v3460_v16 = vadd.f32 %v16816_v63, %v3417_v8 }
 0x321   : > { %v3418_v26 = vmax.f32 %v3382_v17, 0.0  ;;  %v4610_v25 = vsel %vm18741_vm6, %v4280_v61, %v4569_v49  ;;  %v4611_v27 = vsel %vm18740_vm7, %v4281_v54, %v4570_v18  ;;  %v3458_v14 = vadd.f32 %v16816_v63, %v3415_v39  ;;  %v12927_v35 = vpop.f32.mrb[12].mxu0 }
 0x322   : > { %v3416_v28 = vmax.f32 %v3380_v21, 0.0  ;;  %4651 = vst.msk [vmem:[#allocation2 + $0x20] sm:$0xff] %vm3486_vm12, %v4610_v25  ;;  %v3525_v20 = vld [vmem:[#allocation2 + $0x2c] sm:$0xff]  ;;  %v3526_v41 = vld [vmem:[#allocation2 + $0x34] sm:$0x3]  ;;  %3498 = vst.msk [vmem:[#allocation2 + $0x63] sm:$0xff] %vm3486_vm12, %v3460_v16  ;;  %v13647_v6 = vadd.f32 %v12927_v35, %v16607_v12  ;;  %v16960_v8 = vsel %vm16933_vm14, %v4195_v60, %v16862_v32 }
 0x323   : > { %v3543_v48 = vld [vmem:[#allocation2 + $0x30] sm:$0xff]  ;;  %v3461_v3 = vadd.f32 %v16816_v63, %v3418_v26  ;;  %v3233_v4 = vpop.f32.mrb[13].mxu0  ;;  %3528 = vst.msk [vmem:[#allocation2 + $0x8] sm:$0xff] %vm3486_vm12, %v3525_v20  ;;  %4652 = vst.msk [vmem:[#allocation2 + $0x28] sm:$0xff] %vm3486_vm12, %v4611_v27  ;;  %v4196_v32 = vadd.s32 18, %v16875_v62  ;;  %v4197_v18 = vadd.s32 18, %v16890_v43 }
 0x324   : > { %3530 = vst.msk [vmem:[#allocation2 + $0x10] sm:$0x3] %vm18744_vm8, %v3526_v41  ;;  %v4371_v17 = vrot.slane %v3543_v48, 6  ;;  %v16965_v55 = vld [vmem:[#allocation2 + $0x48] sm:$0xff]  ;;  %v3459_v12 = vadd.f32 %v16816_v63, %v3416_v28  ;;  %v13648_v50 = vadd.f32 %v3233_v4, %v16619_v10  ;;  %v12928_v39 = vpop.f32.mrb[14].mxu0  ;;  %v3544_v21 = vld [vmem:[#allocation2 + $0x38] sm:$0xff]  ;;  %v3385_v54 = vadd.f32 %v13647_v6, %v16772_v37 }
 0x325   : > { %3496 = vst.msk [vmem:[#allocation2 + $0x53] sm:$0xff] %vm3486_vm12, %v3458_v14  ;;  %v4377_v60 = vrot.slane %v16965_v55, 6  ;;  %v3545_v22 = vld [vmem:[#allocation2 + $0x40] sm:$0xff]  ;;  %3499 = vst.msk [vmem:[#allocation2 + $0x6b] sm:$0xff] %vm3486_vm12, %v3461_v3  ;;  %v13649_v61 = vadd.f32 %v12928_v39, %v16627_v5  ;;  %v3236_v49 = vpop.f32.mrb[15].mxu0  ;;  %v4373_v16 = vrot.slane %v3544_v21, 6 }
 0x326   : > { %v4372_v10 = vsel %vm665_vm1, %v4369_v23, %v4371_v17  ;;  %v4375_v26 = vrot.slane %v3545_v22, 6  ;;  %3497 = vst.msk [vmem:[#allocation2 + $0x5b] sm:$0xff] %vm3486_vm12, %v3459_v12  ;;  %v18932_v25 = vld [vmem:[#allocation37_spill] sm:$0xff]  ;;  %v18933_v27 = vld [vmem:[#allocation38_spill] sm:$0xff]  ;;  %v3383_v14 = vadd.f32 %v13648_v50, %v16772_v37  ;;  %v18934_v28 = vld [vmem:[#allocation39_spill] sm:$0xff]  ;;  %vm18935_vm4 = vcmp.eq.s32.totalorder %v16265_v36, 17 }
 0x327   : > { %v4282_v5 = vld [vmem:[#allocation2 + $0x32] sm:$0xff]  ;;  %v4571_v35 = vsel %vm18935_vm4, %v4372_v10, %v3543_v48  ;;  %vm18751_vm8 = vcmp.eq.s32.totalorder %v18932_v25, 0  ;;  %vm18750_vm14 = vcmp.eq.s32.totalorder %v18933_v27, 0  ;;  %v3421_v9 = vmax.f32 %v3385_v54, 0.0  ;;  %v4283_v39 = vld [vmem:[#allocation2 + $0x3a] sm:$0xff]  ;;  %v4284_v54 = vld [vmem:[#allocation2 + $0x42] sm:$0xff] }
 0x328   : > { %v3386_v23 = vadd.f32 %v13649_v61, %v16772_v37  ;;  %v18936_v20 = vld [vmem:[#allocation49_spill] sm:$0xff]  ;;  %vm18937_vm6 = vcmp.ne.s32.totalorder %v16875_v62, 0  ;;  %vm18938_vm7 = vcmp.lt.s32.totalorder %v16875_v62, 0  ;;  %vm18941_vm4 = vcmp.eq.s32.totalorder %v16265_v36, 0 }
 0x329   : > { %v13650_v41 = vadd.f32 %v3236_v49, %v18936_v20  ;;  %vm16997_vm5 = vmand %vm18938_vm7, %vm18937_vm6  ;;  %v4612_v48 = vsel %vm18941_vm4, %v4282_v5, %v4571_v35  ;;  %v4374_v6 = vsel %vm665_vm1, %v4371_v17, %v4373_v16  ;;  %v4376_v4 = vsel %vm665_vm1, %v4373_v16, %v4375_v26  ;;  %v4285_v49 = vld [vmem:[#allocation2 + $0x4a] sm:$0xff]  ;;  %v17031_v20 = vpop.f32.mrb[20].mxu1 }
 0x32a   : > { %v4378_v12 = vsel %vm665_vm1, %v4375_v26, %v4377_v60  ;;  %4653 = vst.msk [vmem:[#allocation2 + $0x30] sm:$0xff] %vm3486_vm12, %v4612_v48  ;;  %v4572_v17 = vsel %vm18765_vm0, %v4374_v6, %v3544_v21  ;;  %v4573_v61 = vsel %vm18758_vm2, %v4376_v4, %v3545_v22  ;;  %v3464_v16 = vadd.f32 %v16816_v63, %v3421_v9  ;;  %v12931_v22 = vpop.f32.mrb[16].mxu0  ;;  %v18945_v4 = vld [vmem:[#allocation52_spill] sm:$0xff] }
 0x32b   : > { %v4574_v10 = vsel %vm18752_vm3, %v4378_v12, %v16965_v55  ;;  %v4613_v26 = vsel %vm18748_vm15, %v4283_v39, %v4572_v17  ;;  %v4614_v5 = vsel %vm18747_vm13, %v4284_v54, %v4573_v61  ;;  %vm18944_vm6 = vcmp.eq.s32.totalorder %v16284_v13, 0  ;;  %v17039_v39 = vpop.f32.mrb[21].mxu1 }
 0x32c   : > { %v4615_v35 = vsel %vm18944_vm6, %v4285_v49, %v4574_v10  ;;  %v3419_v21 = vmax.f32 %v3383_v14, 0.0  ;;  %4654 = vst.msk [vmem:[#allocation2 + $0x38] sm:$0xff] %vm3486_vm12, %v4613_v26  ;;  %4655 = vst.msk [vmem:[#allocation2 + $0x40] sm:$0xff] %vm3486_vm12, %v4614_v5  ;;  %v3547_v48 = vld [vmem:[#allocation2 + $0x50] sm:$0xff]  ;;  %v3422_v9 = vmax.f32 %v3386_v23, 0.0  ;;  %v3384_v6 = vadd.f32 %v13650_v41, %v16772_v37  ;;  %v3249_v14 = vpop.f32.mrb[17].mxu0 }
 0x32d   : > { %4656 = vst.msk [vmem:[#allocation2 + $0x48] sm:$0xff] %vm3486_vm12, %v4615_v35  ;;  %3502 = vst.msk [vmem:[#allocation2 + $0x83] sm:$0xff] %vm3486_vm12, %v3464_v16  ;;  %v13651_v12 = vadd.f32 %v12931_v22, %v18945_v4  ;;  %v17044_v54 = vsel %vm16997_vm5, %v4196_v32, %v16875_v62  ;;  %v4379_v17 = vrot.slane %v3547_v48, 6  ;;  %v17046_v61 = vld [vmem:[#allocation2 + $0x68] sm:$0xff]  ;;  %v17050_v23 = vpop.f32.mrb[22].mxu1  ;;  %v12932_v41 = vpop.f32.mrb[18].mxu0  ;;  %v17055_v26 = vsel %vm17012_vm10, %v4197_v18, %v16890_v43 }
 0x32e   : > { %v3462_v49 = vadd.f32 %v16816_v63, %v3419_v21  ;;  %v18946_v10 = vld [vmem:[#allocation53_spill] sm:$0xff]  ;;  %v18749_v5 = vrot.slane %v17046_v61, 6  ;;  %v3548_v3 = vld [vmem:[#allocation2 + $0x58] sm:$0xff]  ;;  %v3549_v62 = vld [vmem:[#allocation2 + $0x60] sm:$0xff]  ;;  %v3465_v32 = vadd.f32 %v16816_v63, %v3422_v9  ;;  %v3420_v35 = vmax.f32 %v3384_v6, 0.0  ;;  %v17060_v21 = vpop.f32.mrb[23].mxu1 }
 0x32f   : > { %v13652_v16 = vadd.f32 %v3249_v14, %v18946_v10  ;;  %v3389_v22 = vadd.f32 %v13651_v12, %v16772_v37  ;;  %v4380_v4 = vsel %vm665_vm1, %v4377_v60, %v4379_v17  ;;  %v4381_v14 = vrot.slane %v3548_v3, 6  ;;  %v18947_v43 = vld [vmem:[#allocation40_spill] sm:$0xff]  ;;  %v3252_v50 = vpop.f32.mrb[19].mxu0  ;;  %v4286_v57 = vld [vmem:[#allocation2 + $0x52] sm:$0xff] }
 0x330   : > { %v4383_v10 = vrot.slane %v3549_v62, 6  ;;  %3500 = vst.msk [vmem:[#allocation2 + $0x73] sm:$0xff] %vm3486_vm12, %v3462_v49  ;;  %vm18764_vm5 = vcmp.eq.s32.totalorder %v18947_v43, 17  ;;  %vm18948_vm7 = vcmp.eq.s32.totalorder %v16317_v42, 17  ;;  %vm18763_vm11 = vcmp.eq.s32.totalorder %v18947_v43, 0  ;;  %3503 = vst.msk [vmem:[#allocation2 + $0x8b] sm:$0xff] %vm3486_vm12, %v3465_v32 }
 0x331   : > { %v3387_v18 = vadd.f32 %v13652_v16, %v16772_v37  ;;  %v4575_v9 = vsel %vm18948_vm7, %v4380_v4, %v3547_v48  ;;  %v3463_v55 = vadd.f32 %v16816_v63, %v3420_v35  ;;  %v3425_v60 = vmax.f32 %v3389_v22, 0.0  ;;  %v18949_v6 = vld [vmem:[#allocation54_spill] sm:$0xff]  ;;  %v4289_v38 = vld [vmem:[#allocation2 + $0x6a] sm:$0xff]  ;;  %v17081_v4 = vld [vmem:[#allocation2] sm:$0xff] }
 0x332   : > { %v13653_v12 = vadd.f32 %v12932_v41, %v18949_v6  ;;  %v4616_v49 = vsel %vm18950_vm9, %v4286_v57, %v4575_v9  ;;  %v4382_v2 = vsel %vm665_vm1, %v4379_v17, %v4381_v14  ;;  %v4384_v16 = vsel %vm665_vm1, %v4381_v14, %v4383_v10  ;;  %18951 = vst [vmem:[#allocation49_spill] sm:$0xff] %v17081_v4  ;;  %v17083_v32 = vld [vmem:[#allocation2 + $0x8] sm:$0xff]  ;;  %v4287_v35 = vld [vmem:[#allocation2 + $0x5a] sm:$0xff] }
 0x333   : > { %v4386_v48 = vsel %vm665_vm1, %v4383_v10, %v18749_v5  ;;  %4657 = vst.msk [vmem:[#allocation2 + $0x50] sm:$0xff] %vm3486_vm12, %v4616_v49  ;;  %v4288_v41 = vld [vmem:[#allocation2 + $0x62] sm:$0xff]  ;;  %vm18952_vm10 = vcmp.eq.s32.totalorder %v18932_v25, 17  ;;  %vm18953_vm4 = vcmp.eq.s32.totalorder %v18933_v27, 17  ;;  %vm18954_vm6 = vcmp.eq.s32.totalorder %v18934_v28, 17  ;;  %3501 = vst.msk [vmem:[#allocation2 + $0x7b] sm:$0xff] %vm3486_vm12, %v3463_v55 }
 0x334   : > { %v4576_v57 = vsel %vm18952_vm10, %v4382_v2, %v3548_v3  ;;  %v4577_v17 = vsel %vm18953_vm4, %v4384_v16, %v3549_v62  ;;  %v4578_v22 = vsel %vm18954_vm6, %v4386_v48, %v17046_v61  ;;  %v18955_v14 = vld [vmem:[#allocation41_spill] sm:$0xff]  ;;  %v18956_v10 = vld [vmem:[#allocation42_spill] sm:$0xff]  ;;  %v3468_v9 = vadd.f32 %v16816_v63, %v3425_v60  ;;  %v18957_v6 = vld [vmem:[#allocation43_spill] sm:$0xff]  ;;  %v17109_v60 = vpop.f32.mrb[24].mxu1  ;;  %v12935_v16 = vpop.f32.mrb[20].mxu0 }
 0x335   : > { %vm18767_vm7 = vcmp.eq.s32.totalorder %v18955_v14, 17  ;;  %vm18777_vm9 = vcmp.eq.s32.totalorder %v18956_v10, 17  ;;  %vm18770_vm13 = vcmp.eq.s32.totalorder %v18957_v6, 17  ;;  %v17098_v49 = vld [vmem:[#allocation2 + $0x10] sm:$0xff]  ;;  %v4617_v2 = vsel %vm18751_vm8, %v4287_v35, %v4576_v57  ;;  %v18959_v48 = vld [vmem:[#allocation55_spill] sm:$0xff]  ;;  %v3265_v57 = vpop.f32.mrb[21].mxu0 }
 0x336   : > { %v4618_v3 = vsel %vm18750_vm14, %v4288_v41, %v4577_v17  ;;  %vm18958_vm10 = vcmp.eq.s32.totalorder %v18934_v28, 0  ;;  %vm18776_vm4 = vcmp.eq.s32.totalorder %v18955_v14, 0  ;;  %vm18775_vm6 = vcmp.eq.s32.totalorder %v18956_v10, 0  ;;  %4658 = vst.msk [vmem:[#allocation2 + $0x58] sm:$0xff] %vm3486_vm12, %v4617_v2  ;;  %3506 = vst.msk [vmem:[#allocation2 + $0xa3] sm:$0xff] %vm3486_vm12, %v3468_v9  ;;  %v18960_v9 = vld [vmem:[#allocation44_spill] sm:$0xff] }
 0x337   : > { %v4619_v62 = vsel %vm18958_vm10, %v4289_v38, %v4578_v22  ;;  %v3423_v55 = vmax.f32 %v3387_v18, 0.0  ;;  %vm18774_vm15 = vcmp.eq.s32.totalorder %v18957_v6, 0  ;;  %4659 = vst.msk [vmem:[#allocation2 + $0x60] sm:$0xff] %vm3486_vm12, %v4618_v3  ;;  %v3390_v38 = vadd.f32 %v13653_v12, %v16772_v37  ;;  %v17118_v18 = vpop.f32.mrb[25].mxu1  ;;  %v17133_v17 = vld [vmem:[#allocation2 + $0x88] sm:$0xff] }
 0x338   : > { %4660 = vst.msk [vmem:[#allocation2 + $0x68] sm:$0xff] %vm3486_vm12, %v4619_v62  ;;  %v13654_v35 = vadd.f32 %v3252_v50, %v18959_v48  ;;  %v13655_v41 = vadd.f32 %v12935_v16, %v17031_v20  ;;  %v13656_v2 = vadd.f32 %v3265_v57, %v17039_v39  ;;  %v17123_v3 = vpop.f32.mrb[26].mxu1  ;;  %v12936_v62 = vpop.f32.mrb[22].mxu0  ;;  %vm18778_vm10 = vcmp.eq.s32.totalorder %v16960_v8, 17  ;;  %v3551_v50 = vld [vmem:[#allocation2 + $0x70] sm:$0xff] }
 0x339   : > { %v3466_v22 = vadd.f32 %v16816_v63, %v3423_v55  ;;  %v3426_v20 = vmax.f32 %v3390_v38, 0.0  ;;  %v13657_v5 = vadd.f32 %v12936_v62, %v17050_v23  ;;  %v17131_v55 = vpop.f32.mrb[27].mxu1  ;;  %v3268_v39 = vpop.f32.mrb[23].mxu0  ;;  %v4387_v57 = vrot.slane %v3551_v50, 6  ;;  %v4290_v62 = vld [vmem:[#allocation2 + $0x72] sm:$0xff] }
 0x33a   : > { %v3388_v16 = vadd.f32 %v13654_v35, %v16772_v37  ;;  %v3393_v48 = vadd.f32 %v13655_v41, %v16772_v37  ;;  %vm18785_vm14 = vcmp.eq.s32.totalorder %v18960_v9, 17  ;;  %v3391_v12 = vadd.f32 %v13656_v2, %v16772_v37  ;;  %v3553_v25 = vld [vmem:[#allocation2 + $0x80] sm:$0xff]  ;;  %v12939_v0 = vpop.f32.mrb[24].mxu0 }
 0x33b   : > { %3504 = vst.msk [vmem:[#allocation2 + $0x93] sm:$0xff] %vm3486_vm12, %v3466_v22  ;;  %v13658_v38 = vadd.f32 %v3268_v39, %v17060_v21  ;;  %v18961_v35 = vrot.slane %v17083_v32, 6  ;;  %v18962_v41 = vrot.slane %v17081_v4, 6  ;;  %vm18791_vm8 = vcmp.eq.s32.totalorder %v17044_v54, 17  ;;  %v3552_v39 = vld [vmem:[#allocation2 + $0x78] sm:$0xff] }
 0x33c   : > { %vm18784_vm3 = vcmp.eq.s32.totalorder %v18960_v9, 0  ;;  %v3469_v22 = vadd.f32 %v16816_v63, %v3426_v20  ;;  %v3424_v28 = vmax.f32 %v3388_v16, 0.0  ;;  %v3429_v27 = vmax.f32 %v3393_v48, 0.0  ;;  %v4291_v43 = vld [vmem:[#allocation2 + $0x7a] sm:$0xff] }
 0x33d   : > { %v17144_v23 = vsel %vm665_vm1, %v18962_v41, %v18961_v35  ;;  %v18963_v2 = vrot.slane %v17046_v61, 6  ;;  %v3427_v42 = vmax.f32 %v3391_v12, 0.0  ;;  %v3394_v35 = vadd.f32 %v13657_v5, %v16772_v37 }
 0x33e   : > { %v3392_v41 = vadd.f32 %v13658_v38, %v16772_v37  ;;  %vm18788_vm2 = vcmp.eq.s32.totalorder %v17055_v26, 17  ;;  %v4389_v20 = vrot.slane %v3552_v39, 6  ;;  %v4391_v16 = vrot.slane %v3553_v25, 6  ;;  %3507 = vst.msk [vmem:[#allocation2 + $0xab] sm:$0xff] %vm3486_vm12, %v3469_v22 }
 0x33f   : > { %v4388_v21 = vsel %vm665_vm1, %v18963_v2, %v4387_v57  ;;  %v3467_v61 = vadd.f32 %v16816_v63, %v3424_v28  ;;  %v3472_v12 = vadd.f32 %v16816_v63, %v3429_v27  ;;  %v3470_v5 = vadd.f32 %v16816_v63, %v3427_v42  ;;  %v17164_v2 = vpop.f32.mrb[28].mxu1  ;;  %v18966_v27 = vld [vmem:[#allocation46_spill] sm:$0xff]  ;;  %v18967_v42 = vld [vmem:[#allocation47_spill] sm:$0xff] }
 0x340   : > { %v4579_v13 = vsel %vm18764_vm5, %v4388_v21, %v3551_v50  ;;  %v3430_v38 = vmax.f32 %v3394_v35, 0.0  ;;  %v4390_v50 = vsel %vm665_vm1, %v4387_v57, %v4389_v20  ;;  %v4392_v21 = vsel %vm665_vm1, %v4389_v20, %v4391_v16  ;;  %v17176_v35 = vpop.f32.mrb[29].mxu1  ;;  %v4292_v57 = vld [vmem:[#allocation2 + $0x82] sm:$0xff] }
 0x341   : > { %v4620_v48 = vsel %vm18763_vm11, %v4290_v62, %v4579_v13  ;;  %v18964_v22 = vrot.slane %v17133_v17, 6  ;;  %3505 = vst.msk [vmem:[#allocation2 + $0x9b] sm:$0xff] %vm3486_vm12, %v3467_v61  ;;  %v18965_v13 = vld [vmem:[#allocation45_spill] sm:$0xff]  ;;  %v3428_v62 = vmax.f32 %v3392_v41, 0.0  ;;  %v4580_v20 = vsel %vm18767_vm7, %v4390_v50, %v3552_v39  ;;  %3510 = vst.msk [vmem:[#allocation2 + $0xc3] sm:$0xff] %vm3486_vm12, %v3472_v12  ;;  %v18968_v41 = vld [vmem:[#allocation48_spill] sm:$0xff] }
 0x342   : > { %4661 = vst.msk [vmem:[#allocation2 + $0x70] sm:$0xff] %vm3486_vm12, %v4620_v48  ;;  %v3281_v48 = vpop.f32.mrb[25].mxu0  ;;  %vm18792_vm5 = vcmp.eq.s32.totalorder %v18965_v13, 0  ;;  %vm18795_vm0 = vcmp.eq.s32.totalorder %v18966_v27, 0  ;;  %3508 = vst.msk [vmem:[#allocation2 + $0xb3] sm:$0xff] %vm3486_vm12, %v3470_v5  ;;  %vm18794_vm11 = vcmp.eq.s32.totalorder %v18967_v42, 0  ;;  %v3473_v39 = vadd.f32 %v16816_v63, %v3430_v38 }
 0x343   : > { %v4394_v28 = vsel %vm665_vm1, %v4391_v16, %v18964_v22  ;;  %v4581_v16 = vsel %vm18777_vm9, %v4392_v21, %v3553_v25  ;;  %v4293_v22 = vld [vmem:[#allocation2 + $0x8a] sm:$0xff]  ;;  %vm18793_vm7 = vcmp.eq.s32.totalorder %v18968_v41, 17  ;;  %v17192_v25 = vpop.f32.mrb[30].mxu1  ;;  %v12940_v50 = vpop.f32.mrb[26].mxu0  ;;  %v4621_v21 = vsel %vm18776_vm4, %v4291_v43, %v4580_v20 }
 0x344   : > { %v4582_v61 = vsel %vm18770_vm13, %v4394_v28, %v17133_v17  ;;  %v4622_v28 = vsel %vm18775_vm6, %v4292_v57, %v4581_v16  ;;  %v3555_v58 = vld [vmem:[#allocation2 + $0x90] sm:$0xff]  ;;  %vm18796_vm13 = vcmp.eq.s32.totalorder %v18968_v41, 0  ;;  %v3471_v5 = vadd.f32 %v16816_v63, %v3428_v62  ;;  %v17202_v36 = vpop.f32.mrb[31].mxu1  ;;  %v3284_v38 = vpop.f32.mrb[27].mxu0  ;;  %4662 = vst.msk [vmem:[#allocation2 + $0x78] sm:$0xff] %vm3486_vm12, %v4621_v21  ;;  %3511 = vst.msk [vmem:[#allocation2 + $0xcb] sm:$0xff] %vm3486_vm12, %v3473_v39 }
 0x345   : > { %v4623_v12 = vsel %vm18774_vm15, %v4293_v22, %v4582_v61  ;;  %4663 = vst.msk [vmem:[#allocation2 + $0x80] sm:$0xff] %vm3486_vm12, %v4622_v28  ;;  %v4395_v14 = vrot.slane %v3555_v58, 6  ;;  %v13659_v43 = vadd.f32 %v12939_v0, %v17109_v60  ;;  %v13660_v57 = vadd.f32 %v3281_v48, %v17118_v18  ;;  %v18974_v48 = vld [vmem:[#allocation50_spill] sm:$0xff]  ;;  %v4297_v9 = vld [vmem:[#allocation2 + $0xaa] sm:$0xff] }
 0x346   : > { %4664 = vst.msk [vmem:[#allocation2 + $0x88] sm:$0xff] %vm3486_vm12, %v4623_v12  ;;  %v13661_v20 = vadd.f32 %v12940_v50, %v17123_v3  ;;  %3509 = vst.msk [vmem:[#allocation2 + $0xbb] sm:$0xff] %vm3486_vm12, %v3471_v5  ;;  %v13662_v62 = vadd.f32 %v3284_v38, %v17131_v55  ;;  %v18969_v16 = vrot.slane %v17098_v49, 6  ;;  %v18970_v22 = vrot.slane %v17083_v32, 6  ;;  %v3558_v55 = vld [vmem:[#allocation2 + $0xa8] sm:$0xff]  ;;  %v18975_v50 = vld [vmem:[#allocation51_spill] sm:$0xff] }
 0x347   : > { %v18971_v21 = vrot.slane %v16903_v15, 6  ;;  %v17228_v60 = vsel %vm18778_vm10, %v17144_v23, %v17083_v32  ;;  %v18973_v18 = vrot.slane %v17133_v17, 6  ;;  %vm18806_vm4 = vcmp.eq.s32.totalorder %v18975_v50, 17  ;;  %v4294_v38 = vld [vmem:[#allocation2 + $0x92] sm:$0xff] }
 0x348   : > { %v4364_v61 = vsel %vm665_vm1, %v18970_v22, %v18969_v16  ;;  %v18972_v39 = vmov %v18969_v16  ;;  %v3397_v28 = vadd.f32 %v13659_v43, %v16772_v37  ;;  %v3395_v12 = vadd.f32 %v13660_v57, %v16772_v37  ;;  %v3557_v16 = vld [vmem:[#allocation2 + $0xa0] sm:$0xff] }
 0x349   : > { %v4366_v0 = vsel %vm665_vm1, %v18972_v39, %v18971_v21  ;;  %v4396_v3 = vsel %vm665_vm1, %v18973_v18, %v4395_v14  ;;  %vm18805_vm9 = vcmp.eq.s32.totalorder %v16754_v46, 17  ;;  %v3398_v5 = vadd.f32 %v13661_v20, %v16772_v37  ;;  %v3556_v20 = vld [vmem:[#allocation2 + $0x98] sm:$0xff]  ;;  %v4296_v52 = vld [vmem:[#allocation2 + $0xa2] sm:$0xff] }
 0x34a   : > { %v4583_v32 = vsel %vm18785_vm14, %v4396_v3, %v3555_v58  ;;  %v4401_v17 = vrot.slane %v3558_v55, 6  ;;  %vm18804_vm10 = vcmp.eq.s32.totalorder %v18974_v48, 0  ;;  %vm18803_vm15 = vcmp.eq.s32.totalorder %v18975_v50, 0  ;;  %v3559_v3 = vld [vmem:[#allocation2 + $0xb0] sm:$0xff] }
 0x34b   : > { %vm18802_vm6 = vcmp.eq.s32.totalorder %v16754_v46, 0  ;;  %v3396_v23 = vadd.f32 %v13662_v62, %v16772_v37  ;;  %v17248_v43 = vsel %vm18791_vm8, %v4364_v61, %v17098_v49  ;;  %v4624_v57 = vsel %vm18784_vm3, %v4294_v38, %v4583_v32  ;;  %v4295_v32 = vld [vmem:[#allocation2 + $0x9a] sm:$0xff] }
 0x34c   : > { %v3433_v58 = vmax.f32 %v3397_v28, 0.0  ;;  %v3431_v22 = vmax.f32 %v3395_v12, 0.0  ;;  %v3434_v21 = vmax.f32 %v3398_v5, 0.0  ;;  %4665 = vst.msk [vmem:[#allocation2 + $0x90] sm:$0xff] %vm3486_vm12, %v4624_v57  ;;  %v4397_v39 = vrot.slane %v3556_v20, 6  ;;  %v17261_v12 = vpop.f32.mrb[32].mxu1 }
 0x34d   : > { %v4399_v18 = vrot.slane %v3557_v16, 6  ;;  %v3432_v6 = vmax.f32 %v3396_v23, 0.0  ;;  %v17256_v62 = vsel %vm18788_vm2, %v4366_v0, %v16903_v15  ;;  %v4403_v49 = vrot.slane %v3559_v3, 6  ;;  %v12943_v5 = vpop.f32.mrb[28].mxu0  ;;  %v17266_v15 = vld [vmem:[#allocation2 + $0xc8] sm:$0xff]  ;;  %v3561_v4 = vld [vmem:[#allocation2 + $0xc0] sm:$0xff] }
 0x34e   : > { %v3476_v61 = vadd.f32 %v16816_v63, %v3433_v58  ;;  %v3474_v38 = vadd.f32 %v16816_v63, %v3431_v22  ;;  %v3477_v28 = vadd.f32 %v16816_v63, %v3434_v21  ;;  %v4398_v57 = vsel %vm665_vm1, %v4395_v14, %v4397_v39  ;;  %v17269_v58 = vpop.f32.mrb[33].mxu1  ;;  %v3297_v22 = vpop.f32.mrb[29].mxu0 }
 0x34f   : > { %v4400_v23 = vsel %vm665_vm1, %v4397_v39, %v4399_v18  ;;  %v4402_v10 = vsel %vm665_vm1, %v4399_v18, %v4401_v17  ;;  %v3475_v0 = vadd.f32 %v16816_v63, %v3432_v6  ;;  %vm18976_vm3 = vcmp.eq.s32.totalorder %v18965_v13, 17  ;;  %v3560_v18 = vld [vmem:[#allocation2 + $0xb8] sm:$0xff]  ;;  %v17282_v6 = vpop.f32.mrb[34].mxu1 }
 0x350   : > { %v4584_v21 = vsel %vm18976_vm3, %v4398_v57, %v3556_v20  ;;  %vm18977_vm14 = vcmp.eq.s32.totalorder %v18966_v27, 17  ;;  %v4404_v14 = vsel %vm665_vm1, %v4401_v17, %v4403_v49  ;;  %vm18978_vm2 = vcmp.eq.s32.totalorder %v18967_v42, 17  ;;  %3514 = vst.msk [vmem:[#allocation2 + $0xe3] sm:$0xff] %vm3486_vm12, %v3476_v61  ;;  %3512 = vst.msk [vmem:[#allocation2 + $0xd3] sm:$0xff] %vm3486_vm12, %v3474_v38  ;;  %v12944_v20 = vpop.f32.mrb[30].mxu0  ;;  %v17297_v38 = vpop.f32.mrb[35].mxu1 }
 0x351   : > { %v4585_v34 = vsel %vm18977_vm14, %v4400_v23, %v3557_v16  ;;  %v4586_v39 = vsel %vm18978_vm2, %v4402_v10, %v3558_v55  ;;  %vm18798_vm8 = vcmp.eq.s32.totalorder %v16759_v19, 17  ;;  %3515 = vst.msk [vmem:[#allocation2 + $0xeb] sm:$0xff] %vm3486_vm12, %v3477_v28  ;;  %v4625_v16 = vsel %vm18792_vm5, %v4295_v32, %v4584_v21  ;;  %v4298_v10 = vld [vmem:[#allocation2 + $0xb2] sm:$0xff]  ;;  %3513 = vst.msk [vmem:[#allocation2 + $0xdb] sm:$0xff] %vm3486_vm12, %v3475_v0  ;;  %v4277_v21 = vld [vmem:[#allocation2 + $0xa] sm:$0xff] }
 0x352   : > { %v4626_v17 = vsel %vm18795_vm0, %v4296_v52, %v4585_v34  ;;  %v4587_v55 = vsel %vm18793_vm7, %v4404_v14, %v3559_v3  ;;  %v4627_v61 = vsel %vm18794_vm11, %v4297_v9, %v4586_v39  ;;  %vm18797_vm2 = vcmp.eq.s32.totalorder %v16759_v19, 0  ;;  %v3300_v34 = vpop.f32.mrb[31].mxu0  ;;  %4666 = vst.msk [vmem:[#allocation2 + $0x98] sm:$0xff] %vm3486_vm12, %v4625_v16 }
 0x353   : > { %vm18799_vm3 = vcmp.eq.s32.totalorder %v16764_v47, 17  ;;  %vm18800_vm14 = vcmp.eq.s32.totalorder %v16777_v11, 17  ;;  %vm18801_vm5 = vcmp.eq.s32.totalorder %v16781_v24, 17  ;;  %4667 = vst.msk [vmem:[#allocation2 + $0xa0] sm:$0xff] %vm3486_vm12, %v4626_v17  ;;  %v4628_v52 = vsel %vm18796_vm13, %v4298_v10, %v4587_v55  ;;  %4668 = vst.msk [vmem:[#allocation2 + $0xa8] sm:$0xff] %vm3486_vm12, %v4627_v61  ;;  %v12947_v17 = vpop.f32.mrb[32].mxu0 }
 0x354   : > { %v4409_v9 = vrot.slane %v17266_v15, 6  ;;  %v4405_v3 = vrot.slane %v3560_v18, 6  ;;  %v4407_v28 = vrot.slane %v3561_v4, 6  ;;  %4669 = vst.msk [vmem:[#allocation2 + $0xb0] sm:$0xff] %vm3486_vm12, %v4628_v52  ;;  %v13663_v32 = vadd.f32 %v12943_v5, %v17164_v2  ;;  %v17316_v10 = vld [vmem:[#allocation2 + $0x2] sm:$0xff]  ;;  %v4301_v5 = vld [vmem:[#allocation2 + $0xca] sm:$0xff] }
 0x355   : > { %v13664_v57 = vadd.f32 %v3297_v22, %v17176_v35  ;;  %v13665_v23 = vadd.f32 %v12944_v20, %v17192_v25  ;;  %v13666_v0 = vadd.f32 %v3300_v34, %v17202_v36  ;;  %vm18808_vm13 = vcmp.eq.s32.totalorder %v17044_v54, 0  ;;  %v4299_v35 = vld [vmem:[#allocation2 + $0xba] sm:$0xff]  ;;  %v4300_v36 = vld [vmem:[#allocation2 + $0xc2] sm:$0xff]  ;;  %v3313_v55 = vpop.f32.mrb[33].mxu0 }
 0x356   : > { %v4406_v14 = vsel %vm665_vm1, %v4403_v49, %v4405_v3  ;;  %v4408_v39 = vsel %vm665_vm1, %v4405_v3, %v4407_v28  ;;  %v4410_v16 = vsel %vm665_vm1, %v4407_v28, %v4409_v9  ;;  %vm18979_vm0 = vcmp.eq.s32.totalorder %v16960_v8, 0  ;;  %v12948_v34 = vpop.f32.mrb[34].mxu0 }
 0x357   : > { %v4607_v2 = vsel %vm18979_vm0, %v4277_v21, %v17228_v60  ;;  %vm18807_vm11 = vcmp.eq.s32.totalorder %v17055_v26, 0  ;;  %vm18980_vm7 = vcmp.eq.s32.totalorder %v18974_v48, 17  ;;  %v4589_v49 = vsel %vm18806_vm4, %v4408_v39, %v3561_v4 }
 0x358   : > { %v4588_v25 = vsel %vm18980_vm7, %v4406_v14, %v3560_v18  ;;  %v4590_v22 = vsel %vm18805_vm9, %v4410_v16, %v17266_v15  ;;  %v3401_v20 = vadd.f32 %v13663_v32, %v16772_v37  ;;  %4648 = vst.msk [vmem:[#allocation2 + $0x8] sm:$0xff] %vm3486_vm12, %v4607_v2  ;;  %v4630_v61 = vsel %vm18803_vm15, %v4300_v36, %v4589_v49  ;;  %v3563_v15 = vld [vmem:[#allocation2 + $0xd0] sm:$0xff]  ;;  %v17342_v52 = vld [vmem:[#allocation2 + $0xe8] sm:$0xff]  ;;  %v3316_v14 = vpop.f32.mrb[35].mxu0  ;;  %v3564_v16 = vld [vmem:[#allocation2 + $0xd8] sm:$0xff] }
 0x359   : > { %v4629_v60 = vsel %vm18804_vm10, %v4299_v35, %v4588_v25  ;;  %v4631_v18 = vsel %vm18802_vm6, %v4301_v5, %v4590_v22  ;;  %v3399_v4 = vadd.f32 %v13664_v57, %v16772_v37  ;;  %4671 = vst.msk [vmem:[#allocation2 + $0xc0] sm:$0xff] %vm3486_vm12, %v4630_v61  ;;  %v3402_v28 = vadd.f32 %v13665_v23, %v16772_v37  ;;  %v3565_v2 = vld [vmem:[#allocation2 + $0xe0] sm:$0xff] }
 0x35a   : > { %4670 = vst.msk [vmem:[#allocation2 + $0xb8] sm:$0xff] %vm3486_vm12, %v4629_v60  ;;  %4672 = vst.msk [vmem:[#allocation2 + $0xc8] sm:$0xff] %vm3486_vm12, %v4631_v18  ;;  %v3437_v3 = vmax.f32 %v3401_v20, 0.0  ;;  %v3400_v32 = vadd.f32 %v13666_v0, %v16772_v37  ;;  %v13667_v21 = vadd.f32 %v12947_v17, %v17261_v12  ;;  %v4411_v39 = vrot.slane %v3563_v15, 6  ;;  %v14751_v17 = vld [vmem:[#allocation9] ss:$0 sm:$0xff] }
 0x35b   : > { %v4417_v57 = vrot.slane %v17342_v52, 6  ;;  %v3435_v35 = vmax.f32 %v3399_v4, 0.0  ;;  %v13668_v36 = vadd.f32 %v3313_v55, %v17269_v58  ;;  %vm4105_vm0 = vcmp.ne.s32.totalorder %v16847_v51, 0  ;;  %v4302_v20 = vld [vmem:[#allocation2 + $0xd2] sm:$0xff]  ;;  %v4304_v18 = vld [vmem:[#allocation2 + $0xe2] sm:$0xff] }
 0x35c   : > { %v4413_v25 = vrot.slane %v3564_v16, 6  ;;  %v4415_v49 = vrot.slane %v3565_v2, 6  ;;  %v3480_v5 = vadd.f32 %v16816_v63, %v3437_v3  ;;  %v3438_v23 = vmax.f32 %v3402_v28, 0.0  ;;  %v4305_v3 = vld [vmem:[#allocation2 + $0xea] sm:$0xff] }
 0x35d   : > { %v4412_v37 = vsel %vm665_vm1, %v4409_v9, %v4411_v39  ;;  %v3478_v12 = vadd.f32 %v16816_v63, %v3435_v35  ;;  %v3436_v0 = vmax.f32 %v3400_v32, 0.0  ;;  %v3405_v22 = vadd.f32 %v14751_v17, %v13667_v21  ;;  %v4303_v9 = vld [vmem:[#allocation2 + $0xda] sm:$0xff]  ;;  %v4278_v35 = vld [vmem:[#allocation2 + $0x12] sm:$0xff] }
 0x35e   : > { %v4591_v60 = vsel %vm18798_vm8, %v4412_v37, %v3563_v15  ;;  %v4414_v58 = vsel %vm665_vm1, %v4411_v39, %v4413_v25  ;;  %v4416_v55 = vsel %vm665_vm1, %v4413_v25, %v4415_v49  ;;  %3518 = vst.msk [vmem:[#allocation2 + $0x103] sm:$0xff] %vm3486_vm12, %v3480_v5  ;;  %v4418_v61 = vsel %vm665_vm1, %v4415_v49, %v4417_v57 }
 0x35f   : > { %v4632_v63 = vsel %vm18797_vm2, %v4302_v20, %v4591_v60  ;;  %v4592_v4 = vsel %vm18799_vm3, %v4414_v58, %v3564_v16  ;;  %v4593_v15 = vsel %vm18800_vm14, %v4416_v55, %v3565_v2  ;;  %3516 = vst.msk [vmem:[#allocation2 + $0xf3] sm:$0xff] %vm3486_vm12, %v3478_v12  ;;  %vm18809_vm7 = vcmp.eq.s32.totalorder %v16803_v45, 17  ;;  %v14752_v16 = vld [vmem:[#allocation10] ss:$0 sm:$0xff] }
 0x360   : > { %v4594_v28 = vsel %vm18801_vm5, %v4418_v61, %v17342_v52  ;;  %4673 = vst.msk [vmem:[#allocation2 + $0xd0] sm:$0xff] %vm3486_vm12, %v4632_v63  ;;  %vm18981_vm2 = vcmp.eq.s32.totalorder %v16764_v47, 0  ;;  %vm18982_vm8 = vcmp.eq.s32.totalorder %v16777_v11, 0  ;;  %vm4513_vm3 = vcmp.eq.s32.totalorder %v16803_v45, 0 }
 0x361   : > { %v4633_v32 = vsel %vm18981_vm2, %v4303_v9, %v4592_v4  ;;  %v4634_v21 = vsel %vm18982_vm8, %v4304_v18, %v4593_v15  ;;  %vm18983_vm14 = vcmp.eq.s32.totalorder %v16781_v24, 0  ;;  %v3481_v2 = vadd.f32 %v14752_v16, %v3438_v23 }
 0x362   : > { %v4635_v39 = vsel %vm18983_vm14, %v4305_v3, %v4594_v28  ;;  %4674 = vst.msk [vmem:[#allocation2 + $0xd8] sm:$0xff] %vm3486_vm12, %v4633_v32  ;;  %4675 = vst.msk [vmem:[#allocation2 + $0xe0] sm:$0xff] %vm3486_vm12, %v4634_v21  ;;  %v3479_v25 = vadd.f32 %v14752_v16, %v3436_v0  ;;  %v3441_v49 = vmax.f32 %v3405_v22, 0.0  ;;  %v3403_v5 = vadd.f32 %v14751_v17, %v13668_v36 }
 0x363   : > { %4676 = vst.msk [vmem:[#allocation2 + $0xe8] sm:$0xff] %vm3486_vm12, %v4635_v39  ;;  %v13669_v37 = vadd.f32 %v12948_v34, %v17282_v6  ;;  %3519 = vst.msk [vmem:[#allocation2 + $0x10b] sm:$0xff] %vm3486_vm12, %v3481_v2  ;;  %v13670_v12 = vadd.f32 %v3316_v14, %v17297_v38  ;;  %v18984_v20 = vshrl.u32 %v16828_v53, 4  ;;  %v4608_v23 = vsel %vm18808_vm13, %v4278_v35, %v17248_v43 }
 0x364   : > { %v4609_v0 = vsel %vm18807_vm11, %v16945_v7, %v17256_v62  ;;  %3517 = vst.msk [vmem:[#allocation2 + $0xfb] sm:$0xff] %vm3486_vm12, %v3479_v25  ;;  %vm4555_vm8 = vcmp.eq.s32.totalorder %v16807_v29, 17  ;;  %vm4556_vm2 = vcmp.eq.s32.totalorder %v16813_v59, 17  ;;  %v3484_v6 = vadd.f32 %v14752_v16, %v3441_v49  ;;  %4649 = vst.msk [vmem:[#allocation2 + $0x10] sm:$0xff] %vm3486_vm12, %v4608_v23 }
 0x365   : > { %v4034_v60 = vmul.u32 18, %v18984_v20  ;;  %v3439_v38 = vmax.f32 %v3403_v5, 0.0  ;;  %vm4146_vm14 = vcmp.lt.s32.totalorder %v16847_v51, 0  ;;  %v3406_v53 = vadd.f32 %v14751_v17, %v13669_v37  ;;  %4650 = vst.msk [vmem:[#allocation2 + $0x18] sm:$0xff] %vm3486_vm12, %v4609_v0 }
 0x366   : > { %vm18810_vm5 = vcmp.eq.s32.totalorder %v16807_v29, 0  ;;  %v4228_v7 = vadd.s32 18, %v16847_v51  ;;  %v3404_v43 = vadd.f32 %v14751_v17, %v13670_v12  ;;  %v3626_v62 = vshrl.u32 %v16880_v33, 4  ;;  %3522 = vst.msk [vmem:[#allocation2 + $0x123] sm:$0xff] %vm3486_vm12, %v3484_v6  ;;  %v3567_v36 = vld [vmem:[#allocation2 + $0xf0] sm:$0xff]  ;;  %vm17413_vm4 = vmand %vm4146_vm14, %vm4105_vm0 }
 0x367   : > { %v3482_v34 = vadd.f32 %v14752_v16, %v3439_v38  ;;  %v3442_v14 = vmax.f32 %v3406_v53, 0.0  ;;  %vm4106_vm10 = vcmp.ne.s32.totalorder %v16868_v30, 0  ;;  %vm4147_vm9 = vcmp.lt.s32.totalorder %v16868_v30, 0 }
 0x368   : > { %v3440_v17 = vmax.f32 %v3404_v43, 0.0  ;;  %v4035_v33 = vsub.s32 %v16791_v44, %v4034_v60  ;;  %vm4107_vm11 = vcmp.ne.s32.totalorder %v16872_v31, 0  ;;  %vm4148_vm13 = vcmp.lt.s32.totalorder %v16872_v31, 0  ;;  %vm17429_vm6 = vmand %vm4147_vm9, %vm4106_vm10 }
 0x369   : > { %v4419_v58 = vrot.slane %v3567_v36, 6  ;;  %vm4557_vm15 = vcmp.eq.s32.totalorder %v16859_v40, 17  ;;  %3520 = vst.msk [vmem:[#allocation2 + $0x113] sm:$0xff] %vm3486_vm12, %v3482_v34  ;;  %v3485_v55 = vadd.f32 %v14752_v16, %v3442_v14  ;;  %v4229_v61 = vadd.s32 18, %v16868_v30  ;;  %vm17447_vm9 = vmand %vm4148_vm13, %vm4107_vm11 }
 0x36a   : > { %vm4109_vm0 = vcmp.ne.s32.totalorder %v16850_v1, 0  ;;  %vm4150_vm14 = vcmp.lt.s32.totalorder %v16850_v1, 0  ;;  %v3483_v63 = vadd.f32 %v14752_v16, %v3440_v17  ;;  %v3627_v9 = vmul.u32 18, %v3626_v62  ;;  %v3570_v4 = vld [vmem:[#allocation2 + $0x108] sm:$0xff] }
 0x36b   : > { %v4420_v18 = vsel %vm665_vm1, %v4417_v57, %v4419_v58  ;;  %v17439_v15 = vsel %vm17413_vm4, %v4228_v7, %v16847_v51  ;;  %3523 = vst.msk [vmem:[#allocation2 + $0x12b] sm:$0xff] %vm3486_vm12, %v3485_v55  ;;  %v4232_v3 = vadd.s32 18, %v16850_v1  ;;  %v4230_v52 = vadd.s32 18, %v16872_v31  ;;  %v4306_v57 = vld [vmem:[#allocation2 + $0xf2] sm:$0xff]  ;;  %v3569_v39 = vld [vmem:[#allocation2 + $0x100] sm:$0xff] }
 0x36c   : > { %v4595_v32 = vsel %vm18809_vm7, %v4420_v18, %v3567_v36  ;;  %v4425_v51 = vrot.slane %v3570_v4, 6  ;;  %v3568_v21 = vld [vmem:[#allocation2 + $0xf8] sm:$0xff]  ;;  %3521 = vst.msk [vmem:[#allocation2 + $0x11b] sm:$0xff] %vm3486_vm12, %v3483_v63  ;;  %vm4108_vm4 = vcmp.ne.s32.totalorder %v4035_v33, 0  ;;  %vm4149_vm10 = vcmp.lt.s32.totalorder %v4035_v33, 0  ;;  %vm17469_vm7 = vmand %vm4150_vm14, %vm4109_vm0  ;;  %v4308_v38 = vld [vmem:[#allocation2 + $0x102] sm:$0xff] }
 0x36d   : > { %v4636_v16 = vsel %vm4513_vm3, %v4306_v57, %v4595_v32  ;;  %v4421_v2 = vrot.slane %v3568_v21, 6  ;;  %v4423_v35 = vrot.slane %v3569_v39, 6  ;;  %v17460_v25 = vsel %vm17429_vm6, %v4229_v61, %v16868_v30  ;;  %v4309_v30 = vld [vmem:[#allocation2 + $0x10a] sm:$0xff]  ;;  %v4307_v12 = vld [vmem:[#allocation2 + $0xfa] sm:$0xff]  ;;  %vm17481_vm6 = vmand %vm4149_vm10, %vm4108_vm4 }
 0x36e   : > { %4677 = vst.msk [vmem:[#allocation2 + $0xf0] sm:$0xff] %vm3486_vm12, %v4636_v16  ;;  %vm4517_vm13 = vcmp.eq.s32.totalorder %v17439_v15, 0  ;;  %vm18811_vm11 = vcmp.eq.s32.totalorder %v17439_v15, 17  ;;  %v4231_v5 = vadd.s32 18, %v4035_v33  ;;  %v17474_v37 = vsub.s32 %v16143_v56, %v3627_v9 }
 0x36f   : > { %v4422_v20 = vsel %vm665_vm1, %v4419_v58, %v4421_v2  ;;  %v4424_v60 = vsel %vm665_vm1, %v4421_v2, %v4423_v35  ;;  %v4426_v23 = vsel %vm665_vm1, %v4423_v35, %v4425_v51  ;;  %v17488_v6 = vsel %vm17447_vm9, %v4230_v52, %v16872_v31 }
 0x370   : > { %v4596_v53 = vsel %vm4555_vm8, %v4422_v20, %v3568_v21  ;;  %v4597_v7 = vsel %vm4556_vm2, %v4424_v60, %v3569_v39  ;;  %v4598_v43 = vsel %vm4557_vm15, %v4426_v23, %v3570_v4  ;;  %v3571_v62 = vld [vmem:[#allocation2 + $0x110] sm:$0xff]  ;;  %vm18818_vm0 = vcmp.eq.s32.totalorder %v17460_v25, 0 }
 0x371   : > { %v3531_v34 = vld [vmem:[#allocation2 + $0x10e] sm:$0xff]  ;;  %v4637_v14 = vsel %vm18810_vm5, %v4307_v12, %v4596_v53  ;;  %vm18995_vm14 = vcmp.eq.s32.totalorder %v16813_v59, 0  ;;  %vm18996_vm9 = vcmp.eq.s32.totalorder %v16859_v40, 0  ;;  %v4427_v22 = vrot.slane %v3571_v62, 6 }
 0x372   : > { %v4638_v31 = vsel %vm18995_vm14, %v4308_v38, %v4597_v7  ;;  %v4639_v36 = vsel %vm18996_vm9, %v4309_v30, %v4598_v43  ;;  %3534 = vst.msk [vmem:[#allocation2 + $0x132] sm:$0xff] %vm3486_vm12, %v3531_v34  ;;  %4678 = vst.msk [vmem:[#allocation2 + $0xf8] sm:$0xff] %vm3486_vm12, %v4637_v14  ;;  %v3574_v17 = vld [vmem:[#allocation2 + $0x128] sm:$0xff]  ;;  %v17509_v58 = vsel %vm17481_vm6, %v4231_v5, %v4035_v33  ;;  %vm18817_vm4 = vcmp.eq.s32.totalorder %v17488_v6, 0  ;;  %v4310_v33 = vld [vmem:[#allocation2 + $0x112] sm:$0xff] }
 0x373   : > { %4679 = vst.msk [vmem:[#allocation2 + $0x100] sm:$0xff] %vm3486_vm12, %v4638_v31  ;;  %4680 = vst.msk [vmem:[#allocation2 + $0x108] sm:$0xff] %vm3486_vm12, %v4639_v36  ;;  %vm4071_vm10 = vcmp.ne.s32.totalorder %v17474_v37, 0  ;;  %v17514_v55 = vadd.s32 312, %v16143_v56  ;;  %v4428_v61 = vsel %vm665_vm1, %v4425_v51, %v4427_v22  ;;  %v17520_v63 = vsel %vm17469_vm7, %v4232_v3, %v16850_v1  ;;  %v3532_v9 = vld [vmem:[#allocation2 + $0x116] sm:$0xff]  ;;  %v3573_v52 = vld [vmem:[#allocation2 + $0x120] sm:$0xff] }
 0x374   : > { %v4433_v44 = vrot.slane %v3574_v17, 6  ;;  %v3533_v18 = vld [vmem:[#allocation2 + $0x11e] sm:$0x3]  ;;  %vm4112_vm6 = vcmp.lt.s32.totalorder %v17474_v37, 0  ;;  %v4599_v28 = vsel %vm18811_vm11, %v4428_v61, %v3571_v62  ;;  %3535 = vst.msk [vmem:[#allocation2 + $0x13a] sm:$0xff] %vm3486_vm12, %v3532_v9  ;;  %vm18997_vm14 = vcmask 25600  }
 0x375   : > { %v3572_v4 = vld [vmem:[#allocation2 + $0x118] sm:$0xff]  ;;  %3536 = vst.msk [vmem:[#allocation2 + $0x142] sm:$0x3] %vm18997_vm14, %v3533_v18  ;;  %vm18821_vm9 = vcmp.eq.s32.totalorder %v17460_v25, 17  ;;  %vm18820_vm7 = vcmp.eq.s32.totalorder %v17488_v6, 17  ;;  %v4640_v1 = vsel %vm4517_vm13, %v4310_v33, %v4599_v28  ;;  %v4431_v3 = vrot.slane %v3573_v52, 6  ;;  %vm17540_vm14 = vmand %vm4112_vm6, %vm4071_vm10 }
 0x376   : > { %v4429_v57 = vrot.slane %v3572_v4, 6  ;;  %vm18819_vm5 = vcmp.eq.s32.totalorder %v17509_v58, 17  ;;  %v4194_v32 = vadd.s32 18, %v17474_v37  ;;  %vm18812_vm11 = vcmp.eq.s32.totalorder %v17509_v58, 0  ;;  %4681 = vst.msk [vmem:[#allocation2 + $0x110] sm:$0xff] %vm3486_vm12, %v4640_v1  ;;  %v4311_v2 = vld [vmem:[#allocation2 + $0x11a] sm:$0xff] }
 0x377   : > { %v17545_v39 = vmul.u32.u64.low 3817748708, %v17514_v55  ;;  %v17546_v16 = vmul.u32.u64.high 3817748708, %v17514_v55, %v17545_v39  ;;  %v4434_v49 = vsel %vm665_vm1, %v4431_v3, %v4433_v44  ;;  %v4313_v12 = vld [vmem:[#allocation2 + $0x12a] sm:$0xff]  ;;  %vm18816_vm10 = vcmp.eq.s32.totalorder %v17520_v63, 17  ;;  %v4312_v20 = vld [vmem:[#allocation2 + $0x122] sm:$0xff] }
 0x378   : > { %v4430_v51 = vsel %vm665_vm1, %v4427_v22, %v4429_v57  ;;  %v4432_v35 = vsel %vm665_vm1, %v4429_v57, %v4431_v3  ;;  %v4602_v23 = vsel %vm18819_vm5, %v4434_v49, %v3574_v17  ;;  %v17570_v43 = vsel %vm17540_vm14, %v4194_v32, %v17474_v37  ;;  %v19000_v22 = vld [vmem:[#allocation49_spill] sm:$0xff]  ;;  %v4747_v3 = vld [vmem:[#allocation2 + $0x19] sm:$0xff]  ;;  %v4748_v49 = vld [vmem:[#allocation2 + $0x21] sm:$0xff] }
 0x379   : > { %v4600_v5 = vsel %vm18821_vm9, %v4430_v51, %v3572_v4  ;;  %v17552_v30 = vld [vmem:[#allocation2 + $0x130] sm:$0xff]  ;;  %v4601_v60 = vsel %vm18820_vm7, %v4432_v35, %v3573_v52  ;;  %v4643_v7 = vsel %vm18812_vm11, %v4313_v12, %v4602_v23  ;;  %vm18815_vm6 = vcmp.eq.s32.totalorder %v17520_v63, 0  ;;  %v17608_v12 = vld [vmem:[#allocation12 + $0x4] sm:$0x3] }
 0x37a   : > { %v4641_v0 = vsel %vm18818_vm0, %v4311_v2, %v4600_v5  ;;  %v4435_v38 = vrot.slane %v17552_v30, 6  ;;  %v4642_v53 = vsel %vm18817_vm4, %v4312_v20, %v4601_v60  ;;  %4684 = vst.msk [vmem:[#allocation2 + $0x128] sm:$0xff] %vm3486_vm12, %v4643_v7  ;;  %v4314_v14 = vld [vmem:[#allocation2 + $0x132] sm:$0xff]  ;;  %vm18814_vm14 = vcmp.eq.s32.totalorder %v17570_v43, 17  ;;  %v4745_v21 = vld [vmem:[#allocation2 + $0x9] sm:$0xff] }
 0x37b   : > { %4682 = vst.msk [vmem:[#allocation2 + $0x118] sm:$0xff] %vm3486_vm12, %v4641_v0  ;;  %4683 = vst.msk [vmem:[#allocation2 + $0x120] sm:$0xff] %vm3486_vm12, %v4642_v53  ;;  %vm18813_vm11 = vcmp.eq.s32.totalorder %v17570_v43, 0  ;;  %v19001_v17 = vrot.slane %v19000_v22, 6  ;;  %v3619_v18 = vadd.s32 320, %v16143_v56  ;;  %v4746_v1 = vld [vmem:[#allocation2 + $0x11] sm:$0xff] }
 0x37c   : > { %v4436_v62 = vsel %vm665_vm1, %v4433_v44, %v4435_v38  ;;  %v17578_v34 = vld [vmem:[#allocation2 + $0x140] sm:$0xf]  ;;  %v4055_v44 = vshrl.u32 %v17546_v16, 4  ;;  %v4749_v39 = vld [vmem:[#allocation2 + $0x29] sm:$0xff]  ;;  %v14753_v16 = vld [vmem:[#allocation12] sm:$0x3]  ;;  %v4781_v35 = vpack.c.bf16 %v4747_v3, %v4746_v1 }
 0x37d   : > { %v4603_v31 = vsel %vm18816_vm10, %v4436_v62, %v17552_v30  ;;  %v4318_v37 = vrot.slane %v17578_v34, 2  ;;  %v17601_v28 = vmul.u32.u64.low 3817748708, %v3619_v18  ;;  %v17602_v52 = vmul.u32.u64.high 3817748708, %v3619_v18, %v17601_v28  ;;  %v3576_v23 = vld [vmem:[#allocation2 + $0x138] sm:$0xff]  ;;  %v4756_v1 = vld [vmem:[#allocation2 + $0x61] sm:$0xff] }
 0x37e   : > { %v4644_v36 = vsel %vm18815_vm6, %v4314_v14, %v4603_v31  ;;  %v4056_v33 = vmul.u32 18, %v4055_v44  ;;  %v5089_v2 = vsel %vm665_vm1, %v14753_v16, 0  ;;  %v4439_v60 = vrot.slane %v17578_v34, 6  ;;  %v4750_v62 = vld [vmem:[#allocation2 + $0x31] sm:$0xff]  ;;  %v4751_v14 = vld [vmem:[#allocation2 + $0x39] sm:$0xff] }
 0x37f   : > { %4685 = vst.msk [vmem:[#allocation2 + $0x130] sm:$0xff] %vm3486_vm12, %v4644_v36  ;;  %v4482_v61 = vsel %vm665_vm1, %v4318_v37, %v19001_v17  ;;  %v4066_v32 = vshrl.u32 %v17602_v52, 4  ;;  %v4437_v7 = vrot.slane %v3576_v23, 6  ;;  %vm4687_vm9 = vcmask 27648   ;;  %v4753_v37 = vld [vmem:[#allocation2 + $0x49] sm:$0xff]  ;;  %v4315_v17 = vld [vmem:[#allocation2 + $0x13a] sm:$0xff] }
 0x380   : > { %v4565_v9 = vsel %vm18814_vm14, %v4482_v61, %v19000_v22  ;;  %v4057_v57 = vsub.s32 %v17514_v55, %v4056_v33  ;;  %v4782_v55 = vpack.c.bf16 %v4749_v39, %v4748_v49  ;;  %v4316_v61 = vld [vmem:[#allocation2 + $0x142] sm:$0xf]  ;;  %v4754_v28 = vld [vmem:[#allocation2 + $0x51] sm:$0xff]  ;;  %v4755_v52 = vld [vmem:[#allocation2 + $0x59] sm:$0xff] }
 0x381   : > { %v4606_v4 = vsel %vm18813_vm11, %v17316_v10, %v4565_v9  ;;  %v4067_v10 = vmul.u32 18, %v4066_v32  ;;  %v4438_v36 = vsel %vm665_vm1, %v4435_v38, %v4437_v7  ;;  %v4440_v22 = vsel %vm665_vm1, %v4437_v7, %v4439_v60  ;;  %v4758_v32 = vld [vmem:[#allocation2 + $0x71] sm:$0xff]  ;;  %v4767_v60 = vld [vmem:[#allocation2 + $0xb9] sm:$0xff]  ;;  %v4768_v7 = vld [vmem:[#allocation2 + $0xc1] sm:$0xff] }
 0x382   : > { %4647 = vst.msk [vmem:[#allocation2] sm:$0xff] %vm3486_vm12, %v4606_v4  ;;  %vm4110_vm11 = vcmp.ne.s32.totalorder %v4057_v57, 0  ;;  %vm4151_vm14 = vcmp.lt.s32.totalorder %v4057_v57, 0  ;;  %v4233_v5 = vadd.s32 18, %v4057_v57  ;;  %v4752_v4 = vld [vmem:[#allocation2 + $0x41] sm:$0xff] }
 0x383   : > { %v4068_v20 = vsub.s32 %v3619_v18, %v4067_v10  ;;  %vm4192_vm4 = vmand %vm4151_vm14, %vm4110_vm11  ;;  %v4783_v18 = vpack.c.bf16 %v4751_v14, %v4750_v62  ;;  %v4784_v33 = vpack.c.bf16 %v4753_v37, %v4752_v4  ;;  %v4763_v10 = vld [vmem:[#allocation2 + $0x99] sm:$0xff]  ;;  %v4770_v14 = vld [vmem:[#allocation2 + $0xd1] sm:$0xff] }
 0x384   : > { %v17615_v53 = vsel %vm4192_vm4, %v4233_v5, %v4057_v57  ;;  %v4785_v57 = vpack.c.bf16 %v4755_v52, %v4754_v28  ;;  %v4764_v5 = vld [vmem:[#allocation2 + $0xa1] sm:$0xff]  ;;  %v4771_v37 = vld [vmem:[#allocation2 + $0xd9] sm:$0xff] }
 0x385   : > { %vm4111_vm6 = vcmp.ne.s32.totalorder %v4068_v20, 0  ;;  %vm4152_vm10 = vcmp.lt.s32.totalorder %v4068_v20, 0  ;;  %v4234_v0 = vadd.s32 18, %v4068_v20  ;;  %vm18823_vm5 = vcmp.eq.s32.totalorder %v17615_v53, 0  ;;  %v4779_v28 = vld [vmem:[#allocation2 + $0x119] sm:$0xff] }
 0x386   : > { %vm4193_vm0 = vmand %vm4152_vm10, %vm4111_vm6  ;;  %vm4563_vm7 = vcmp.eq.s32.totalorder %v17615_v53, 17 }
 0x387   : > { %v17617_v31 = vsel %vm4193_vm0, %v4234_v0, %v4068_v20  ;;  %v4604_v44 = vsel %vm4563_vm7, %v4438_v36, %v3576_v23  ;;  %v4766_v20 = vld [vmem:[#allocation2 + $0xb1] sm:$0xff]  ;;  %v4769_v23 = vld [vmem:[#allocation2 + $0xc9] sm:$0xff]  ;;  %vm7672_vm0 = vcmask 64512  }
 0x388   : > { %vm18822_vm11 = vcmp.eq.s32.totalorder %v17617_v31, 0  ;;  %vm18824_vm4 = vcmp.eq.s32.totalorder %v17617_v31, 17  ;;  %v4645_v30 = vsel %vm18823_vm5, %v4315_v17, %v4604_v44  ;;  %v4791_v0 = vpack.c.bf16 %v4767_v60, %v4766_v20  ;;  %v4773_v36 = vld [vmem:[#allocation2 + $0xe9] sm:$0xff]  ;;  %v4772_v17 = vld [vmem:[#allocation2 + $0xe1] sm:$0xff]  ;;  %v4774_v44 = vld [vmem:[#allocation2 + $0xf1] sm:$0xff] }
 0x389   : > { %v4744_v51 = vld [vmem:[#allocation2 + $0x1] sm:$0xff]  ;;  %v4605_v9 = vsel %vm18824_vm4, %v4440_v22, %v17578_v34  ;;  %4686 = vst.msk [vmem:[#allocation2 + $0x138] sm:$0xff] %vm3486_vm12, %v4645_v30  ;;  %v4757_v34 = vld [vmem:[#allocation2 + $0x69] sm:$0xff]  ;;  %v4792_v62 = vpack.c.bf16 %v4769_v23, %v4768_v7  ;;  %v4793_v22 = vpack.c.bf16 %v4771_v37, %v4770_v14  ;;  %v4704_v14 = vld [vmem:[#allocation2 + $0x78] sm:$0xff] }
 0x38a   : > { %v4780_v56 = vpack.c.bf16 %v4745_v21, %v4744_v51  ;;  %v4646_v38 = vsel %vm18822_vm11, %v4316_v61, %v4605_v9  ;;  %v4786_v3 = vpack.c.bf16 %v4757_v34, %v4756_v1  ;;  %v4759_v51 = vld [vmem:[#allocation2 + $0x79] sm:$0xff]  ;;  %v4761_v21 = vld [vmem:[#allocation2 + $0x89] sm:$0xff]  ;;  %v4794_v61 = vpack.c.bf16 %v4773_v36, %v4772_v17  ;;  %v4776_v30 = vld [vmem:[#allocation2 + $0x101] sm:$0xff] }
 0x38b   : > { %4688 = vst.msk [vmem:[#allocation2 + $0x140] sm:$0xf] %vm4687_vm9, %v4646_v38  ;;  %v4787_v39 = vpack.c.bf16 %v4759_v51, %v4758_v32  ;;  %v4775_v9 = vld [vmem:[#allocation2 + $0xf9] sm:$0xff]  ;;  %v4702_v23 = vld [vmem:[#allocation2 + $0x68] sm:$0xff]  ;;  %vm8260_vm9 = vcmask 1043456  }
 0x38c   : > { %12951 = vmatprep.mubr.msk.bf16.mxu1 %vm3486_vm12, %v4780_v56  ;;  %v4760_v56 = vld [vmem:[#allocation2 + $0x81] sm:$0xff]  ;;  %v4795_v4 = vpack.c.bf16 %v4775_v9, %v4774_v44  ;;  %v4692_v32 = vld [vmem:[#allocation2 + $0x18] sm:$0xff] }
 0x38d   : > { %12952 = vmatmul.mubr.msk.bf16.vlgmr.msra.gmra.mrb[36].mxu1 %vm3486_vm12, %v4781_v35  ;;  %v4788_v16 = vpack.c.bf16 %v4761_v21, %v4760_v56  ;;  %v4765_v35 = vld [vmem:[#allocation2 + $0xa9] sm:$0xff]  ;;  %v4689_v52 = vld [vmem:[#allocation2] sm:$0xff]  ;;  %v5379_v56 = vsel %vm665_vm1, %v17608_v12, 0  ;;  %v4708_v44 = vld [vmem:[#allocation2 + $0x98] sm:$0xff] }
 0x38e   : > { %12955 = vmatprep.mubr.msk.bf16.mxu1 %vm3486_vm12, %v4782_v55  ;;  %12988 = vmatpush3.bf16.msra.mxu1 %v5089_v2  ;;  %v4762_v2 = vld [vmem:[#allocation2 + $0x91] sm:$0xff]  ;;  %v4790_v55 = vpack.c.bf16 %v4765_v35, %v4764_v5  ;;  %v4693_v51 = vld [vmem:[#allocation2 + $0x20] sm:$0xff]  ;;  %v4694_v21 = vld [vmem:[#allocation2 + $0x28] sm:$0xff] }
 0x38f   : > { %14501 = vmatprep.subr.msk.bf16.mxu1 %vm665_vm1, %v17608_v12  ;;  %v4789_v49 = vpack.c.bf16 %v4763_v10, %v4762_v2  ;;  %v17656_v2 = vld [vmem:[#allocation12 + $0x6] sm:$0x3]  ;;  %v4697_v35 = vld [vmem:[#allocation2 + $0x40] sm:$0xff]  ;;  %v4695_v5 = vld [vmem:[#allocation2 + $0x30] sm:$0xff] }
 0x390   : > { %v4696_v10 = vld [vmem:[#allocation2 + $0x38] sm:$0xff]  ;;  %v4701_v60 = vld [vmem:[#allocation2 + $0x60] sm:$0xff]  ;;  %v4706_v36 = vld [vmem:[#allocation2 + $0x88] sm:$0xff] }
 0x391   : > { %v4700_v12 = vld [vmem:[#allocation2 + $0x58] sm:$0xff]  ;;  %v4705_v37 = vld [vmem:[#allocation2 + $0x80] sm:$0xff] }
 0x392   : > { %v4709_v9 = vld [vmem:[#allocation2 + $0xa0] sm:$0xff] }
 0x395   : > { %12956 = vmatmul.mubr.msk.bf16.gmra.mrb[40].mxu1 %vm3486_vm12, %v4783_v18  ;;  %v4777_v18 = vld [vmem:[#allocation2 + $0x109] sm:$0xff] }
 0x396   : > { %12959 = vmatprep.mubr.msk.bf16.mxu1 %vm3486_vm12, %v4784_v33  ;;  %v4796_v38 = vpack.c.bf16 %v4777_v18, %v4776_v30  ;;  %v4778_v33 = vld [vmem:[#allocation2 + $0x111] sm:$0xff]  ;;  %v4710_v18 = vld [vmem:[#allocation2 + $0xa8] sm:$0xff] }
 0x397   : > { %v4797_v34 = vpack.c.bf16 %v4779_v28, %v4778_v33  ;;  %v4712_v33 = vld [vmem:[#allocation2 + $0xb8] sm:$0xff]  ;;  %v4713_v28 = vld [vmem:[#allocation2 + $0xc0] sm:$0xff] }
 0x39d   : > { %12960 = vmatmul.mubr.msk.bf16.gmra.mrb[44].mxu1 %vm3486_vm12, %v4785_v57  ;;  %v4690_v57 = vld [vmem:[#allocation2 + $0x8] sm:$0xff] }
 0x39e   : > { %12963 = vmatprep.mubr.msk.bf16.mxu1 %vm3486_vm12, %v4786_v3  ;;  %v4725_v1 = vpack.c.bf16 %v4690_v57, %v4689_v52  ;;  %v4691_v3 = vld [vmem:[#allocation2 + $0x10] sm:$0xff]  ;;  %v4714_v52 = vld [vmem:[#allocation2 + $0xc8] sm:$0xff] }
 0x3a5   : > { %12964 = vmatmul.mubr.msk.bf16.gmra.mrb[48].mxu1 %vm3486_vm12, %v4787_v39  ;;  %v4726_v39 = vpack.c.bf16 %v4692_v32, %v4691_v3  ;;  %v4716_v3 = vld [vmem:[#allocation2 + $0xd8] sm:$0xff]  ;;  %v4717_v32 = vld [vmem:[#allocation2 + $0xe0] sm:$0xff] }
 0x3a6   : > { %12967 = vmatprep.mubr.msk.bf16.mxu1 %vm3486_vm12, %v4788_v16  ;;  %v4727_v16 = vpack.c.bf16 %v4694_v21, %v4693_v51  ;;  %v4718_v51 = vld [vmem:[#allocation2 + $0xe8] sm:$0xff]  ;;  %v4715_v21 = vld [vmem:[#allocation2 + $0xd0] sm:$0xff] }
 0x3ad   : > { %12968 = vmatmul.mubr.msk.bf16.gmra.mrb[52].mxu1 %vm3486_vm12, %v4789_v49  ;;  %v4698_v49 = vld [vmem:[#allocation2 + $0x48] sm:$0xff] }
 0x3ae   : > { %12971 = vmatprep.mubr.msk.bf16.mxu1 %vm3486_vm12, %v4790_v55  ;;  %v4728_v55 = vpack.c.bf16 %v4696_v10, %v4695_v5  ;;  %v4729_v20 = vpack.c.bf16 %v4698_v49, %v4697_v35  ;;  %v4721_v10 = vld [vmem:[#allocation2 + $0x100] sm:$0xff]  ;;  %v4722_v35 = vld [vmem:[#allocation2 + $0x108] sm:$0xff]  ;;  %v4719_v49 = vld [vmem:[#allocation2 + $0xf0] sm:$0xff] }
 0x3b5   : > { %12972 = vmatmul.mubr.msk.bf16.gmra.mrb[56].mxu1 %vm3486_vm12, %v4791_v0  ;;  %v4699_v0 = vld [vmem:[#allocation2 + $0x50] sm:$0xff] }
 0x3b6   : > { %12975 = vmatprep.mubr.msk.bf16.mxu1 %vm3486_vm12, %v4792_v62  ;;  %v4730_v7 = vpack.c.bf16 %v4700_v12, %v4699_v0  ;;  %v4731_v62 = vpack.c.bf16 %v4702_v23, %v4701_v60  ;;  %v5268_v12 = vld [vmem:[#allocation2 + $0x2] sm:$0xff]  ;;  %v4723_v60 = vld [vmem:[#allocation2 + $0x110] sm:$0xff] }
 0x3b7   : > { %v5269_v0 = vld [vmem:[#allocation2 + $0xa] sm:$0xff] }
 0x3bd   : > { %12976 = vmatmul.mubr.msk.bf16.gmra.mrb[60].mxu1 %vm3486_vm12, %v4793_v22  ;;  %v4703_v22 = vld [vmem:[#allocation2 + $0x70] sm:$0xff] }
 0x3be   : > { %12979 = vmatprep.mubr.msk.bf16.mxu1 %vm3486_vm12, %v4794_v61  ;;  %v4732_v17 = vpack.c.bf16 %v4704_v14, %v4703_v22  ;;  %v4733_v61 = vpack.c.bf16 %v4706_v36, %v4705_v37  ;;  %v5271_v14 = vld [vmem:[#allocation2 + $0x1a] sm:$0xff]  ;;  %v5273_v37 = vld [vmem:[#allocation2 + $0x2a] sm:$0xff]  ;;  %v5272_v22 = vld [vmem:[#allocation2 + $0x22] sm:$0xff] }
 0x3c5   : > { %12980 = vmatmul.mubr.msk.bf16.gmra.mrb[64].mxu1 %vm3486_vm12, %v4795_v4  ;;  %v4707_v4 = vld [vmem:[#allocation2 + $0x90] sm:$0xff] }
 0x3c6   : > { %12983 = vmatprep.mubr.msk.bf16.mxu1 %vm3486_vm12, %v4796_v38  ;;  %v4734_v30 = vpack.c.bf16 %v4708_v44, %v4707_v4  ;;  %v4735_v38 = vpack.c.bf16 %v4710_v18, %v4709_v9  ;;  %v17684_v44 = vld [vmem:[#allocation12 + $0x8] sm:$0x3]  ;;  %v5274_v9 = vld [vmem:[#allocation2 + $0x32] sm:$0xff]  ;;  %v5277_v4 = vld [vmem:[#allocation2 + $0x4a] sm:$0xff] }
 0x3c7   : > { %v5275_v18 = vld [vmem:[#allocation2 + $0x3a] sm:$0xff] }
 0x3cd   : > { %12984 = vmatmul.mubr.msk.bf16.gmra.mrb[68].mxu1 %vm3486_vm12, %v4797_v34  ;;  %v4711_v34 = vld [vmem:[#allocation2 + $0xb0] sm:$0xff] }
 0x3ce   : > { %12989 = vmatprep.mubr.msk.bf16.mxu1 %vm3486_vm12, %v4725_v1  ;;  %v4736_v57 = vpack.c.bf16 %v4712_v33, %v4711_v34  ;;  %v4737_v1 = vpack.c.bf16 %v4714_v52, %v4713_v28  ;;  %v5278_v33 = vld [vmem:[#allocation2 + $0x52] sm:$0xff]  ;;  %v5279_v28 = vld [vmem:[#allocation2 + $0x5a] sm:$0xff]  ;;  %v5281_v52 = vld [vmem:[#allocation2 + $0x6a] sm:$0xff] }
 0x3cf   : > { %v5309_v34 = vpack.c.bf16 %v5279_v28, %v5278_v33  ;;  %v5300_v28 = vld [vmem:[#allocation2 + $0x102] sm:$0xff] }
 0x3d5   : > { %12990 = vmatmul.mubr.msk.bf16.vlgmr.msra.gmra.mrb[36].mxu1 %vm3486_vm12, %v4726_v39  ;;  %v4738_v39 = vpack.c.bf16 %v4716_v3, %v4715_v21  ;;  %v5282_v3 = vld [vmem:[#allocation2 + $0x72] sm:$0xff] }
 0x3d6   : > { %12993 = vmatprep.mubr.msk.bf16.mxu1 %vm3486_vm12, %v4727_v16  ;;  %13026 = vmatpush3.bf16.msra.mxu1 %v5379_v56  ;;  %v4739_v56 = vpack.c.bf16 %v4718_v51, %v4717_v32  ;;  %v4720_v16 = vld [vmem:[#allocation2 + $0xf8] sm:$0xff]  ;;  %v5285_v51 = vld [vmem:[#allocation2 + $0x8a] sm:$0xff] }
 0x3d7   : > { %14502 = vmatprep.subr.msk.bf16.mxu1 %vm665_vm1, %v17656_v2  ;;  %v4740_v5 = vpack.c.bf16 %v4720_v16, %v4719_v49  ;;  %v5283_v32 = vld [vmem:[#allocation2 + $0x7a] sm:$0xff]  ;;  %v5286_v16 = vld [vmem:[#allocation2 + $0x92] sm:$0xff] }
 0x3d8   : > { %v5311_v21 = vpack.c.bf16 %v5283_v32, %v5282_v3  ;;  %v5303_v3 = vld [vmem:[#allocation2 + $0x11a] sm:$0xff] }
 0x3dd   : > { %12994 = vmatmul.mubr.msk.bf16.gmra.mrb[40].mxu1 %vm3486_vm12, %v4728_v55  ;;  %v4741_v55 = vpack.c.bf16 %v4722_v35, %v4721_v10  ;;  %v5287_v10 = vld [vmem:[#allocation2 + $0x9a] sm:$0xff]  ;;  %v5289_v35 = vld [vmem:[#allocation2 + $0xaa] sm:$0xff] }
 0x3de   : > { %12997 = vmatprep.mubr.msk.bf16.mxu1 %vm3486_vm12, %v4729_v20  ;;  %v4724_v20 = vld [vmem:[#allocation2 + $0x118] sm:$0xff]  ;;  %v5313_v49 = vpack.c.bf16 %v5287_v10, %v5286_v16  ;;  %v5922_v16 = vld [vmem:[#allocation2 + $0x23] sm:$0xff] }
 0x3df   : > { %v4742_v23 = vpack.c.bf16 %v4724_v20, %v4723_v60  ;;  %v5290_v20 = vld [vmem:[#allocation2 + $0xb2] sm:$0xff]  ;;  %v5293_v60 = vld [vmem:[#allocation2 + $0xca] sm:$0xff] }
 0x3e5   : > { %12998 = vmatmul.mubr.msk.bf16.gmra.mrb[44].mxu1 %vm3486_vm12, %v4730_v7  ;;  %v5304_v7 = vpack.c.bf16 %v5269_v0, %v5268_v12  ;;  %v5291_v12 = vld [vmem:[#allocation2 + $0xba] sm:$0xff]  ;;  %v5292_v0 = vld [vmem:[#allocation2 + $0xc2] sm:$0xff] }
 0x3e6   : > { %13001 = vmatprep.mubr.msk.bf16.mxu1 %vm3486_vm12, %v4731_v62  ;;  %v5270_v62 = vld [vmem:[#allocation2 + $0x12] sm:$0xff] }
 0x3e7   : > { %v17678_v36 = vpack.c.bf16 %v5271_v14, %v5270_v62  ;;  %v5294_v62 = vld [vmem:[#allocation2 + $0xd2] sm:$0xff]  ;;  %v5295_v14 = vld [vmem:[#allocation2 + $0xda] sm:$0xff] }
 0x3ed   : > { %13002 = vmatmul.mubr.msk.bf16.gmra.mrb[48].mxu1 %vm3486_vm12, %v4732_v17  ;;  %v5705_v17 = vsel %vm665_vm1, %v17656_v2, 0 }
 0x3ee   : > { %13005 = vmatprep.mubr.msk.bf16.mxu1 %vm3486_vm12, %v4733_v61  ;;  %v17682_v61 = vpack.c.bf16 %v5273_v37, %v5272_v22  ;;  %v5297_v37 = vld [vmem:[#allocation2 + $0xea] sm:$0xff]  ;;  %v5317_v22 = vpack.c.bf16 %v5295_v14, %v5294_v62  ;;  %v5932_v62 = vld [vmem:[#allocation2 + $0x73] sm:$0xff]  ;;  %v5933_v14 = vld [vmem:[#allocation2 + $0x7b] sm:$0xff] }
 0x3f5   : > { %13006 = vmatmul.mubr.msk.bf16.gmra.mrb[52].mxu1 %vm3486_vm12, %v4734_v30  ;;  %v5307_v30 = vpack.c.bf16 %v5275_v18, %v5274_v9  ;;  %v5298_v18 = vld [vmem:[#allocation2 + $0xf2] sm:$0xff] }
 0x3f6   : > { %13009 = vmatprep.mubr.msk.bf16.mxu1 %vm3486_vm12, %v4735_v38  ;;  %v5276_v38 = vld [vmem:[#allocation2 + $0x42] sm:$0xff] }
 0x3f7   : > { %v5308_v2 = vpack.c.bf16 %v5277_v4, %v5276_v38  ;;  %v5299_v4 = vld [vmem:[#allocation2 + $0xfa] sm:$0xff]  ;;  %v5301_v38 = vld [vmem:[#allocation2 + $0x10a] sm:$0xff] }
 0x3f8   : > { %v5319_v33 = vpack.c.bf16 %v5299_v4, %v5298_v18  ;;  %v5936_v18 = vld [vmem:[#allocation2 + $0x93] sm:$0xff]  ;;  %v5937_v4 = vld [vmem:[#allocation2 + $0x9b] sm:$0xff] }
 0x3fd   : > { %13010 = vmatmul.mubr.msk.bf16.gmra.mrb[56].mxu1 %vm3486_vm12, %v4736_v57  ;;  %v5280_v57 = vld [vmem:[#allocation2 + $0x62] sm:$0xff] }
 0x3fe   : > { %13013 = vmatprep.mubr.msk.bf16.mxu1 %vm3486_vm12, %v4737_v1  ;;  %v5310_v1 = vpack.c.bf16 %v5281_v52, %v5280_v57  ;;  %v5320_v52 = vpack.c.bf16 %v5301_v38, %v5300_v28  ;;  %v5302_v57 = vld [vmem:[#allocation2 + $0x112] sm:$0xff]  ;;  %v5934_v38 = vld [vmem:[#allocation2 + $0x83] sm:$0xff]  ;;  %v5964_v28 = vpack.c.bf16 %v5937_v4, %v5936_v18 }
 0x3ff   : > { %v5321_v32 = vpack.c.bf16 %v5303_v3, %v5302_v57  ;;  %v5940_v57 = vld [vmem:[#allocation2 + $0xb3] sm:$0xff]  ;;  %v5941_v3 = vld [vmem:[#allocation2 + $0xbb] sm:$0xff]  ;;  %v6248_v4 = vld [vmem:[#allocation2 + $0x24] sm:$0xff] }
 0x400   : > { %v6251_v18 = vld [vmem:[#allocation2 + $0x3c] sm:$0xff] }
 0x405   : > { %13014 = vmatmul.mubr.msk.bf16.gmra.mrb[60].mxu1 %vm3486_vm12, %v4738_v39  ;;  %v5284_v39 = vld [vmem:[#allocation2 + $0x82] sm:$0xff] }
 0x406   : > { %13017 = vmatprep.mubr.msk.bf16.mxu1 %vm3486_vm12, %v4739_v56  ;;  %v5312_v56 = vpack.c.bf16 %v5285_v51, %v5284_v39  ;;  %v6031_v51 = vsel %vm665_vm1, %v17684_v44, 0  ;;  %v6301_v39 = vld [vmem:[#allocation12 + $0xa] sm:$0x3] }
 0x40d   : > { %13018 = vmatmul.mubr.msk.bf16.gmra.mrb[64].mxu1 %vm3486_vm12, %v4740_v5  ;;  %v5288_v5 = vld [vmem:[#allocation2 + $0xa2] sm:$0xff] }
 0x40e   : > { %13021 = vmatprep.mubr.msk.bf16.mxu1 %vm3486_vm12, %v4741_v55  ;;  %v5314_v55 = vpack.c.bf16 %v5289_v35, %v5288_v5  ;;  %v6357_v35 = vsel %vm665_vm1, %v6301_v39, 0  ;;  %v17732_v5 = vld [vmem:[#allocation12 + $0xc] sm:$0x3] }
 0x415   : > { %13022 = vmatmul.mubr.msk.bf16.gmra.mrb[68].mxu1 %vm3486_vm12, %v4742_v23  ;;  %v5315_v23 = vpack.c.bf16 %v5291_v12, %v5290_v20  ;;  %v5928_v20 = vld [vmem:[#allocation2 + $0x53] sm:$0xff]  ;;  %v5929_v12 = vld [vmem:[#allocation2 + $0x5b] sm:$0xff] }
 0x416   : > { %13027 = vmatprep.mubr.msk.bf16.mxu1 %vm3486_vm12, %v5304_v7  ;;  %v5316_v7 = vpack.c.bf16 %v5293_v60, %v5292_v0  ;;  %v5926_v60 = vld [vmem:[#allocation2 + $0x43] sm:$0xff]  ;;  %v5960_v0 = vpack.c.bf16 %v5929_v12, %v5928_v20  ;;  %v5953_v20 = vld [vmem:[#allocation2 + $0x11b] sm:$0xff] }
 0x417   : > { %v5950_v12 = vld [vmem:[#allocation2 + $0x103] sm:$0xff] }
 0x41d   : > { %13028 = vmatmul.mubr.msk.bf16.vlgmr.msra.gmra.mrb[36].mxu1 %vm3486_vm12, %v17678_v36 }
 0x41e   : > { %13031 = vmatprep.mubr.msk.bf16.mxu1 %vm3486_vm12, %v17682_v61  ;;  %13064 = vmatpush3.bf16.msra.mxu1 %v5705_v17  ;;  %v5296_v17 = vld [vmem:[#allocation2 + $0xe2] sm:$0xff] }
 0x41f   : > { %14503 = vmatprep.subr.msk.bf16.mxu1 %vm665_vm1, %v17684_v44  ;;  %v5318_v9 = vpack.c.bf16 %v5297_v37, %v5296_v17  ;;  %v5921_v44 = vld [vmem:[#allocation2 + $0x1b] sm:$0xff]  ;;  %v5930_v37 = vld [vmem:[#allocation2 + $0x63] sm:$0xff]  ;;  %v5962_v17 = vpack.c.bf16 %v5933_v14, %v5932_v62 }
 0x420   : > { %v6247_v62 = vld [vmem:[#allocation2 + $0x1c] sm:$0xff] }
 0x421   : > { %v5954_v14 = vld [vmem:[#allocation2 + $0x123] sm:$0xff] }
 0x425   : > { %13032 = vmatmul.mubr.msk.bf16.gmra.mrb[40].mxu1 %vm3486_vm12, %v5307_v30 }
 0x426   : > { %13035 = vmatprep.mubr.msk.bf16.mxu1 %vm3486_vm12, %v5308_v2 }
 0x42d   : > { %13036 = vmatmul.mubr.msk.bf16.gmra.mrb[44].mxu1 %vm3486_vm12, %v5309_v34 }
 0x42e   : > { %13039 = vmatprep.mubr.msk.bf16.mxu1 %vm3486_vm12, %v5310_v1 }
 0x435   : > { %13040 = vmatmul.mubr.msk.bf16.gmra.mrb[48].mxu1 %vm3486_vm12, %v5311_v21 }
 0x436   : > { %13043 = vmatprep.mubr.msk.bf16.mxu1 %vm3486_vm12, %v5312_v56 }
 0x43d   : > { %13044 = vmatmul.mubr.msk.bf16.gmra.mrb[52].mxu1 %vm3486_vm12, %v5313_v49 }
 0x43e   : > { %13047 = vmatprep.mubr.msk.bf16.mxu1 %vm3486_vm12, %v5314_v55 }
 0x445   : > { %13048 = vmatmul.mubr.msk.bf16.gmra.mrb[56].mxu1 %vm3486_vm12, %v5315_v23 }
 0x446   : > { %13051 = vmatprep.mubr.msk.bf16.mxu1 %vm3486_vm12, %v5316_v7 }
 0x44d   : > { %13052 = vmatmul.mubr.msk.bf16.gmra.mrb[60].mxu1 %vm3486_vm12, %v5317_v22 }
 0x44e   : > { %13055 = vmatprep.mubr.msk.bf16.mxu1 %vm3486_vm12, %v5318_v9 }
 0x455   : > { %13056 = vmatmul.mubr.msk.bf16.gmra.mrb[64].mxu1 %vm3486_vm12, %v5319_v33 }
 0x456   : > { %13059 = vmatprep.mubr.msk.bf16.mxu1 %vm3486_vm12, %v5320_v52 }
 0x45d   : > { %13060 = vmatmul.mubr.msk.bf16.gmra.mrb[68].mxu1 %vm3486_vm12, %v5321_v32 }
 0x45e   : > { %13065 = vmatprep.mubr.msk.bf16.mxu1 %vm3486_vm12, %v17678_v36  ;;  %v5629_v36 = vld [vmem:[#allocation2 + $0x12a] sm:$0xff] }
 0x465   : > { %13066 = vmatmul.mubr.msk.bf16.vlgmr.msra.gmra.mrb[36].mxu1 %vm3486_vm12, %v17682_v61  ;;  %v5920_v61 = vld [vmem:[#allocation2 + $0x13] sm:$0xff] }
 0x466   : > { %13069 = vmatprep.mubr.msk.bf16.mxu1 %vm3486_vm12, %v5307_v30  ;;  %13102 = vmatpush3.bf16.msra.mxu1 %v6031_v51  ;;  %v5628_v30 = vld [vmem:[#allocation2 + $0x122] sm:$0xff] }
 0x467   : > { %14504 = vmatprep.subr.msk.bf16.mxu1 %vm665_vm1, %v6301_v39  ;;  %v5966_v39 = vpack.c.bf16 %v5941_v3, %v5940_v57  ;;  %v6253_v57 = vld [vmem:[#allocation2 + $0x4c] sm:$0xff]  ;;  %v6254_v3 = vld [vmem:[#allocation2 + $0x54] sm:$0xff] }
 0x46d   : > { %13070 = vmatmul.mubr.msk.bf16.gmra.mrb[40].mxu1 %vm3486_vm12, %v5308_v2  ;;  %v5647_v2 = vpack.c.bf16 %v5629_v36, %v5628_v30  ;;  %v5943_v36 = vld [vmem:[#allocation2 + $0xcb] sm:$0xff]  ;;  %v5942_v30 = vld [vmem:[#allocation2 + $0xc3] sm:$0xff] }
 0x46e   : > { %13073 = vmatprep.mubr.msk.bf16.mxu1 %vm3486_vm12, %v5309_v34  ;;  %v5956_v34 = vpack.c.bf16 %v5921_v44, %v5920_v61  ;;  %v5944_v61 = vld [vmem:[#allocation2 + $0xd3] sm:$0xff]  ;;  %v5945_v44 = vld [vmem:[#allocation2 + $0xdb] sm:$0xff] }
 0x475   : > { %13074 = vmatmul.mubr.msk.bf16.gmra.mrb[44].mxu1 %vm3486_vm12, %v5310_v1  ;;  %v5923_v1 = vld [vmem:[#allocation2 + $0x2b] sm:$0xff] }
 0x476   : > { %13077 = vmatprep.mubr.msk.bf16.mxu1 %vm3486_vm12, %v5311_v21  ;;  %v5924_v21 = vld [vmem:[#allocation2 + $0x33] sm:$0xff]  ;;  %v5957_v10 = vpack.c.bf16 %v5923_v1, %v5922_v16  ;;  %v5947_v1 = vld [vmem:[#allocation2 + $0xeb] sm:$0xff]  ;;  %v5946_v16 = vld [vmem:[#allocation2 + $0xe3] sm:$0xff] }
 0x47d   : > { %13078 = vmatmul.mubr.msk.bf16.gmra.mrb[48].mxu1 %vm3486_vm12, %v5312_v56  ;;  %v5925_v56 = vld [vmem:[#allocation2 + $0x3b] sm:$0xff] }
 0x47e   : > { %13081 = vmatprep.mubr.msk.bf16.mxu1 %vm3486_vm12, %v5313_v49  ;;  %v5958_v49 = vpack.c.bf16 %v5925_v56, %v5924_v21  ;;  %v5948_v21 = vld [vmem:[#allocation2 + $0xf3] sm:$0xff]  ;;  %v5949_v56 = vld [vmem:[#allocation2 + $0xfb] sm:$0xff] }
 0x485   : > { %13082 = vmatmul.mubr.msk.bf16.gmra.mrb[52].mxu1 %vm3486_vm12, %v5314_v55  ;;  %v5927_v55 = vld [vmem:[#allocation2 + $0x4b] sm:$0xff] }
 0x486   : > { %13085 = vmatprep.mubr.msk.bf16.mxu1 %vm3486_vm12, %v5315_v23  ;;  %v5959_v23 = vpack.c.bf16 %v5927_v55, %v5926_v60  ;;  %v5952_v55 = vld [vmem:[#allocation2 + $0x113] sm:$0xff] }
 0x48d   : > { %13086 = vmatmul.mubr.msk.bf16.gmra.mrb[56].mxu1 %vm3486_vm12, %v5316_v7  ;;  %v5931_v7 = vld [vmem:[#allocation2 + $0x6b] sm:$0xff] }
 0x48e   : > { %13089 = vmatprep.mubr.msk.bf16.mxu1 %vm3486_vm12, %v5317_v22  ;;  %v5961_v22 = vpack.c.bf16 %v5931_v7, %v5930_v37  ;;  %v6246_v7 = vld [vmem:[#allocation2 + $0x14] sm:$0xff] }
 0x495   : > { %13090 = vmatmul.mubr.msk.bf16.gmra.mrb[60].mxu1 %vm3486_vm12, %v5318_v9  ;;  %v5935_v9 = vld [vmem:[#allocation2 + $0x8b] sm:$0xff] }
 0x496   : > { %13093 = vmatprep.mubr.msk.bf16.mxu1 %vm3486_vm12, %v5319_v33  ;;  %v5963_v33 = vpack.c.bf16 %v5935_v9, %v5934_v38  ;;  %v6250_v9 = vld [vmem:[#allocation2 + $0x34] sm:$0xff] }
 0x49d   : > { %13094 = vmatmul.mubr.msk.bf16.gmra.mrb[64].mxu1 %vm3486_vm12, %v5320_v52  ;;  %v5939_v52 = vld [vmem:[#allocation2 + $0xab] sm:$0xff] }
 0x49e   : > { %13097 = vmatprep.mubr.msk.bf16.mxu1 %vm3486_vm12, %v5321_v32  ;;  %v5938_v32 = vld [vmem:[#allocation2 + $0xa3] sm:$0xff] }
 0x49f   : > { %v5965_v51 = vpack.c.bf16 %v5939_v52, %v5938_v32  ;;  %v17760_v52 = vld [vmem:[#allocation12 + $0xe] sm:$0x3]  ;;  %v6255_v32 = vld [vmem:[#allocation2 + $0x5c] sm:$0xff] }
 0x4a5   : > { %13098 = vmatmul.mubr.msk.bf16.gmra.mrb[68].mxu1 %vm3486_vm12, %v5647_v2  ;;  %v5967_v2 = vpack.c.bf16 %v5943_v36, %v5942_v30  ;;  %v6257_v36 = vld [vmem:[#allocation2 + $0x6c] sm:$0xff]  ;;  %v6256_v30 = vld [vmem:[#allocation2 + $0x64] sm:$0xff] }
 0x4a6   : > { %13103 = vmatprep.mubr.msk.bf16.mxu1 %vm3486_vm12, %v5956_v34  ;;  %v5968_v34 = vpack.c.bf16 %v5945_v44, %v5944_v61  ;;  %v6258_v61 = vld [vmem:[#allocation2 + $0x74] sm:$0xff]  ;;  %v6259_v44 = vld [vmem:[#allocation2 + $0x7c] sm:$0xff] }
 0x4ad   : > { %13104 = vmatmul.mubr.msk.bf16.vlgmr.msra.gmra.mrb[36].mxu1 %vm3486_vm12, %v5957_v10  ;;  %v5969_v10 = vpack.c.bf16 %v5947_v1, %v5946_v16  ;;  %v6261_v1 = vld [vmem:[#allocation2 + $0x8c] sm:$0xff]  ;;  %v6260_v16 = vld [vmem:[#allocation2 + $0x84] sm:$0xff] }
 0x4ae   : > { %13107 = vmatprep.mubr.msk.bf16.mxu1 %vm3486_vm12, %v5958_v49  ;;  %13140 = vmatpush3.bf16.msra.mxu1 %v6357_v35  ;;  %v5970_v35 = vpack.c.bf16 %v5949_v56, %v5948_v21  ;;  %v5951_v49 = vld [vmem:[#allocation2 + $0x10b] sm:$0xff]  ;;  %v6262_v21 = vld [vmem:[#allocation2 + $0x94] sm:$0xff]  ;;  %v6263_v56 = vld [vmem:[#allocation2 + $0x9c] sm:$0xff] }
 0x4af   : > { %14505 = vmatprep.subr.msk.bf16.mxu1 %vm665_vm1, %v17732_v5  ;;  %v5971_v60 = vpack.c.bf16 %v5951_v49, %v5950_v12  ;;  %v6265_v49 = vld [vmem:[#allocation2 + $0xac] sm:$0xff]  ;;  %v6264_v12 = vld [vmem:[#allocation2 + $0xa4] sm:$0xff] }
 0x4b5   : > { %13108 = vmatmul.mubr.msk.bf16.gmra.mrb[40].mxu1 %vm3486_vm12, %v5959_v23  ;;  %v5972_v23 = vpack.c.bf16 %v5953_v20, %v5952_v55  ;;  %v6266_v55 = vld [vmem:[#allocation2 + $0xb4] sm:$0xff]  ;;  %v6267_v20 = vld [vmem:[#allocation2 + $0xbc] sm:$0xff] }
 0x4b6   : > { %13111 = vmatprep.mubr.msk.bf16.mxu1 %vm3486_vm12, %v5960_v0  ;;  %v5955_v0 = vld [vmem:[#allocation2 + $0x12b] sm:$0xff] }
 0x4b7   : > { %v5973_v37 = vpack.c.bf16 %v5955_v0, %v5954_v14  ;;  %v6269_v0 = vld [vmem:[#allocation2 + $0xcc] sm:$0xff]  ;;  %v6268_v14 = vld [vmem:[#allocation2 + $0xc4] sm:$0xff] }
 0x4bd   : > { %13112 = vmatmul.mubr.msk.bf16.gmra.mrb[44].mxu1 %vm3486_vm12, %v5961_v22  ;;  %v6282_v22 = vpack.c.bf16 %v6247_v62, %v6246_v7  ;;  %v6270_v7 = vld [vmem:[#allocation2 + $0xd4] sm:$0xff]  ;;  %v6271_v62 = vld [vmem:[#allocation2 + $0xdc] sm:$0xff] }
 0x4be   : > { %13115 = vmatprep.mubr.msk.bf16.mxu1 %vm3486_vm12, %v5962_v17  ;;  %v6249_v17 = vld [vmem:[#allocation2 + $0x2c] sm:$0xff] }
 0x4bf   : > { %v17754_v38 = vpack.c.bf16 %v6249_v17, %v6248_v4  ;;  %v6273_v17 = vld [vmem:[#allocation2 + $0xec] sm:$0xff]  ;;  %v6272_v4 = vld [vmem:[#allocation2 + $0xe4] sm:$0xff] }
 0x4c5   : > { %13116 = vmatmul.mubr.msk.bf16.gmra.mrb[48].mxu1 %vm3486_vm12, %v5963_v33  ;;  %v6683_v33 = vsel %vm665_vm1, %v17732_v5, 0  ;;  %v6286_v5 = vpack.c.bf16 %v6255_v32, %v6254_v3  ;;  %v6277_v3 = vld [vmem:[#allocation2 + $0x10c] sm:$0xff]  ;;  %v6278_v32 = vld [vmem:[#allocation2 + $0x114] sm:$0xff] }
 0x4c6   : > { %13119 = vmatprep.mubr.msk.bf16.mxu1 %vm3486_vm12, %v5964_v28  ;;  %v17758_v28 = vpack.c.bf16 %v6251_v18, %v6250_v9  ;;  %v6274_v9 = vld [vmem:[#allocation2 + $0xf4] sm:$0xff]  ;;  %v6275_v18 = vld [vmem:[#allocation2 + $0xfc] sm:$0xff] }
 0x4cd   : > { %13120 = vmatmul.mubr.msk.bf16.gmra.mrb[52].mxu1 %vm3486_vm12, %v5965_v51  ;;  %v6252_v51 = vld [vmem:[#allocation2 + $0x44] sm:$0xff] }
 0x4ce   : > { %13123 = vmatprep.mubr.msk.bf16.mxu1 %vm3486_vm12, %v5966_v39  ;;  %v6285_v39 = vpack.c.bf16 %v6253_v57, %v6252_v51  ;;  %v6296_v57 = vpack.c.bf16 %v6275_v18, %v6274_v9  ;;  %v6279_v51 = vld [vmem:[#allocation2 + $0x11c] sm:$0xff]  ;;  %v6910_v18 = vld [vmem:[#allocation2 + $0x85] sm:$0xff] }
 0x4d5   : > { %13124 = vmatmul.mubr.msk.bf16.gmra.mrb[56].mxu1 %vm3486_vm12, %v5967_v2  ;;  %v6287_v2 = vpack.c.bf16 %v6257_v36, %v6256_v30  ;;  %v6276_v36 = vld [vmem:[#allocation2 + $0x104] sm:$0xff]  ;;  %v6281_v30 = vld [vmem:[#allocation2 + $0x12c] sm:$0xff] }
 0x4d6   : > { %13127 = vmatprep.mubr.msk.bf16.mxu1 %vm3486_vm12, %v5968_v34  ;;  %v6288_v34 = vpack.c.bf16 %v6259_v44, %v6258_v61  ;;  %v6297_v61 = vpack.c.bf16 %v6277_v3, %v6276_v36  ;;  %v6298_v44 = vpack.c.bf16 %v6279_v51, %v6278_v32  ;;  %v6915_v3 = vld [vmem:[#allocation2 + $0xad] sm:$0xff]  ;;  %v6914_v51 = vld [vmem:[#allocation2 + $0xa5] sm:$0xff] }
 0x4d7   : > { %v6942_v36 = vpack.c.bf16 %v6915_v3, %v6914_v51  ;;  %v7228_v3 = vld [vmem:[#allocation2 + $0x46] sm:$0xff]  ;;  %v7230_v51 = vld [vmem:[#allocation2 + $0x56] sm:$0xff] }
 0x4dd   : > { %13128 = vmatmul.mubr.msk.bf16.gmra.mrb[60].mxu1 %vm3486_vm12, %v5969_v10  ;;  %v6289_v10 = vpack.c.bf16 %v6261_v1, %v6260_v16  ;;  %v6280_v1 = vld [vmem:[#allocation2 + $0x124] sm:$0xff] }
 0x4de   : > { %13131 = vmatprep.mubr.msk.bf16.mxu1 %vm3486_vm12, %v5970_v35  ;;  %v6290_v35 = vpack.c.bf16 %v6263_v56, %v6262_v21  ;;  %v6299_v21 = vpack.c.bf16 %v6281_v30, %v6280_v1  ;;  %v7009_v56 = vsel %vm665_vm1, %v17760_v52, 0  ;;  %v7279_v16 = vld [vmem:[#allocation12 + $0x10] sm:$0x3]  ;;  %v6919_v30 = vld [vmem:[#allocation2 + $0xcd] sm:$0xff] }
 0x4e5   : > { %13132 = vmatmul.mubr.msk.bf16.gmra.mrb[64].mxu1 %vm3486_vm12, %v5971_v60  ;;  %v6291_v60 = vpack.c.bf16 %v6265_v49, %v6264_v12 }
 0x4e6   : > { %13135 = vmatprep.mubr.msk.bf16.mxu1 %vm3486_vm12, %v5972_v23  ;;  %v6292_v23 = vpack.c.bf16 %v6267_v20, %v6266_v55  ;;  %v6902_v55 = vld [vmem:[#allocation2 + $0x45] sm:$0xff]  ;;  %v7335_v20 = vsel %vm665_vm1, %v7279_v16, 0 }
 0x4ed   : > { %13136 = vmatmul.mubr.msk.bf16.gmra.mrb[68].mxu1 %vm3486_vm12, %v5973_v37  ;;  %v6293_v37 = vpack.c.bf16 %v6269_v0, %v6268_v14  ;;  %v6907_v0 = vld [vmem:[#allocation2 + $0x6d] sm:$0xff] }
 0x4ee   : > { %13141 = vmatprep.mubr.msk.bf16.mxu1 %vm3486_vm12, %v6282_v22  ;;  %v6294_v22 = vpack.c.bf16 %v6271_v62, %v6270_v7  ;;  %v6906_v62 = vld [vmem:[#allocation2 + $0x65] sm:$0xff] }
 0x4ef   : > { %v6938_v14 = vpack.c.bf16 %v6907_v0, %v6906_v62  ;;  %v6930_v0 = vld [vmem:[#allocation2 + $0x125] sm:$0xff]  ;;  %v6932_v62 = vld [vmem:[#allocation2 + $0x135] sm:$0xff] }
 0x4f5   : > { %13142 = vmatmul.mubr.msk.bf16.vlgmr.msra.gmra.mrb[36].mxu1 %vm3486_vm12, %v17754_v38 }
 0x4f6   : > { %13145 = vmatprep.mubr.msk.bf16.mxu1 %vm3486_vm12, %v17758_v28  ;;  %13178 = vmatpush3.bf16.msra.mxu1 %v6683_v33  ;;  %v6295_v33 = vpack.c.bf16 %v6273_v17, %v6272_v4  ;;  %v6911_v17 = vld [vmem:[#allocation2 + $0x8d] sm:$0xff] }
 0x4f7   : > { %14506 = vmatprep.subr.msk.bf16.mxu1 %vm665_vm1, %v17760_v52  ;;  %v6899_v52 = vld [vmem:[#allocation2 + $0x2d] sm:$0xff]  ;;  %v6940_v4 = vpack.c.bf16 %v6911_v17, %v6910_v18  ;;  %v7226_v18 = vld [vmem:[#allocation2 + $0x36] sm:$0xff] }
 0x4f8   : > { %v7224_v17 = vld [vmem:[#allocation2 + $0x26] sm:$0xff] }
 0x4fd   : > { %13146 = vmatmul.mubr.msk.bf16.gmra.mrb[40].mxu1 %vm3486_vm12, %v6285_v39 }
 0x4fe   : > { %13149 = vmatprep.mubr.msk.bf16.mxu1 %vm3486_vm12, %v6286_v5 }
 0x505   : > { %13150 = vmatmul.mubr.msk.bf16.gmra.mrb[44].mxu1 %vm3486_vm12, %v6287_v2 }
 0x506   : > { %13153 = vmatprep.mubr.msk.bf16.mxu1 %vm3486_vm12, %v6288_v34 }
 0x50d   : > { %13154 = vmatmul.mubr.msk.bf16.gmra.mrb[48].mxu1 %vm3486_vm12, %v6289_v10 }
 0x50e   : > { %13157 = vmatprep.mubr.msk.bf16.mxu1 %vm3486_vm12, %v6290_v35 }
 0x515   : > { %13158 = vmatmul.mubr.msk.bf16.gmra.mrb[52].mxu1 %vm3486_vm12, %v6291_v60 }
 0x516   : > { %13161 = vmatprep.mubr.msk.bf16.mxu1 %vm3486_vm12, %v6292_v23 }
 0x51d   : > { %13162 = vmatmul.mubr.msk.bf16.gmra.mrb[56].mxu1 %vm3486_vm12, %v6293_v37 }
 0x51e   : > { %13165 = vmatprep.mubr.msk.bf16.mxu1 %vm3486_vm12, %v6294_v22 }
 0x525   : > { %13166 = vmatmul.mubr.msk.bf16.gmra.mrb[60].mxu1 %vm3486_vm12, %v6295_v33 }
 0x526   : > { %13169 = vmatprep.mubr.msk.bf16.mxu1 %vm3486_vm12, %v6296_v57 }
 0x52d   : > { %13170 = vmatmul.mubr.msk.bf16.gmra.mrb[64].mxu1 %vm3486_vm12, %v6297_v61 }
 0x52e   : > { %13173 = vmatprep.mubr.msk.bf16.mxu1 %vm3486_vm12, %v6298_v44 }
 0x535   : > { %13174 = vmatmul.mubr.msk.bf16.gmra.mrb[68].mxu1 %vm3486_vm12, %v6299_v21 }
 0x536   : > { %13179 = vmatprep.mubr.msk.bf16.mxu1 %vm3486_vm12, %v17754_v38  ;;  %v6606_v38 = vld [vmem:[#allocation2 + $0x134] sm:$0xff] }
 0x53d   : > { %13180 = vmatmul.mubr.msk.bf16.vlgmr.msra.gmra.mrb[36].mxu1 %vm3486_vm12, %v17758_v28  ;;  %v6607_v28 = vld [vmem:[#allocation2 + $0x13c] sm:$0xff] }
 0x53e   : > { %13183 = vmatprep.mubr.msk.bf16.mxu1 %vm3486_vm12, %v6285_v39  ;;  %13216 = vmatpush3.bf16.msra.mxu1 %v7009_v56  ;;  %v6625_v39 = vpack.c.bf16 %v6607_v28, %v6606_v38  ;;  %v6921_v38 = vld [vmem:[#allocation2 + $0xdd] sm:$0xff]  ;;  %v6923_v28 = vld [vmem:[#allocation2 + $0xed] sm:$0xff] }
 0x53f   : > { %14507 = vmatprep.subr.msk.bf16.mxu1 %vm665_vm1, %v7279_v16  ;;  %v6920_v16 = vld [vmem:[#allocation2 + $0xd5] sm:$0xff] }
 0x545   : > { %13184 = vmatmul.mubr.msk.bf16.gmra.mrb[40].mxu1 %vm3486_vm12, %v6286_v5  ;;  %v6898_v5 = vld [vmem:[#allocation2 + $0x25] sm:$0xff] }
 0x546   : > { %13187 = vmatprep.mubr.msk.bf16.mxu1 %vm3486_vm12, %v6287_v2  ;;  %v6934_v2 = vpack.c.bf16 %v6899_v52, %v6898_v5  ;;  %v6945_v52 = vpack.c.bf16 %v6921_v38, %v6920_v16  ;;  %v7237_v16 = vld [vmem:[#allocation2 + $0x8e] sm:$0xff] }
 0x54d   : > { %13188 = vmatmul.mubr.msk.bf16.gmra.mrb[44].mxu1 %vm3486_vm12, %v6288_v34  ;;  %v6900_v34 = vld [vmem:[#allocation2 + $0x35] sm:$0xff] }
 0x54e   : > { %13191 = vmatprep.mubr.msk.bf16.mxu1 %vm3486_vm12, %v6289_v10  ;;  %v6901_v10 = vld [vmem:[#allocation2 + $0x3d] sm:$0xff] }
 0x54f   : > { %v6935_v49 = vpack.c.bf16 %v6901_v10, %v6900_v34  ;;  %v6925_v34 = vld [vmem:[#allocation2 + $0xfd] sm:$0xff]  ;;  %v6927_v10 = vld [vmem:[#allocation2 + $0x10d] sm:$0xff] }
 0x555   : > { %13192 = vmatmul.mubr.msk.bf16.gmra.mrb[48].mxu1 %vm3486_vm12, %v6290_v35  ;;  %v6903_v35 = vld [vmem:[#allocation2 + $0x4d] sm:$0xff] }
 0x556   : > { %13195 = vmatprep.mubr.msk.bf16.mxu1 %vm3486_vm12, %v6291_v60  ;;  %v6936_v12 = vpack.c.bf16 %v6903_v35, %v6902_v55  ;;  %v6904_v60 = vld [vmem:[#allocation2 + $0x55] sm:$0xff] }
 0x55d   : > { %13196 = vmatmul.mubr.msk.bf16.gmra.mrb[52].mxu1 %vm3486_vm12, %v6292_v23  ;;  %v6905_v23 = vld [vmem:[#allocation2 + $0x5d] sm:$0xff] }
 0x55e   : > { %13199 = vmatprep.mubr.msk.bf16.mxu1 %vm3486_vm12, %v6293_v37  ;;  %v6937_v7 = vpack.c.bf16 %v6905_v23, %v6904_v60  ;;  %v6908_v37 = vld [vmem:[#allocation2 + $0x75] sm:$0xff]  ;;  %v6931_v60 = vld [vmem:[#allocation2 + $0x12d] sm:$0xff] }
 0x565   : > { %13200 = vmatmul.mubr.msk.bf16.gmra.mrb[56].mxu1 %vm3486_vm12, %v6294_v22  ;;  %v6909_v22 = vld [vmem:[#allocation2 + $0x7d] sm:$0xff] }
 0x566   : > { %13203 = vmatprep.mubr.msk.bf16.mxu1 %vm3486_vm12, %v6295_v33  ;;  %v6939_v9 = vpack.c.bf16 %v6909_v22, %v6908_v37  ;;  %v6912_v33 = vld [vmem:[#allocation2 + $0x95] sm:$0xff] }
 0x567   : > { %v7225_v37 = vld [vmem:[#allocation2 + $0x2e] sm:$0xff] }
 0x56d   : > { %13204 = vmatmul.mubr.msk.bf16.gmra.mrb[60].mxu1 %vm3486_vm12, %v6296_v57  ;;  %v6913_v57 = vld [vmem:[#allocation2 + $0x9d] sm:$0xff] }
 0x56e   : > { %13207 = vmatprep.mubr.msk.bf16.mxu1 %vm3486_vm12, %v6297_v61  ;;  %v6941_v32 = vpack.c.bf16 %v6913_v57, %v6912_v33  ;;  %v6916_v61 = vld [vmem:[#allocation2 + $0xb5] sm:$0xff] }
 0x56f   : > { %v7229_v33 = vld [vmem:[#allocation2 + $0x4e] sm:$0xff] }
 0x575   : > { %13208 = vmatmul.mubr.msk.bf16.gmra.mrb[64].mxu1 %vm3486_vm12, %v6298_v44  ;;  %v6917_v44 = vld [vmem:[#allocation2 + $0xbd] sm:$0xff] }
 0x576   : > { %13211 = vmatprep.mubr.msk.bf16.mxu1 %vm3486_vm12, %v6299_v21  ;;  %v6943_v1 = vpack.c.bf16 %v6917_v44, %v6916_v61  ;;  %v6918_v21 = vld [vmem:[#allocation2 + $0xc5] sm:$0xff]  ;;  %v7233_v61 = vld [vmem:[#allocation2 + $0x6e] sm:$0xff] }
 0x577   : > { %v6944_v56 = vpack.c.bf16 %v6919_v30, %v6918_v21  ;;  %v7232_v30 = vld [vmem:[#allocation2 + $0x66] sm:$0xff]  ;;  %v7234_v21 = vld [vmem:[#allocation2 + $0x76] sm:$0xff] }
 0x57d   : > { %13212 = vmatmul.mubr.msk.bf16.gmra.mrb[68].mxu1 %vm3486_vm12, %v6625_v39  ;;  %v6922_v39 = vld [vmem:[#allocation2 + $0xe5] sm:$0xff] }
 0x57e   : > { %13217 = vmatprep.mubr.msk.bf16.mxu1 %vm3486_vm12, %v6934_v2  ;;  %v6946_v5 = vpack.c.bf16 %v6923_v28, %v6922_v39  ;;  %v6924_v2 = vld [vmem:[#allocation2 + $0xf5] sm:$0xff]  ;;  %v7236_v28 = vld [vmem:[#allocation2 + $0x86] sm:$0xff] }
 0x57f   : > { %v6947_v35 = vpack.c.bf16 %v6925_v34, %v6924_v2  ;;  %v7238_v39 = vld [vmem:[#allocation2 + $0x96] sm:$0xff]  ;;  %v7241_v2 = vld [vmem:[#allocation2 + $0xae] sm:$0xff] }
 0x585   : > { %13218 = vmatmul.mubr.msk.bf16.vlgmr.msra.gmra.mrb[36].mxu1 %vm3486_vm12, %v6935_v49  ;;  %v6926_v49 = vld [vmem:[#allocation2 + $0x105] sm:$0xff] }
 0x586   : > { %13221 = vmatprep.mubr.msk.bf16.mxu1 %vm3486_vm12, %v6936_v12  ;;  %13254 = vmatpush3.bf16.msra.mxu1 %v7335_v20  ;;  %v6948_v55 = vpack.c.bf16 %v6927_v10, %v6926_v49  ;;  %v6928_v20 = vld [vmem:[#allocation2 + $0x115] sm:$0xff]  ;;  %v6929_v12 = vld [vmem:[#allocation2 + $0x11d] sm:$0xff]  ;;  %v7240_v10 = vld [vmem:[#allocation2 + $0xa6] sm:$0xff] }
 0x587   : > { %v6949_v23 = vpack.c.bf16 %v6929_v12, %v6928_v20  ;;  %v7242_v49 = vld [vmem:[#allocation2 + $0xb6] sm:$0xff]  ;;  %v7245_v20 = vld [vmem:[#allocation2 + $0xce] sm:$0xff] }
 0x58d   : > { %13222 = vmatmul.mubr.msk.bf16.gmra.mrb[40].mxu1 %vm3486_vm12, %v6937_v7  ;;  %v6950_v7 = vpack.c.bf16 %v6931_v60, %v6930_v0  ;;  %v7244_v60 = vld [vmem:[#allocation2 + $0xc6] sm:$0xff]  ;;  %v7246_v0 = vld [vmem:[#allocation2 + $0xd6] sm:$0xff] }
 0x58e   : > { %13225 = vmatprep.mubr.msk.bf16.mxu1 %vm3486_vm12, %v6938_v14  ;;  %v6933_v14 = vld [vmem:[#allocation2 + $0x13d] sm:$0xff] }
 0x58f   : > { %v6951_v22 = vpack.c.bf16 %v6933_v14, %v6932_v62  ;;  %v7249_v62 = vld [vmem:[#allocation2 + $0xee] sm:$0xff] }
 0x595   : > { %13226 = vmatmul.mubr.msk.bf16.gmra.mrb[44].mxu1 %vm3486_vm12, %v6939_v9  ;;  %v7260_v9 = vpack.c.bf16 %v7225_v37, %v7224_v17  ;;  %v7248_v37 = vld [vmem:[#allocation2 + $0xe6] sm:$0xff]  ;;  %v7250_v17 = vld [vmem:[#allocation2 + $0xf6] sm:$0xff] }
 0x596   : > { %13229 = vmatprep.mubr.msk.bf16.mxu1 %vm3486_vm12, %v6940_v4  ;;  %v7227_v4 = vld [vmem:[#allocation2 + $0x3e] sm:$0xff] }
 0x597   : > { %v7261_v57 = vpack.c.bf16 %v7227_v4, %v7226_v18  ;;  %v7253_v18 = vld [vmem:[#allocation2 + $0x10e] sm:$0xff] }
 0x59d   : > { %13230 = vmatmul.mubr.msk.bf16.gmra.mrb[48].mxu1 %vm3486_vm12, %v6941_v32  ;;  %v7262_v32 = vpack.c.bf16 %v7229_v33, %v7228_v3  ;;  %v7252_v33 = vld [vmem:[#allocation2 + $0x106] sm:$0xff]  ;;  %v7254_v3 = vld [vmem:[#allocation2 + $0x116] sm:$0xff] }
 0x59e   : > { %13233 = vmatprep.mubr.msk.bf16.mxu1 %vm3486_vm12, %v6942_v36  ;;  %v7231_v36 = vld [vmem:[#allocation2 + $0x5e] sm:$0xff] }
 0x59f   : > { %v7263_v44 = vpack.c.bf16 %v7231_v36, %v7230_v51  ;;  %v7257_v51 = vld [vmem:[#allocation2 + $0x12e] sm:$0xff] }
 0x5a5   : > { %13234 = vmatmul.mubr.msk.bf16.gmra.mrb[52].mxu1 %vm3486_vm12, %v6943_v1  ;;  %v7264_v1 = vpack.c.bf16 %v7233_v61, %v7232_v30  ;;  %v7256_v61 = vld [vmem:[#allocation2 + $0x126] sm:$0xff]  ;;  %v7258_v30 = vld [vmem:[#allocation2 + $0x136] sm:$0xff] }
 0x5a6   : > { %13237 = vmatprep.mubr.msk.bf16.mxu1 %vm3486_vm12, %v6944_v56  ;;  %v7235_v56 = vld [vmem:[#allocation2 + $0x7e] sm:$0xff] }
 0x5a7   : > { %v7265_v38 = vpack.c.bf16 %v7235_v56, %v7234_v21  ;;  %v19002_v56 = vmov 0.0  }
 0x5a8   : > { %7673 = vst.msk [vmem:[#allocation3 + $0x144] sm:$0xff] %vm7672_vm0, %v19002_v56 }
 0x5ad   : > { %13238 = vmatmul.mubr.msk.bf16.gmra.mrb[56].mxu1 %vm3486_vm12, %v6945_v52  ;;  %v7266_v52 = vpack.c.bf16 %v7237_v16, %v7236_v28  ;;  %v8205_v16 = vld [vmem:[#allocation16 + $0x4] sm:$0xf]  ;;  %v17847_v28 = vld [vmem:[#allocation16] sm:$0xf] }
 0x5ae   : > { %13241 = vmatprep.mubr.msk.bf16.mxu1 %vm3486_vm12, %v6946_v5  ;;  %v7239_v5 = vld [vmem:[#allocation2 + $0x9e] sm:$0xff]  ;;  %14508 = vmatprep.subr.msk.bf16.mxu0 %vm8260_vm9, %v8205_v16 }
 0x5af   : > { %v7267_v34 = vpack.c.bf16 %v7239_v5, %v7238_v39 }
 0x5b5   : > { %13242 = vmatmul.mubr.msk.bf16.gmra.mrb[60].mxu1 %vm3486_vm12, %v6947_v35  ;;  %v7268_v35 = vpack.c.bf16 %v7241_v2, %v7240_v10 }
 0x5b6   : > { %13245 = vmatprep.mubr.msk.bf16.mxu1 %vm3486_vm12, %v6948_v55  ;;  %v7243_v55 = vld [vmem:[#allocation2 + $0xbe] sm:$0xff] }
 0x5b7   : > { %v7269_v12 = vpack.c.bf16 %v7243_v55, %v7242_v49 }
 0x5bd   : > { %13246 = vmatmul.mubr.msk.bf16.gmra.mrb[64].mxu1 %vm3486_vm12, %v6949_v23  ;;  %v7270_v23 = vpack.c.bf16 %v7245_v20, %v7244_v60 }
 0x5be   : > { %13249 = vmatprep.mubr.msk.bf16.mxu1 %vm3486_vm12, %v6950_v7  ;;  %v7247_v7 = vld [vmem:[#allocation2 + $0xde] sm:$0xff] }
 0x5bf   : > { %v7271_v14 = vpack.c.bf16 %v7247_v7, %v7246_v0 }
 0x5c5   : > { %13250 = vmatmul.mubr.msk.bf16.gmra.mrb[68].mxu1 %vm3486_vm12, %v6951_v22  ;;  %v7272_v22 = vpack.c.bf16 %v7249_v62, %v7248_v37 }
 0x5c6   : > { %13255 = vmatprep.mubr.msk.bf16.mxu1 %vm3486_vm12, %v7260_v9  ;;  %v7251_v9 = vld [vmem:[#allocation2 + $0xfe] sm:$0xff] }
 0x5c7   : > { %v7273_v4 = vpack.c.bf16 %v7251_v9, %v7250_v17 }
 0x5cd   : > { %13256 = vmatmul.mubr.msk.bf16.vlgmr.msra.gmra.mrb[36].mxu1 %vm3486_vm12, %v7261_v57  ;;  %v7274_v57 = vpack.c.bf16 %v7253_v18, %v7252_v33 }
 0x5ce   : > { %13259 = vmatprep.mubr.msk.bf16.mxu1 %vm3486_vm12, %v7262_v32  ;;  %v7255_v32 = vld [vmem:[#allocation2 + $0x11e] sm:$0xff] }
 0x5cf   : > { %v7275_v36 = vpack.c.bf16 %v7255_v32, %v7254_v3 }
 0x5d5   : > { %13260 = vmatmul.mubr.msk.bf16.gmra.mrb[40].mxu1 %vm3486_vm12, %v7263_v44  ;;  %v7276_v44 = vpack.c.bf16 %v7257_v51, %v7256_v61 }
 0x5d6   : > { %13263 = vmatprep.mubr.msk.bf16.mxu1 %vm3486_vm12, %v7264_v1  ;;  %v7259_v1 = vld [vmem:[#allocation2 + $0x13e] sm:$0xff] }
 0x5d7   : > { %v7277_v21 = vpack.c.bf16 %v7259_v1, %v7258_v30 }
 0x5dd   : > { %13264 = vmatmul.mubr.msk.bf16.gmra.mrb[44].mxu1 %vm3486_vm12, %v7265_v38  ;;  %v8262_v38 = vsel %vm8260_vm9, %v8205_v16, 0 }
 0x5de   : > { %13267 = vmatprep.mubr.msk.bf16.mxu1 %vm3486_vm12, %v7266_v52  ;;  %13292 = vmatpush3.bf16.msra.mxu0 %v8262_v38  ;;  %v17851_v52 = vld [vmem:[#allocation13] ss:$0 sm:$0xff] }
 0x5df   : > { %14509 = vmatprep.subr.msk.bf16.mxu0 %vm8260_vm9, %v17847_v28 }
 0x5e5   : > { %13268 = vmatmul.mubr.msk.bf16.gmra.mrb[48].mxu1 %vm3486_vm12, %v7267_v34  ;;  %v17854_v34 = vld [vmem:[#allocation15] ss:$0 sm:$0xff] }
 0x5e6   : > { %13271 = vmatprep.mubr.msk.bf16.mxu1 %vm3486_vm12, %v7268_v35 }
 0x5ed   : > { %13272 = vmatmul.mubr.msk.bf16.gmra.mrb[52].mxu1 %vm3486_vm12, %v7269_v12 }
 0x5ee   : > { %13275 = vmatprep.mubr.msk.bf16.mxu1 %vm3486_vm12, %v7270_v23 }
 0x5f5   : > { %13276 = vmatmul.mubr.msk.bf16.gmra.mrb[56].mxu1 %vm3486_vm12, %v7271_v14 }
 0x5f6   : > { %13279 = vmatprep.mubr.msk.bf16.mxu1 %vm3486_vm12, %v7272_v22 }
 0x5fd   : > { %13280 = vmatmul.mubr.msk.bf16.gmra.mrb[60].mxu1 %vm3486_vm12, %v7273_v4 }
 0x5fe   : > { %13283 = vmatprep.mubr.msk.bf16.mxu1 %vm3486_vm12, %v7274_v57 }
 0x605   : > { %13284 = vmatmul.mubr.msk.bf16.gmra.mrb[64].mxu1 %vm3486_vm12, %v7275_v36 }
 0x606   : > { %13287 = vmatprep.mubr.msk.bf16.mxu1 %vm3486_vm12, %v7276_v44 }
 0x60d   : > { %13288 = vmatmul.mubr.msk.bf16.gmra.mrb[68].mxu1 %vm3486_vm12, %v7277_v21  ;;  %vm7715_vm12 = vcmask 58368  }
 0x6a0   : > { %v13257_v39 = vpop.f32.mrb[36].mxu1 }
 0x6a1   : > { %v7559_v5 = vadd.f32 %v13257_v39, %v17851_v52  ;;  %v7371_v2 = vpop.f32.mrb[37].mxu1 }
 0x6a2   : > { %v7557_v10 = vadd.f32 %v17851_v52, %v7371_v2  ;;  %v13258_v35 = vpop.f32.mrb[38].mxu1 }
 0x6a3   : > { %v7595_v49 = vmax.f32 %v7559_v5, 0.0  ;;  %v7560_v55 = vadd.f32 %v13258_v35, %v17851_v52  ;;  %v7374_v20 = vpop.f32.mrb[39].mxu1 }
 0x6a4   : > { %v7593_v12 = vmax.f32 %v7557_v10, 0.0  ;;  %v7558_v60 = vadd.f32 %v17851_v52, %v7374_v20 }
 0x6a5   : > { %v7638_v23 = vadd.f32 %v17854_v34, %v7595_v49  ;;  %v7596_v0 = vmax.f32 %v7560_v55, 0.0 }
 0x6a6   : > { %v7636_v7 = vadd.f32 %v17854_v34, %v7593_v12  ;;  %v7594_v62 = vmax.f32 %v7558_v60, 0.0 }
 0x6a7   : > { %7676 = vst.msk [vmem:[#allocation3 + $0x23] sm:$0xff] %vm7672_vm0, %v7638_v23  ;;  %v7639_v14 = vadd.f32 %v17854_v34, %v7596_v0 }
 0x6a8   : > { %7674 = vst.msk [vmem:[#allocation3 + $0x13] sm:$0xff] %vm7672_vm0, %v7636_v7  ;;  %v7637_v37 = vadd.f32 %v17854_v34, %v7594_v62  ;;  %v13261_v22 = vpop.f32.mrb[40].mxu1 }
 0x6a9   : > { %7677 = vst.msk [vmem:[#allocation3 + $0x2b] sm:$0xff] %vm7672_vm0, %v7639_v14  ;;  %v7563_v17 = vadd.f32 %v13261_v22, %v17851_v52  ;;  %v7387_v9 = vpop.f32.mrb[41].mxu1 }
 0x6aa   : > { %7675 = vst.msk [vmem:[#allocation3 + $0x1b] sm:$0xff] %vm7672_vm0, %v7637_v37  ;;  %v7561_v18 = vadd.f32 %v17851_v52, %v7387_v9  ;;  %v13262_v4 = vpop.f32.mrb[42].mxu1  ;;  %v19003_v9 = vld [vmem:[#allocation30_spill] sm:$0xff] }
 0x6ab   : > { %v7599_v33 = vmax.f32 %v7563_v17, 0.0  ;;  %v7564_v57 = vadd.f32 %v13262_v4, %v17851_v52  ;;  %v7390_v3 = vpop.f32.mrb[43].mxu1  ;;  %vm19004_vm10 = vcmp.eq.s32.totalorder %v19003_v9, 17  ;;  %v19005_v4 = vld [vmem:[#allocation31_spill] sm:$0xff]  ;;  %vm19007_vm14 = vcmp.eq.s32.totalorder %v19003_v9, 0 }
 0x6ac   : > { %v7597_v32 = vmax.f32 %v7561_v18, 0.0  ;;  %v7562_v51 = vadd.f32 %v17851_v52, %v7390_v3  ;;  %vm19006_vm6 = vcmp.eq.s32.totalorder %v19005_v4, 17  ;;  %vm19008_vm11 = vcmp.eq.s32.totalorder %v19005_v4, 0 }
 0x6ad   : > { %v7642_v36 = vadd.f32 %v17854_v34, %v7599_v33  ;;  %v7600_v61 = vmax.f32 %v7564_v57, 0.0 }
 0x6ae   : > { %v7640_v44 = vadd.f32 %v17854_v34, %v7597_v32  ;;  %v7598_v30 = vmax.f32 %v7562_v51, 0.0 }
 0x6af   : > { %7680 = vst.msk [vmem:[#allocation3 + $0x43] sm:$0xff] %vm7672_vm0, %v7642_v36  ;;  %v7643_v1 = vadd.f32 %v17854_v34, %v7600_v61 }
 0x6b0   : > { %v7710_v21 = vld [vmem:[#allocation3 + $0x24] sm:$0xff]  ;;  %7678 = vst.msk [vmem:[#allocation3 + $0x33] sm:$0xff] %vm7672_vm0, %v7640_v44  ;;  %v7641_v16 = vadd.f32 %v17854_v34, %v7598_v30  ;;  %v13265_v38 = vpop.f32.mrb[44].mxu1 }
 0x6b1   : > { %v7728_v56 = vld [vmem:[#allocation3 + $0x28] sm:$0xff]  ;;  %7713 = vst.msk [vmem:[#allocation3] sm:$0xff] %vm7672_vm0, %v7710_v21  ;;  %v17878_v5 = vld [vmem:[#allocation3 + $0x18] sm:$0xff]  ;;  %v7727_v2 = vld [vmem:[#allocation3 + $0x20] sm:$0xff]  ;;  %v7567_v10 = vadd.f32 %v13265_v38, %v17851_v52  ;;  %v7403_v35 = vpop.f32.mrb[45].mxu1 }
 0x6b2   : > { %v7857_v39 = vrot.slane %v7728_v56, 6  ;;  %7681 = vst.msk [vmem:[#allocation3 + $0x4b] sm:$0xff] %vm7672_vm0, %v7643_v1  ;;  %v18825_v49 = vrot.slane %v17878_v5, 6  ;;  %v7855_v55 = vrot.slane %v7727_v2, 6  ;;  %7679 = vst.msk [vmem:[#allocation3 + $0x3b] sm:$0xff] %vm7672_vm0, %v7641_v16  ;;  %v7565_v20 = vadd.f32 %v17851_v52, %v7403_v35  ;;  %v13266_v12 = vpop.f32.mrb[46].mxu1 }
 0x6b3   : > { %v7603_v60 = vmax.f32 %v7567_v10, 0.0  ;;  %v7568_v23 = vadd.f32 %v13266_v12, %v17851_v52  ;;  %v7406_v0 = vpop.f32.mrb[47].mxu1  ;;  %v7769_v22 = vld [vmem:[#allocation3 + $0x2a] sm:$0xff]  ;;  %v7768_v17 = vld [vmem:[#allocation3 + $0x22] sm:$0xff]  ;;  %v17896_v32 = vld [vmem:[#allocation3 + $0x1a] sm:$0xff] }
 0x6b4   : > { %v7856_v7 = vsel %vm665_vm1, %v18825_v49, %v7855_v55  ;;  %v7858_v62 = vsel %vm665_vm1, %v7855_v55, %v7857_v39  ;;  %v7601_v14 = vmax.f32 %v7565_v20, 0.0  ;;  %v7566_v37 = vadd.f32 %v17851_v52, %v7406_v0 }
 0x6b5   : > { %v7975_v18 = vsel %vm19004_vm10, %v7856_v7, %v7727_v2  ;;  %v7976_v33 = vsel %vm19006_vm6, %v7858_v62, %v7728_v56  ;;  %v7646_v57 = vadd.f32 %v17854_v34, %v7603_v60  ;;  %v7604_v3 = vmax.f32 %v7568_v23, 0.0 }
 0x6b6   : > { %v8016_v51 = vsel %vm19007_vm14, %v7768_v17, %v7975_v18  ;;  %v8017_v36 = vsel %vm19008_vm11, %v7769_v22, %v7976_v33  ;;  %v7644_v61 = vadd.f32 %v17854_v34, %v7601_v14  ;;  %v7602_v44 = vmax.f32 %v7566_v37, 0.0  ;;  %v19009_v22 = vld [vmem:[#allocation32_spill] sm:$0xff] }
 0x6b7   : > { %8057 = vst.msk [vmem:[#allocation3 + $0x20] sm:$0xff] %vm7672_vm0, %v8016_v51  ;;  %v7711_v30 = vld [vmem:[#allocation3 + $0x2c] sm:$0xff]  ;;  %v7712_v1 = vld [vmem:[#allocation3 + $0x34] sm:$0x3]  ;;  %7684 = vst.msk [vmem:[#allocation3 + $0x63] sm:$0xff] %vm7672_vm0, %v7646_v57  ;;  %v7647_v56 = vadd.f32 %v17854_v34, %v7604_v3  ;;  %vm19010_vm11 = vcmp.eq.s32.totalorder %v19009_v22, 17 }
 0x6b8   : > { %v7729_v21 = vld [vmem:[#allocation3 + $0x30] sm:$0xff]  ;;  %7714 = vst.msk [vmem:[#allocation3 + $0x8] sm:$0xff] %vm7672_vm0, %v7711_v30  ;;  %8058 = vst.msk [vmem:[#allocation3 + $0x28] sm:$0xff] %vm7672_vm0, %v8017_v36  ;;  %v7645_v2 = vadd.f32 %v17854_v34, %v7602_v44  ;;  %v13269_v10 = vpop.f32.mrb[48].mxu1  ;;  %vm19011_vm10 = vcmp.eq.s32.totalorder %v19009_v22, 0 }
 0x6b9   : > { %7716 = vst.msk [vmem:[#allocation3 + $0x10] sm:$0x3] %vm7715_vm12, %v7712_v1  ;;  %v7859_v16 = vrot.slane %v7729_v21, 6  ;;  %v7732_v38 = vld [vmem:[#allocation3 + $0x48] sm:$0xff]  ;;  %v7730_v55 = vld [vmem:[#allocation3 + $0x38] sm:$0xff]  ;;  %v7731_v20 = vld [vmem:[#allocation3 + $0x40] sm:$0xff]  ;;  %v7571_v12 = vadd.f32 %v13269_v10, %v17851_v52 }
 0x6ba   : > { %7682 = vst.msk [vmem:[#allocation3 + $0x53] sm:$0xff] %vm7672_vm0, %v7644_v61  ;;  %v7865_v35 = vrot.slane %v7732_v38, 6  ;;  %7685 = vst.msk [vmem:[#allocation3 + $0x6b] sm:$0xff] %vm7672_vm0, %v7647_v56  ;;  %v7419_v60 = vpop.f32.mrb[49].mxu1  ;;  %v7861_v0 = vrot.slane %v7730_v55, 6  ;;  %v7863_v7 = vrot.slane %v7731_v20, 6 }
 0x6bb   : > { %v7860_v23 = vsel %vm665_vm1, %v7857_v39, %v7859_v16  ;;  %7683 = vst.msk [vmem:[#allocation3 + $0x5b] sm:$0xff] %vm7672_vm0, %v7645_v2  ;;  %v7569_v62 = vadd.f32 %v17851_v52, %v7419_v60  ;;  %v13270_v14 = vpop.f32.mrb[50].mxu1  ;;  %v7770_v37 = vld [vmem:[#allocation3 + $0x32] sm:$0xff]  ;;  %v7607_v18 = vmax.f32 %v7571_v12, 0.0  ;;  %v7773_v36 = vld [vmem:[#allocation3 + $0x4a] sm:$0xff]  ;;  %v7771_v44 = vld [vmem:[#allocation3 + $0x3a] sm:$0xff] }
 0x6bc   : > { %v7977_v17 = vsel %vm19010_vm11, %v7860_v23, %v7729_v21  ;;  %v7572_v33 = vadd.f32 %v13270_v14, %v17851_v52  ;;  %v7422_v57 = vpop.f32.mrb[51].mxu1  ;;  %v7862_v39 = vsel %vm665_vm1, %v7859_v16, %v7861_v0  ;;  %v7864_v51 = vsel %vm665_vm1, %v7861_v0, %v7863_v7  ;;  %v7772_v30 = vld [vmem:[#allocation3 + $0x42] sm:$0xff]  ;;  %v19016_v10 = vld [vmem:[#allocation35_spill] sm:$0xff] }
 0x6bd   : > { %v8018_v3 = vsel %vm19011_vm10, %v7770_v37, %v7977_v17  ;;  %v7866_v61 = vsel %vm665_vm1, %v7863_v7, %v7865_v35  ;;  %v19012_v1 = vld [vmem:[#allocation33_spill] sm:$0xff]  ;;  %v19014_v56 = vld [vmem:[#allocation34_spill] sm:$0xff]  ;;  %vm19017_vm11 = vcmp.eq.s32.totalorder %v19016_v10, 17  ;;  %v7650_v16 = vadd.f32 %v17854_v34, %v7607_v18 }
 0x6be   : > { %8059 = vst.msk [vmem:[#allocation3 + $0x30] sm:$0xff] %vm7672_vm0, %v8018_v3  ;;  %vm19013_vm6 = vcmp.eq.s32.totalorder %v19012_v1, 17  ;;  %vm19015_vm14 = vcmp.eq.s32.totalorder %v19014_v56, 17  ;;  %v7980_v12 = vsel %vm19017_vm11, %v7866_v61, %v7732_v38  ;;  %v17932_v60 = vld [vmem:[#allocation3] sm:$0xff]  ;;  %vm19018_vm10 = vcmp.eq.s32.totalorder %v19012_v1, 0 }
 0x6bf   : > { %v7978_v21 = vsel %vm19013_vm6, %v7862_v39, %v7730_v55  ;;  %v7979_v2 = vsel %vm19015_vm14, %v7864_v51, %v7731_v20  ;;  %vm19019_vm5 = vcmp.eq.s32.totalorder %v19014_v56, 0  ;;  %vm19020_vm4 = vcmp.eq.s32.totalorder %v19016_v10, 0  ;;  %7688 = vst.msk [vmem:[#allocation3 + $0x83] sm:$0xff] %vm7672_vm0, %v7650_v16  ;;  %v17945_v37 = vld [vmem:[#allocation3 + $0x8] sm:$0xff] }
 0x6c0   : > { %v8019_v23 = vsel %vm19018_vm10, %v7771_v44, %v7978_v21  ;;  %v8020_v0 = vsel %vm19019_vm5, %v7772_v30, %v7979_v2  ;;  %v8021_v7 = vsel %vm19020_vm4, %v7773_v36, %v7980_v12  ;;  %v7605_v55 = vmax.f32 %v7569_v62, 0.0  ;;  %v13273_v62 = vpop.f32.mrb[52].mxu1 }
 0x6c1   : > { %8060 = vst.msk [vmem:[#allocation3 + $0x38] sm:$0xff] %vm7672_vm0, %v8019_v23  ;;  %8061 = vst.msk [vmem:[#allocation3 + $0x40] sm:$0xff] %vm7672_vm0, %v8020_v0  ;;  %v7733_v20 = vld [vmem:[#allocation3 + $0x50] sm:$0xff]  ;;  %v7608_v38 = vmax.f32 %v7572_v33, 0.0  ;;  %v7570_v14 = vadd.f32 %v17851_v52, %v7422_v57  ;;  %v17947_v18 = vld [vmem:[#allocation3 + $0x68] sm:$0xff]  ;;  %v7849_v51 = vrot.slane %v17945_v37, 6  ;;  %v7575_v57 = vadd.f32 %v13273_v62, %v17851_v52 }
 0x6c2   : > { %8062 = vst.msk [vmem:[#allocation3 + $0x48] sm:$0xff] %vm7672_vm0, %v8021_v7  ;;  %v7867_v17 = vrot.slane %v7733_v20, 6  ;;  %v7648_v3 = vadd.f32 %v17854_v34, %v7605_v55  ;;  %v7873_v36 = vrot.slane %v17947_v18, 6  ;;  %v7734_v61 = vld [vmem:[#allocation3 + $0x58] sm:$0xff]  ;;  %v7735_v44 = vld [vmem:[#allocation3 + $0x60] sm:$0xff]  ;;  %v7435_v21 = vpop.f32.mrb[53].mxu1 }
 0x6c3   : > { %v7651_v33 = vadd.f32 %v17854_v34, %v7608_v38  ;;  %v7606_v30 = vmax.f32 %v7570_v14, 0.0  ;;  %v7869_v12 = vrot.slane %v7734_v61, 6  ;;  %v7871_v16 = vrot.slane %v7735_v44, 6  ;;  %v13274_v0 = vpop.f32.mrb[54].mxu1  ;;  %v7774_v7 = vld [vmem:[#allocation3 + $0x52] sm:$0xff] }
 0x6c4   : > { %v7868_v2 = vsel %vm665_vm1, %v7865_v35, %v7867_v17  ;;  %7686 = vst.msk [vmem:[#allocation3 + $0x73] sm:$0xff] %vm7672_vm0, %v7648_v3  ;;  %v7573_v23 = vadd.f32 %v17851_v52, %v7435_v21  ;;  %v19021_v55 = vld [vmem:[#allocation36_spill] sm:$0xff]  ;;  %v7611_v14 = vmax.f32 %v7575_v57, 0.0  ;;  %v7576_v62 = vadd.f32 %v13274_v0, %v17851_v52  ;;  %v7438_v39 = vpop.f32.mrb[55].mxu1  ;;  %v19024_v57 = vld [vmem:[#allocation37_spill] sm:$0xff]  ;;  %v19026_v0 = vld [vmem:[#allocation38_spill] sm:$0xff] }
 0x6c5   : > { %vm19022_vm5 = vcmp.eq.s32.totalorder %v19021_v55, 17  ;;  %7689 = vst.msk [vmem:[#allocation3 + $0x8b] sm:$0xff] %vm7672_vm0, %v7651_v33  ;;  %v7649_v38 = vadd.f32 %v17854_v34, %v7606_v30  ;;  %vm19023_vm4 = vcmp.eq.s32.totalorder %v19021_v55, 0  ;;  %v7870_v3 = vsel %vm665_vm1, %v7867_v17, %v7869_v12  ;;  %v7775_v33 = vld [vmem:[#allocation3 + $0x5a] sm:$0xff]  ;;  %v7776_v30 = vld [vmem:[#allocation3 + $0x62] sm:$0xff]  ;;  %v19028_v17 = vld [vmem:[#allocation39_spill] sm:$0xff] }
 0x6c6   : > { %v7981_v49 = vsel %vm19022_vm5, %v7868_v2, %v7733_v20  ;;  %v7872_v21 = vsel %vm665_vm1, %v7869_v12, %v7871_v16  ;;  %v7874_v10 = vsel %vm665_vm1, %v7871_v16, %v7873_v36  ;;  %v7725_v20 = vld [vmem:[#allocation3 + $0x10] sm:$0xff]  ;;  %vm19025_vm6 = vcmp.eq.s32.totalorder %v19024_v57, 17 }
 0x6c7   : > { %v8022_v35 = vsel %vm19023_vm4, %v7774_v7, %v7981_v49  ;;  %v7982_v2 = vsel %vm19025_vm6, %v7870_v3, %v7734_v61  ;;  %vm19027_vm14 = vcmp.eq.s32.totalorder %v19026_v0, 17  ;;  %v7777_v49 = vld [vmem:[#allocation3 + $0x6a] sm:$0xff]  ;;  %vm19029_vm11 = vcmp.eq.s32.totalorder %v19028_v17, 17  ;;  %7687 = vst.msk [vmem:[#allocation3 + $0x7b] sm:$0xff] %vm7672_vm0, %v7649_v38 }
 0x6c8   : > { %8063 = vst.msk [vmem:[#allocation3 + $0x50] sm:$0xff] %vm7672_vm0, %v8022_v35  ;;  %v7983_v56 = vsel %vm19027_vm14, %v7872_v21, %v7735_v44  ;;  %v7984_v12 = vsel %vm19029_vm11, %v7874_v10, %v17947_v18  ;;  %v7654_v16 = vadd.f32 %v17854_v34, %v7611_v14  ;;  %vm19030_vm10 = vcmp.eq.s32.totalorder %v19024_v57, 0 }
 0x6c9   : > { %v8023_v7 = vsel %vm19030_vm10, %v7775_v33, %v7982_v2  ;;  %vm19031_vm5 = vcmp.eq.s32.totalorder %v19026_v0, 0  ;;  %vm19032_vm4 = vcmp.eq.s32.totalorder %v19028_v17, 0  ;;  %v7609_v3 = vmax.f32 %v7573_v23, 0.0  ;;  %v13277_v33 = vpop.f32.mrb[56].mxu1  ;;  %v7765_v0 = vld [vmem:[#allocation3 + $0xa] sm:$0xff] }
 0x6ca   : > { %v8024_v35 = vsel %vm19031_vm5, %v7776_v30, %v7983_v56  ;;  %v8025_v61 = vsel %vm19032_vm4, %v7777_v49, %v7984_v12  ;;  %8064 = vst.msk [vmem:[#allocation3 + $0x58] sm:$0xff] %vm7672_vm0, %v8023_v7  ;;  %7692 = vst.msk [vmem:[#allocation3 + $0xa3] sm:$0xff] %vm7672_vm0, %v7654_v16  ;;  %v7612_v10 = vmax.f32 %v7576_v62, 0.0  ;;  %v7574_v44 = vadd.f32 %v17851_v52, %v7438_v39  ;;  %v7451_v12 = vpop.f32.mrb[57].mxu1 }
 0x6cb   : > { %8065 = vst.msk [vmem:[#allocation3 + $0x60] sm:$0xff] %vm7672_vm0, %v8024_v35  ;;  %8066 = vst.msk [vmem:[#allocation3 + $0x68] sm:$0xff] %vm7672_vm0, %v8025_v61  ;;  %v19033_v38 = vrot.slane %v17932_v60, 6  ;;  %v7851_v56 = vrot.slane %v7725_v20, 6  ;;  %v7652_v21 = vadd.f32 %v17854_v34, %v7609_v3  ;;  %vm19034_vm6 = vcmp.eq.s32.totalorder %v16960_v8, 17  ;;  %v7737_v30 = vld [vmem:[#allocation3 + $0x70] sm:$0xff] }
 0x6cc   : > { %v7655_v2 = vadd.f32 %v17854_v34, %v7612_v10  ;;  %v7610_v49 = vmax.f32 %v7574_v44, 0.0  ;;  %v7579_v62 = vadd.f32 %v13277_v33, %v17851_v52  ;;  %v7875_v16 = vrot.slane %v7737_v30, 6  ;;  %v18001_v7 = vld [vmem:[#allocation3 + $0x88] sm:$0xff]  ;;  %v13278_v61 = vpop.f32.mrb[58].mxu1 }
 0x6cd   : > { %v7850_v14 = vsel %vm665_vm1, %v19033_v38, %v7849_v51  ;;  %v7852_v39 = vsel %vm665_vm1, %v7849_v51, %v7851_v56  ;;  %7690 = vst.msk [vmem:[#allocation3 + $0x93] sm:$0xff] %vm7672_vm0, %v7652_v21  ;;  %v7577_v35 = vadd.f32 %v17851_v52, %v7451_v12  ;;  %v19035_v3 = vrot.slane %v17878_v5, 6  ;;  %v7454_v21 = vpop.f32.mrb[59].mxu1 }
 0x6ce   : > { %v7972_v23 = vsel %vm19034_vm6, %v7850_v14, %v17945_v37  ;;  %vm19036_vm14 = vcmp.eq.s32.totalorder %v17044_v54, 17  ;;  %7693 = vst.msk [vmem:[#allocation3 + $0xab] sm:$0xff] %vm7672_vm0, %v7655_v2  ;;  %v7653_v51 = vadd.f32 %v17854_v34, %v7610_v49  ;;  %v7615_v38 = vmax.f32 %v7579_v62, 0.0  ;;  %v7738_v12 = vld [vmem:[#allocation3 + $0x78] sm:$0xff]  ;;  %v7739_v17 = vld [vmem:[#allocation3 + $0x80] sm:$0xff] }
 0x6cf   : > { %v7854_v37 = vsel %vm665_vm1, %v7851_v56, %v19035_v3  ;;  %v7973_v10 = vsel %vm19036_vm14, %v7852_v39, %v7725_v20  ;;  %v7580_v14 = vadd.f32 %v13278_v61, %v17851_v52  ;;  %v7876_v33 = vsel %vm665_vm1, %v7873_v36, %v7875_v16  ;;  %v7778_v2 = vld [vmem:[#allocation3 + $0x72] sm:$0xff] }
 0x6d0   : > { %v7613_v56 = vmax.f32 %v7577_v35, 0.0  ;;  %v7578_v3 = vadd.f32 %v17851_v52, %v7454_v21  ;;  %vm19037_vm11 = vcmp.eq.s32.totalorder %v17055_v26, 17  ;;  %v19038_v39 = vld [vmem:[#allocation40_spill] sm:$0xff]  ;;  %v7877_v62 = vrot.slane %v7738_v12, 6  ;;  %7691 = vst.msk [vmem:[#allocation3 + $0x9b] sm:$0xff] %vm7672_vm0, %v7653_v51 }
 0x6d1   : > { %v7974_v20 = vsel %vm19037_vm11, %v7854_v37, %v17878_v5  ;;  %vm19039_vm10 = vcmp.eq.s32.totalorder %v19038_v39, 17  ;;  %v7879_v61 = vrot.slane %v7739_v17, 6  ;;  %v7658_v18 = vadd.f32 %v17854_v34, %v7615_v38  ;;  %v18035_v38 = vld [vmem:[#allocation3 + $0x2] sm:$0xff] }
 0x6d2   : > { %v7985_v49 = vsel %vm19039_vm10, %v7876_v33, %v7737_v30  ;;  %vm19040_vm5 = vcmp.eq.s32.totalorder %v19038_v39, 0  ;;  %v7656_v35 = vadd.f32 %v17854_v34, %v7613_v56  ;;  %v7616_v21 = vmax.f32 %v7580_v14, 0.0  ;;  %v7779_v14 = vld [vmem:[#allocation3 + $0x7a] sm:$0xff]  ;;  %v7780_v56 = vld [vmem:[#allocation3 + $0x82] sm:$0xff] }
 0x6d3   : > { %v8026_v36 = vsel %vm19040_vm5, %v7778_v2, %v7985_v49  ;;  %v7614_v44 = vmax.f32 %v7578_v3, 0.0  ;;  %v7878_v5 = vsel %vm665_vm1, %v7875_v16, %v7877_v62  ;;  %v7880_v30 = vsel %vm665_vm1, %v7877_v62, %v7879_v61  ;;  %7696 = vst.msk [vmem:[#allocation3 + $0xc3] sm:$0xff] %vm7672_vm0, %v7658_v18  ;;  %v19043_v3 = vld [vmem:[#allocation41_spill] sm:$0xff]  ;;  %v19045_v49 = vld [vmem:[#allocation42_spill] sm:$0xff] }
 0x6d4   : > { %8067 = vst.msk [vmem:[#allocation3 + $0x70] sm:$0xff] %vm7672_vm0, %v8026_v36  ;;  %v19041_v37 = vrot.slane %v18001_v7, 6  ;;  %vm19042_vm4 = vcmp.eq.s32.totalorder %v16960_v8, 0  ;;  %vm19044_vm6 = vcmp.eq.s32.totalorder %v19043_v3, 17  ;;  %vm19046_vm14 = vcmp.eq.s32.totalorder %v19045_v49, 17  ;;  %v7781_v62 = vld [vmem:[#allocation3 + $0x8a] sm:$0xff] }
 0x6d5   : > { %v8013_v33 = vsel %vm19042_vm4, %v7765_v0, %v7972_v23  ;;  %v7986_v2 = vsel %vm19044_vm6, %v7878_v5, %v7738_v12  ;;  %v7987_v16 = vsel %vm19046_vm14, %v7880_v30, %v7739_v17  ;;  %v19047_v36 = vld [vmem:[#allocation43_spill] sm:$0xff]  ;;  %7694 = vst.msk [vmem:[#allocation3 + $0xb3] sm:$0xff] %vm7672_vm0, %v7656_v35  ;;  %v7659_v18 = vadd.f32 %v17854_v34, %v7616_v21 }
 0x6d6   : > { %v7882_v51 = vsel %vm665_vm1, %v7879_v61, %v19041_v37  ;;  %vm19048_vm11 = vcmp.eq.s32.totalorder %v19047_v36, 17  ;;  %v13281_v37 = vpop.f32.mrb[60].mxu1  ;;  %8054 = vst.msk [vmem:[#allocation3 + $0x8] sm:$0xff] %vm7672_vm0, %v8013_v33  ;;  %v7766_v0 = vld [vmem:[#allocation3 + $0x12] sm:$0xff]  ;;  %vm19049_vm10 = vcmp.eq.s32.totalorder %v19043_v3, 0  ;;  %vm19050_vm5 = vcmp.eq.s32.totalorder %v19045_v49, 0 }
 0x6d7   : > { %v7988_v61 = vsel %vm19048_vm11, %v7882_v51, %v18001_v7  ;;  %v8027_v23 = vsel %vm19049_vm10, %v7779_v14, %v7986_v2  ;;  %v8028_v12 = vsel %vm19050_vm5, %v7780_v56, %v7987_v16  ;;  %v7741_v17 = vld [vmem:[#allocation3 + $0x90] sm:$0xff]  ;;  %vm19051_vm4 = vcmp.eq.s32.totalorder %v19047_v36, 0  ;;  %v7467_v51 = vpop.f32.mrb[61].mxu1  ;;  %v7744_v21 = vld [vmem:[#allocation3 + $0xa8] sm:$0xff]  ;;  %7697 = vst.msk [vmem:[#allocation3 + $0xcb] sm:$0xff] %vm7672_vm0, %v7659_v18 }
 0x6d8   : > { %v8029_v5 = vsel %vm19051_vm4, %v7781_v62, %v7988_v61  ;;  %v7657_v30 = vadd.f32 %v17854_v34, %v7614_v44  ;;  %8068 = vst.msk [vmem:[#allocation3 + $0x78] sm:$0xff] %vm7672_vm0, %v8027_v23  ;;  %8069 = vst.msk [vmem:[#allocation3 + $0x80] sm:$0xff] %vm7672_vm0, %v8028_v12  ;;  %v7883_v35 = vrot.slane %v7741_v17, 6  ;;  %v7583_v33 = vadd.f32 %v13281_v37, %v17851_v52  ;;  %v13282_v56 = vpop.f32.mrb[62].mxu1  ;;  %v7742_v23 = vld [vmem:[#allocation3 + $0x98] sm:$0xff]  ;;  %v7743_v12 = vld [vmem:[#allocation3 + $0xa0] sm:$0xff] }
 0x6d9   : > { %8070 = vst.msk [vmem:[#allocation3 + $0x88] sm:$0xff] %vm7672_vm0, %v8029_v5  ;;  %v7581_v14 = vadd.f32 %v17851_v52, %v7467_v51  ;;  %vm19052_vm6 = vcmp.eq.s32.totalorder %v17044_v54, 0  ;;  %v7889_v44 = vrot.slane %v7744_v21, 6  ;;  %v7584_v16 = vadd.f32 %v13282_v56, %v17851_v52  ;;  %v7470_v62 = vpop.f32.mrb[63].mxu1  ;;  %v19055_v51 = vld [vmem:[#allocation44_spill] sm:$0xff] }
 0x6da   : > { %v8014_v2 = vsel %vm19052_vm6, %v7766_v0, %v7973_v10  ;;  %7695 = vst.msk [vmem:[#allocation3 + $0xbb] sm:$0xff] %vm7672_vm0, %v7657_v30  ;;  %vm19053_vm14 = vcmp.eq.s32.totalorder %v17055_v26, 0  ;;  %v19054_v18 = vrot.slane %v18001_v7, 6  ;;  %v7619_v5 = vmax.f32 %v7583_v33, 0.0  ;;  %v7782_v30 = vld [vmem:[#allocation3 + $0x92] sm:$0xff] }
 0x6db   : > { %8055 = vst.msk [vmem:[#allocation3 + $0x10] sm:$0xff] %vm7672_vm0, %v8014_v2  ;;  %v8015_v61 = vsel %vm19053_vm14, %v17896_v32, %v7974_v20  ;;  %v7617_v10 = vmax.f32 %v7581_v14, 0.0  ;;  %v7582_v0 = vadd.f32 %v17851_v52, %v7470_v62  ;;  %vm19056_vm11 = vcmp.eq.s32.totalorder %v19055_v51, 17 }
 0x6dc   : > { %v7884_v37 = vsel %vm665_vm1, %v19054_v18, %v7883_v35  ;;  %8056 = vst.msk [vmem:[#allocation3 + $0x18] sm:$0xff] %vm7672_vm0, %v8015_v61  ;;  %v7885_v2 = vrot.slane %v7742_v23, 6  ;;  %v7887_v36 = vrot.slane %v7743_v12, 6  ;;  %v7620_v49 = vmax.f32 %v7584_v16, 0.0  ;;  %v7745_v61 = vld [vmem:[#allocation3 + $0xb0] sm:$0xff]  ;;  %v7783_v16 = vld [vmem:[#allocation3 + $0x9a] sm:$0xff] }
 0x6dd   : > { %v7989_v56 = vsel %vm19056_vm11, %v7884_v37, %v7741_v17  ;;  %vm19057_vm10 = vcmp.eq.s32.totalorder %v19055_v51, 0  ;;  %v7662_v7 = vadd.f32 %v17854_v34, %v7619_v5  ;;  %v7660_v20 = vadd.f32 %v17854_v34, %v7617_v10  ;;  %v7784_v37 = vld [vmem:[#allocation3 + $0xa2] sm:$0xff]  ;;  %v7785_v10 = vld [vmem:[#allocation3 + $0xaa] sm:$0xff] }
 0x6de   : > { %v8030_v32 = vsel %vm19057_vm10, %v7782_v30, %v7989_v56  ;;  %v7618_v33 = vmax.f32 %v7582_v0, 0.0  ;;  %v7886_v14 = vsel %vm665_vm1, %v7883_v35, %v7885_v2  ;;  %v7888_v62 = vsel %vm665_vm1, %v7885_v2, %v7887_v36 }
 0x6df   : > { %8071 = vst.msk [vmem:[#allocation3 + $0x90] sm:$0xff] %vm7672_vm0, %v8030_v32  ;;  %v7890_v17 = vsel %vm665_vm1, %v7887_v36, %v7889_v44  ;;  %v7663_v18 = vadd.f32 %v17854_v34, %v7620_v49  ;;  %vm19058_vm5 = vcmp.eq.s32.totalorder %v18965_v13, 17  ;;  %vm19059_vm4 = vcmp.eq.s32.totalorder %v18966_v27, 17  ;;  %7700 = vst.msk [vmem:[#allocation3 + $0xe3] sm:$0xff] %vm7672_vm0, %v7662_v7  ;;  %v13285_v36 = vpop.f32.mrb[64].mxu1 }
 0x6e0   : > { %v7990_v30 = vsel %vm19058_vm5, %v7886_v14, %v7742_v23  ;;  %v7991_v5 = vsel %vm19059_vm4, %v7888_v62, %v7743_v12  ;;  %v7891_v0 = vrot.slane %v7745_v61, 6  ;;  %vm19060_vm6 = vcmp.eq.s32.totalorder %v18967_v42, 17  ;;  %7698 = vst.msk [vmem:[#allocation3 + $0xd3] sm:$0xff] %vm7672_vm0, %v7660_v20  ;;  %v7748_v12 = vld [vmem:[#allocation3 + $0xc8] sm:$0xff] }
 0x6e1   : > { %v7992_v35 = vsel %vm19060_vm6, %v7890_v17, %v7744_v21  ;;  %vm19061_vm14 = vcmp.eq.s32.totalorder %v18965_v13, 0  ;;  %vm19062_vm11 = vcmp.eq.s32.totalorder %v18966_v27, 0  ;;  %vm19063_vm10 = vcmp.eq.s32.totalorder %v18967_v42, 0  ;;  %7701 = vst.msk [vmem:[#allocation3 + $0xeb] sm:$0xff] %vm7672_vm0, %v7663_v18  ;;  %v7483_v21 = vpop.f32.mrb[65].mxu1  ;;  %v7746_v20 = vld [vmem:[#allocation3 + $0xb8] sm:$0xff] }
 0x6e2   : > { %v8031_v49 = vsel %vm19061_vm14, %v7783_v16, %v7990_v30  ;;  %v8032_v56 = vsel %vm19062_vm11, %v7784_v37, %v7991_v5  ;;  %v8033_v23 = vsel %vm19063_vm10, %v7785_v10, %v7992_v35  ;;  %v7661_v2 = vadd.f32 %v17854_v34, %v7618_v33  ;;  %v7747_v14 = vld [vmem:[#allocation3 + $0xc0] sm:$0xff]  ;;  %v13286_v16 = vpop.f32.mrb[66].mxu1  ;;  %v7786_v18 = vld [vmem:[#allocation3 + $0xb2] sm:$0xff] }
 0x6e3   : > { %8072 = vst.msk [vmem:[#allocation3 + $0x98] sm:$0xff] %vm7672_vm0, %v8031_v49  ;;  %8073 = vst.msk [vmem:[#allocation3 + $0xa0] sm:$0xff] %vm7672_vm0, %v8032_v56  ;;  %v7892_v32 = vsel %vm665_vm1, %v7889_v44, %v7891_v0  ;;  %v7897_v7 = vrot.slane %v7748_v12, 6  ;;  %v7587_v62 = vadd.f32 %v13285_v36, %v17851_v52  ;;  %v7585_v17 = vadd.f32 %v17851_v52, %v7483_v21  ;;  %v7486_v5 = vpop.f32.mrb[67].mxu1 }
 0x6e4   : > { %8074 = vst.msk [vmem:[#allocation3 + $0xa8] sm:$0xff] %vm7672_vm0, %v8033_v23  ;;  %vm19064_vm5 = vcmp.eq.s32.totalorder %v18968_v41, 17  ;;  %v7893_v37 = vrot.slane %v7746_v20, 6  ;;  %v7895_v30 = vrot.slane %v7747_v14, 6  ;;  %7699 = vst.msk [vmem:[#allocation3 + $0xdb] sm:$0xff] %vm7672_vm0, %v7661_v2  ;;  %v7588_v44 = vadd.f32 %v13286_v16, %v17851_v52  ;;  %v7787_v2 = vld [vmem:[#allocation3 + $0xba] sm:$0xff] }
 0x6e5   : > { %v7993_v33 = vsel %vm19064_vm5, %v7892_v32, %v7745_v61  ;;  %vm19065_vm4 = vcmp.eq.s32.totalorder %v18968_v41, 0  ;;  %v7623_v35 = vmax.f32 %v7587_v62, 0.0  ;;  %v7621_v49 = vmax.f32 %v7585_v17, 0.0  ;;  %v7788_v32 = vld [vmem:[#allocation3 + $0xc2] sm:$0xff]  ;;  %v7789_v17 = vld [vmem:[#allocation3 + $0xca] sm:$0xff] }
 0x6e6   : > { %v8034_v10 = vsel %vm19065_vm4, %v7786_v18, %v7993_v33  ;;  %v7586_v36 = vadd.f32 %v17851_v52, %v7486_v5  ;;  %v7894_v56 = vsel %vm665_vm1, %v7891_v0, %v7893_v37  ;;  %v7896_v61 = vsel %vm665_vm1, %v7893_v37, %v7895_v30 }
 0x6e7   : > { %8075 = vst.msk [vmem:[#allocation3 + $0xb0] sm:$0xff] %vm7672_vm0, %v8034_v10  ;;  %v7898_v23 = vsel %vm665_vm1, %v7895_v30, %v7897_v7  ;;  %v7624_v21 = vmax.f32 %v7588_v44, 0.0  ;;  %vm19066_vm6 = vcmp.eq.s32.totalorder %v18974_v48, 17  ;;  %vm19067_vm14 = vcmp.eq.s32.totalorder %v18975_v50, 17  ;;  %v7749_v30 = vld [vmem:[#allocation3 + $0xd0] sm:$0xff] }
 0x6e8   : > { %v7994_v16 = vsel %vm19066_vm6, %v7894_v56, %v7746_v20  ;;  %v7995_v62 = vsel %vm19067_vm14, %v7896_v61, %v7747_v14  ;;  %vm19068_vm11 = vcmp.eq.s32.totalorder %v16754_v46, 17  ;;  %v7666_v33 = vadd.f32 %v17854_v34, %v7623_v35  ;;  %v13289_v35 = vpop.f32.mrb[68].mxu1 }
 0x6e9   : > { %v7996_v18 = vsel %vm19068_vm11, %v7898_v23, %v7748_v12  ;;  %vm19069_vm10 = vcmp.eq.s32.totalorder %v18974_v48, 0  ;;  %vm19070_vm5 = vcmp.eq.s32.totalorder %v18975_v50, 0  ;;  %vm19071_vm4 = vcmp.eq.s32.totalorder %v16754_v46, 0  ;;  %v7752_v12 = vld [vmem:[#allocation3 + $0xe8] sm:$0xff] }
 0x6ea   : > { %v8035_v0 = vsel %vm19069_vm10, %v7787_v2, %v7994_v16  ;;  %v8036_v37 = vsel %vm19070_vm5, %v7788_v32, %v7995_v62  ;;  %v8037_v44 = vsel %vm19071_vm4, %v7789_v17, %v7996_v18  ;;  %v7664_v20 = vadd.f32 %v17854_v34, %v7621_v49  ;;  %7704 = vst.msk [vmem:[#allocation3 + $0x103] sm:$0xff] %vm7672_vm0, %v7666_v33  ;;  %v7499_v49 = vpop.f32.mrb[69].mxu1 }
 0x6eb   : > { %8076 = vst.msk [vmem:[#allocation3 + $0xb8] sm:$0xff] %vm7672_vm0, %v8035_v0  ;;  %8077 = vst.msk [vmem:[#allocation3 + $0xc0] sm:$0xff] %vm7672_vm0, %v8036_v37  ;;  %v7899_v14 = vrot.slane %v7749_v30, 6  ;;  %v7667_v5 = vadd.f32 %v17854_v34, %v7624_v21  ;;  %v7622_v10 = vmax.f32 %v7586_v36, 0.0  ;;  %v7905_v56 = vrot.slane %v7752_v12, 6  ;;  %v7750_v2 = vld [vmem:[#allocation3 + $0xd8] sm:$0xff] }
 0x6ec   : > { %8078 = vst.msk [vmem:[#allocation3 + $0xc8] sm:$0xff] %vm7672_vm0, %v8037_v44  ;;  %7702 = vst.msk [vmem:[#allocation3 + $0xf3] sm:$0xff] %vm7672_vm0, %v7664_v20  ;;  %v7591_v61 = vadd.f32 %v13289_v35, %v17851_v52  ;;  %v7751_v32 = vld [vmem:[#allocation3 + $0xe0] sm:$0xff]  ;;  %v7589_v62 = vadd.f32 %v17851_v52, %v7499_v49  ;;  %v13290_v17 = vpop.f32.mrb[70].mxu1  ;;  %v7790_v21 = vld [vmem:[#allocation3 + $0xd2] sm:$0xff]  ;;  %vm19072_vm6 = vcmp.eq.s32.totalorder %v16759_v19, 17 }
 0x6ed   : > { %v7900_v23 = vsel %vm665_vm1, %v7897_v7, %v7899_v14  ;;  %7705 = vst.msk [vmem:[#allocation3 + $0x10b] sm:$0xff] %vm7672_vm0, %v7667_v5  ;;  %v7665_v16 = vadd.f32 %v17854_v34, %v7622_v10  ;;  %v7901_v18 = vrot.slane %v7750_v2, 6  ;;  %v7903_v33 = vrot.slane %v7751_v32, 6  ;;  %v7502_v37 = vpop.f32.mrb[71].mxu1  ;;  %v7791_v49 = vld [vmem:[#allocation3 + $0xda] sm:$0xff] }
 0x6ee   : > { %v7997_v36 = vsel %vm19072_vm6, %v7900_v23, %v7749_v30  ;;  %v7627_v0 = vmax.f32 %v7591_v61, 0.0  ;;  %vm19073_vm14 = vcmp.eq.s32.totalorder %v16759_v19, 0  ;;  %v7625_v44 = vmax.f32 %v7589_v62, 0.0  ;;  %v7792_v23 = vld [vmem:[#allocation3 + $0xe2] sm:$0xff] }
 0x6ef   : > { %v8038_v7 = vsel %vm19073_vm14, %v7790_v21, %v7997_v36  ;;  %7703 = vst.msk [vmem:[#allocation3 + $0xfb] sm:$0xff] %vm7672_vm0, %v7665_v16  ;;  %v7592_v20 = vadd.f32 %v13290_v17, %v17851_v52  ;;  %v7590_v5 = vadd.f32 %v17851_v52, %v7502_v37  ;;  %v7902_v10 = vsel %vm665_vm1, %v7899_v14, %v7901_v18  ;;  %v7793_v17 = vld [vmem:[#allocation3 + $0xea] sm:$0xff] }
 0x6f0   : > { %8079 = vst.msk [vmem:[#allocation3 + $0xd0] sm:$0xff] %vm7672_vm0, %v8038_v7  ;;  %v7904_v30 = vsel %vm665_vm1, %v7901_v18, %v7903_v33  ;;  %v7906_v35 = vsel %vm665_vm1, %v7903_v33, %v7905_v56  ;;  %v7670_v61 = vadd.f32 %v17854_v34, %v7627_v0  ;;  %vm19074_vm11 = vcmp.eq.s32.totalorder %v16764_v47, 17 }
 0x6f1   : > { %v7998_v16 = vsel %vm19074_vm11, %v7902_v10, %v7750_v2  ;;  %vm19075_vm10 = vcmp.eq.s32.totalorder %v16777_v11, 17  ;;  %vm19076_vm5 = vcmp.eq.s32.totalorder %v16781_v24, 17  ;;  %v7668_v14 = vadd.f32 %v17854_v34, %v7625_v44 }
 0x6f2   : > { %v7999_v62 = vsel %vm19075_vm10, %v7904_v30, %v7751_v32  ;;  %v8000_v52 = vsel %vm19076_vm5, %v7906_v35, %v7752_v12  ;;  %vm19077_vm4 = vcmp.eq.s32.totalorder %v16764_v47, 0  ;;  %vm19078_vm6 = vcmp.eq.s32.totalorder %v16777_v11, 0  ;;  %7708 = vst.msk [vmem:[#allocation3 + $0x123] sm:$0xff] %vm7672_vm0, %v7670_v61 }
 0x6f3   : > { %v8039_v21 = vsel %vm19077_vm4, %v7791_v49, %v7998_v16  ;;  %v8040_v36 = vsel %vm19078_vm6, %v7792_v23, %v7999_v62  ;;  %vm19079_vm14 = vcmp.eq.s32.totalorder %v16781_v24, 0  ;;  %v7628_v2 = vmax.f32 %v7592_v20, 0.0  ;;  %v7753_v32 = vld [vmem:[#allocation3 + $0xf0] sm:$0xff]  ;;  %7706 = vst.msk [vmem:[#allocation3 + $0x113] sm:$0xff] %vm7672_vm0, %v7668_v14 }
 0x6f4   : > { %v8041_v18 = vsel %vm19079_vm14, %v7793_v17, %v8000_v52  ;;  %8080 = vst.msk [vmem:[#allocation3 + $0xd8] sm:$0xff] %vm7672_vm0, %v8039_v21  ;;  %8081 = vst.msk [vmem:[#allocation3 + $0xe0] sm:$0xff] %vm7672_vm0, %v8040_v36  ;;  %v7626_v12 = vmax.f32 %v7590_v5, 0.0  ;;  %v7907_v33 = vrot.slane %v7753_v32, 6  ;;  %v7756_v0 = vld [vmem:[#allocation3 + $0x108] sm:$0xff]  ;;  %v7794_v35 = vld [vmem:[#allocation3 + $0xf2] sm:$0xff] }
 0x6f5   : > { %8082 = vst.msk [vmem:[#allocation3 + $0xe8] sm:$0xff] %vm7672_vm0, %v8041_v18  ;;  %v7671_v37 = vadd.f32 %v17854_v34, %v7628_v2  ;;  %v7913_v7 = vrot.slane %v7756_v0, 6  ;;  %vm19080_vm11 = vcmp.eq.s32.totalorder %v16803_v45, 17  ;;  %vm19082_vm10 = vcmp.eq.s32.totalorder %v16813_v59, 0 }
 0x6f6   : > { %v7669_v44 = vadd.f32 %v17854_v34, %v7626_v12  ;;  %v7908_v10 = vsel %vm665_vm1, %v7905_v56, %v7907_v33  ;;  %v7754_v20 = vld [vmem:[#allocation3 + $0xf8] sm:$0xff]  ;;  %v7755_v30 = vld [vmem:[#allocation3 + $0x100] sm:$0xff]  ;;  %v7797_v34 = vld [vmem:[#allocation3 + $0x10a] sm:$0xff]  ;;  %vm19083_vm5 = vcmp.eq.s32.totalorder %v16859_v40, 0  ;;  %vm19089_vm4 = vcmp.eq.s32.totalorder %v17488_v6, 0 }
 0x6f7   : > { %7709 = vst.msk [vmem:[#allocation3 + $0x12b] sm:$0xff] %vm7672_vm0, %v7671_v37  ;;  %v8001_v61 = vsel %vm19080_vm11, %v7908_v10, %v7753_v32  ;;  %v7909_v49 = vrot.slane %v7754_v20, 6  ;;  %v7911_v23 = vrot.slane %v7755_v30, 6  ;;  %v7795_v16 = vld [vmem:[#allocation3 + $0xfa] sm:$0xff]  ;;  %v7796_v52 = vld [vmem:[#allocation3 + $0x102] sm:$0xff]  ;;  %vm19090_vm6 = vcmp.eq.s32.totalorder %v17509_v58, 0 }
 0x6f8   : > { %7707 = vst.msk [vmem:[#allocation3 + $0x11b] sm:$0xff] %vm7672_vm0, %v7669_v44  ;;  %v8042_v5 = vsel %vm4513_vm3, %v7794_v35, %v8001_v61  ;;  %vm19081_vm3 = vcmp.eq.s32.totalorder %v16807_v29, 0  ;;  %vm19091_vm14 = vcmp.eq.s32.totalorder %v17520_v63, 17  ;;  %vm19092_vm11 = vcmp.eq.s32.totalorder %v17520_v63, 0  ;;  %v8153_v63 = vld [vmem:[#allocation3 + $0x19] sm:$0xff] }
 0x6f9   : > { %8083 = vst.msk [vmem:[#allocation3 + $0xf0] sm:$0xff] %vm7672_vm0, %v8042_v5  ;;  %v7910_v56 = vsel %vm665_vm1, %v7907_v33, %v7909_v49  ;;  %v7912_v62 = vsel %vm665_vm1, %v7909_v49, %v7911_v23  ;;  %v7914_v17 = vsel %vm665_vm1, %v7911_v23, %v7913_v7 }
 0x6fa   : > { %v8002_v14 = vsel %vm4555_vm8, %v7910_v56, %v7754_v20  ;;  %v8003_v21 = vsel %vm4556_vm2, %v7912_v62, %v7755_v30  ;;  %v8004_v36 = vsel %vm4557_vm15, %v7914_v17, %v7756_v0  ;;  %v7757_v18 = vld [vmem:[#allocation3 + $0x110] sm:$0xff]  ;;  %vm19084_vm15 = vcmp.eq.s32.totalorder %v17439_v15, 17 }
 0x6fb   : > { %v7717_v2 = vld [vmem:[#allocation3 + $0x10e] sm:$0xff]  ;;  %v8043_v32 = vsel %vm19081_vm3, %v7795_v16, %v8002_v14  ;;  %v8044_v12 = vsel %vm19082_vm10, %v7796_v52, %v8003_v21  ;;  %v8045_v33 = vsel %vm19083_vm5, %v7797_v34, %v8004_v36  ;;  %v7915_v37 = vrot.slane %v7757_v18, 6 }
 0x6fc   : > { %7720 = vst.msk [vmem:[#allocation3 + $0x132] sm:$0xff] %vm7672_vm0, %v7717_v2  ;;  %8084 = vst.msk [vmem:[#allocation3 + $0xf8] sm:$0xff] %vm7672_vm0, %v8043_v32  ;;  %v7798_v0 = vld [vmem:[#allocation3 + $0x112] sm:$0xff]  ;;  %vm19085_vm8 = vcmp.eq.s32.totalorder %v17460_v25, 17  ;;  %vm19086_vm2 = vcmp.eq.s32.totalorder %v17488_v6, 17  ;;  %vm19094_vm3 = vcmp.eq.s32.totalorder %v17570_v43, 17 }
 0x6fd   : > { %8085 = vst.msk [vmem:[#allocation3 + $0x100] sm:$0xff] %vm7672_vm0, %v8044_v12  ;;  %8086 = vst.msk [vmem:[#allocation3 + $0x108] sm:$0xff] %vm7672_vm0, %v8045_v33  ;;  %v7916_v44 = vsel %vm665_vm1, %v7913_v7, %v7915_v37  ;;  %vm19095_vm10 = vcmp.eq.s32.totalorder %v17570_v43, 0  ;;  %vm8093_vm5 = vcmask 60416  }
 0x6fe   : > { %v7760_v10 = vld [vmem:[#allocation3 + $0x128] sm:$0xff]  ;;  %v8005_v20 = vsel %vm19084_vm15, %v7916_v44, %v7757_v18  ;;  %vm19096_vm15 = vcmp.eq.s32.totalorder %v17617_v31, 17 }
 0x6ff   : > { %v7921_v30 = vrot.slane %v7760_v10, 6  ;;  %v7718_v35 = vld [vmem:[#allocation3 + $0x116] sm:$0xff]  ;;  %v7719_v61 = vld [vmem:[#allocation3 + $0x11e] sm:$0x3]  ;;  %v8046_v23 = vsel %vm4517_vm13, %v7798_v0, %v8005_v20  ;;  %v7759_v5 = vld [vmem:[#allocation3 + $0x120] sm:$0xff]  ;;  %vm19087_vm13 = vcmp.eq.s32.totalorder %v17509_v58, 17 }
 0x700   : > { %v7758_v49 = vld [vmem:[#allocation3 + $0x118] sm:$0xff]  ;;  %7721 = vst.msk [vmem:[#allocation3 + $0x13a] sm:$0xff] %vm7672_vm0, %v7718_v35  ;;  %v7919_v16 = vrot.slane %v7759_v5, 6  ;;  %8087 = vst.msk [vmem:[#allocation3 + $0x110] sm:$0xff] %vm7672_vm0, %v8046_v23  ;;  %v7801_v21 = vld [vmem:[#allocation3 + $0x12a] sm:$0xff]  ;;  %v19093_v58 = vrot.slane %v17932_v60, 6 }
 0x701   : > { %7722 = vst.msk [vmem:[#allocation3 + $0x142] sm:$0x3] %vm7715_vm12, %v7719_v61  ;;  %v7917_v34 = vrot.slane %v7758_v49, 6  ;;  %v7799_v62 = vld [vmem:[#allocation3 + $0x11a] sm:$0xff]  ;;  %v7800_v18 = vld [vmem:[#allocation3 + $0x122] sm:$0xff]  ;;  %vm19088_vm12 = vcmp.eq.s32.totalorder %v17460_v25, 0 }
 0x702   : > { %v7922_v52 = vsel %vm665_vm1, %v7919_v16, %v7921_v30  ;;  %v8152_v23 = vld [vmem:[#allocation3 + $0x11] sm:$0xff] }
 0x703   : > { %v7918_v7 = vsel %vm665_vm1, %v7915_v37, %v7917_v34  ;;  %v7761_v56 = vld [vmem:[#allocation3 + $0x130] sm:$0xff]  ;;  %v7920_v17 = vsel %vm665_vm1, %v7917_v34, %v7919_v16  ;;  %v8008_v32 = vsel %vm19087_vm13, %v7922_v52, %v7760_v10  ;;  %v18248_v52 = vld [vmem:[#allocation16 + $0x8] sm:$0xf]  ;;  %vm11085_vm13 = vcmp.lt.s32.totalorder %v19009_v22, 16 }
 0x704   : > { %v8006_v14 = vsel %vm19085_vm8, %v7918_v7, %v7758_v49  ;;  %v7923_v36 = vrot.slane %v7761_v56, 6  ;;  %v8007_v2 = vsel %vm19086_vm2, %v7920_v17, %v7759_v5  ;;  %v8049_v37 = vsel %vm19090_vm6, %v7801_v21, %v8008_v32  ;;  %v7802_v44 = vld [vmem:[#allocation3 + $0x132] sm:$0xff]  ;;  %v8151_v34 = vld [vmem:[#allocation3 + $0x9] sm:$0xff]  ;;  %v8158_v32 = vld [vmem:[#allocation3 + $0x41] sm:$0xff] }
 0x705   : > { %v8047_v12 = vsel %vm19088_vm12, %v7799_v62, %v8006_v14  ;;  %v8048_v33 = vsel %vm19089_vm4, %v7800_v18, %v8007_v2  ;;  %8090 = vst.msk [vmem:[#allocation3 + $0x128] sm:$0xff] %vm7672_vm0, %v8049_v37  ;;  %v8155_v16 = vld [vmem:[#allocation3 + $0x29] sm:$0xff]  ;;  %v8154_v62 = vld [vmem:[#allocation3 + $0x21] sm:$0xff]  ;;  %v8496_v17 = vsel %vm8260_vm9, %v17847_v28, 0  ;;  %v8157_v14 = vld [vmem:[#allocation3 + $0x39] sm:$0xff]  ;;  %vm19097_vm8 = vcmp.eq.s32.totalorder %v17615_v53, 0 }
 0x706   : > { %8088 = vst.msk [vmem:[#allocation3 + $0x118] sm:$0xff] %vm7672_vm0, %v8047_v12  ;;  %v7924_v0 = vsel %vm665_vm1, %v7921_v30, %v7923_v36  ;;  %8089 = vst.msk [vmem:[#allocation3 + $0x120] sm:$0xff] %vm7672_vm0, %v8048_v33  ;;  %v8159_v21 = vld [vmem:[#allocation3 + $0x49] sm:$0xff]  ;;  %vm19098_vm2 = vcmp.eq.s32.totalorder %v17617_v31, 0  ;;  %v8168_v31 = vld [vmem:[#allocation3 + $0x91] sm:$0xff]  ;;  %vm11083_vm12 = vcmp.lt.s32.totalorder %v19003_v9, 16 }
 0x707   : > { %v8009_v10 = vsel %vm19091_vm14, %v7924_v0, %v7761_v56  ;;  %v8187_v56 = vpack.c.bf16 %v8153_v63, %v8152_v23  ;;  %v7762_v28 = vld [vmem:[#allocation3 + $0x138] sm:$0xff]  ;;  %v8190_v12 = vpack.c.bf16 %v8159_v21, %v8158_v32  ;;  %v8162_v63 = vld [vmem:[#allocation3 + $0x61] sm:$0xff]  ;;  %vm11086_vm4 = vcmp.lt.s32.totalorder %v19012_v1, 16 }
 0x708   : > { %v7763_v20 = vld [vmem:[#allocation3 + $0x140] sm:$0xf]  ;;  %v8050_v6 = vsel %vm19092_vm11, %v7802_v44, %v8009_v10  ;;  %v7925_v33 = vrot.slane %v7762_v28, 6  ;;  %v8172_v21 = vld [vmem:[#allocation3 + $0xb1] sm:$0xff]  ;;  %vm11084_vm6 = vcmp.lt.s32.totalorder %v19005_v4, 16  ;;  %vm11089_vm14 = vcmp.lt.s32.totalorder %v19021_v55, 16 }
 0x709   : > { %v7806_v35 = vrot.slane %v7763_v20, 2  ;;  %8091 = vst.msk [vmem:[#allocation3 + $0x130] sm:$0xff] %vm7672_vm0, %v8050_v6  ;;  %v7927_v18 = vrot.slane %v7763_v20, 6  ;;  %v7803_v44 = vld [vmem:[#allocation3 + $0x13a] sm:$0xff]  ;;  %v7804_v10 = vld [vmem:[#allocation3 + $0x142] sm:$0xf] }
 0x70a   : > { %v7926_v37 = vsel %vm665_vm1, %v7923_v36, %v7925_v33  ;;  %v8163_v36 = vld [vmem:[#allocation3 + $0x69] sm:$0xff] }
 0x70b   : > { %v7970_v61 = vsel %vm665_vm1, %v7806_v35, %v19093_v58  ;;  %v7928_v0 = vsel %vm665_vm1, %v7925_v33, %v7927_v18  ;;  %v8010_v6 = vsel %vm4563_vm7, %v7926_v37, %v7762_v28  ;;  %v8160_v58 = vld [vmem:[#allocation3 + $0x51] sm:$0xff]  ;;  %v8173_v18 = vld [vmem:[#allocation3 + $0xb9] sm:$0xff]  ;;  %v8174_v28 = vld [vmem:[#allocation3 + $0xc1] sm:$0xff]  ;;  %vm11081_vm1 = vcmp.lt.s32.totalorder %v17044_v54, 16 }
 0x70c   : > { %v7971_v30 = vsel %vm19094_vm3, %v7970_v61, %v17932_v60  ;;  %v8188_v60 = vpack.c.bf16 %v8155_v16, %v8154_v62  ;;  %v8011_v35 = vsel %vm19096_vm15, %v7928_v0, %v7763_v20  ;;  %v8161_v61 = vld [vmem:[#allocation3 + $0x59] sm:$0xff]  ;;  %v8164_v20 = vld [vmem:[#allocation3 + $0x71] sm:$0xff]  ;;  %v8167_v16 = vld [vmem:[#allocation3 + $0x89] sm:$0xff]  ;;  %v8197_v32 = vpack.c.bf16 %v8173_v18, %v8172_v21 }
 0x70d   : > { %v8012_v49 = vsel %vm19095_vm10, %v18035_v38, %v7971_v30  ;;  %v8156_v38 = vld [vmem:[#allocation3 + $0x31] sm:$0xff]  ;;  %v8051_v30 = vsel %vm19097_vm8, %v7803_v44, %v8010_v6  ;;  %v8191_v23 = vpack.c.bf16 %v8161_v61, %v8160_v58  ;;  %v8169_v62 = vld [vmem:[#allocation3 + $0x99] sm:$0xff]  ;;  %v8179_v0 = vld [vmem:[#allocation3 + $0xe9] sm:$0xff]  ;;  %vm11079_vm7 = vcmp.lt.s32.totalorder %v17570_v43, 16 }
 0x70e   : > { %8053 = vst.msk [vmem:[#allocation3] sm:$0xff] %vm7672_vm0, %v8012_v49  ;;  %v8189_v2 = vpack.c.bf16 %v8157_v14, %v8156_v38  ;;  %v8052_v49 = vsel %vm19098_vm2, %v7804_v10, %v8011_v35  ;;  %8092 = vst.msk [vmem:[#allocation3 + $0x138] sm:$0xff] %vm7672_vm0, %v8051_v30  ;;  %v8170_v38 = vld [vmem:[#allocation3 + $0xa1] sm:$0xff]  ;;  %v8176_v33 = vld [vmem:[#allocation3 + $0xd1] sm:$0xff]  ;;  %vm11090_vm3 = vcmp.lt.s32.totalorder %v19024_v57, 16  ;;  %vm11093_vm15 = vcmp.lt.s32.totalorder %v19038_v39, 16 }
 0x70f   : > { %8094 = vst.msk [vmem:[#allocation3 + $0x140] sm:$0xf] %vm8093_vm5, %v8052_v49  ;;  %v8177_v37 = vld [vmem:[#allocation3 + $0xd9] sm:$0xff]  ;;  %v8178_v10 = vld [vmem:[#allocation3 + $0xe1] sm:$0xff]  ;;  %v8180_v35 = vld [vmem:[#allocation3 + $0xf1] sm:$0xff]  ;;  %vm11094_vm2 = vcmp.lt.s32.totalorder %v19043_v3, 16 }
 0x710   : > { %v8199_v44 = vpack.c.bf16 %v8177_v37, %v8176_v33  ;;  %v8200_v6 = vpack.c.bf16 %v8179_v0, %v8178_v10  ;;  %v8181_v58 = vld [vmem:[#allocation3 + $0xf9] sm:$0xff]  ;;  %v8183_v61 = vld [vmem:[#allocation3 + $0x109] sm:$0xff]  ;;  %v8182_v49 = vld [vmem:[#allocation3 + $0x101] sm:$0xff] }
 0x711   : > { %v8201_v30 = vpack.c.bf16 %v8181_v58, %v8180_v35  ;;  %v8103_v21 = vld [vmem:[#allocation3 + $0x40] sm:$0xff]  ;;  %v8104_v18 = vld [vmem:[#allocation3 + $0x48] sm:$0xff]  ;;  %v8105_v37 = vld [vmem:[#allocation3 + $0x50] sm:$0xff] }
 0x712   : > { %v8108_v33 = vld [vmem:[#allocation3 + $0x68] sm:$0xff]  ;;  %v8110_v10 = vld [vmem:[#allocation3 + $0x78] sm:$0xff]  ;;  %v8109_v58 = vld [vmem:[#allocation3 + $0x70] sm:$0xff] }
 0x713   : > { %v8112_v35 = vld [vmem:[#allocation3 + $0x88] sm:$0xff] }
 0x715   : > { %v8150_v5 = vld [vmem:[#allocation3 + $0x1] sm:$0xff] }
 0x716   : > { %v8186_v7 = vpack.c.bf16 %v8151_v34, %v8150_v5  ;;  %v8192_v5 = vpack.c.bf16 %v8163_v36, %v8162_v63  ;;  %v8165_v34 = vld [vmem:[#allocation3 + $0x79] sm:$0xff]  ;;  %v8202_v36 = vpack.c.bf16 %v8183_v61, %v8182_v49  ;;  %v8138_v61 = vpack.c.bf16 %v8110_v10, %v8109_v58 }
 0x717   : > { %v8193_v53 = vpack.c.bf16 %v8165_v34, %v8164_v20  ;;  %v8185_v63 = vld [vmem:[#allocation3 + $0x119] sm:$0xff]  ;;  %v8096_v34 = vld [vmem:[#allocation3 + $0x8] sm:$0xff] }
 0x718   : > { %13293 = vmatprep.mubr.msk.bf16.mxu0 %vm7672_vm0, %v8186_v7  ;;  %v8166_v7 = vld [vmem:[#allocation3 + $0x81] sm:$0xff]  ;;  %v8114_v49 = vld [vmem:[#allocation3 + $0x98] sm:$0xff] }
 0x719   : > { %13294 = vmatmul.mubr.msk.bf16.vlgmr.msra.gmra.mrb[36].mxu0 %vm7672_vm0, %v8187_v56  ;;  %v8194_v56 = vpack.c.bf16 %v8167_v16, %v8166_v7  ;;  %v8098_v7 = vld [vmem:[#allocation3 + $0x18] sm:$0xff] }
 0x71a   : > { %13297 = vmatprep.mubr.msk.bf16.mxu0 %vm7672_vm0, %v8188_v60  ;;  %13330 = vmatpush3.bf16.msra.mxu0 %v8496_v17  ;;  %v8171_v17 = vld [vmem:[#allocation3 + $0xa9] sm:$0xff]  ;;  %v8195_v60 = vpack.c.bf16 %v8169_v62, %v8168_v31  ;;  %v8677_v58 = vld [vmem:[#allocation3 + $0x12] sm:$0xff] }
 0x71b   : > { %14510 = vmatprep.subr.msk.bf16.mxu0 %vm8260_vm9, %v18248_v52  ;;  %v8196_v14 = vpack.c.bf16 %v8171_v17, %v8170_v38  ;;  %v8100_v31 = vld [vmem:[#allocation3 + $0x28] sm:$0xff]  ;;  %v8786_v17 = vsel %vm8260_vm9, %v18248_v52, 0  ;;  %v8106_v52 = vld [vmem:[#allocation3 + $0x58] sm:$0xff] }
 0x71c   : > { %v18284_v38 = vld [vmem:[#allocation16 + $0xc] sm:$0xf]  ;;  %v8136_v0 = vpack.c.bf16 %v8106_v52, %v8105_v37  ;;  %v8125_v52 = vld [vmem:[#allocation3 + $0xf0] sm:$0xff]  ;;  %v8130_v37 = vld [vmem:[#allocation3 + $0x118] sm:$0xff] }
 0x721   : > { %13298 = vmatmul.mubr.msk.bf16.gmra.mrb[40].mxu0 %vm7672_vm0, %v8189_v2  ;;  %v8175_v2 = vld [vmem:[#allocation3 + $0xc9] sm:$0xff] }
 0x722   : > { %13301 = vmatprep.mubr.msk.bf16.mxu0 %vm7672_vm0, %v8190_v12  ;;  %v8198_v12 = vpack.c.bf16 %v8175_v2, %v8174_v28  ;;  %v8101_v2 = vld [vmem:[#allocation3 + $0x30] sm:$0xff]  ;;  %v8135_v28 = vpack.c.bf16 %v8104_v18, %v8103_v21 }
 0x729   : > { %13302 = vmatmul.mubr.msk.bf16.gmra.mrb[44].mxu0 %vm7672_vm0, %v8191_v23  ;;  %v8184_v23 = vld [vmem:[#allocation3 + $0x111] sm:$0xff] }
 0x72a   : > { %13305 = vmatprep.mubr.msk.bf16.mxu0 %vm7672_vm0, %v8192_v5  ;;  %v8095_v5 = vld [vmem:[#allocation3] sm:$0xff]  ;;  %v8203_v20 = vpack.c.bf16 %v8185_v63, %v8184_v23  ;;  %v8116_v23 = vld [vmem:[#allocation3 + $0xa8] sm:$0xff]  ;;  %v8113_v63 = vld [vmem:[#allocation3 + $0x90] sm:$0xff] }
 0x72b   : > { %v8131_v16 = vpack.c.bf16 %v8096_v34, %v8095_v5  ;;  %v8140_v5 = vpack.c.bf16 %v8114_v49, %v8113_v63  ;;  %v8118_v34 = vld [vmem:[#allocation3 + $0xb8] sm:$0xff] }
 0x731   : > { %13306 = vmatmul.mubr.msk.bf16.gmra.mrb[48].mxu0 %vm7672_vm0, %v8193_v53  ;;  %v8097_v53 = vld [vmem:[#allocation3 + $0x10] sm:$0xff] }
 0x732   : > { %13309 = vmatprep.mubr.msk.bf16.mxu0 %vm7672_vm0, %v8194_v56  ;;  %v8099_v56 = vld [vmem:[#allocation3 + $0x20] sm:$0xff]  ;;  %v8132_v62 = vpack.c.bf16 %v8098_v7, %v8097_v53  ;;  %v8120_v53 = vld [vmem:[#allocation3 + $0xc8] sm:$0xff]  ;;  %v8117_v7 = vld [vmem:[#allocation3 + $0xb0] sm:$0xff] }
 0x739   : > { %13310 = vmatmul.mubr.msk.bf16.gmra.mrb[52].mxu0 %vm7672_vm0, %v8195_v60  ;;  %v8133_v60 = vpack.c.bf16 %v8100_v31, %v8099_v56  ;;  %v8142_v56 = vpack.c.bf16 %v8118_v34, %v8117_v7  ;;  %v8682_v34 = vld [vmem:[#allocation3 + $0x3a] sm:$0xff]  ;;  %v8683_v7 = vld [vmem:[#allocation3 + $0x42] sm:$0xff] }
 0x73a   : > { %13313 = vmatprep.mubr.msk.bf16.mxu0 %vm7672_vm0, %v8196_v14  ;;  %v8102_v14 = vld [vmem:[#allocation3 + $0x38] sm:$0xff] }
 0x741   : > { %13314 = vmatmul.mubr.msk.bf16.gmra.mrb[56].mxu0 %vm7672_vm0, %v8197_v32  ;;  %v8134_v32 = vpack.c.bf16 %v8102_v14, %v8101_v2  ;;  %v8121_v14 = vld [vmem:[#allocation3 + $0xd0] sm:$0xff]  ;;  %v8126_v2 = vld [vmem:[#allocation3 + $0xf8] sm:$0xff] }
 0x742   : > { %13317 = vmatprep.mubr.msk.bf16.mxu0 %vm7672_vm0, %v8198_v12  ;;  %v8107_v12 = vld [vmem:[#allocation3 + $0x60] sm:$0xff] }
 0x749   : > { %13318 = vmatmul.mubr.msk.bf16.gmra.mrb[60].mxu0 %vm7672_vm0, %v8199_v44  ;;  %v8137_v44 = vpack.c.bf16 %v8108_v33, %v8107_v12  ;;  %v8146_v12 = vpack.c.bf16 %v8126_v2, %v8125_v52  ;;  %v8692_v2 = vld [vmem:[#allocation3 + $0x8a] sm:$0xff] }
 0x74a   : > { %13321 = vmatprep.mubr.msk.bf16.mxu0 %vm7672_vm0, %v8200_v6  ;;  %v8111_v6 = vld [vmem:[#allocation3 + $0x80] sm:$0xff] }
 0x751   : > { %13322 = vmatmul.mubr.msk.bf16.gmra.mrb[64].mxu0 %vm7672_vm0, %v8201_v30  ;;  %v8139_v30 = vpack.c.bf16 %v8112_v35, %v8111_v6  ;;  %v8676_v6 = vld [vmem:[#allocation3 + $0xa] sm:$0xff] }
 0x752   : > { %13325 = vmatprep.mubr.msk.bf16.mxu0 %vm7672_vm0, %v8202_v36  ;;  %v8115_v36 = vld [vmem:[#allocation3 + $0xa0] sm:$0xff] }
 0x759   : > { %13326 = vmatmul.mubr.msk.bf16.gmra.mrb[68].mxu0 %vm7672_vm0, %v8203_v20  ;;  %v8141_v20 = vpack.c.bf16 %v8116_v23, %v8115_v36  ;;  %v8679_v36 = vld [vmem:[#allocation3 + $0x22] sm:$0xff]  ;;  %v9112_v23 = vsel %vm8260_vm9, %v18284_v38, 0 }
 0x75a   : > { %13331 = vmatprep.mubr.msk.bf16.mxu0 %vm7672_vm0, %v8131_v16  ;;  %v8119_v16 = vld [vmem:[#allocation3 + $0xc0] sm:$0xff] }
 0x75b   : > { %v8143_v31 = vpack.c.bf16 %v8120_v53, %v8119_v16  ;;  %v8684_v16 = vld [vmem:[#allocation3 + $0x4a] sm:$0xff] }
 0x761   : > { %13332 = vmatmul.mubr.msk.bf16.vlgmr.msra.gmra.mrb[36].mxu0 %vm7672_vm0, %v8132_v62  ;;  %v8122_v62 = vld [vmem:[#allocation3 + $0xd8] sm:$0xff] }
 0x762   : > { %13335 = vmatprep.mubr.msk.bf16.mxu0 %vm7672_vm0, %v8133_v60  ;;  %13368 = vmatpush3.bf16.msra.mxu0 %v8786_v17  ;;  %v8123_v17 = vld [vmem:[#allocation3 + $0xe0] sm:$0xff]  ;;  %v8124_v60 = vld [vmem:[#allocation3 + $0xe8] sm:$0xff]  ;;  %v8144_v21 = vpack.c.bf16 %v8122_v62, %v8121_v14 }
 0x763   : > { %14511 = vmatprep.subr.msk.bf16.mxu0 %vm8260_vm9, %v18284_v38  ;;  %v8145_v18 = vpack.c.bf16 %v8124_v60, %v8123_v17  ;;  %v8715_v38 = vpack.c.bf16 %v8684_v16, %v8683_v7  ;;  %v8688_v62 = vld [vmem:[#allocation3 + $0x6a] sm:$0xff]  ;;  %v8687_v60 = vld [vmem:[#allocation3 + $0x62] sm:$0xff] }
 0x764   : > { %v8717_v14 = vpack.c.bf16 %v8688_v62, %v8687_v60  ;;  %v8703_v7 = vld [vmem:[#allocation3 + $0xe2] sm:$0xff]  ;;  %v8706_v62 = vld [vmem:[#allocation3 + $0xfa] sm:$0xff]  ;;  %v8708_v60 = vld [vmem:[#allocation3 + $0x10a] sm:$0xff] }
 0x769   : > { %13336 = vmatmul.mubr.msk.bf16.gmra.mrb[40].mxu0 %vm7672_vm0, %v8134_v32  ;;  %v8127_v32 = vld [vmem:[#allocation3 + $0x100] sm:$0xff] }
 0x76a   : > { %13339 = vmatprep.mubr.msk.bf16.mxu0 %vm7672_vm0, %v8135_v28  ;;  %v8128_v28 = vld [vmem:[#allocation3 + $0x108] sm:$0xff] }
 0x76b   : > { %v8147_v33 = vpack.c.bf16 %v8128_v28, %v8127_v32  ;;  %v8691_v28 = vld [vmem:[#allocation3 + $0x82] sm:$0xff] }
 0x76c   : > { %v8719_v52 = vpack.c.bf16 %v8692_v2, %v8691_v28  ;;  %v8709_v28 = vld [vmem:[#allocation3 + $0x112] sm:$0xff] }
 0x771   : > { %13340 = vmatmul.mubr.msk.bf16.gmra.mrb[44].mxu0 %vm7672_vm0, %v8136_v0  ;;  %v8675_v0 = vld [vmem:[#allocation3 + $0x2] sm:$0xff] }
 0x772   : > { %13343 = vmatprep.mubr.msk.bf16.mxu0 %vm7672_vm0, %v8137_v44  ;;  %v8129_v44 = vld [vmem:[#allocation3 + $0x110] sm:$0xff]  ;;  %v8711_v35 = vpack.c.bf16 %v8676_v6, %v8675_v0 }
 0x773   : > { %v8148_v10 = vpack.c.bf16 %v8130_v37, %v8129_v44  ;;  %v8696_v37 = vld [vmem:[#allocation3 + $0xaa] sm:$0xff]  ;;  %v8695_v44 = vld [vmem:[#allocation3 + $0xa2] sm:$0xff]  ;;  %v8697_v6 = vld [vmem:[#allocation3 + $0xb2] sm:$0xff] }
 0x779   : > { %13344 = vmatmul.mubr.msk.bf16.gmra.mrb[48].mxu0 %vm7672_vm0, %v8138_v61  ;;  %v8678_v61 = vld [vmem:[#allocation3 + $0x1a] sm:$0xff] }
 0x77a   : > { %13347 = vmatprep.mubr.msk.bf16.mxu0 %vm7672_vm0, %v8139_v30  ;;  %v8680_v30 = vld [vmem:[#allocation3 + $0x2a] sm:$0xff]  ;;  %v18306_v49 = vpack.c.bf16 %v8678_v61, %v8677_v58 }
 0x77b   : > { %v18310_v63 = vpack.c.bf16 %v8680_v30, %v8679_v36  ;;  %v8700_v58 = vld [vmem:[#allocation3 + $0xca] sm:$0xff]  ;;  %v8699_v30 = vld [vmem:[#allocation3 + $0xc2] sm:$0xff] }
 0x77c   : > { %v8723_v36 = vpack.c.bf16 %v8700_v58, %v8699_v30  ;;  %v18360_v58 = vld [vmem:[#allocation16 + $0x18] sm:$0xf] }
 0x77d   : > { %v9335_v30 = vld [vmem:[#allocation3 + $0x53] sm:$0xff] }
 0x781   : > { %13348 = vmatmul.mubr.msk.bf16.gmra.mrb[52].mxu0 %vm7672_vm0, %v8140_v5  ;;  %v18312_v5 = vld [vmem:[#allocation16 + $0x10] sm:$0xf] }
 0x782   : > { %13351 = vmatprep.mubr.msk.bf16.mxu0 %vm7672_vm0, %v8141_v20  ;;  %v8681_v20 = vld [vmem:[#allocation3 + $0x32] sm:$0xff] }
 0x783   : > { %v8714_v53 = vpack.c.bf16 %v8682_v34, %v8681_v20  ;;  %v8702_v20 = vld [vmem:[#allocation3 + $0xda] sm:$0xff]  ;;  %v8704_v34 = vld [vmem:[#allocation3 + $0xea] sm:$0xff] }
 0x789   : > { %13352 = vmatmul.mubr.msk.bf16.gmra.mrb[56].mxu0 %vm7672_vm0, %v8142_v56  ;;  %v8685_v56 = vld [vmem:[#allocation3 + $0x52] sm:$0xff] }
 0x78a   : > { %13355 = vmatprep.mubr.msk.bf16.mxu0 %vm7672_vm0, %v8143_v31  ;;  %v8686_v31 = vld [vmem:[#allocation3 + $0x5a] sm:$0xff] }
 0x78b   : > { %v8716_v17 = vpack.c.bf16 %v8686_v31, %v8685_v56  ;;  %v8725_v56 = vpack.c.bf16 %v8704_v34, %v8703_v7  ;;  %v8705_v31 = vld [vmem:[#allocation3 + $0xf2] sm:$0xff] }
 0x78c   : > { %v9339_v7 = vld [vmem:[#allocation3 + $0x73] sm:$0xff] }
 0x791   : > { %13356 = vmatmul.mubr.msk.bf16.gmra.mrb[60].mxu0 %vm7672_vm0, %v8144_v21  ;;  %v8689_v21 = vld [vmem:[#allocation3 + $0x72] sm:$0xff] }
 0x792   : > { %13359 = vmatprep.mubr.msk.bf16.mxu0 %vm7672_vm0, %v8145_v18  ;;  %v8690_v18 = vld [vmem:[#allocation3 + $0x7a] sm:$0xff] }
 0x793   : > { %v8718_v32 = vpack.c.bf16 %v8690_v18, %v8689_v21  ;;  %v8726_v21 = vpack.c.bf16 %v8706_v62, %v8705_v31  ;;  %v8707_v18 = vld [vmem:[#allocation3 + $0x102] sm:$0xff] }
 0x794   : > { %v8727_v2 = vpack.c.bf16 %v8708_v60, %v8707_v18  ;;  %v9337_v31 = vld [vmem:[#allocation3 + $0x63] sm:$0xff]  ;;  %v9343_v18 = vld [vmem:[#allocation3 + $0x93] sm:$0xff] }
 0x799   : > { %13360 = vmatmul.mubr.msk.bf16.gmra.mrb[64].mxu0 %vm7672_vm0, %v8146_v12  ;;  %v8693_v12 = vld [vmem:[#allocation3 + $0x92] sm:$0xff] }
 0x79a   : > { %13363 = vmatprep.mubr.msk.bf16.mxu0 %vm7672_vm0, %v8147_v33  ;;  %v8694_v33 = vld [vmem:[#allocation3 + $0x9a] sm:$0xff] }
 0x79b   : > { %v8720_v0 = vpack.c.bf16 %v8694_v33, %v8693_v12  ;;  %v8710_v12 = vld [vmem:[#allocation3 + $0x11a] sm:$0xff] }
 0x79c   : > { %v8728_v33 = vpack.c.bf16 %v8710_v12, %v8709_v28  ;;  %v9341_v28 = vld [vmem:[#allocation3 + $0x83] sm:$0xff] }
 0x7a1   : > { %13364 = vmatmul.mubr.msk.bf16.gmra.mrb[68].mxu0 %vm7672_vm0, %v8148_v10  ;;  %v8721_v10 = vpack.c.bf16 %v8696_v37, %v8695_v44  ;;  %v9438_v37 = vsel %vm8260_vm9, %v18312_v5, 0  ;;  %v9708_v44 = vld [vmem:[#allocation16 + $0x14] sm:$0xf] }
 0x7a2   : > { %13369 = vmatprep.mubr.msk.bf16.mxu0 %vm7672_vm0, %v8711_v35  ;;  %v8698_v35 = vld [vmem:[#allocation3 + $0xba] sm:$0xff] }
 0x7a3   : > { %v8722_v61 = vpack.c.bf16 %v8698_v35, %v8697_v6  ;;  %v9764_v6 = vsel %vm8260_vm9, %v9708_v44, 0 }
 0x7a9   : > { %13370 = vmatmul.mubr.msk.bf16.vlgmr.msra.gmra.mrb[36].mxu0 %vm7672_vm0, %v18306_v49 }
 0x7aa   : > { %13373 = vmatprep.mubr.msk.bf16.mxu0 %vm7672_vm0, %v18310_v63  ;;  %13406 = vmatpush3.bf16.msra.mxu0 %v9112_v23  ;;  %v8701_v23 = vld [vmem:[#allocation3 + $0xd2] sm:$0xff] }
 0x7ab   : > { %14512 = vmatprep.subr.msk.bf16.mxu0 %vm8260_vm9, %v18312_v5  ;;  %v8724_v16 = vpack.c.bf16 %v8702_v20, %v8701_v23  ;;  %v9328_v5 = vld [vmem:[#allocation3 + $0x1b] sm:$0xff]  ;;  %v9333_v23 = vld [vmem:[#allocation3 + $0x43] sm:$0xff] }
 0x7b1   : > { %13374 = vmatmul.mubr.msk.bf16.gmra.mrb[40].mxu0 %vm7672_vm0, %v8714_v53 }
 0x7b2   : > { %13377 = vmatprep.mubr.msk.bf16.mxu0 %vm7672_vm0, %v8715_v38 }
 0x7b9   : > { %13378 = vmatmul.mubr.msk.bf16.gmra.mrb[44].mxu0 %vm7672_vm0, %v8716_v17 }
 0x7ba   : > { %13381 = vmatprep.mubr.msk.bf16.mxu0 %vm7672_vm0, %v8717_v14 }
 0x7c1   : > { %13382 = vmatmul.mubr.msk.bf16.gmra.mrb[48].mxu0 %vm7672_vm0, %v8718_v32 }
 0x7c2   : > { %13385 = vmatprep.mubr.msk.bf16.mxu0 %vm7672_vm0, %v8719_v52 }
 0x7c9   : > { %13386 = vmatmul.mubr.msk.bf16.gmra.mrb[52].mxu0 %vm7672_vm0, %v8720_v0 }
 0x7ca   : > { %13389 = vmatprep.mubr.msk.bf16.mxu0 %vm7672_vm0, %v8721_v10 }
 0x7d1   : > { %13390 = vmatmul.mubr.msk.bf16.gmra.mrb[56].mxu0 %vm7672_vm0, %v8722_v61 }
 0x7d2   : > { %13393 = vmatprep.mubr.msk.bf16.mxu0 %vm7672_vm0, %v8723_v36 }
 0x7d9   : > { %13394 = vmatmul.mubr.msk.bf16.gmra.mrb[60].mxu0 %vm7672_vm0, %v8724_v16 }
 0x7da   : > { %13397 = vmatprep.mubr.msk.bf16.mxu0 %vm7672_vm0, %v8725_v56 }
 0x7e1   : > { %13398 = vmatmul.mubr.msk.bf16.gmra.mrb[64].mxu0 %vm7672_vm0, %v8726_v21 }
 0x7e2   : > { %13401 = vmatprep.mubr.msk.bf16.mxu0 %vm7672_vm0, %v8727_v2 }
 0x7e9   : > { %13402 = vmatmul.mubr.msk.bf16.gmra.mrb[68].mxu0 %vm7672_vm0, %v8728_v33 }
 0x7ea   : > { %13407 = vmatprep.mubr.msk.bf16.mxu0 %vm7672_vm0, %v18306_v49  ;;  %v9036_v49 = vld [vmem:[#allocation3 + $0x12a] sm:$0xff] }
 0x7f1   : > { %13408 = vmatmul.mubr.msk.bf16.vlgmr.msra.gmra.mrb[36].mxu0 %vm7672_vm0, %v18310_v63  ;;  %v9327_v63 = vld [vmem:[#allocation3 + $0x13] sm:$0xff] }
 0x7f2   : > { %13411 = vmatprep.mubr.msk.bf16.mxu0 %vm7672_vm0, %v8714_v53  ;;  %13444 = vmatpush3.bf16.msra.mxu0 %v9438_v37  ;;  %v9035_v53 = vld [vmem:[#allocation3 + $0x122] sm:$0xff]  ;;  %v9346_v37 = vld [vmem:[#allocation3 + $0xab] sm:$0xff] }
 0x7f3   : > { %14513 = vmatprep.subr.msk.bf16.mxu0 %vm8260_vm9, %v9708_v44  ;;  %v9347_v44 = vld [vmem:[#allocation3 + $0xb3] sm:$0xff] }
 0x7f9   : > { %13412 = vmatmul.mubr.msk.bf16.gmra.mrb[40].mxu0 %vm7672_vm0, %v8715_v38  ;;  %v9054_v38 = vpack.c.bf16 %v9036_v49, %v9035_v53  ;;  %v9348_v49 = vld [vmem:[#allocation3 + $0xbb] sm:$0xff] }
 0x7fa   : > { %13415 = vmatprep.mubr.msk.bf16.mxu0 %vm7672_vm0, %v8716_v17  ;;  %v9363_v17 = vpack.c.bf16 %v9328_v5, %v9327_v63  ;;  %v9345_v63 = vld [vmem:[#allocation3 + $0xa3] sm:$0xff]  ;;  %v9373_v53 = vpack.c.bf16 %v9348_v49, %v9347_v44  ;;  %v10090_v49 = vsel %vm8260_vm9, %v18360_v58, 0 }
 0x7fb   : > { %v9372_v5 = vpack.c.bf16 %v9346_v37, %v9345_v63  ;;  %v9655_v37 = vld [vmem:[#allocation3 + $0x24] sm:$0xff] }
 0x801   : > { %13416 = vmatmul.mubr.msk.bf16.gmra.mrb[44].mxu0 %vm7672_vm0, %v8717_v14  ;;  %v9330_v14 = vld [vmem:[#allocation3 + $0x2b] sm:$0xff] }
 0x802   : > { %13419 = vmatprep.mubr.msk.bf16.mxu0 %vm7672_vm0, %v8718_v32  ;;  %v9331_v32 = vld [vmem:[#allocation3 + $0x33] sm:$0xff] }
 0x809   : > { %13420 = vmatmul.mubr.msk.bf16.gmra.mrb[48].mxu0 %vm7672_vm0, %v8719_v52  ;;  %v9332_v52 = vld [vmem:[#allocation3 + $0x3b] sm:$0xff] }
 0x80a   : > { %13423 = vmatprep.mubr.msk.bf16.mxu0 %vm7672_vm0, %v8720_v0  ;;  %v9329_v0 = vld [vmem:[#allocation3 + $0x23] sm:$0xff]  ;;  %v9365_v35 = vpack.c.bf16 %v9332_v52, %v9331_v32 }
 0x80b   : > { %v9349_v32 = vld [vmem:[#allocation3 + $0xc3] sm:$0xff] }
 0x811   : > { %13424 = vmatmul.mubr.msk.bf16.gmra.mrb[52].mxu0 %vm7672_vm0, %v8721_v10  ;;  %v9364_v10 = vpack.c.bf16 %v9330_v14, %v9329_v0  ;;  %v9352_v14 = vld [vmem:[#allocation3 + $0xdb] sm:$0xff] }
 0x812   : > { %13427 = vmatprep.mubr.msk.bf16.mxu0 %vm7672_vm0, %v8722_v61  ;;  %v9334_v61 = vld [vmem:[#allocation3 + $0x4b] sm:$0xff] }
 0x813   : > { %v9366_v20 = vpack.c.bf16 %v9334_v61, %v9333_v23  ;;  %v9353_v61 = vld [vmem:[#allocation3 + $0xe3] sm:$0xff]  ;;  %v9358_v23 = vld [vmem:[#allocation3 + $0x10b] sm:$0xff] }
 0x819   : > { %13428 = vmatmul.mubr.msk.bf16.gmra.mrb[56].mxu0 %vm7672_vm0, %v8723_v36  ;;  %v9336_v36 = vld [vmem:[#allocation3 + $0x5b] sm:$0xff] }
 0x81a   : > { %13431 = vmatprep.mubr.msk.bf16.mxu0 %vm7672_vm0, %v8724_v16  ;;  %v9367_v34 = vpack.c.bf16 %v9336_v36, %v9335_v30  ;;  %v9338_v16 = vld [vmem:[#allocation3 + $0x6b] sm:$0xff] }
 0x81b   : > { %v9368_v62 = vpack.c.bf16 %v9338_v16, %v9337_v31  ;;  %v9357_v16 = vld [vmem:[#allocation3 + $0x103] sm:$0xff]  ;;  %v9362_v31 = vld [vmem:[#allocation3 + $0x12b] sm:$0xff] }
 0x821   : > { %13432 = vmatmul.mubr.msk.bf16.gmra.mrb[60].mxu0 %vm7672_vm0, %v8725_v56  ;;  %v9340_v56 = vld [vmem:[#allocation3 + $0x7b] sm:$0xff] }
 0x822   : > { %13435 = vmatprep.mubr.msk.bf16.mxu0 %vm7672_vm0, %v8726_v21  ;;  %v9369_v60 = vpack.c.bf16 %v9340_v56, %v9339_v7  ;;  %v9342_v21 = vld [vmem:[#allocation3 + $0x8b] sm:$0xff]  ;;  %v9378_v7 = vpack.c.bf16 %v9358_v23, %v9357_v16  ;;  %v9670_v23 = vld [vmem:[#allocation3 + $0x9c] sm:$0xff] }
 0x823   : > { %v9370_v12 = vpack.c.bf16 %v9342_v21, %v9341_v28  ;;  %v9361_v21 = vld [vmem:[#allocation3 + $0x123] sm:$0xff]  ;;  %v9656_v28 = vld [vmem:[#allocation3 + $0x2c] sm:$0xff] }
 0x824   : > { %v18382_v44 = vpack.c.bf16 %v9656_v28, %v9655_v37  ;;  %v9678_v28 = vld [vmem:[#allocation3 + $0xdc] sm:$0xff] }
 0x829   : > { %13436 = vmatmul.mubr.msk.bf16.gmra.mrb[64].mxu0 %vm7672_vm0, %v8727_v2  ;;  %v9344_v2 = vld [vmem:[#allocation3 + $0x9b] sm:$0xff] }
 0x82a   : > { %13439 = vmatprep.mubr.msk.bf16.mxu0 %vm7672_vm0, %v8728_v33  ;;  %v9371_v33 = vpack.c.bf16 %v9344_v2, %v9343_v18  ;;  %v9380_v18 = vpack.c.bf16 %v9362_v31, %v9361_v21  ;;  %v9674_v31 = vld [vmem:[#allocation3 + $0xbc] sm:$0xff] }
 0x831   : > { %13440 = vmatmul.mubr.msk.bf16.gmra.mrb[68].mxu0 %vm7672_vm0, %v9054_v38  ;;  %v9350_v38 = vld [vmem:[#allocation3 + $0xcb] sm:$0xff] }
 0x832   : > { %13445 = vmatprep.mubr.msk.bf16.mxu0 %vm7672_vm0, %v9363_v17  ;;  %v9351_v17 = vld [vmem:[#allocation3 + $0xd3] sm:$0xff]  ;;  %v9374_v52 = vpack.c.bf16 %v9350_v38, %v9349_v32 }
 0x833   : > { %v9375_v0 = vpack.c.bf16 %v9352_v14, %v9351_v17  ;;  %v9661_v38 = vld [vmem:[#allocation3 + $0x54] sm:$0xff]  ;;  %v9662_v17 = vld [vmem:[#allocation3 + $0x5c] sm:$0xff]  ;;  %v9659_v14 = vld [vmem:[#allocation3 + $0x44] sm:$0xff] }
 0x839   : > { %13446 = vmatmul.mubr.msk.bf16.vlgmr.msra.gmra.mrb[36].mxu0 %vm7672_vm0, %v9364_v10  ;;  %v9354_v10 = vld [vmem:[#allocation3 + $0xeb] sm:$0xff] }
 0x83a   : > { %13449 = vmatprep.mubr.msk.bf16.mxu0 %vm7672_vm0, %v9365_v35  ;;  %13482 = vmatpush3.bf16.msra.mxu0 %v9764_v6  ;;  %v9355_v6 = vld [vmem:[#allocation3 + $0xf3] sm:$0xff]  ;;  %v9356_v35 = vld [vmem:[#allocation3 + $0xfb] sm:$0xff]  ;;  %v9376_v30 = vpack.c.bf16 %v9354_v10, %v9353_v61 }
 0x83b   : > { %14514 = vmatprep.subr.msk.bf16.mxu0 %vm8260_vm9, %v18360_v58  ;;  %v9377_v36 = vpack.c.bf16 %v9356_v35, %v9355_v6  ;;  %v9693_v58 = vpack.c.bf16 %v9662_v17, %v9661_v38  ;;  %v9666_v10 = vld [vmem:[#allocation3 + $0x7c] sm:$0xff]  ;;  %v9663_v6 = vld [vmem:[#allocation3 + $0x64] sm:$0xff] }
 0x83c   : > { %v9682_v38 = vld [vmem:[#allocation3 + $0xfc] sm:$0xff]  ;;  %v9679_v17 = vld [vmem:[#allocation3 + $0xe4] sm:$0xff] }
 0x841   : > { %13450 = vmatmul.mubr.msk.bf16.gmra.mrb[40].mxu0 %vm7672_vm0, %v9366_v20  ;;  %v9359_v20 = vld [vmem:[#allocation3 + $0x113] sm:$0xff] }
 0x842   : > { %13453 = vmatprep.mubr.msk.bf16.mxu0 %vm7672_vm0, %v9367_v34  ;;  %v9360_v34 = vld [vmem:[#allocation3 + $0x11b] sm:$0xff] }
 0x843   : > { %v9379_v56 = vpack.c.bf16 %v9360_v34, %v9359_v20  ;;  %v9667_v20 = vld [vmem:[#allocation3 + $0x84] sm:$0xff] }
 0x849   : > { %13454 = vmatmul.mubr.msk.bf16.gmra.mrb[44].mxu0 %vm7672_vm0, %v9368_v62  ;;  %v9653_v62 = vld [vmem:[#allocation3 + $0x14] sm:$0xff] }
 0x84a   : > { %13457 = vmatprep.mubr.msk.bf16.mxu0 %vm7672_vm0, %v9369_v60  ;;  %v9654_v60 = vld [vmem:[#allocation3 + $0x1c] sm:$0xff] }
 0x84b   : > { %v9689_v2 = vpack.c.bf16 %v9654_v60, %v9653_v62  ;;  %v9671_v62 = vld [vmem:[#allocation3 + $0xa4] sm:$0xff] }
 0x851   : > { %13458 = vmatmul.mubr.msk.bf16.gmra.mrb[48].mxu0 %vm7672_vm0, %v9370_v12  ;;  %v9657_v12 = vld [vmem:[#allocation3 + $0x34] sm:$0xff] }
 0x852   : > { %13461 = vmatprep.mubr.msk.bf16.mxu0 %vm7672_vm0, %v9371_v33  ;;  %v9658_v33 = vld [vmem:[#allocation3 + $0x3c] sm:$0xff] }
 0x853   : > { %v18386_v63 = vpack.c.bf16 %v9658_v33, %v9657_v12  ;;  %v9675_v12 = vld [vmem:[#allocation3 + $0xc4] sm:$0xff] }
 0x859   : > { %13462 = vmatmul.mubr.msk.bf16.gmra.mrb[52].mxu0 %vm7672_vm0, %v9372_v5  ;;  %v18388_v5 = vld [vmem:[#allocation16 + $0x1c] sm:$0xf] }
 0x85a   : > { %13465 = vmatprep.mubr.msk.bf16.mxu0 %vm7672_vm0, %v9373_v53  ;;  %v9660_v53 = vld [vmem:[#allocation3 + $0x4c] sm:$0xff] }
 0x85b   : > { %v9692_v32 = vpack.c.bf16 %v9660_v53, %v9659_v14  ;;  %v9681_v53 = vld [vmem:[#allocation3 + $0xf4] sm:$0xff] }
 0x861   : > { %13466 = vmatmul.mubr.msk.bf16.gmra.mrb[56].mxu0 %vm7672_vm0, %v9374_v52  ;;  %v9664_v52 = vld [vmem:[#allocation3 + $0x6c] sm:$0xff] }
 0x862   : > { %13469 = vmatprep.mubr.msk.bf16.mxu0 %vm7672_vm0, %v9375_v0  ;;  %v9665_v0 = vld [vmem:[#allocation3 + $0x74] sm:$0xff]  ;;  %v9694_v35 = vpack.c.bf16 %v9664_v52, %v9663_v6  ;;  %v9703_v52 = vpack.c.bf16 %v9682_v38, %v9681_v53  ;;  %v9686_v6 = vld [vmem:[#allocation3 + $0x11c] sm:$0xff] }
 0x863   : > { %v9695_v61 = vpack.c.bf16 %v9666_v10, %v9665_v0  ;;  %v9684_v0 = vld [vmem:[#allocation3 + $0x10c] sm:$0xff]  ;;  %v9685_v10 = vld [vmem:[#allocation3 + $0x114] sm:$0xff] }
 0x864   : > { %v10315_v38 = vld [vmem:[#allocation3 + $0x75] sm:$0xff] }
 0x869   : > { %13470 = vmatmul.mubr.msk.bf16.gmra.mrb[60].mxu0 %vm7672_vm0, %v9376_v30  ;;  %v9668_v30 = vld [vmem:[#allocation3 + $0x8c] sm:$0xff] }
 0x86a   : > { %13473 = vmatprep.mubr.msk.bf16.mxu0 %vm7672_vm0, %v9377_v36  ;;  %v9669_v36 = vld [vmem:[#allocation3 + $0x94] sm:$0xff]  ;;  %v9696_v34 = vpack.c.bf16 %v9668_v30, %v9667_v20  ;;  %v9683_v30 = vld [vmem:[#allocation3 + $0x104] sm:$0xff]  ;;  %v9688_v20 = vld [vmem:[#allocation3 + $0x12c] sm:$0xff] }
 0x86b   : > { %v9697_v16 = vpack.c.bf16 %v9670_v23, %v9669_v36  ;;  %v9704_v36 = vpack.c.bf16 %v9684_v0, %v9683_v30  ;;  %v9705_v23 = vpack.c.bf16 %v9686_v6, %v9685_v10  ;;  %v10317_v0 = vld [vmem:[#allocation3 + $0x85] sm:$0xff]  ;;  %v10319_v6 = vld [vmem:[#allocation3 + $0x95] sm:$0xff]  ;;  %v10320_v30 = vld [vmem:[#allocation3 + $0x9d] sm:$0xff] }
 0x871   : > { %13474 = vmatmul.mubr.msk.bf16.gmra.mrb[64].mxu0 %vm7672_vm0, %v9378_v7  ;;  %v9672_v7 = vld [vmem:[#allocation3 + $0xac] sm:$0xff] }
 0x872   : > { %13477 = vmatprep.mubr.msk.bf16.mxu0 %vm7672_vm0, %v9379_v56  ;;  %v9673_v56 = vld [vmem:[#allocation3 + $0xb4] sm:$0xff]  ;;  %v9698_v60 = vpack.c.bf16 %v9672_v7, %v9671_v62  ;;  %v9687_v7 = vld [vmem:[#allocation3 + $0x124] sm:$0xff]  ;;  %v10686_v62 = vld [vmem:[#allocation16 + $0x20] sm:$0xf] }
 0x873   : > { %v9699_v21 = vpack.c.bf16 %v9674_v31, %v9673_v56  ;;  %v9706_v56 = vpack.c.bf16 %v9688_v20, %v9687_v7  ;;  %v10416_v31 = vsel %vm8260_vm9, %v18388_v5, 0  ;;  %v10321_v20 = vld [vmem:[#allocation3 + $0xa5] sm:$0xff] }
 0x879   : > { %13478 = vmatmul.mubr.msk.bf16.gmra.mrb[68].mxu0 %vm7672_vm0, %v9380_v18  ;;  %v9676_v18 = vld [vmem:[#allocation3 + $0xcc] sm:$0xff] }
 0x87a   : > { %13483 = vmatprep.mubr.msk.bf16.mxu0 %vm7672_vm0, %v9689_v2  ;;  %v9677_v2 = vld [vmem:[#allocation3 + $0xd4] sm:$0xff]  ;;  %v9700_v33 = vpack.c.bf16 %v9676_v18, %v9675_v12  ;;  %v10742_v18 = vsel %vm8260_vm9, %v10686_v62, 0  ;;  %v10312_v12 = vld [vmem:[#allocation3 + $0x5d] sm:$0xff] }
 0x87b   : > { %v9701_v37 = vpack.c.bf16 %v9678_v28, %v9677_v2  ;;  %v10311_v28 = vld [vmem:[#allocation3 + $0x55] sm:$0xff] }
 0x881   : > { %13484 = vmatmul.mubr.msk.bf16.vlgmr.msra.gmra.mrb[36].mxu0 %vm7672_vm0, %v18382_v44 }
 0x882   : > { %13487 = vmatprep.mubr.msk.bf16.mxu0 %vm7672_vm0, %v18386_v63  ;;  %13520 = vmatpush3.bf16.msra.mxu0 %v10090_v49  ;;  %v9680_v49 = vld [vmem:[#allocation3 + $0xec] sm:$0xff] }
 0x883   : > { %14515 = vmatprep.subr.msk.bf16.mxu0 %vm8260_vm9, %v18388_v5  ;;  %v9702_v14 = vpack.c.bf16 %v9680_v49, %v9679_v17  ;;  %v10306_v5 = vld [vmem:[#allocation3 + $0x2d] sm:$0xff]  ;;  %v10313_v49 = vld [vmem:[#allocation3 + $0x65] sm:$0xff]  ;;  %v10316_v17 = vld [vmem:[#allocation3 + $0x7d] sm:$0xff] }
 0x889   : > { %13488 = vmatmul.mubr.msk.bf16.gmra.mrb[40].mxu0 %vm7672_vm0, %v9692_v32 }
 0x88a   : > { %13491 = vmatprep.mubr.msk.bf16.mxu0 %vm7672_vm0, %v9693_v58 }
 0x891   : > { %13492 = vmatmul.mubr.msk.bf16.gmra.mrb[44].mxu0 %vm7672_vm0, %v9694_v35 }
 0x892   : > { %13495 = vmatprep.mubr.msk.bf16.mxu0 %vm7672_vm0, %v9695_v61 }
 0x899   : > { %13496 = vmatmul.mubr.msk.bf16.gmra.mrb[48].mxu0 %vm7672_vm0, %v9696_v34 }
 0x89a   : > { %13499 = vmatprep.mubr.msk.bf16.mxu0 %vm7672_vm0, %v9697_v16 }
 0x8a1   : > { %13500 = vmatmul.mubr.msk.bf16.gmra.mrb[52].mxu0 %vm7672_vm0, %v9698_v60 }
 0x8a2   : > { %13503 = vmatprep.mubr.msk.bf16.mxu0 %vm7672_vm0, %v9699_v21 }
 0x8a9   : > { %13504 = vmatmul.mubr.msk.bf16.gmra.mrb[56].mxu0 %vm7672_vm0, %v9700_v33 }
 0x8aa   : > { %13507 = vmatprep.mubr.msk.bf16.mxu0 %vm7672_vm0, %v9701_v37 }
 0x8b1   : > { %13508 = vmatmul.mubr.msk.bf16.gmra.mrb[60].mxu0 %vm7672_vm0, %v9702_v14 }
 0x8b2   : > { %13511 = vmatprep.mubr.msk.bf16.mxu0 %vm7672_vm0, %v9703_v52 }
 0x8b9   : > { %13512 = vmatmul.mubr.msk.bf16.gmra.mrb[64].mxu0 %vm7672_vm0, %v9704_v36 }
 0x8ba   : > { %13515 = vmatprep.mubr.msk.bf16.mxu0 %vm7672_vm0, %v9705_v23 }
 0x8c1   : > { %13516 = vmatmul.mubr.msk.bf16.gmra.mrb[68].mxu0 %vm7672_vm0, %v9706_v56 }
 0x8c2   : > { %13521 = vmatprep.mubr.msk.bf16.mxu0 %vm7672_vm0, %v18382_v44  ;;  %v10013_v44 = vld [vmem:[#allocation3 + $0x134] sm:$0xff] }
 0x8c9   : > { %13522 = vmatmul.mubr.msk.bf16.vlgmr.msra.gmra.mrb[36].mxu0 %vm7672_vm0, %v18386_v63  ;;  %v10014_v63 = vld [vmem:[#allocation3 + $0x13c] sm:$0xff] }
 0x8ca   : > { %13525 = vmatprep.mubr.msk.bf16.mxu0 %vm7672_vm0, %v9692_v32  ;;  %13558 = vmatpush3.bf16.msra.mxu0 %v10416_v31  ;;  %v10032_v32 = vpack.c.bf16 %v10014_v63, %v10013_v44  ;;  %v10324_v31 = vld [vmem:[#allocation3 + $0xbd] sm:$0xff]  ;;  %v10325_v63 = vld [vmem:[#allocation3 + $0xc5] sm:$0xff] }
 0x8cb   : > { %14516 = vmatprep.subr.msk.bf16.mxu0 %vm8260_vm9, %v10686_v62  ;;  %v10326_v62 = vld [vmem:[#allocation3 + $0xcd] sm:$0xff]  ;;  %vm11080_vm9 = vcmp.lt.s32.totalorder %v16960_v8, 16 }
 0x8d1   : > { %13526 = vmatmul.mubr.msk.bf16.gmra.mrb[40].mxu0 %vm7672_vm0, %v9693_v58  ;;  %v10305_v58 = vld [vmem:[#allocation3 + $0x25] sm:$0xff] }
 0x8d2   : > { %13529 = vmatprep.mubr.msk.bf16.mxu0 %vm7672_vm0, %v9694_v35  ;;  %v10341_v35 = vpack.c.bf16 %v10306_v5, %v10305_v58  ;;  %v10351_v5 = vpack.c.bf16 %v10326_v62, %v10325_v63  ;;  %v10328_v58 = vld [vmem:[#allocation3 + $0xdd] sm:$0xff]  ;;  %v10640_v63 = vld [vmem:[#allocation3 + $0x6e] sm:$0xff] }
 0x8d3   : > { %v10637_v62 = vld [vmem:[#allocation3 + $0x56] sm:$0xff] }
 0x8d9   : > { %13530 = vmatmul.mubr.msk.bf16.gmra.mrb[44].mxu0 %vm7672_vm0, %v9695_v61  ;;  %v10307_v61 = vld [vmem:[#allocation3 + $0x35] sm:$0xff] }
 0x8da   : > { %13533 = vmatprep.mubr.msk.bf16.mxu0 %vm7672_vm0, %v9696_v34  ;;  %v10308_v34 = vld [vmem:[#allocation3 + $0x3d] sm:$0xff] }
 0x8e1   : > { %13534 = vmatmul.mubr.msk.bf16.gmra.mrb[48].mxu0 %vm7672_vm0, %v9697_v16  ;;  %v10310_v16 = vld [vmem:[#allocation3 + $0x4d] sm:$0xff] }
 0x8e2   : > { %13537 = vmatprep.mubr.msk.bf16.mxu0 %vm7672_vm0, %v9698_v60  ;;  %v10342_v60 = vpack.c.bf16 %v10308_v34, %v10307_v61  ;;  %v10329_v34 = vld [vmem:[#allocation3 + $0xe5] sm:$0xff] }
 0x8e9   : > { %13538 = vmatmul.mubr.msk.bf16.gmra.mrb[52].mxu0 %vm7672_vm0, %v9699_v21  ;;  %v10309_v21 = vld [vmem:[#allocation3 + $0x45] sm:$0xff] }
 0x8ea   : > { %13541 = vmatprep.mubr.msk.bf16.mxu0 %vm7672_vm0, %v9700_v33  ;;  %v10343_v2 = vpack.c.bf16 %v10310_v16, %v10309_v21  ;;  %v10314_v33 = vld [vmem:[#allocation3 + $0x6d] sm:$0xff]  ;;  %v10332_v21 = vld [vmem:[#allocation3 + $0xfd] sm:$0xff] }
 0x8eb   : > { %v10345_v53 = vpack.c.bf16 %v10314_v33, %v10313_v49  ;;  %v10335_v33 = vld [vmem:[#allocation3 + $0x115] sm:$0xff]  ;;  %v10338_v49 = vld [vmem:[#allocation3 + $0x12d] sm:$0xff] }
 0x8f1   : > { %13542 = vmatmul.mubr.msk.bf16.gmra.mrb[56].mxu0 %vm7672_vm0, %v9701_v37  ;;  %v10344_v37 = vpack.c.bf16 %v10312_v12, %v10311_v28  ;;  %v10333_v28 = vld [vmem:[#allocation3 + $0x105] sm:$0xff] }
 0x8f2   : > { %13545 = vmatprep.mubr.msk.bf16.mxu0 %vm7672_vm0, %v9702_v14  ;;  %v10318_v14 = vld [vmem:[#allocation3 + $0x8d] sm:$0xff] }
 0x8f3   : > { %v10347_v10 = vpack.c.bf16 %v10318_v14, %v10317_v0  ;;  %v10339_v14 = vld [vmem:[#allocation3 + $0x135] sm:$0xff] }
 0x8f4   : > { %v10632_v0 = vld [vmem:[#allocation3 + $0x2e] sm:$0xff] }
 0x8f9   : > { %13546 = vmatmul.mubr.msk.bf16.gmra.mrb[60].mxu0 %vm7672_vm0, %v9703_v52  ;;  %v10346_v52 = vpack.c.bf16 %v10316_v17, %v10315_v38  ;;  %v10337_v38 = vld [vmem:[#allocation3 + $0x125] sm:$0xff] }
 0x8fa   : > { %13549 = vmatprep.mubr.msk.bf16.mxu0 %vm7672_vm0, %v9704_v36  ;;  %v10322_v36 = vld [vmem:[#allocation3 + $0xad] sm:$0xff]  ;;  %v10357_v17 = vpack.c.bf16 %v10338_v49, %v10337_v38  ;;  %v10649_v49 = vld [vmem:[#allocation3 + $0xb6] sm:$0xff] }
 0x8fb   : > { %v10349_v7 = vpack.c.bf16 %v10322_v36, %v10321_v20  ;;  %v10633_v36 = vld [vmem:[#allocation3 + $0x36] sm:$0xff]  ;;  %v10636_v20 = vld [vmem:[#allocation3 + $0x4e] sm:$0xff] }
 0x8fc   : > { %v10652_v38 = vld [vmem:[#allocation3 + $0xce] sm:$0xff] }
 0x901   : > { %13550 = vmatmul.mubr.msk.bf16.gmra.mrb[64].mxu0 %vm7672_vm0, %v9705_v23  ;;  %v10348_v23 = vpack.c.bf16 %v10320_v30, %v10319_v6  ;;  %v10631_v6 = vld [vmem:[#allocation3 + $0x26] sm:$0xff] }
 0x902   : > { %13553 = vmatprep.mubr.msk.bf16.mxu0 %vm7672_vm0, %v9706_v56  ;;  %v10323_v56 = vld [vmem:[#allocation3 + $0xb5] sm:$0xff]  ;;  %v10667_v30 = vpack.c.bf16 %v10632_v0, %v10631_v6 }
 0x903   : > { %v10350_v44 = vpack.c.bf16 %v10324_v31, %v10323_v56  ;;  %v10635_v56 = vld [vmem:[#allocation3 + $0x46] sm:$0xff]  ;;  %v10653_v0 = vld [vmem:[#allocation3 + $0xd6] sm:$0xff]  ;;  %v10656_v6 = vld [vmem:[#allocation3 + $0xee] sm:$0xff] }
 0x904   : > { %v10669_v31 = vpack.c.bf16 %v10636_v20, %v10635_v56  ;;  %v10657_v20 = vld [vmem:[#allocation3 + $0xf6] sm:$0xff]  ;;  %v10660_v56 = vld [vmem:[#allocation3 + $0x10e] sm:$0xff] }
 0x909   : > { %13554 = vmatmul.mubr.msk.bf16.gmra.mrb[68].mxu0 %vm7672_vm0, %v10032_v32  ;;  %v10327_v32 = vld [vmem:[#allocation3 + $0xd5] sm:$0xff] }
 0x90a   : > { %13559 = vmatprep.mubr.msk.bf16.mxu0 %vm7672_vm0, %v10341_v35  ;;  %v10330_v35 = vld [vmem:[#allocation3 + $0xed] sm:$0xff]  ;;  %v10352_v61 = vpack.c.bf16 %v10328_v58, %v10327_v32 }
 0x90b   : > { %v10353_v16 = vpack.c.bf16 %v10330_v35, %v10329_v34  ;;  %v10639_v32 = vld [vmem:[#allocation3 + $0x66] sm:$0xff]  ;;  %v10641_v35 = vld [vmem:[#allocation3 + $0x76] sm:$0xff]  ;;  %v10644_v34 = vld [vmem:[#allocation3 + $0x8e] sm:$0xff] }
 0x90c   : > { %v10671_v58 = vpack.c.bf16 %v10640_v63, %v10639_v32  ;;  %v10661_v63 = vld [vmem:[#allocation3 + $0x116] sm:$0xff]  ;;  %v10664_v32 = vld [vmem:[#allocation3 + $0x12e] sm:$0xff] }
 0x911   : > { %13560 = vmatmul.mubr.msk.bf16.vlgmr.msra.gmra.mrb[36].mxu0 %vm7672_vm0, %v10342_v60  ;;  %v10331_v60 = vld [vmem:[#allocation3 + $0xf5] sm:$0xff] }
 0x912   : > { %13563 = vmatprep.mubr.msk.bf16.mxu0 %vm7672_vm0, %v10343_v2  ;;  %13596 = vmatpush3.bf16.msra.mxu0 %v10742_v18  ;;  %v10334_v18 = vld [vmem:[#allocation3 + $0x10d] sm:$0xff]  ;;  %v10354_v2 = vpack.c.bf16 %v10332_v21, %v10331_v60 }
 0x913   : > { %v10355_v12 = vpack.c.bf16 %v10334_v18, %v10333_v28  ;;  %v10643_v60 = vld [vmem:[#allocation3 + $0x86] sm:$0xff]  ;;  %v10645_v18 = vld [vmem:[#allocation3 + $0x96] sm:$0xff]  ;;  %v10648_v28 = vld [vmem:[#allocation3 + $0xae] sm:$0xff] }
 0x914   : > { %v10673_v21 = vpack.c.bf16 %v10644_v34, %v10643_v60  ;;  %v10665_v34 = vld [vmem:[#allocation3 + $0x136] sm:$0xff] }
 0x919   : > { %13564 = vmatmul.mubr.msk.bf16.gmra.mrb[40].mxu0 %vm7672_vm0, %v10344_v37  ;;  %v10336_v37 = vld [vmem:[#allocation3 + $0x11d] sm:$0xff] }
 0x91a   : > { %13567 = vmatprep.mubr.msk.bf16.mxu0 %vm7672_vm0, %v10345_v53  ;;  %v10356_v53 = vpack.c.bf16 %v10336_v37, %v10335_v33  ;;  %v10647_v33 = vld [vmem:[#allocation3 + $0xa6] sm:$0xff] }
 0x91b   : > { %v10675_v37 = vpack.c.bf16 %v10648_v28, %v10647_v33 }
 0x921   : > { %13568 = vmatmul.mubr.msk.bf16.gmra.mrb[44].mxu0 %vm7672_vm0, %v10346_v52  ;;  %v10340_v52 = vld [vmem:[#allocation3 + $0x13d] sm:$0xff] }
 0x922   : > { %13571 = vmatprep.mubr.msk.bf16.mxu0 %vm7672_vm0, %v10347_v10  ;;  %v10358_v10 = vpack.c.bf16 %v10340_v52, %v10339_v14  ;;  %v10651_v14 = vld [vmem:[#allocation3 + $0xc6] sm:$0xff] }
 0x923   : > { %v10677_v52 = vpack.c.bf16 %v10652_v38, %v10651_v14 }
 0x929   : > { %13572 = vmatmul.mubr.msk.bf16.gmra.mrb[48].mxu0 %vm7672_vm0, %v10348_v23  ;;  %v10634_v23 = vld [vmem:[#allocation3 + $0x3e] sm:$0xff] }
 0x92a   : > { %13575 = vmatprep.mubr.msk.bf16.mxu0 %vm7672_vm0, %v10349_v7  ;;  %v10668_v7 = vpack.c.bf16 %v10634_v23, %v10633_v36  ;;  %v10655_v36 = vld [vmem:[#allocation3 + $0xe6] sm:$0xff] }
 0x92b   : > { %v10679_v23 = vpack.c.bf16 %v10656_v6, %v10655_v36 }
 0x931   : > { %13576 = vmatmul.mubr.msk.bf16.gmra.mrb[52].mxu0 %vm7672_vm0, %v10350_v44  ;;  %v10638_v44 = vld [vmem:[#allocation3 + $0x5e] sm:$0xff] }
 0x932   : > { %13579 = vmatprep.mubr.msk.bf16.mxu0 %vm7672_vm0, %v10351_v5  ;;  %v10670_v5 = vpack.c.bf16 %v10638_v44, %v10637_v62  ;;  %v10659_v62 = vld [vmem:[#allocation3 + $0x106] sm:$0xff] }
 0x933   : > { %v10681_v44 = vpack.c.bf16 %v10660_v56, %v10659_v62 }
 0x939   : > { %13580 = vmatmul.mubr.msk.bf16.gmra.mrb[56].mxu0 %vm7672_vm0, %v10352_v61  ;;  %v10642_v61 = vld [vmem:[#allocation3 + $0x7e] sm:$0xff] }
 0x93a   : > { %13583 = vmatprep.mubr.msk.bf16.mxu0 %vm7672_vm0, %v10353_v16  ;;  %v10672_v16 = vpack.c.bf16 %v10642_v61, %v10641_v35  ;;  %v10663_v35 = vld [vmem:[#allocation3 + $0x126] sm:$0xff] }
 0x93b   : > { %v10683_v61 = vpack.c.bf16 %v10664_v32, %v10663_v35 }
 0x941   : > { %13584 = vmatmul.mubr.msk.bf16.gmra.mrb[60].mxu0 %vm7672_vm0, %v10354_v2  ;;  %v10646_v2 = vld [vmem:[#allocation3 + $0x9e] sm:$0xff] }
 0x942   : > { %13587 = vmatprep.mubr.msk.bf16.mxu0 %vm7672_vm0, %v10355_v12  ;;  %v10674_v12 = vpack.c.bf16 %v10646_v2, %v10645_v18 }
 0x949   : > { %13588 = vmatmul.mubr.msk.bf16.gmra.mrb[64].mxu0 %vm7672_vm0, %v10356_v53  ;;  %v10650_v53 = vld [vmem:[#allocation3 + $0xbe] sm:$0xff] }
 0x94a   : > { %13591 = vmatprep.mubr.msk.bf16.mxu0 %vm7672_vm0, %v10357_v17  ;;  %v10676_v17 = vpack.c.bf16 %v10650_v53, %v10649_v49 }
 0x951   : > { %13592 = vmatmul.mubr.msk.bf16.gmra.mrb[68].mxu0 %vm7672_vm0, %v10358_v10  ;;  %v10654_v10 = vld [vmem:[#allocation3 + $0xde] sm:$0xff] }
 0x952   : > { %13597 = vmatprep.mubr.msk.bf16.mxu0 %vm7672_vm0, %v10667_v30  ;;  %v10678_v30 = vpack.c.bf16 %v10654_v10, %v10653_v0 }
 0x959   : > { %13598 = vmatmul.mubr.msk.bf16.vlgmr.msra.gmra.mrb[36].mxu0 %vm7672_vm0, %v10668_v7  ;;  %v10658_v7 = vld [vmem:[#allocation3 + $0xfe] sm:$0xff] }
 0x95a   : > { %13601 = vmatprep.mubr.msk.bf16.mxu0 %vm7672_vm0, %v10669_v31  ;;  %v10680_v31 = vpack.c.bf16 %v10658_v7, %v10657_v20 }
 0x961   : > { %13602 = vmatmul.mubr.msk.bf16.gmra.mrb[40].mxu0 %vm7672_vm0, %v10670_v5  ;;  %v10662_v5 = vld [vmem:[#allocation3 + $0x11e] sm:$0xff] }
 0x962   : > { %13605 = vmatprep.mubr.msk.bf16.mxu0 %vm7672_vm0, %v10671_v58  ;;  %v10682_v58 = vpack.c.bf16 %v10662_v5, %v10661_v63 }
 0x969   : > { %13606 = vmatmul.mubr.msk.bf16.gmra.mrb[44].mxu0 %vm7672_vm0, %v10672_v16  ;;  %v10666_v16 = vld [vmem:[#allocation3 + $0x13e] sm:$0xff] }
 0x96a   : > { %13609 = vmatprep.mubr.msk.bf16.mxu0 %vm7672_vm0, %v10673_v21  ;;  %v10684_v60 = vpack.c.bf16 %v10666_v16, %v10665_v34  ;;  %v18471_v21 = vld [vmem:[#allocation18] ss:$0 sm:$0xff] }
 0x971   : > { %13610 = vmatmul.mubr.msk.bf16.gmra.mrb[48].mxu0 %vm7672_vm0, %v10674_v12  ;;  %v18474_v12 = vld [vmem:[#allocation19] ss:$0 sm:$0xff] }
 0x972   : > { %13613 = vmatprep.mubr.msk.bf16.mxu0 %vm7672_vm0, %v10675_v37 }
 0x979   : > { %13614 = vmatmul.mubr.msk.bf16.gmra.mrb[52].mxu0 %vm7672_vm0, %v10676_v17 }
 0x97a   : > { %13617 = vmatprep.mubr.msk.bf16.mxu0 %vm7672_vm0, %v10677_v52 }
 0x981   : > { %13618 = vmatmul.mubr.msk.bf16.gmra.mrb[56].mxu0 %vm7672_vm0, %v10678_v30 }
 0x982   : > { %13621 = vmatprep.mubr.msk.bf16.mxu0 %vm7672_vm0, %v10679_v23 }
 0x989   : > { %13622 = vmatmul.mubr.msk.bf16.gmra.mrb[60].mxu0 %vm7672_vm0, %v10680_v31 }
 0x98a   : > { %13625 = vmatprep.mubr.msk.bf16.mxu0 %vm7672_vm0, %v10681_v44 }
 0x991   : > { %13626 = vmatmul.mubr.msk.bf16.gmra.mrb[64].mxu0 %vm7672_vm0, %v10682_v58 }
 0x992   : > { %13629 = vmatprep.mubr.msk.bf16.mxu0 %vm7672_vm0, %v10683_v61 }
 0x999   : > { %13630 = vmatmul.mubr.msk.bf16.gmra.mrb[68].mxu0 %vm7672_vm0, %v10684_v60  ;;  %vm11082_vm0 = vcmp.lt.s32.totalorder %v17055_v26, 16 }
 0xa2c   : > { %v13599_v18 = vpop.f32.mrb[36].mxu0 }
 0xa2d   : > { %v10966_v2 = vadd.f32 %v13599_v18, %v18471_v21  ;;  %v10778_v28 = vpop.f32.mrb[37].mxu0 }
 0xa2e   : > { %v10964_v33 = vadd.f32 %v18471_v21, %v10778_v28  ;;  %v13600_v37 = vpop.f32.mrb[38].mxu0 }
 0xa2f   : > { %v11002_v49 = vmax.f32 %v10966_v2, 0.0  ;;  %v10967_v53 = vadd.f32 %v13600_v37, %v18471_v21  ;;  %v10781_v38 = vpop.f32.mrb[39].mxu0 }
 0xa30   : > { %v11000_v17 = vmax.f32 %v10964_v33, 0.0  ;;  %v10965_v14 = vadd.f32 %v18471_v21, %v10781_v38 }
 0xa31   : > { %v11045_v52 = vadd.f32 %v18474_v12, %v11002_v49  ;;  %v11003_v0 = vmax.f32 %v10967_v53, 0.0 }
 0xa32   : > { %v11043_v10 = vadd.f32 %v18474_v12, %v11000_v17  ;;  %v11001_v6 = vmax.f32 %v10965_v14, 0.0 }
 0xa33   : > { %v11117_v30 = vsel %vm11081_vm1, %v11045_v52, 0.0  ;;  %v11046_v36 = vadd.f32 %v18474_v12, %v11003_v0 }
 0xa34   : > { %v12060_v23 = vpack.c.bf16 %v11117_v30, %v11117_v30  ;;  %v11115_v54 = vsel %vm11079_vm7, %v11043_v10, 0.0  ;;  %v11044_v20 = vadd.f32 %v18474_v12, %v11001_v6  ;;  %v13603_v7 = vpop.f32.mrb[40].mxu0  ;;  %vm11097_vm7 = vcmp.lt.s32.totalorder %v19055_v51, 16 }
 0xa35   : > { %v12058_v56 = vpack.c.bf16 %v11115_v54, %v11115_v54  ;;  %v11118_v31 = vsel %vm11082_vm0, %v11046_v36, 0.0  ;;  %v10970_v43 = vadd.f32 %v13603_v7, %v18471_v21  ;;  %v10794_v62 = vpop.f32.mrb[41].mxu0  ;;  %v19099_v7 = vld [vmem:[#allocation34_spill] sm:$0xff] }
 0xa36   : > { %11297 = vst.msk [vmem:[%s18489_s17 + $0x8] sm:$0xf] %vm8093_vm5, %v12060_v23  ;;  %v12061_v26 = vpack.c.bf16 %v11118_v31, %v11118_v31  ;;  %v11116_v8 = vsel %vm11080_vm9, %v11044_v20, 0.0  ;;  %v10968_v44 = vadd.f32 %v18471_v21, %v10794_v62  ;;  %v13604_v63 = vpop.f32.mrb[42].mxu0  ;;  %vm11087_vm11 = vcmp.lt.s32.totalorder %v19099_v7, 16 }
 0xa37   : > { %11295 = vst.msk [vmem:[%s18489_s17] sm:$0xf] %vm8093_vm5, %v12058_v56  ;;  %v12059_v5 = vpack.c.bf16 %v11116_v8, %v11116_v8  ;;  %v11006_v32 = vmax.f32 %v10970_v43, 0.0  ;;  %v10971_v58 = vadd.f32 %v13604_v63, %v18471_v21  ;;  %v10797_v35 = vpop.f32.mrb[43].mxu0  ;;  %vm11098_vm9 = vcmp.lt.s32.totalorder %v18965_v13, 16 }
 0xa38   : > { %11298 = vst.msk [vmem:[%s18489_s17 + $0xc] sm:$0xf] %vm8093_vm5, %v12061_v26  ;;  %v11004_v61 = vmax.f32 %v10968_v44, 0.0  ;;  %v10969_v34 = vadd.f32 %v18471_v21, %v10797_v35  ;;  %v19100_v26 = vld [vmem:[#allocation35_spill] sm:$0xff] }
 0xa39   : > { %11296 = vst.msk [vmem:[%s18489_s17 + $0x4] sm:$0xf] %vm8093_vm5, %v12059_v5  ;;  %v11049_v16 = vadd.f32 %v18474_v12, %v11006_v32  ;;  %v11007_v60 = vmax.f32 %v10971_v58, 0.0  ;;  %vm11088_vm10 = vcmp.lt.s32.totalorder %v19100_v26, 16 }
 0xa3a   : > { %v11047_v18 = vadd.f32 %v18474_v12, %v11004_v61  ;;  %v11005_v2 = vmax.f32 %v10969_v34, 0.0 }
 0xa3b   : > { %v11121_v28 = vsel %vm11085_vm13, %v11049_v16, 0.0  ;;  %v11050_v22 = vadd.f32 %v18474_v12, %v11007_v60 }
 0xa3c   : > { %v12064_v33 = vpack.c.bf16 %v11121_v28, %v11121_v28  ;;  %v11119_v37 = vsel %vm11083_vm12, %v11047_v18, 0.0  ;;  %v11048_v49 = vadd.f32 %v18474_v12, %v11005_v2  ;;  %v13607_v53 = vpop.f32.mrb[44].mxu0  ;;  %vm11101_vm12 = vcmp.lt.s32.totalorder %v18968_v41, 16 }
 0xa3d   : > { %v12062_v9 = vpack.c.bf16 %v11119_v37, %v11119_v37  ;;  %v11122_v38 = vsel %vm11086_vm4, %v11050_v22, 0.0  ;;  %v10974_v17 = vadd.f32 %v13607_v53, %v18471_v21  ;;  %v10810_v14 = vpop.f32.mrb[45].mxu0  ;;  %v19101_v53 = vld [vmem:[#allocation38_spill] sm:$0xff]  ;;  %vm11099_vm4 = vcmp.lt.s32.totalorder %v18966_v27, 16 }
 0xa3e   : > { %11301 = vst.msk [vmem:[%s18489_s17 + $0x18] sm:$0xf] %vm8093_vm5, %v12064_v33  ;;  %v12065_v1 = vpack.c.bf16 %v11122_v38, %v11122_v38  ;;  %v11120_v52 = vsel %vm11084_vm6, %v11048_v49, 0.0  ;;  %v10972_v0 = vadd.f32 %v18471_v21, %v10810_v14  ;;  %v13608_v10 = vpop.f32.mrb[46].mxu0  ;;  %vm11091_vm8 = vcmp.lt.s32.totalorder %v19101_v53, 16 }
 0xa3f   : > { %11299 = vst.msk [vmem:[%s18489_s17 + $0x10] sm:$0xf] %vm8093_vm5, %v12062_v9  ;;  %v12063_v4 = vpack.c.bf16 %v11120_v52, %v11120_v52  ;;  %v11010_v6 = vmax.f32 %v10974_v17, 0.0  ;;  %v10975_v30 = vadd.f32 %v13608_v10, %v18471_v21  ;;  %v10813_v36 = vpop.f32.mrb[47].mxu0  ;;  %vm11102_vm6 = vcmp.lt.s32.totalorder %v18974_v48, 16 }
 0xa40   : > { %11302 = vst.msk [vmem:[%s18489_s17 + $0x1c] sm:$0xf] %vm8093_vm5, %v12065_v1  ;;  %v11008_v23 = vmax.f32 %v10972_v0, 0.0  ;;  %v10973_v54 = vadd.f32 %v18471_v21, %v10813_v36  ;;  %v19102_v1 = vld [vmem:[#allocation39_spill] sm:$0xff] }
 0xa41   : > { %11300 = vst.msk [vmem:[%s18489_s17 + $0x14] sm:$0xf] %vm8093_vm5, %v12063_v4  ;;  %v11053_v20 = vadd.f32 %v18474_v12, %v11010_v6  ;;  %v11011_v56 = vmax.f32 %v10975_v30, 0.0  ;;  %vm11092_vm1 = vcmp.lt.s32.totalorder %v19102_v1, 16 }
 0xa42   : > { %v11051_v31 = vadd.f32 %v18474_v12, %v11008_v23  ;;  %v11009_v43 = vmax.f32 %v10973_v54, 0.0 }
 0xa43   : > { %v11125_v62 = vsel %vm11089_vm14, %v11053_v20, 0.0  ;;  %v11054_v55 = vadd.f32 %v18474_v12, %v11011_v56  ;;  %vm11100_vm14 = vcmp.lt.s32.totalorder %v18967_v42, 16 }
 0xa44   : > { %v12068_v8 = vpack.c.bf16 %v11125_v62, %v11125_v62  ;;  %v11123_v44 = vsel %vm11087_vm11, %v11051_v31, 0.0  ;;  %v11052_v63 = vadd.f32 %v18474_v12, %v11009_v43  ;;  %v13611_v5 = vpop.f32.mrb[48].mxu0  ;;  %vm11105_vm11 = vcmp.lt.s32.totalorder %v16759_v19, 16 }
 0xa45   : > { %v12066_v32 = vpack.c.bf16 %v11123_v44, %v11123_v44  ;;  %v11126_v58 = vsel %vm11090_vm3, %v11054_v55, 0.0  ;;  %v10978_v35 = vadd.f32 %v13611_v5, %v18471_v21  ;;  %v10826_v61 = vpop.f32.mrb[49].mxu0  ;;  %v19103_v44 = vld [vmem:[#allocation42_spill] sm:$0xff]  ;;  %vm11103_vm3 = vcmp.lt.s32.totalorder %v18975_v50, 16 }
 0xa46   : > { %11305 = vst.msk [vmem:[%s18489_s17 + $0x28] sm:$0xf] %vm8093_vm5, %v12068_v8  ;;  %v12069_v57 = vpack.c.bf16 %v11126_v58, %v11126_v58  ;;  %v11124_v34 = vsel %vm11088_vm10, %v11052_v63, 0.0  ;;  %v10976_v16 = vadd.f32 %v18471_v21, %v10826_v61  ;;  %v13612_v60 = vpop.f32.mrb[50].mxu0  ;;  %vm11095_vm0 = vcmp.lt.s32.totalorder %v19103_v44, 16 }
 0xa47   : > { %11303 = vst.msk [vmem:[%s18489_s17 + $0x20] sm:$0xf] %vm8093_vm5, %v12066_v32  ;;  %v12067_v18 = vpack.c.bf16 %v11124_v34, %v11124_v34  ;;  %v11014_v2 = vmax.f32 %v10978_v35, 0.0  ;;  %v10979_v28 = vadd.f32 %v13612_v60, %v18471_v21  ;;  %v10829_v22 = vpop.f32.mrb[51].mxu0  ;;  %v19104_v35 = vld [vmem:[#allocation43_spill] sm:$0xff]  ;;  %vm11106_vm10 = vcmp.lt.s32.totalorder %v16764_v47, 16 }
 0xa48   : > { %11306 = vst.msk [vmem:[%s18489_s17 + $0x2c] sm:$0xf] %vm8093_vm5, %v12069_v57  ;;  %v11012_v33 = vmax.f32 %v10976_v16, 0.0  ;;  %v10977_v37 = vadd.f32 %v18471_v21, %v10829_v22  ;;  %vm11096_vm13 = vcmp.lt.s32.totalorder %v19104_v35, 16 }
 0xa49   : > { %11304 = vst.msk [vmem:[%s18489_s17 + $0x24] sm:$0xf] %vm8093_vm5, %v12067_v18  ;;  %v11057_v49 = vadd.f32 %v18474_v12, %v11014_v2  ;;  %v11015_v9 = vmax.f32 %v10979_v28, 0.0 }
 0xa4a   : > { %v11055_v38 = vadd.f32 %v18474_v12, %v11012_v33  ;;  %v11013_v17 = vmax.f32 %v10977_v37, 0.0 }
 0xa4b   : > { %v11129_v14 = vsel %vm11093_vm15, %v11057_v49, 0.0  ;;  %v11058_v39 = vadd.f32 %v18474_v12, %v11015_v9  ;;  %vm11104_vm15 = vcmp.lt.s32.totalorder %v16754_v46, 16 }
 0xa4c   : > { %v12072_v52 = vpack.c.bf16 %v11129_v14, %v11129_v14  ;;  %v11127_v0 = vsel %vm11091_vm8, %v11055_v38, 0.0  ;;  %v11056_v10 = vadd.f32 %v18474_v12, %v11013_v17  ;;  %v13615_v4 = vpop.f32.mrb[52].mxu0  ;;  %vm11109_vm8 = vcmp.lt.s32.totalorder %v16803_v45, 16 }
 0xa4d   : > { %v12070_v6 = vpack.c.bf16 %v11127_v0, %v11127_v0  ;;  %v11130_v30 = vsel %vm11094_vm2, %v11058_v39, 0.0  ;;  %v10982_v36 = vadd.f32 %v13615_v4, %v18471_v21  ;;  %v10842_v23 = vpop.f32.mrb[53].mxu0  ;;  %vm11107_vm2 = vcmp.lt.s32.totalorder %v16777_v11, 16 }
 0xa4e   : > { %11309 = vst.msk [vmem:[%s18489_s17 + $0x38] sm:$0xf] %vm8093_vm5, %v12072_v52  ;;  %v12073_v3 = vpack.c.bf16 %v11130_v30, %v11130_v30  ;;  %v11128_v54 = vsel %vm11092_vm1, %v11056_v10, 0.0  ;;  %v10980_v20 = vadd.f32 %v18471_v21, %v10842_v23  ;;  %v13616_v7 = vpop.f32.mrb[54].mxu0  ;;  %vm11110_vm1 = vcmp.lt.s32.totalorder %v16807_v29, 16 }
 0xa4f   : > { %11307 = vst.msk [vmem:[%s18489_s17 + $0x30] sm:$0xf] %vm8093_vm5, %v12070_v6  ;;  %v12071_v56 = vpack.c.bf16 %v11128_v54, %v11128_v54  ;;  %v11018_v31 = vmax.f32 %v10982_v36, 0.0  ;;  %v10983_v43 = vadd.f32 %v13616_v7, %v18471_v21  ;;  %v10845_v62 = vpop.f32.mrb[55].mxu0 }
 0xa50   : > { %11310 = vst.msk [vmem:[%s18489_s17 + $0x3c] sm:$0xf] %vm8093_vm5, %v12073_v3  ;;  %v11016_v55 = vmax.f32 %v10980_v20, 0.0  ;;  %v10981_v26 = vadd.f32 %v18471_v21, %v10845_v62 }
 0xa51   : > { %11308 = vst.msk [vmem:[%s18489_s17 + $0x34] sm:$0xf] %vm8093_vm5, %v12071_v56  ;;  %v11061_v8 = vadd.f32 %v18474_v12, %v11018_v31  ;;  %v11019_v63 = vmax.f32 %v10983_v43, 0.0 }
 0xa52   : > { %v11059_v5 = vadd.f32 %v18474_v12, %v11016_v55  ;;  %v11017_v32 = vmax.f32 %v10981_v26, 0.0 }
 0xa53   : > { %v11133_v58 = vsel %vm11097_vm7, %v11061_v8, 0.0  ;;  %v11062_v51 = vadd.f32 %v18474_v12, %v11019_v63  ;;  %vm11108_vm7 = vcmp.lt.s32.totalorder %v16781_v24, 16 }
 0xa54   : > { %v12076_v61 = vpack.c.bf16 %v11133_v58, %v11133_v58  ;;  %v11131_v57 = vsel %vm11095_vm0, %v11059_v5, 0.0  ;;  %v11060_v34 = vadd.f32 %v18474_v12, %v11017_v32  ;;  %v13619_v16 = vpop.f32.mrb[56].mxu0  ;;  %vm11113_vm0 = vcmp.lt.s32.totalorder %v17439_v15, 16 }
 0xa55   : > { %v12074_v60 = vpack.c.bf16 %v11131_v57, %v11131_v57  ;;  %v11134_v18 = vsel %vm11098_vm9, %v11062_v51, 0.0  ;;  %v10986_v2 = vadd.f32 %v13619_v16, %v18471_v21  ;;  %v10858_v28 = vpop.f32.mrb[57].mxu0  ;;  %vm11111_vm9 = vcmp.lt.s32.totalorder %v16813_v59, 16 }
 0xa56   : > { %11313 = vst.msk [vmem:[%s18489_s17 + $0x48] sm:$0xf] %vm8093_vm5, %v12076_v61  ;;  %v12077_v13 = vpack.c.bf16 %v11134_v18, %v11134_v18  ;;  %v11132_v22 = vsel %vm11096_vm13, %v11060_v34, 0.0  ;;  %v10984_v33 = vadd.f32 %v18471_v21, %v10858_v28  ;;  %v13620_v37 = vpop.f32.mrb[58].mxu0  ;;  %vm11114_vm13 = vcmp.lt.s32.totalorder %v17460_v25, 16 }
 0xa57   : > { %11311 = vst.msk [vmem:[%s18489_s17 + $0x40] sm:$0xf] %vm8093_vm5, %v12074_v60  ;;  %v12075_v49 = vpack.c.bf16 %v11132_v22, %v11132_v22  ;;  %v11022_v53 = vmax.f32 %v10986_v2, 0.0  ;;  %v10987_v9 = vadd.f32 %v13620_v37, %v18471_v21  ;;  %v10861_v38 = vpop.f32.mrb[59].mxu0 }
 0xa58   : > { %11314 = vst.msk [vmem:[%s18489_s17 + $0x4c] sm:$0xf] %vm8093_vm5, %v12077_v13  ;;  %v11020_v17 = vmax.f32 %v10984_v33, 0.0  ;;  %v10985_v14 = vadd.f32 %v18471_v21, %v10861_v38 }
 0xa59   : > { %11312 = vst.msk [vmem:[%s18489_s17 + $0x44] sm:$0xf] %vm8093_vm5, %v12075_v49  ;;  %v11065_v39 = vadd.f32 %v18474_v12, %v11022_v53  ;;  %v11023_v1 = vmax.f32 %v10987_v9, 0.0 }
 0xa5a   : > { %v11063_v52 = vadd.f32 %v18474_v12, %v11020_v17  ;;  %v11021_v0 = vmax.f32 %v10985_v14, 0.0 }
 0xa5b   : > { %v11137_v10 = vsel %vm11101_vm12, %v11065_v39, 0.0  ;;  %v11066_v41 = vadd.f32 %v18474_v12, %v11023_v1  ;;  %vm11112_vm12 = vcmp.lt.s32.totalorder %v16859_v40, 16 }
 0xa5c   : > { %v12080_v4 = vpack.c.bf16 %v11137_v10, %v11137_v10  ;;  %v11135_v6 = vsel %vm11099_vm4, %v11063_v52, 0.0  ;;  %v11064_v30 = vadd.f32 %v18474_v12, %v11021_v0  ;;  %v13623_v36 = vpop.f32.mrb[60].mxu0 }
 0xa5d   : > { %v12078_v27 = vpack.c.bf16 %v11135_v6, %v11135_v6  ;;  %v11138_v23 = vsel %vm11102_vm6, %v11066_v41, 0.0  ;;  %v10990_v3 = vadd.f32 %v13623_v36, %v18471_v21  ;;  %v10874_v54 = vpop.f32.mrb[61].mxu0 }
 0xa5e   : > { %11317 = vst.msk [vmem:[%s18489_s17 + $0x58] sm:$0xf] %vm8093_vm5, %v12080_v4  ;;  %v12081_v48 = vpack.c.bf16 %v11138_v23, %v11138_v23  ;;  %v11136_v20 = vsel %vm11100_vm14, %v11064_v30, 0.0  ;;  %v10988_v7 = vadd.f32 %v18471_v21, %v10874_v54  ;;  %v13624_v56 = vpop.f32.mrb[62].mxu0 }
 0xa5f   : > { %11315 = vst.msk [vmem:[%s18489_s17 + $0x50] sm:$0xf] %vm8093_vm5, %v12078_v27  ;;  %v12079_v42 = vpack.c.bf16 %v11136_v20, %v11136_v20  ;;  %v11026_v31 = vmax.f32 %v10990_v3, 0.0  ;;  %v10991_v43 = vadd.f32 %v13624_v56, %v18471_v21  ;;  %v10877_v62 = vpop.f32.mrb[63].mxu0 }
 0xa60   : > { %11318 = vst.msk [vmem:[%s18489_s17 + $0x5c] sm:$0xf] %vm8093_vm5, %v12081_v48  ;;  %v11024_v55 = vmax.f32 %v10988_v7, 0.0  ;;  %v10989_v26 = vadd.f32 %v18471_v21, %v10877_v62 }
 0xa61   : > { %11316 = vst.msk [vmem:[%s18489_s17 + $0x54] sm:$0xf] %vm8093_vm5, %v12079_v42  ;;  %v11069_v8 = vadd.f32 %v18474_v12, %v11026_v31  ;;  %v11027_v44 = vmax.f32 %v10991_v43, 0.0 }
 0xa62   : > { %v11067_v63 = vadd.f32 %v18474_v12, %v11024_v55  ;;  %v11025_v5 = vmax.f32 %v10989_v26, 0.0 }
 0xa63   : > { %v11141_v32 = vsel %vm11105_vm11, %v11069_v8, 0.0  ;;  %v11070_v19 = vadd.f32 %v18474_v12, %v11027_v44 }
 0xa64   : > { %v12084_v58 = vpack.c.bf16 %v11141_v32, %v11141_v32  ;;  %v11139_v51 = vsel %vm11103_vm3, %v11067_v63, 0.0  ;;  %v11068_v35 = vadd.f32 %v18474_v12, %v11025_v5  ;;  %v13627_v61 = vpop.f32.mrb[64].mxu0 }
 0xa65   : > { %v12082_v50 = vpack.c.bf16 %v11139_v51, %v11139_v51  ;;  %v11142_v57 = vsel %vm11106_vm10, %v11070_v19, 0.0  ;;  %v10994_v34 = vadd.f32 %v13627_v61, %v18471_v21  ;;  %v10890_v16 = vpop.f32.mrb[65].mxu0 }
 0xa66   : > { %11321 = vst.msk [vmem:[%s18489_s17 + $0x68] sm:$0xf] %vm8093_vm5, %v12084_v58  ;;  %v12085_v47 = vpack.c.bf16 %v11142_v57, %v11142_v57  ;;  %v11140_v60 = vsel %vm11104_vm15, %v11068_v35, 0.0  ;;  %v10992_v18 = vadd.f32 %v18471_v21, %v10890_v16  ;;  %v13628_v2 = vpop.f32.mrb[66].mxu0 }
 0xa67   : > { %11319 = vst.msk [vmem:[%s18489_s17 + $0x60] sm:$0xf] %vm8093_vm5, %v12082_v50  ;;  %v12083_v46 = vpack.c.bf16 %v11140_v60, %v11140_v60  ;;  %v11030_v28 = vmax.f32 %v10994_v34, 0.0  ;;  %v10995_v13 = vadd.f32 %v13628_v2, %v18471_v21  ;;  %v10893_v22 = vpop.f32.mrb[67].mxu0 }
 0xa68   : > { %11322 = vst.msk [vmem:[%s18489_s17 + $0x6c] sm:$0xf] %vm8093_vm5, %v12085_v47  ;;  %v11028_v33 = vmax.f32 %v10992_v18, 0.0  ;;  %v10993_v37 = vadd.f32 %v18471_v21, %v10893_v22 }
 0xa69   : > { %11320 = vst.msk [vmem:[%s18489_s17 + $0x64] sm:$0xf] %vm8093_vm5, %v12083_v46  ;;  %v11073_v49 = vadd.f32 %v18474_v12, %v11030_v28  ;;  %v11031_v53 = vmax.f32 %v10995_v13, 0.0 }
 0xa6a   : > { %v11071_v9 = vadd.f32 %v18474_v12, %v11028_v33  ;;  %v11029_v38 = vmax.f32 %v10993_v37, 0.0 }
 0xa6b   : > { %v11145_v17 = vsel %vm11109_vm8, %v11073_v49, 0.0  ;;  %v11074_v45 = vadd.f32 %v18474_v12, %v11031_v53 }
 0xa6c   : > { %v12088_v14 = vpack.c.bf16 %v11145_v17, %v11145_v17  ;;  %v11143_v39 = vsel %vm11107_vm2, %v11071_v9, 0.0  ;;  %v11072_v1 = vadd.f32 %v18474_v12, %v11029_v38  ;;  %v13631_v52 = vpop.f32.mrb[68].mxu0 }
 0xa6d   : > { %v12086_v11 = vpack.c.bf16 %v11143_v39, %v11143_v39  ;;  %v11146_v0 = vsel %vm11110_vm1, %v11074_v45, 0.0  ;;  %v10998_v10 = vadd.f32 %v13631_v52, %v18471_v21  ;;  %v10906_v41 = vpop.f32.mrb[69].mxu0 }
 0xa6e   : > { %11325 = vst.msk [vmem:[%s18489_s17 + $0x78] sm:$0xf] %vm8093_vm5, %v12088_v14  ;;  %v12089_v29 = vpack.c.bf16 %v11146_v0, %v11146_v0  ;;  %v11144_v4 = vsel %vm11108_vm7, %v11072_v1, 0.0  ;;  %v10996_v6 = vadd.f32 %v18471_v21, %v10906_v41  ;;  %v13632_v30 = vpop.f32.mrb[70].mxu0 }
 0xa6f   : > { %11323 = vst.msk [vmem:[%s18489_s17 + $0x70] sm:$0xf] %vm8093_vm5, %v12086_v11  ;;  %v12087_v24 = vpack.c.bf16 %v11144_v4, %v11144_v4  ;;  %v11034_v36 = vmax.f32 %v10998_v10, 0.0  ;;  %v10999_v27 = vadd.f32 %v13632_v30, %v18471_v21  ;;  %v10909_v23 = vpop.f32.mrb[71].mxu0 }
 0xa70   : > { %11326 = vst.msk [vmem:[%s18489_s17 + $0x7c] sm:$0xf] %vm8093_vm5, %v12089_v29  ;;  %v11032_v3 = vmax.f32 %v10996_v6, 0.0  ;;  %v10997_v54 = vadd.f32 %v18471_v21, %v10909_v23 }
 0xa71   : > { %11324 = vst.msk [vmem:[%s18489_s17 + $0x74] sm:$0xf] %vm8093_vm5, %v12087_v24  ;;  %v11077_v48 = vadd.f32 %v18474_v12, %v11034_v36  ;;  %v11035_v20 = vmax.f32 %v10999_v27, 0.0 }
 0xa72   : > { %v11075_v7 = vadd.f32 %v18474_v12, %v11032_v3  ;;  %v11033_v56 = vmax.f32 %v10997_v54, 0.0 }
 0xa73   : > { %v11149_v15 = vsel %vm11113_vm0, %v11077_v48, 0.0  ;;  %v11078_v42 = vadd.f32 %v18474_v12, %v11035_v20 }
 0xa74   : > { %v12092_v21 = vpack.c.bf16 %v11149_v15, %v11149_v15  ;;  %v11147_v31 = vsel %vm11111_vm9, %v11075_v7, 0.0  ;;  %v11076_v59 = vadd.f32 %v18474_v12, %v11033_v56 }
 0xa75   : > { %v12090_v43 = vpack.c.bf16 %v11147_v31, %v11147_v31  ;;  %v11150_v62 = vsel %vm11114_vm13, %v11078_v42, 0.0 }
 0xa76   : > { %11329 = vst.msk [vmem:[%s18489_s17 + $0x88] sm:$0xf] %vm8093_vm5, %v12092_v21  ;;  %v12093_v25 = vpack.c.bf16 %v11150_v62, %v11150_v62  ;;  %v11148_v55 = vsel %vm11112_vm12, %v11076_v59, 0.0 }
 0xa77   : > { %11327 = vst.msk [vmem:[%s18489_s17 + $0x80] sm:$0xf] %vm8093_vm5, %v12090_v43  ;;  %v12091_v40 = vpack.c.bf16 %v11148_v55, %v11148_v55 }
 0xa78   : > { %11330 = vst.msk [vmem:[%s18489_s17 + $0x8c] sm:$0xf] %vm8093_vm5, %v12093_v25 }
 0xa79   : > { %11328 = vst.msk [vmem:[%s18489_s17 + $0x84] sm:$0xf] %vm8093_vm5, %v12091_v40 }
 0xa7a   : > { %15049 = shalt.err (!%p15046_p3)
}
 0xa7b   : > { %s15050_s28 = scalar_lea.hbm %s18657_s1, 2304  ;;  %s15054_s18 = scalar_lea.hbm %s19105_s29, 9216 }
 0xa7c   : > { %p15051_p4 = scmp.ne.s32.totalorder %s18657_s1, %s15050_s28  ;;  %p15055_p9 = scmp.lt.u32.totalorder %s18657_s1, %s19105_s29 }
 0xa7d   : > { %p15056_p12 = scmp.lt.u32.totalorder %s15054_s18, %s15050_s28  ;;  %p15058_p13 = scmp.lt.u32.totalorder %s15050_s28, %s18657_s1 }
 0xa7e   : > { %p15052_p8 = pnand %p15051_p4, %p19106_p0 }
 0xa7f   : > { %p15057_p1 = por %p15056_p12, %p15055_p9 }
 0xa80   : > { %p15053_p6 = pneg %p15052_p8 }
 0xa81   : > { %p15059_p2 = por %p15058_p13, %p15057_p1 }
 0xa83   : > { %p15060_p7 = pnand %p15059_p2, %p15053_p6 }
 0xa85   : > { %15063 = shalt.err (!%p15060_p7)
}
 0xa86   : > { %s15143_s24 = smov 64   ;;  %s15144_s20 = smov 4  }
 0xa87   : > { %14642 = dma.vmem_to_hbm [thread:$0]  (%p19106_p0), %s18661_s11, 2304, %s18657_s1, %s11332_s2, %s15143_s24, %s15143_s24, %s15144_s20  }
 0xa88 PF: > { %p14699_p5 = scmp.ge.s32.totalorder %s15122_s16, 2  ;;  %s11360_s30 = sand.u32 1, %s15110_s13  }
 0xa89   : > { %p19107_p10 = scmp.ne.s32.totalorder %s18846_s25, 0  ;;  %s11361_s27 = scalar_lea.sflag [#allocation6], %s11360_s30 }
 0xa8b   : > { %p14677_p11 = pnand %p14699_p5, %p19107_p10 }
 0xa8d   : > { %15105 = dma.done.wait (!%p14677_p11), %s11361_s27, 2304  }
 0xa8e   : > { %15107 = vsyncadd (!%p14677_p11), %s11361_s27, 4294964992  ;;  %p28_p3 = scmp.ge.s32.totalorder %s15452_s23, 6   ;;  %s19108_s13 = smov %s15114_s14 }
 0xa8f   : > { %s19109_s14 = smov %s15118_s15  ;;  %s19110_s15 = smov %s15464_s12 }
 0xa90   : > { %s19111_s16 = smov %s15452_s23  ;;  %30 = sbr.rel (!%p28_p3) target bundleno = 14 (0xe), region = 165 }
 0xa97   :  { %11366 = vsyncpa [#allocation5], 1 }
 0xa98   :  { %11368 = vsyncpa [#allocation5 + $0x1], 1 }
 0xa99   :  { %11369 = vsyncpa [#allocation8], 1 }
 0xa9a   :  { %11370 = vsyncpa [#allocation11], 1 }
 0xa9b   :  { %11371 = vsyncpa [#allocation14], 1 }
 0xa9c   :  { %11372 = vsyncpa [#allocation17], 1 }
 0xa9d   :  { %11373 = vsyncpa [#allocation20], 1 }
 0xa9e   :  { %11374 = vsyncpa [#allocation6], 1 }
 0xa9f   :  { %11376 = vsyncpa [#allocation6 + $0x1], 1 }

</bundles_post_ra>
